<compile_context>
chip_gen: v7x
topology: tpu7x:2x2x1
jax: 0.10.0
libtpu: 0.0.40
codegen_flags: <defaults>
</compile_context>

<pallas_src>
import functools
import math

import jax
import jax.numpy as jnp
from jax.experimental import pallas as pl
from jax.experimental.pallas import tpu as pltpu

_BN_EPS = 1e-5
_COMPILER_PARAMS = pltpu.CompilerParams(
    dimension_semantics=("parallel",),
)


# ----------------------------------------------------------------------------
# In-kernel helpers
# ----------------------------------------------------------------------------
def _fill_shifted_planes(xb, sh_ref, H, W):
    """Fill sh_ref (3, H+2, W, C) with zero-padded, column-shifted copies of xb (H, W, C).

    Plane dx holds padded[:, dx:dx+W, :] of the implicit (H+2, W+2) zero-padded image,
    so the 3x3 tap (dy, dx) is the contiguous slice sh_ref[dx, dy:dy+H, :, :].
    Only the padding border is zeroed; everything else is overwritten by the data writes.
    """
    cin = xb.shape[-1]
    dt = sh_ref.dtype
    zrow = jnp.zeros((1, W, cin), dt)
    for dx in range(3):
        sh_ref[dx, 0:1, :, :] = zrow            # top pad row
        sh_ref[dx, H + 1:H + 2, :, :] = zrow    # bottom pad row
    zcol = jnp.zeros((H + 2, 1, cin), dt)
    sh_ref[0, :, 0:1, :] = zcol                 # left pad column (plane dx=0)
    sh_ref[2, :, W - 1:W, :] = zcol             # right pad column (plane dx=2)
    sh_ref[1, 1:H + 1, :, :] = xb                       # dx = 1 (center)
    sh_ref[0, 1:H + 1, 1:W, :] = xb[:, 0:W - 1, :]      # dx = 0 (left neighbor)
    sh_ref[2, 1:H + 1, 0:W - 1, :] = xb[:, 1:W, :]      # dx = 2 (right neighbor)


def _conv3x3(sh_ref, w_ref, H, W, cout):
    """3x3 conv (pad=1, stride=1) as MXU matmul(s) on the shifted-plane scratch.

    Weights are flat (9*C, Cout); row index = (dy*3 + dx)*C + c (BN scale pre-folded).

    * C % 128 == 0: one im2col matmul with K = 9*C.  The 9 taps are concatenated along
      the lane axis at 128-aligned offsets (cheap vreg placement), so the whole tap
      accumulation happens inside the MXU (MRB accumulate on v7x; fills the 256-deep
      v6e/v7x MXU), one result pop, one epilogue.
    * otherwise (small C, e.g. the first conv of the first block): 9 small matmuls
      accumulated in f32.
    """
    cin = sh_ref.shape[-1]
    if cin % 128 == 0:
        cols = jnp.concatenate(
            [sh_ref[dx, dy:dy + H, :, :] for dy in range(3) for dx in range(3)],
            axis=-1)                                        # (H, W, 9*C), lane-aligned
        return jnp.dot(cols.reshape(H * W, 9 * cin), w_ref[...],
                       preferred_element_type=jnp.float32)
    acc = jnp.zeros((H * W, cout), jnp.float32)
    for dy in range(3):
        for dx in range(3):
            k0 = (dy * 3 + dx) * cin
            acc = acc + jnp.dot(sh_ref[dx, dy:dy + H, :, :].reshape(H * W, cin),
                                w_ref[k0:k0 + cin, :],
                                preferred_element_type=jnp.float32)
    return acc


# ----------------------------------------------------------------------------
# Fused basic-block kernel (one batch element per grid step)
# ----------------------------------------------------------------------------
def _basicblock_kernel(x_ref, w1_ref, b1_ref, w2_ref, b2_ref, *rest, H, W, proj):
    if proj:
        wr_ref, br_ref, out_ref, xsh_ref, hsh_ref = rest
    else:
        out_ref, xsh_ref, hsh_ref = rest
    cin = x_ref.shape[-1]
    cmid = b1_ref.shape[-1]
    cout = out_ref.shape[-1]

    # conv1 + bn1 + relu1  (BN scale folded into w1 -> bias-only epilogue).
    _fill_shifted_planes(x_ref[0].astype(xsh_ref.dtype), xsh_ref, H, W)
    h = jnp.maximum(_conv3x3(xsh_ref, w1_ref, H, W, cmid) + b1_ref[...], 0.0)

    # conv2 + bn2 -- the intermediate h stays in VMEM (bf16) and never touches HBM.
    _fill_shifted_planes(h.reshape(H, W, cmid).astype(hsh_ref.dtype), hsh_ref, H, W)
    y = _conv3x3(hsh_ref, w2_ref, H, W, cout) + b2_ref[...]

    # Residual: identity, or fused 1x1 conv + bn projection (same MXU stream).
    x0 = x_ref[0].reshape(H * W, cin)
    if proj:
        res = jnp.dot(x0.astype(wr_ref.dtype), wr_ref[...],
                      preferred_element_type=jnp.float32) + br_ref[...]
    else:
        res = x0  # f32; requires cin == cout

    out_ref[0] = jnp.maximum(y + res, 0.0).reshape(H, W, cout).astype(out_ref.dtype)


# ----------------------------------------------------------------------------
# pallas_call wrapper (one fused call per block)
# ----------------------------------------------------------------------------
def basicblock_nhwc(params, x):
    B, H, W, Cin = x.shape
    w1, b1 = params["c1"]
    w2, b2 = params["c2"]
    Cmid = w1.shape[-1]
    Cout = w2.shape[-1]
    proj = "res" in params
    if not proj:
        assert Cin == Cout, "identity residual requires depth_in == output_dim"

    # Layout notes: keep Cout a multiple of 128 (lane-dense output stores) and
    # W a multiple of 8 so the (H, W, C) -> (H*W, C) reshapes are free relayouts.
    in_specs = [
        pl.BlockSpec((1, H, W, Cin), lambda b: (b, 0, 0, 0)),
        pl.BlockSpec((9 * Cin, Cmid), lambda b: (0, 0)),
        pl.BlockSpec((1, Cmid), lambda b: (0, 0)),
        pl.BlockSpec((9 * Cmid, Cout), lambda b: (0, 0)),
        pl.BlockSpec((1, Cout), lambda b: (0, 0)),
    ]
    args = [x, w1, b1, w2, b2]
    if proj:
        wr, br = params["res"]
        in_specs += [pl.BlockSpec((Cin, Cout), lambda b: (0, 0)),
                     pl.BlockSpec((1, Cout), lambda b: (0, 0))]
        args += [wr, br]

    kernel = functools.partial(_basicblock_kernel, H=H, W=W, proj=proj)
    return pl.pallas_call(
        kernel,
        out_shape=jax.ShapeDtypeStruct((B, H, W, Cout), x.dtype),
        grid=(B,),
        in_specs=in_specs,
        out_specs=pl.BlockSpec((1, H, W, Cout), lambda b: (b, 0, 0, 0)),
        scratch_shapes=[
            pltpu.VMEM((3, H + 2, W, Cin), jnp.bfloat16),    # shifted planes of x
            pltpu.VMEM((3, H + 2, W, Cmid), jnp.bfloat16),   # shifted planes of h
        ],
        compiler_params=_COMPILER_PARAMS,
    )(*args)


# ----------------------------------------------------------------------------
# Parameter init: conv bias + BN folded to (scale-folded weight, bias)
# ----------------------------------------------------------------------------
def _make_conv_bn(key, kh, kw, cin, cout):
    kw_, kb, kg, kbe, km, kv = jax.random.split(key, 6)
    fan_in = kh * kw * cin
    w = jax.random.normal(kw_, (kh, kw, cin, cout), jnp.float32) / math.sqrt(fan_in)
    conv_b = 0.1 * jax.random.normal(kb, (cout,), jnp.float32)
    gamma = 1.0 + 0.1 * jax.random.normal(kg, (cout,), jnp.float32)
    beta = 0.1 * jax.random.normal(kbe, (cout,), jnp.float32)
    r_mean = 0.1 * jax.random.normal(km, (cout,), jnp.float32)
    r_var = jnp.abs(1.0 + 0.1 * jax.random.normal(kv, (cout,), jnp.float32))
    scale = gamma / jnp.sqrt(r_var + _BN_EPS)
    # Fold the BN scale into the conv weights; keep accumulation/epilogue in f32.
    # Flat layout: row index = (dy*kw + dx)*cin + c  (matches the in-kernel im2col order).
    w_folded = (w * scale.reshape(1, 1, 1, cout)).reshape(kh * kw * cin, cout)
    bias = (conv_b - r_mean) * scale + beta
    return (w_folded.astype(jnp.bfloat16), bias.reshape(1, cout))


def init_basicblock_params(key, depth_in, output_dim):
    k_res, k1, k2 = jax.random.split(key, 3)
    p = {
        "c1": _make_conv_bn(k1, 3, 3, depth_in, output_dim),
        "c2": _make_conv_bn(k2, 3, 3, output_dim, output_dim),
    }
    if depth_in != output_dim:
        p["res"] = _make_conv_bn(k_res, 1, 1, depth_in, output_dim)
    return p


# ----------------------------------------------------------------------------
# Pure-JAX reference (same folded bf16 weights, same bf16-rounded conv inputs)
# ----------------------------------------------------------------------------
def _ref_conv_bn(x, w_flat, b, kh, kw):
    cin = x.shape[-1]
    cout = w_flat.shape[-1]
    w = w_flat.astype(jnp.float32).reshape(kh, kw, cin, cout)
    y = jax.lax.conv_general_dilated(
        x.astype(jnp.bfloat16).astype(jnp.float32), w,
        window_strides=(1, 1),
        padding=[(kh // 2, kh // 2), (kw // 2, kw // 2)],
        dimension_numbers=("NHWC", "HWIO", "NHWC"),
        precision=jax.lax.Precision.HIGHEST)
    return y + b.reshape(1, 1, 1, cout)


def basicblock_reference_nhwc(p, x):
    w1, b1 = p["c1"]
    w2, b2 = p["c2"]
    if "res" in p:
        wr, br = p["res"]
        residual = _ref_conv_bn(x, wr, br, 1, 1)
    else:
        residual = x
    out = jnp.maximum(_ref_conv_bn(x, w1, b1, 3, 3), 0.0)
    out = _ref_conv_bn(out, w2, b2, 3, 3) + residual
    return jnp.maximum(out, 0.0)


# ----------------------------------------------------------------------------
if __name__ == "__main__":
    key = jax.random.PRNGKey(0)
    kp1, kp2, kx = jax.random.split(key, 3)

    B, C_in, H, W = 2, 16, 16, 16
    C_out = 128  # lane-dense output channels (multiple of 128)
    x_nchw = jax.random.normal(kx, (B, C_in, H, W), jnp.float32)  # NCHW like PyTorch

    block1 = init_basicblock_params(kp1, C_in, C_out)    # depth_in != output_dim -> 1x1 proj
    block2 = init_basicblock_params(kp2, C_out, C_out)   # depth_in == output_dim -> identity

    @jax.jit
    def fwd(p1, p2, x):
        # One NCHW->NHWC transpose at entry and one NHWC->NCHW at exit; the two fused
        # block kernels chain directly in NHWC (no inter-block transposes / HBM churn).
        h = jnp.transpose(x, (0, 2, 3, 1))
        h = basicblock_nhwc(p2, basicblock_nhwc(p1, h))
        return jnp.transpose(h, (0, 3, 1, 2))

    out = jax.block_until_ready(fwd(block1, block2, x_nchw))

    assert out.shape == (B, C_out, H, W), out.shape
    assert bool(jnp.all(jnp.isfinite(out)))

    # Correctness check against a pure-JAX reference using the same folded bf16 weights.
    x_nhwc = jnp.transpose(x_nchw, (0, 2, 3, 1))
    ref = basicblock_reference_nhwc(block2, basicblock_reference_nhwc(block1, x_nhwc))
    ref = jnp.transpose(ref, (0, 3, 1, 2))
    max_err = float(jnp.max(jnp.abs(out - ref)))
    assert bool(jnp.allclose(out, ref, atol=2e-2, rtol=2e-2)), max_err

    print("KERNEL_OK")
</pallas_src>

<mosaic_0001>
module attributes {stable_mosaic.version = 11 : i64} {
  func.func @_basicblock_kernel(%arg0: i32, %arg1: memref<1x16x16x128xf32, #tpu.memory_space<vmem>>, %arg2: memref<1152x128xbf16, #tpu.memory_space<vmem>>, %arg3: memref<1x128xf32, #tpu.memory_space<vmem>>, %arg4: memref<1152x128xbf16, #tpu.memory_space<vmem>>, %arg5: memref<1x128xf32, #tpu.memory_space<vmem>>, %arg6: memref<1x16x16x128xf32, #tpu.memory_space<vmem>>, %arg7: memref<3x18x16x128xbf16, #tpu.memory_space<vmem>>, %arg8: memref<3x18x16x128xbf16, #tpu.memory_space<vmem>>) attributes {dimension_semantics = [#tpu.dimension_semantics<parallel>], iteration_bounds = array<i64: 2>, scalar_prefetch = 0 : i64, scratch_operands = 2 : i64, tpu.core_type = #tpu.core_type<tc>, window_params = [{transform_indices = @transform_0, window_bounds = array<i64: 1, 16, 16, 128>}, {pipeline_mode = #tpu.pipeline_mode<synchronous>, transform_indices = @transform_1, window_bounds = array<i64: 1152, 128>}, {pipeline_mode = #tpu.pipeline_mode<synchronous>, transform_indices = @transform_2, window_bounds = array<i64: 1, 128>}, {pipeline_mode = #tpu.pipeline_mode<synchronous>, transform_indices = @transform_3, window_bounds = array<i64: 1152, 128>}, {pipeline_mode = #tpu.pipeline_mode<synchronous>, transform_indices = @transform_4, window_bounds = array<i64: 1, 128>}, {transform_indices = @transform_5, window_bounds = array<i64: 1, 16, 16, 128>}]} {
    %c0 = arith.constant 0 : index
    %c0_0 = arith.constant 0 : index
    %c0_1 = arith.constant 0 : index
    %c0_2 = arith.constant 0 : index
    %0 = vector.load %arg1[%c0, %c0_0, %c0_1, %c0_2] : memref<1x16x16x128xf32, #tpu.memory_space<vmem>>, vector<1x16x16x128xf32>
    %1 = vector.shape_cast %0 : vector<1x16x16x128xf32> to vector<16x16x128xf32>
    %2 = arith.truncf %1 : vector<16x16x128xf32> to vector<16x16x128xbf16>
    %cst = arith.constant 0.000000e+00 : bf16
    %3 = vector.broadcast %cst : bf16 to vector<1x16x128xbf16>
    %c0_3 = arith.constant 0 : index
    %c0_4 = arith.constant 0 : index
    %c0_5 = arith.constant 0 : index
    %c0_6 = arith.constant 0 : index
    %4 = vector.load %arg7[%c0_3, %c0_4, %c0_5, %c0_6] : memref<3x18x16x128xbf16, #tpu.memory_space<vmem>>, vector<1x1x16x128xbf16>
    %5 = vector.shape_cast %4 : vector<1x1x16x128xbf16> to vector<1x16x128xbf16>
    %6 = vector.shape_cast %3 : vector<1x16x128xbf16> to vector<1x1x16x128xbf16>
    tpu.vector_store %arg7[%c0_3, %c0_4, %c0_5, %c0_6], %6 {strides = array<i32>} : memref<3x18x16x128xbf16, #tpu.memory_space<vmem>>, vector<1x1x16x128xbf16>,
    %c0_7 = arith.constant 0 : index
    %c17 = arith.constant 17 : index
    %c0_8 = arith.constant 0 : index
    %c0_9 = arith.constant 0 : index
    %7 = vector.load %arg7[%c0_7, %c17, %c0_8, %c0_9] : memref<3x18x16x128xbf16, #tpu.memory_space<vmem>>, vector<1x1x16x128xbf16>
    %8 = vector.shape_cast %7 : vector<1x1x16x128xbf16> to vector<1x16x128xbf16>
    %9 = vector.shape_cast %3 : vector<1x16x128xbf16> to vector<1x1x16x128xbf16>
    tpu.vector_store %arg7[%c0_7, %c17, %c0_8, %c0_9], %9 {strides = array<i32>} : memref<3x18x16x128xbf16, #tpu.memory_space<vmem>>, vector<1x1x16x128xbf16>,
    %c1 = arith.constant 1 : index
    %c0_10 = arith.constant 0 : index
    %c0_11 = arith.constant 0 : index
    %c0_12 = arith.constant 0 : index
    %10 = vector.load %arg7[%c1, %c0_10, %c0_11, %c0_12] : memref<3x18x16x128xbf16, #tpu.memory_space<vmem>>, vector<1x1x16x128xbf16>
    %11 = vector.shape_cast %10 : vector<1x1x16x128xbf16> to vector<1x16x128xbf16>
    %12 = vector.shape_cast %3 : vector<1x16x128xbf16> to vector<1x1x16x128xbf16>
    tpu.vector_store %arg7[%c1, %c0_10, %c0_11, %c0_12], %12 {strides = array<i32>} : memref<3x18x16x128xbf16, #tpu.memory_space<vmem>>, vector<1x1x16x128xbf16>,
    %c1_13 = arith.constant 1 : index
    %c17_14 = arith.constant 17 : index
    %c0_15 = arith.constant 0 : index
    %c0_16 = arith.constant 0 : index
    %13 = vector.load %arg7[%c1_13, %c17_14, %c0_15, %c0_16] : memref<3x18x16x128xbf16, #tpu.memory_space<vmem>>, vector<1x1x16x128xbf16>
    %14 = vector.shape_cast %13 : vector<1x1x16x128xbf16> to vector<1x16x128xbf16>
    %15 = vector.shape_cast %3 : vector<1x16x128xbf16> to vector<1x1x16x128xbf16>
    tpu.vector_store %arg7[%c1_13, %c17_14, %c0_15, %c0_16], %15 {strides = array<i32>} : memref<3x18x16x128xbf16, #tpu.memory_space<vmem>>, vector<1x1x16x128xbf16>,
    %c2 = arith.constant 2 : index
    %c0_17 = arith.constant 0 : index
    %c0_18 = arith.constant 0 : index
    %c0_19 = arith.constant 0 : index
    %16 = vector.load %arg7[%c2, %c0_17, %c0_18, %c0_19] : memref<3x18x16x128xbf16, #tpu.memory_space<vmem>>, vector<1x1x16x128xbf16>
    %17 = vector.shape_cast %16 : vector<1x1x16x128xbf16> to vector<1x16x128xbf16>
    %18 = vector.shape_cast %3 : vector<1x16x128xbf16> to vector<1x1x16x128xbf16>
    tpu.vector_store %arg7[%c2, %c0_17, %c0_18, %c0_19], %18 {strides = array<i32>} : memref<3x18x16x128xbf16, #tpu.memory_space<vmem>>, vector<1x1x16x128xbf16>,
    %c2_20 = arith.constant 2 : index
    %c17_21 = arith.constant 17 : index
    %c0_22 = arith.constant 0 : index
    %c0_23 = arith.constant 0 : index
    %19 = vector.load %arg7[%c2_20, %c17_21, %c0_22, %c0_23] : memref<3x18x16x128xbf16, #tpu.memory_space<vmem>>, vector<1x1x16x128xbf16>
    %20 = vector.shape_cast %19 : vector<1x1x16x128xbf16> to vector<1x16x128xbf16>
    %21 = vector.shape_cast %3 : vector<1x16x128xbf16> to vector<1x1x16x128xbf16>
    tpu.vector_store %arg7[%c2_20, %c17_21, %c0_22, %c0_23], %21 {strides = array<i32>} : memref<3x18x16x128xbf16, #tpu.memory_space<vmem>>, vector<1x1x16x128xbf16>,
    %cst_24 = arith.constant 0.000000e+00 : bf16
    %22 = vector.broadcast %cst_24 : bf16 to vector<18x1x128xbf16>
    %c0_25 = arith.constant 0 : index
    %c0_26 = arith.constant 0 : index
    %c0_27 = arith.constant 0 : index
    %c0_28 = arith.constant 0 : index
    %23 = vector.load %arg7[%c0_25, %c0_26, %c0_27, %c0_28] : memref<3x18x16x128xbf16, #tpu.memory_space<vmem>>, vector<1x18x1x128xbf16>
    %24 = vector.shape_cast %23 : vector<1x18x1x128xbf16> to vector<18x1x128xbf16>
    %25 = vector.shape_cast %22 : vector<18x1x128xbf16> to vector<1x18x1x128xbf16>
    tpu.vector_store %arg7[%c0_25, %c0_26, %c0_27, %c0_28], %25 {strides = array<i32>} : memref<3x18x16x128xbf16, #tpu.memory_space<vmem>>, vector<1x18x1x128xbf16>,
    %c2_29 = arith.constant 2 : index
    %c0_30 = arith.constant 0 : index
    %c15 = arith.constant 15 : index
    %c0_31 = arith.constant 0 : index
    %26 = vector.load %arg7[%c2_29, %c0_30, %c15, %c0_31] : memref<3x18x16x128xbf16, #tpu.memory_space<vmem>>, vector<1x18x1x128xbf16>
    %27 = vector.shape_cast %26 : vector<1x18x1x128xbf16> to vector<18x1x128xbf16>
    %28 = vector.shape_cast %22 : vector<18x1x128xbf16> to vector<1x18x1x128xbf16>
    tpu.vector_store %arg7[%c2_29, %c0_30, %c15, %c0_31], %28 {strides = array<i32>} : memref<3x18x16x128xbf16, #tpu.memory_space<vmem>>, vector<1x18x1x128xbf16>,
    %c1_32 = arith.constant 1 : index
    %c1_33 = arith.constant 1 : index
    %c0_34 = arith.constant 0 : index
    %c0_35 = arith.constant 0 : index
    %29 = vector.load %arg7[%c1_32, %c1_33, %c0_34, %c0_35] : memref<3x18x16x128xbf16, #tpu.memory_space<vmem>>, vector<1x16x16x128xbf16>
    %30 = vector.shape_cast %29 : vector<1x16x16x128xbf16> to vector<16x16x128xbf16>
    %31 = vector.shape_cast %2 : vector<16x16x128xbf16> to vector<1x16x16x128xbf16>
    tpu.vector_store %arg7[%c1_32, %c1_33, %c0_34, %c0_35], %31 {strides = array<i32>} : memref<3x18x16x128xbf16, #tpu.memory_space<vmem>>, vector<1x16x16x128xbf16>,
    %32 = vector.extract_strided_slice %2 {offsets = [0, 0, 0], sizes = [16, 15, 128], strides = [1, 1, 1]} : vector<16x16x128xbf16> to vector<16x15x128xbf16>
    %c0_36 = arith.constant 0 : index
    %c1_37 = arith.constant 1 : index
    %c1_38 = arith.constant 1 : index
    %c0_39 = arith.constant 0 : index
    %33 = vector.load %arg7[%c0_36, %c1_37, %c1_38, %c0_39] : memref<3x18x16x128xbf16, #tpu.memory_space<vmem>>, vector<1x16x15x128xbf16>
    %34 = vector.shape_cast %33 : vector<1x16x15x128xbf16> to vector<16x15x128xbf16>
    %35 = vector.shape_cast %32 : vector<16x15x128xbf16> to vector<1x16x15x128xbf16>
    tpu.vector_store %arg7[%c0_36, %c1_37, %c1_38, %c0_39], %35 {strides = array<i32>} : memref<3x18x16x128xbf16, #tpu.memory_space<vmem>>, vector<1x16x15x128xbf16>,
    %36 = vector.extract_strided_slice %2 {offsets = [0, 1, 0], sizes = [16, 15, 128], strides = [1, 1, 1]} : vector<16x16x128xbf16> to vector<16x15x128xbf16>
    %c2_40 = arith.constant 2 : index
    %c1_41 = arith.constant 1 : index
    %c0_42 = arith.constant 0 : index
    %c0_43 = arith.constant 0 : index
    %37 = vector.load %arg7[%c2_40, %c1_41, %c0_42, %c0_43] : memref<3x18x16x128xbf16, #tpu.memory_space<vmem>>, vector<1x16x15x128xbf16>
    %38 = vector.shape_cast %37 : vector<1x16x15x128xbf16> to vector<16x15x128xbf16>
    %39 = vector.shape_cast %36 : vector<16x15x128xbf16> to vector<1x16x15x128xbf16>
    tpu.vector_store %arg7[%c2_40, %c1_41, %c0_42, %c0_43], %39 {strides = array<i32>} : memref<3x18x16x128xbf16, #tpu.memory_space<vmem>>, vector<1x16x15x128xbf16>,
    %c0_44 = arith.constant 0 : index
    %c0_45 = arith.constant 0 : index
    %c0_46 = arith.constant 0 : index
    %c0_47 = arith.constant 0 : index
    %40 = vector.load %arg7[%c0_44, %c0_45, %c0_46, %c0_47] : memref<3x18x16x128xbf16, #tpu.memory_space<vmem>>, vector<1x16x16x128xbf16>
    %41 = vector.shape_cast %40 : vector<1x16x16x128xbf16> to vector<16x16x128xbf16>
    %c1_48 = arith.constant 1 : index
    %c0_49 = arith.constant 0 : index
    %c0_50 = arith.constant 0 : index
    %c0_51 = arith.constant 0 : index
    %42 = vector.load %arg7[%c1_48, %c0_49, %c0_50, %c0_51] : memref<3x18x16x128xbf16, #tpu.memory_space<vmem>>, vector<1x16x16x128xbf16>
    %43 = vector.shape_cast %42 : vector<1x16x16x128xbf16> to vector<16x16x128xbf16>
    %c2_52 = arith.constant 2 : index
    %c0_53 = arith.constant 0 : index
    %c0_54 = arith.constant 0 : index
    %c0_55 = arith.constant 0 : index
    %44 = vector.load %arg7[%c2_52, %c0_53, %c0_54, %c0_55] : memref<3x18x16x128xbf16, #tpu.memory_space<vmem>>, vector<1x16x16x128xbf16>
    %45 = vector.shape_cast %44 : vector<1x16x16x128xbf16> to vector<16x16x128xbf16>
    %c0_56 = arith.constant 0 : index
    %c1_57 = arith.constant 1 : index
    %c0_58 = arith.constant 0 : index
    %c0_59 = arith.constant 0 : index
    %46 = vector.load %arg7[%c0_56, %c1_57, %c0_58, %c0_59] : memref<3x18x16x128xbf16, #tpu.memory_space<vmem>>, vector<1x16x16x128xbf16>
    %47 = vector.shape_cast %46 : vector<1x16x16x128xbf16> to vector<16x16x128xbf16>
    %c1_60 = arith.constant 1 : index
    %c1_61 = arith.constant 1 : index
    %c0_62 = arith.constant 0 : index
    %c0_63 = arith.constant 0 : index
    %48 = vector.load %arg7[%c1_60, %c1_61, %c0_62, %c0_63] : memref<3x18x16x128xbf16, #tpu.memory_space<vmem>>, vector<1x16x16x128xbf16>
    %49 = vector.shape_cast %48 : vector<1x16x16x128xbf16> to vector<16x16x128xbf16>
    %c2_64 = arith.constant 2 : index
    %c1_65 = arith.constant 1 : index
    %c0_66 = arith.constant 0 : index
    %c0_67 = arith.constant 0 : index
    %50 = vector.load %arg7[%c2_64, %c1_65, %c0_66, %c0_67] : memref<3x18x16x128xbf16, #tpu.memory_space<vmem>>, vector<1x16x16x128xbf16>
    %51 = vector.shape_cast %50 : vector<1x16x16x128xbf16> to vector<16x16x128xbf16>
    %c0_68 = arith.constant 0 : index
    %c2_69 = arith.constant 2 : index
    %c0_70 = arith.constant 0 : index
    %c0_71 = arith.constant 0 : index
    %52 = vector.load %arg7[%c0_68, %c2_69, %c0_70, %c0_71] : memref<3x18x16x128xbf16, #tpu.memory_space<vmem>>, vector<1x16x16x128xbf16>
    %53 = vector.shape_cast %52 : vector<1x16x16x128xbf16> to vector<16x16x128xbf16>
    %c1_72 = arith.constant 1 : index
    %c2_73 = arith.constant 2 : index
    %c0_74 = arith.constant 0 : index
    %c0_75 = arith.constant 0 : index
    %54 = vector.load %arg7[%c1_72, %c2_73, %c0_74, %c0_75] : memref<3x18x16x128xbf16, #tpu.memory_space<vmem>>, vector<1x16x16x128xbf16>
    %55 = vector.shape_cast %54 : vector<1x16x16x128xbf16> to vector<16x16x128xbf16>
    %c2_76 = arith.constant 2 : index
    %c2_77 = arith.constant 2 : index
    %c0_78 = arith.constant 0 : index
    %c0_79 = arith.constant 0 : index
    %56 = vector.load %arg7[%c2_76, %c2_77, %c0_78, %c0_79] : memref<3x18x16x128xbf16, #tpu.memory_space<vmem>>, vector<1x16x16x128xbf16>
    %57 = vector.shape_cast %56 : vector<1x16x16x128xbf16> to vector<16x16x128xbf16>
    %58 = tpu.concatenate %41, %43, %45, %47, %49, %51, %53, %55, %57 in 2 : vector<16x16x128xbf16>, vector<16x16x128xbf16>, vector<16x16x128xbf16>, vector<16x16x128xbf16>, vector<16x16x128xbf16>, vector<16x16x128xbf16>, vector<16x16x128xbf16>, vector<16x16x128xbf16>, vector<16x16x128xbf16> -> vector<16x16x1152xbf16>
    %59 = vector.shape_cast %58 : vector<16x16x1152xbf16> to vector<256x1152xbf16>
    %c0_80 = arith.constant 0 : index
    %c0_81 = arith.constant 0 : index
    %60 = vector.load %arg2[%c0_80, %c0_81] : memref<1152x128xbf16, #tpu.memory_space<vmem>>, vector<1152x128xbf16>
    %cst_82 = arith.constant dense<0.000000e+00> : vector<256x128xf32>
    %61 = tpu.matmul %59, %60, %cst_82 {dimension_numbers = #tpu.dot_dimension_numbers<[1], [0], [0], [1], [0, 0, 1, 1], [], []>} : vector<256x1152xbf16>, vector<1152x128xbf16>, vector<256x128xf32> -> vector<256x128xf32>
    %c0_83 = arith.constant 0 : index
    %c0_84 = arith.constant 0 : index
    %62 = vector.load %arg3[%c0_83, %c0_84] : memref<1x128xf32, #tpu.memory_space<vmem>>, vector<1x128xf32>
    %63 = vector.broadcast %62 : vector<1x128xf32> to vector<256x128xf32>
    %64 = arith.addf %61, %63 : vector<256x128xf32>
    %cst_85 = arith.constant 0.000000e+00 : f32
    %65 = vector.broadcast %cst_85 : f32 to vector<256x128xf32>
    %66 = arith.maximumf %64, %65 : vector<256x128xf32>
    %67 = vector.shape_cast %66 : vector<256x128xf32> to vector<16x16x128xf32>
    %68 = arith.truncf %67 : vector<16x16x128xf32> to vector<16x16x128xbf16>
    %cst_86 = arith.constant 0.000000e+00 : bf16
    %69 = vector.broadcast %cst_86 : bf16 to vector<1x16x128xbf16>
    %c0_87 = arith.constant 0 : index
    %c0_88 = arith.constant 0 : index
    %c0_89 = arith.constant 0 : index
    %c0_90 = arith.constant 0 : index
    %70 = vector.load %arg8[%c0_87, %c0_88, %c0_89, %c0_90] : memref<3x18x16x128xbf16, #tpu.memory_space<vmem>>, vector<1x1x16x128xbf16>
    %71 = vector.shape_cast %70 : vector<1x1x16x128xbf16> to vector<1x16x128xbf16>
    %72 = vector.shape_cast %69 : vector<1x16x128xbf16> to vector<1x1x16x128xbf16>
    tpu.vector_store %arg8[%c0_87, %c0_88, %c0_89, %c0_90], %72 {strides = array<i32>} : memref<3x18x16x128xbf16, #tpu.memory_space<vmem>>, vector<1x1x16x128xbf16>,
    %c0_91 = arith.constant 0 : index
    %c17_92 = arith.constant 17 : index
    %c0_93 = arith.constant 0 : index
    %c0_94 = arith.constant 0 : index
    %73 = vector.load %arg8[%c0_91, %c17_92, %c0_93, %c0_94] : memref<3x18x16x128xbf16, #tpu.memory_space<vmem>>, vector<1x1x16x128xbf16>
    %74 = vector.shape_cast %73 : vector<1x1x16x128xbf16> to vector<1x16x128xbf16>
    %75 = vector.shape_cast %69 : vector<1x16x128xbf16> to vector<1x1x16x128xbf16>
    tpu.vector_store %arg8[%c0_91, %c17_92, %c0_93, %c0_94], %75 {strides = array<i32>} : memref<3x18x16x128xbf16, #tpu.memory_space<vmem>>, vector<1x1x16x128xbf16>,
    %c1_95 = arith.constant 1 : index
    %c0_96 = arith.constant 0 : index
    %c0_97 = arith.constant 0 : index
    %c0_98 = arith.constant 0 : index
    %76 = vector.load %arg8[%c1_95, %c0_96, %c0_97, %c0_98] : memref<3x18x16x128xbf16, #tpu.memory_space<vmem>>, vector<1x1x16x128xbf16>
    %77 = vector.shape_cast %76 : vector<1x1x16x128xbf16> to vector<1x16x128xbf16>
    %78 = vector.shape_cast %69 : vector<1x16x128xbf16> to vector<1x1x16x128xbf16>
    tpu.vector_store %arg8[%c1_95, %c0_96, %c0_97, %c0_98], %78 {strides = array<i32>} : memref<3x18x16x128xbf16, #tpu.memory_space<vmem>>, vector<1x1x16x128xbf16>,
    %c1_99 = arith.constant 1 : index
    %c17_100 = arith.constant 17 : index
    %c0_101 = arith.constant 0 : index
    %c0_102 = arith.constant 0 : index
    %79 = vector.load %arg8[%c1_99, %c17_100, %c0_101, %c0_102] : memref<3x18x16x128xbf16, #tpu.memory_space<vmem>>, vector<1x1x16x128xbf16>
    %80 = vector.shape_cast %79 : vector<1x1x16x128xbf16> to vector<1x16x128xbf16>
    %81 = vector.shape_cast %69 : vector<1x16x128xbf16> to vector<1x1x16x128xbf16>
    tpu.vector_store %arg8[%c1_99, %c17_100, %c0_101, %c0_102], %81 {strides = array<i32>} : memref<3x18x16x128xbf16, #tpu.memory_space<vmem>>, vector<1x1x16x128xbf16>,
    %c2_103 = arith.constant 2 : index
    %c0_104 = arith.constant 0 : index
    %c0_105 = arith.constant 0 : index
    %c0_106 = arith.constant 0 : index
    %82 = vector.load %arg8[%c2_103, %c0_104, %c0_105, %c0_106] : memref<3x18x16x128xbf16, #tpu.memory_space<vmem>>, vector<1x1x16x128xbf16>
    %83 = vector.shape_cast %82 : vector<1x1x16x128xbf16> to vector<1x16x128xbf16>
    %84 = vector.shape_cast %69 : vector<1x16x128xbf16> to vector<1x1x16x128xbf16>
    tpu.vector_store %arg8[%c2_103, %c0_104, %c0_105, %c0_106], %84 {strides = array<i32>} : memref<3x18x16x128xbf16, #tpu.memory_space<vmem>>, vector<1x1x16x128xbf16>,
    %c2_107 = arith.constant 2 : index
    %c17_108 = arith.constant 17 : index
    %c0_109 = arith.constant 0 : index
    %c0_110 = arith.constant 0 : index
    %85 = vector.load %arg8[%c2_107, %c17_108, %c0_109, %c0_110] : memref<3x18x16x128xbf16, #tpu.memory_space<vmem>>, vector<1x1x16x128xbf16>
    %86 = vector.shape_cast %85 : vector<1x1x16x128xbf16> to vector<1x16x128xbf16>
    %87 = vector.shape_cast %69 : vector<1x16x128xbf16> to vector<1x1x16x128xbf16>
    tpu.vector_store %arg8[%c2_107, %c17_108, %c0_109, %c0_110], %87 {strides = array<i32>} : memref<3x18x16x128xbf16, #tpu.memory_space<vmem>>, vector<1x1x16x128xbf16>,
    %cst_111 = arith.constant 0.000000e+00 : bf16
    %88 = vector.broadcast %cst_111 : bf16 to vector<18x1x128xbf16>
    %c0_112 = arith.constant 0 : index
    %c0_113 = arith.constant 0 : index
    %c0_114 = arith.constant 0 : index
    %c0_115 = arith.constant 0 : index
    %89 = vector.load %arg8[%c0_112, %c0_113, %c0_114, %c0_115] : memref<3x18x16x128xbf16, #tpu.memory_space<vmem>>, vector<1x18x1x128xbf16>
    %90 = vector.shape_cast %89 : vector<1x18x1x128xbf16> to vector<18x1x128xbf16>
    %91 = vector.shape_cast %88 : vector<18x1x128xbf16> to vector<1x18x1x128xbf16>
    tpu.vector_store %arg8[%c0_112, %c0_113, %c0_114, %c0_115], %91 {strides = array<i32>} : memref<3x18x16x128xbf16, #tpu.memory_space<vmem>>, vector<1x18x1x128xbf16>,
    %c2_116 = arith.constant 2 : index
    %c0_117 = arith.constant 0 : index
    %c15_118 = arith.constant 15 : index
    %c0_119 = arith.constant 0 : index
    %92 = vector.load %arg8[%c2_116, %c0_117, %c15_118, %c0_119] : memref<3x18x16x128xbf16, #tpu.memory_space<vmem>>, vector<1x18x1x128xbf16>
    %93 = vector.shape_cast %92 : vector<1x18x1x128xbf16> to vector<18x1x128xbf16>
    %94 = vector.shape_cast %88 : vector<18x1x128xbf16> to vector<1x18x1x128xbf16>
    tpu.vector_store %arg8[%c2_116, %c0_117, %c15_118, %c0_119], %94 {strides = array<i32>} : memref<3x18x16x128xbf16, #tpu.memory_space<vmem>>, vector<1x18x1x128xbf16>,
    %c1_120 = arith.constant 1 : index
    %c1_121 = arith.constant 1 : index
    %c0_122 = arith.constant 0 : index
    %c0_123 = arith.constant 0 : index
    %95 = vector.load %arg8[%c1_120, %c1_121, %c0_122, %c0_123] : memref<3x18x16x128xbf16, #tpu.memory_space<vmem>>, vector<1x16x16x128xbf16>
    %96 = vector.shape_cast %95 : vector<1x16x16x128xbf16> to vector<16x16x128xbf16>
    %97 = vector.shape_cast %68 : vector<16x16x128xbf16> to vector<1x16x16x128xbf16>
    tpu.vector_store %arg8[%c1_120, %c1_121, %c0_122, %c0_123], %97 {strides = array<i32>} : memref<3x18x16x128xbf16, #tpu.memory_space<vmem>>, vector<1x16x16x128xbf16>,
    %98 = vector.extract_strided_slice %68 {offsets = [0, 0, 0], sizes = [16, 15, 128], strides = [1, 1, 1]} : vector<16x16x128xbf16> to vector<16x15x128xbf16>
    %c0_124 = arith.constant 0 : index
    %c1_125 = arith.constant 1 : index
    %c1_126 = arith.constant 1 : index
    %c0_127 = arith.constant 0 : index
    %99 = vector.load %arg8[%c0_124, %c1_125, %c1_126, %c0_127] : memref<3x18x16x128xbf16, #tpu.memory_space<vmem>>, vector<1x16x15x128xbf16>
    %100 = vector.shape_cast %99 : vector<1x16x15x128xbf16> to vector<16x15x128xbf16>
    %101 = vector.shape_cast %98 : vector<16x15x128xbf16> to vector<1x16x15x128xbf16>
    tpu.vector_store %arg8[%c0_124, %c1_125, %c1_126, %c0_127], %101 {strides = array<i32>} : memref<3x18x16x128xbf16, #tpu.memory_space<vmem>>, vector<1x16x15x128xbf16>,
    %102 = vector.extract_strided_slice %68 {offsets = [0, 1, 0], sizes = [16, 15, 128], strides = [1, 1, 1]} : vector<16x16x128xbf16> to vector<16x15x128xbf16>
    %c2_128 = arith.constant 2 : index
    %c1_129 = arith.constant 1 : index
    %c0_130 = arith.constant 0 : index
    %c0_131 = arith.constant 0 : index
    %103 = vector.load %arg8[%c2_128, %c1_129, %c0_130, %c0_131] : memref<3x18x16x128xbf16, #tpu.memory_space<vmem>>, vector<1x16x15x128xbf16>
    %104 = vector.shape_cast %103 : vector<1x16x15x128xbf16> to vector<16x15x128xbf16>
    %105 = vector.shape_cast %102 : vector<16x15x128xbf16> to vector<1x16x15x128xbf16>
    tpu.vector_store %arg8[%c2_128, %c1_129, %c0_130, %c0_131], %105 {strides = array<i32>} : memref<3x18x16x128xbf16, #tpu.memory_space<vmem>>, vector<1x16x15x128xbf16>,
    %c0_132 = arith.constant 0 : index
    %c0_133 = arith.constant 0 : index
    %c0_134 = arith.constant 0 : index
    %c0_135 = arith.constant 0 : index
    %106 = vector.load %arg8[%c0_132, %c0_133, %c0_134, %c0_135] : memref<3x18x16x128xbf16, #tpu.memory_space<vmem>>, vector<1x16x16x128xbf16>
    %107 = vector.shape_cast %106 : vector<1x16x16x128xbf16> to vector<16x16x128xbf16>
    %c1_136 = arith.constant 1 : index
    %c0_137 = arith.constant 0 : index
    %c0_138 = arith.constant 0 : index
    %c0_139 = arith.constant 0 : index
    %108 = vector.load %arg8[%c1_136, %c0_137, %c0_138, %c0_139] : memref<3x18x16x128xbf16, #tpu.memory_space<vmem>>, vector<1x16x16x128xbf16>
    %109 = vector.shape_cast %108 : vector<1x16x16x128xbf16> to vector<16x16x128xbf16>
    %c2_140 = arith.constant 2 : index
    %c0_141 = arith.constant 0 : index
    %c0_142 = arith.constant 0 : index
    %c0_143 = arith.constant 0 : index
    %110 = vector.load %arg8[%c2_140, %c0_141, %c0_142, %c0_143] : memref<3x18x16x128xbf16, #tpu.memory_space<vmem>>, vector<1x16x16x128xbf16>
    %111 = vector.shape_cast %110 : vector<1x16x16x128xbf16> to vector<16x16x128xbf16>
    %c0_144 = arith.constant 0 : index
    %c1_145 = arith.constant 1 : index
    %c0_146 = arith.constant 0 : index
    %c0_147 = arith.constant 0 : index
    %112 = vector.load %arg8[%c0_144, %c1_145, %c0_146, %c0_147] : memref<3x18x16x128xbf16, #tpu.memory_space<vmem>>, vector<1x16x16x128xbf16>
    %113 = vector.shape_cast %112 : vector<1x16x16x128xbf16> to vector<16x16x128xbf16>
    %c1_148 = arith.constant 1 : index
    %c1_149 = arith.constant 1 : index
    %c0_150 = arith.constant 0 : index
    %c0_151 = arith.constant 0 : index
    %114 = vector.load %arg8[%c1_148, %c1_149, %c0_150, %c0_151] : memref<3x18x16x128xbf16, #tpu.memory_space<vmem>>, vector<1x16x16x128xbf16>
    %115 = vector.shape_cast %114 : vector<1x16x16x128xbf16> to vector<16x16x128xbf16>
    %c2_152 = arith.constant 2 : index
    %c1_153 = arith.constant 1 : index
    %c0_154 = arith.constant 0 : index
    %c0_155 = arith.constant 0 : index
    %116 = vector.load %arg8[%c2_152, %c1_153, %c0_154, %c0_155] : memref<3x18x16x128xbf16, #tpu.memory_space<vmem>>, vector<1x16x16x128xbf16>
    %117 = vector.shape_cast %116 : vector<1x16x16x128xbf16> to vector<16x16x128xbf16>
    %c0_156 = arith.constant 0 : index
    %c2_157 = arith.constant 2 : index
    %c0_158 = arith.constant 0 : index
    %c0_159 = arith.constant 0 : index
    %118 = vector.load %arg8[%c0_156, %c2_157, %c0_158, %c0_159] : memref<3x18x16x128xbf16, #tpu.memory_space<vmem>>, vector<1x16x16x128xbf16>
    %119 = vector.shape_cast %118 : vector<1x16x16x128xbf16> to vector<16x16x128xbf16>
    %c1_160 = arith.constant 1 : index
    %c2_161 = arith.constant 2 : index
    %c0_162 = arith.constant 0 : index
    %c0_163 = arith.constant 0 : index
    %120 = vector.load %arg8[%c1_160, %c2_161, %c0_162, %c0_163] : memref<3x18x16x128xbf16, #tpu.memory_space<vmem>>, vector<1x16x16x128xbf16>
    %121 = vector.shape_cast %120 : vector<1x16x16x128xbf16> to vector<16x16x128xbf16>
    %c2_164 = arith.constant 2 : index
    %c2_165 = arith.constant 2 : index
    %c0_166 = arith.constant 0 : index
    %c0_167 = arith.constant 0 : index
    %122 = vector.load %arg8[%c2_164, %c2_165, %c0_166, %c0_167] : memref<3x18x16x128xbf16, #tpu.memory_space<vmem>>, vector<1x16x16x128xbf16>
    %123 = vector.shape_cast %122 : vector<1x16x16x128xbf16> to vector<16x16x128xbf16>
    %124 = tpu.concatenate %107, %109, %111, %113, %115, %117, %119, %121, %123 in 2 : vector<16x16x128xbf16>, vector<16x16x128xbf16>, vector<16x16x128xbf16>, vector<16x16x128xbf16>, vector<16x16x128xbf16>, vector<16x16x128xbf16>, vector<16x16x128xbf16>, vector<16x16x128xbf16>, vector<16x16x128xbf16> -> vector<16x16x1152xbf16>
    %125 = vector.shape_cast %124 : vector<16x16x1152xbf16> to vector<256x1152xbf16>
    %c0_168 = arith.constant 0 : index
    %c0_169 = arith.constant 0 : index
    %126 = vector.load %arg4[%c0_168, %c0_169] : memref<1152x128xbf16, #tpu.memory_space<vmem>>, vector<1152x128xbf16>
    %cst_170 = arith.constant dense<0.000000e+00> : vector<256x128xf32>
    %127 = tpu.matmul %125, %126, %cst_170 {dimension_numbers = #tpu.dot_dimension_numbers<[1], [0], [0], [1], [0, 0, 1, 1], [], []>} : vector<256x1152xbf16>, vector<1152x128xbf16>, vector<256x128xf32> -> vector<256x128xf32>
    %c0_171 = arith.constant 0 : index
    %c0_172 = arith.constant 0 : index
    %128 = vector.load %arg5[%c0_171, %c0_172] : memref<1x128xf32, #tpu.memory_space<vmem>>, vector<1x128xf32>
    %129 = vector.broadcast %128 : vector<1x128xf32> to vector<256x128xf32>
    %130 = arith.addf %127, %129 : vector<256x128xf32>
    %c0_173 = arith.constant 0 : index
    %c0_174 = arith.constant 0 : index
    %c0_175 = arith.constant 0 : index
    %c0_176 = arith.constant 0 : index
    %131 = vector.load %arg1[%c0_173, %c0_174, %c0_175, %c0_176] : memref<1x16x16x128xf32, #tpu.memory_space<vmem>>, vector<1x16x16x128xf32>
    %132 = vector.shape_cast %131 : vector<1x16x16x128xf32> to vector<16x16x128xf32>
    %133 = vector.shape_cast %132 : vector<16x16x128xf32> to vector<256x128xf32>
    %134 = arith.addf %130, %133 : vector<256x128xf32>
    %cst_177 = arith.constant 0.000000e+00 : f32
    %135 = vector.broadcast %cst_177 : f32 to vector<256x128xf32>
    %136 = arith.maximumf %134, %135 : vector<256x128xf32>
    %137 = vector.shape_cast %136 : vector<256x128xf32> to vector<16x16x128xf32>
    %c0_178 = arith.constant 0 : index
    %c0_179 = arith.constant 0 : index
    %c0_180 = arith.constant 0 : index
    %c0_181 = arith.constant 0 : index
    %138 = vector.load %arg6[%c0_178, %c0_179, %c0_180, %c0_181] : memref<1x16x16x128xf32, #tpu.memory_space<vmem>>, vector<1x16x16x128xf32>
    %139 = vector.shape_cast %138 : vector<1x16x16x128xf32> to vector<16x16x128xf32>
    %140 = vector.shape_cast %137 : vector<16x16x128xf32> to vector<1x16x16x128xf32>
    tpu.vector_store %arg6[%c0_178, %c0_179, %c0_180, %c0_181], %140 {strides = array<i32>} : memref<1x16x16x128xf32, #tpu.memory_space<vmem>>, vector<1x16x16x128xf32>,
    return
  }
  func.func @transform_0(%arg0: i32) -> (i32, i32, i32, i32) {
    %c0_i32 = arith.constant 0 : i32
    %c0_i32_0 = arith.constant 0 : i32
    %c0_i32_1 = arith.constant 0 : i32
    %c0_i32_2 = arith.constant 0 : i32
    return %arg0, %c0_i32, %c0_i32_0, %c0_i32_1 : i32, i32, i32, i32
  }
  func.func @transform_1(%arg0: i32) -> (i32, i32) {
    %c0_i32 = arith.constant 0 : i32
    %c0_i32_0 = arith.constant 0 : i32
    %c0_i32_1 = arith.constant 0 : i32
    return %c0_i32, %c0_i32_0 : i32, i32
  }
  func.func @transform_2(%arg0: i32) -> (i32, i32) {
    %c0_i32 = arith.constant 0 : i32
    %c0_i32_0 = arith.constant 0 : i32
    %c0_i32_1 = arith.constant 0 : i32
    return %c0_i32, %c0_i32_0 : i32, i32
  }
  func.func @transform_3(%arg0: i32) -> (i32, i32) {
    %c0_i32 = arith.constant 0 : i32
    %c0_i32_0 = arith.constant 0 : i32
    %c0_i32_1 = arith.constant 0 : i32
    return %c0_i32, %c0_i32_0 : i32, i32
  }
  func.func @transform_4(%arg0: i32) -> (i32, i32) {
    %c0_i32 = arith.constant 0 : i32
    %c0_i32_0 = arith.constant 0 : i32
    %c0_i32_1 = arith.constant 0 : i32
    return %c0_i32, %c0_i32_0 : i32, i32
  }
  func.func @transform_5(%arg0: i32) -> (i32, i32, i32, i32) {
    %c0_i32 = arith.constant 0 : i32
    %c0_i32_0 = arith.constant 0 : i32
    %c0_i32_1 = arith.constant 0 : i32
    %c0_i32_2 = arith.constant 0 : i32
    return %arg0, %c0_i32, %c0_i32_0, %c0_i32_1 : i32, i32, i32, i32
  }
}

module attributes {stable_mosaic.version = 11 : i64} {
  func.func @_basicblock_kernel(%arg0: i32, %arg1: memref<1x16x16x16xf32, #tpu.memory_space<vmem>>, %arg2: memref<144x128xbf16, #tpu.memory_space<vmem>>, %arg3: memref<1x128xf32, #tpu.memory_space<vmem>>, %arg4: memref<1152x128xbf16, #tpu.memory_space<vmem>>, %arg5: memref<1x128xf32, #tpu.memory_space<vmem>>, %arg6: memref<16x128xbf16, #tpu.memory_space<vmem>>, %arg7: memref<1x128xf32, #tpu.memory_space<vmem>>, %arg8: memref<1x16x16x128xf32, #tpu.memory_space<vmem>>, %arg9: memref<3x18x16x16xbf16, #tpu.memory_space<vmem>>, %arg10: memref<3x18x16x128xbf16, #tpu.memory_space<vmem>>) attributes {dimension_semantics = [#tpu.dimension_semantics<parallel>], iteration_bounds = array<i64: 2>, scalar_prefetch = 0 : i64, scratch_operands = 2 : i64, tpu.core_type = #tpu.core_type<tc>, window_params = [{transform_indices = @transform_0, window_bounds = array<i64: 1, 16, 16, 16>}, {pipeline_mode = #tpu.pipeline_mode<synchronous>, transform_indices = @transform_1, window_bounds = array<i64: 144, 128>}, {pipeline_mode = #tpu.pipeline_mode<synchronous>, transform_indices = @transform_2, window_bounds = array<i64: 1, 128>}, {pipeline_mode = #tpu.pipeline_mode<synchronous>, transform_indices = @transform_3, window_bounds = array<i64: 1152, 128>}, {pipeline_mode = #tpu.pipeline_mode<synchronous>, transform_indices = @transform_4, window_bounds = array<i64: 1, 128>}, {pipeline_mode = #tpu.pipeline_mode<synchronous>, transform_indices = @transform_5, window_bounds = array<i64: 16, 128>}, {pipeline_mode = #tpu.pipeline_mode<synchronous>, transform_indices = @transform_6, window_bounds = array<i64: 1, 128>}, {transform_indices = @transform_7, window_bounds = array<i64: 1, 16, 16, 128>}]} {
    %c0 = arith.constant 0 : index
    %c0_0 = arith.constant 0 : index
    %c0_1 = arith.constant 0 : index
    %c0_2 = arith.constant 0 : index
    %0 = vector.load %arg1[%c0, %c0_0, %c0_1, %c0_2] : memref<1x16x16x16xf32, #tpu.memory_space<vmem>>, vector<1x16x16x16xf32>
    %1 = vector.shape_cast %0 : vector<1x16x16x16xf32> to vector<16x16x16xf32>
    %2 = arith.truncf %1 : vector<16x16x16xf32> to vector<16x16x16xbf16>
    %cst = arith.constant 0.000000e+00 : bf16
    %3 = vector.broadcast %cst : bf16 to vector<1x16x16xbf16>
    %c0_3 = arith.constant 0 : index
    %c0_4 = arith.constant 0 : index
    %c0_5 = arith.constant 0 : index
    %c0_6 = arith.constant 0 : index
    %4 = vector.load %arg9[%c0_3, %c0_4, %c0_5, %c0_6] : memref<3x18x16x16xbf16, #tpu.memory_space<vmem>>, vector<1x1x16x16xbf16>
    %5 = vector.shape_cast %4 : vector<1x1x16x16xbf16> to vector<1x16x16xbf16>
    %6 = vector.shape_cast %3 : vector<1x16x16xbf16> to vector<1x1x16x16xbf16>
    tpu.vector_store %arg9[%c0_3, %c0_4, %c0_5, %c0_6], %6 {strides = array<i32>} : memref<3x18x16x16xbf16, #tpu.memory_space<vmem>>, vector<1x1x16x16xbf16>,
    %c0_7 = arith.constant 0 : index
    %c17 = arith.constant 17 : index
    %c0_8 = arith.constant 0 : index
    %c0_9 = arith.constant 0 : index
    %7 = vector.load %arg9[%c0_7, %c17, %c0_8, %c0_9] : memref<3x18x16x16xbf16, #tpu.memory_space<vmem>>, vector<1x1x16x16xbf16>
    %8 = vector.shape_cast %7 : vector<1x1x16x16xbf16> to vector<1x16x16xbf16>
    %9 = vector.shape_cast %3 : vector<1x16x16xbf16> to vector<1x1x16x16xbf16>
    tpu.vector_store %arg9[%c0_7, %c17, %c0_8, %c0_9], %9 {strides = array<i32>} : memref<3x18x16x16xbf16, #tpu.memory_space<vmem>>, vector<1x1x16x16xbf16>,
    %c1 = arith.constant 1 : index
    %c0_10 = arith.constant 0 : index
    %c0_11 = arith.constant 0 : index
    %c0_12 = arith.constant 0 : index
    %10 = vector.load %arg9[%c1, %c0_10, %c0_11, %c0_12] : memref<3x18x16x16xbf16, #tpu.memory_space<vmem>>, vector<1x1x16x16xbf16>
    %11 = vector.shape_cast %10 : vector<1x1x16x16xbf16> to vector<1x16x16xbf16>
    %12 = vector.shape_cast %3 : vector<1x16x16xbf16> to vector<1x1x16x16xbf16>
    tpu.vector_store %arg9[%c1, %c0_10, %c0_11, %c0_12], %12 {strides = array<i32>} : memref<3x18x16x16xbf16, #tpu.memory_space<vmem>>, vector<1x1x16x16xbf16>,
    %c1_13 = arith.constant 1 : index
    %c17_14 = arith.constant 17 : index
    %c0_15 = arith.constant 0 : index
    %c0_16 = arith.constant 0 : index
    %13 = vector.load %arg9[%c1_13, %c17_14, %c0_15, %c0_16] : memref<3x18x16x16xbf16, #tpu.memory_space<vmem>>, vector<1x1x16x16xbf16>
    %14 = vector.shape_cast %13 : vector<1x1x16x16xbf16> to vector<1x16x16xbf16>
    %15 = vector.shape_cast %3 : vector<1x16x16xbf16> to vector<1x1x16x16xbf16>
    tpu.vector_store %arg9[%c1_13, %c17_14, %c0_15, %c0_16], %15 {strides = array<i32>} : memref<3x18x16x16xbf16, #tpu.memory_space<vmem>>, vector<1x1x16x16xbf16>,
    %c2 = arith.constant 2 : index
    %c0_17 = arith.constant 0 : index
    %c0_18 = arith.constant 0 : index
    %c0_19 = arith.constant 0 : index
    %16 = vector.load %arg9[%c2, %c0_17, %c0_18, %c0_19] : memref<3x18x16x16xbf16, #tpu.memory_space<vmem>>, vector<1x1x16x16xbf16>
    %17 = vector.shape_cast %16 : vector<1x1x16x16xbf16> to vector<1x16x16xbf16>
    %18 = vector.shape_cast %3 : vector<1x16x16xbf16> to vector<1x1x16x16xbf16>
    tpu.vector_store %arg9[%c2, %c0_17, %c0_18, %c0_19], %18 {strides = array<i32>} : memref<3x18x16x16xbf16, #tpu.memory_space<vmem>>, vector<1x1x16x16xbf16>,
    %c2_20 = arith.constant 2 : index
    %c17_21 = arith.constant 17 : index
    %c0_22 = arith.constant 0 : index
    %c0_23 = arith.constant 0 : index
    %19 = vector.load %arg9[%c2_20, %c17_21, %c0_22, %c0_23] : memref<3x18x16x16xbf16, #tpu.memory_space<vmem>>, vector<1x1x16x16xbf16>
    %20 = vector.shape_cast %19 : vector<1x1x16x16xbf16> to vector<1x16x16xbf16>
    %21 = vector.shape_cast %3 : vector<1x16x16xbf16> to vector<1x1x16x16xbf16>
    tpu.vector_store %arg9[%c2_20, %c17_21, %c0_22, %c0_23], %21 {strides = array<i32>} : memref<3x18x16x16xbf16, #tpu.memory_space<vmem>>, vector<1x1x16x16xbf16>,
    %cst_24 = arith.constant 0.000000e+00 : bf16
    %22 = vector.broadcast %cst_24 : bf16 to vector<18x1x16xbf16>
    %c0_25 = arith.constant 0 : index
    %c0_26 = arith.constant 0 : index
    %c0_27 = arith.constant 0 : index
    %c0_28 = arith.constant 0 : index
    %23 = vector.load %arg9[%c0_25, %c0_26, %c0_27, %c0_28] : memref<3x18x16x16xbf16, #tpu.memory_space<vmem>>, vector<1x18x1x16xbf16>
    %24 = vector.shape_cast %23 : vector<1x18x1x16xbf16> to vector<18x1x16xbf16>
    %25 = vector.shape_cast %22 : vector<18x1x16xbf16> to vector<1x18x1x16xbf16>
    tpu.vector_store %arg9[%c0_25, %c0_26, %c0_27, %c0_28], %25 {strides = array<i32>} : memref<3x18x16x16xbf16, #tpu.memory_space<vmem>>, vector<1x18x1x16xbf16>,
    %c2_29 = arith.constant 2 : index
    %c0_30 = arith.constant 0 : index
    %c15 = arith.constant 15 : index
    %c0_31 = arith.constant 0 : index
    %26 = vector.load %arg9[%c2_29, %c0_30, %c15, %c0_31] : memref<3x18x16x16xbf16, #tpu.memory_space<vmem>>, vector<1x18x1x16xbf16>
    %27 = vector.shape_cast %26 : vector<1x18x1x16xbf16> to vector<18x1x16xbf16>
    %28 = vector.shape_cast %22 : vector<18x1x16xbf16> to vector<1x18x1x16xbf16>
    tpu.vector_store %arg9[%c2_29, %c0_30, %c15, %c0_31], %28 {strides = array<i32>} : memref<3x18x16x16xbf16, #tpu.memory_space<vmem>>, vector<1x18x1x16xbf16>,
    %c1_32 = arith.constant 1 : index
    %c1_33 = arith.constant 1 : index
    %c0_34 = arith.constant 0 : index
    %c0_35 = arith.constant 0 : index
    %29 = vector.load %arg9[%c1_32, %c1_33, %c0_34, %c0_35] : memref<3x18x16x16xbf16, #tpu.memory_space<vmem>>, vector<1x16x16x16xbf16>
    %30 = vector.shape_cast %29 : vector<1x16x16x16xbf16> to vector<16x16x16xbf16>
    %31 = vector.shape_cast %2 : vector<16x16x16xbf16> to vector<1x16x16x16xbf16>
    tpu.vector_store %arg9[%c1_32, %c1_33, %c0_34, %c0_35], %31 {strides = array<i32>} : memref<3x18x16x16xbf16, #tpu.memory_space<vmem>>, vector<1x16x16x16xbf16>,
    %32 = vector.extract_strided_slice %2 {offsets = [0, 0, 0], sizes = [16, 15, 16], strides = [1, 1, 1]} : vector<16x16x16xbf16> to vector<16x15x16xbf16>
    %c0_36 = arith.constant 0 : index
    %c1_37 = arith.constant 1 : index
    %c1_38 = arith.constant 1 : index
    %c0_39 = arith.constant 0 : index
    %33 = vector.load %arg9[%c0_36, %c1_37, %c1_38, %c0_39] : memref<3x18x16x16xbf16, #tpu.memory_space<vmem>>, vector<1x16x15x16xbf16>
    %34 = vector.shape_cast %33 : vector<1x16x15x16xbf16> to vector<16x15x16xbf16>
    %35 = vector.shape_cast %32 : vector<16x15x16xbf16> to vector<1x16x15x16xbf16>
    tpu.vector_store %arg9[%c0_36, %c1_37, %c1_38, %c0_39], %35 {strides = array<i32>} : memref<3x18x16x16xbf16, #tpu.memory_space<vmem>>, vector<1x16x15x16xbf16>,
    %36 = vector.extract_strided_slice %2 {offsets = [0, 1, 0], sizes = [16, 15, 16], strides = [1, 1, 1]} : vector<16x16x16xbf16> to vector<16x15x16xbf16>
    %c2_40 = arith.constant 2 : index
    %c1_41 = arith.constant 1 : index
    %c0_42 = arith.constant 0 : index
    %c0_43 = arith.constant 0 : index
    %37 = vector.load %arg9[%c2_40, %c1_41, %c0_42, %c0_43] : memref<3x18x16x16xbf16, #tpu.memory_space<vmem>>, vector<1x16x15x16xbf16>
    %38 = vector.shape_cast %37 : vector<1x16x15x16xbf16> to vector<16x15x16xbf16>
    %39 = vector.shape_cast %36 : vector<16x15x16xbf16> to vector<1x16x15x16xbf16>
    tpu.vector_store %arg9[%c2_40, %c1_41, %c0_42, %c0_43], %39 {strides = array<i32>} : memref<3x18x16x16xbf16, #tpu.memory_space<vmem>>, vector<1x16x15x16xbf16>,
    %cst_44 = arith.constant 0.000000e+00 : f32
    %40 = vector.broadcast %cst_44 : f32 to vector<256x128xf32>
    %c0_45 = arith.constant 0 : index
    %c0_46 = arith.constant 0 : index
    %c0_47 = arith.constant 0 : index
    %c0_48 = arith.constant 0 : index
    %41 = vector.load %arg9[%c0_45, %c0_46, %c0_47, %c0_48] : memref<3x18x16x16xbf16, #tpu.memory_space<vmem>>, vector<1x16x16x16xbf16>
    %42 = vector.shape_cast %41 : vector<1x16x16x16xbf16> to vector<16x16x16xbf16>
    %43 = vector.shape_cast %42 : vector<16x16x16xbf16> to vector<256x16xbf16>
    %c0_49 = arith.constant 0 : index
    %c0_50 = arith.constant 0 : index
    %44 = vector.load %arg2[%c0_49, %c0_50] : memref<144x128xbf16, #tpu.memory_space<vmem>>, vector<16x128xbf16>
    %cst_51 = arith.constant dense<0.000000e+00> : vector<256x128xf32>
    %45 = tpu.matmul %43, %44, %cst_51 {dimension_numbers = #tpu.dot_dimension_numbers<[1], [0], [0], [1], [0, 0, 1, 1], [], []>} : vector<256x16xbf16>, vector<16x128xbf16>, vector<256x128xf32> -> vector<256x128xf32>
    %46 = arith.addf %40, %45 : vector<256x128xf32>
    %c1_52 = arith.constant 1 : index
    %c0_53 = arith.constant 0 : index
    %c0_54 = arith.constant 0 : index
    %c0_55 = arith.constant 0 : index
    %47 = vector.load %arg9[%c1_52, %c0_53, %c0_54, %c0_55] : memref<3x18x16x16xbf16, #tpu.memory_space<vmem>>, vector<1x16x16x16xbf16>
    %48 = vector.shape_cast %47 : vector<1x16x16x16xbf16> to vector<16x16x16xbf16>
    %49 = vector.shape_cast %48 : vector<16x16x16xbf16> to vector<256x16xbf16>
    %c16 = arith.constant 16 : index
    %c0_56 = arith.constant 0 : index
    %50 = vector.load %arg2[%c16, %c0_56] : memref<144x128xbf16, #tpu.memory_space<vmem>>, vector<16x128xbf16>
    %cst_57 = arith.constant dense<0.000000e+00> : vector<256x128xf32>
    %51 = tpu.matmul %49, %50, %cst_57 {dimension_numbers = #tpu.dot_dimension_numbers<[1], [0], [0], [1], [0, 0, 1, 1], [], []>} : vector<256x16xbf16>, vector<16x128xbf16>, vector<256x128xf32> -> vector<256x128xf32>
    %52 = arith.addf %46, %51 : vector<256x128xf32>
    %c2_58 = arith.constant 2 : index
    %c0_59 = arith.constant 0 : index
    %c0_60 = arith.constant 0 : index
    %c0_61 = arith.constant 0 : index
    %53 = vector.load %arg9[%c2_58, %c0_59, %c0_60, %c0_61] : memref<3x18x16x16xbf16, #tpu.memory_space<vmem>>, vector<1x16x16x16xbf16>
    %54 = vector.shape_cast %53 : vector<1x16x16x16xbf16> to vector<16x16x16xbf16>
    %55 = vector.shape_cast %54 : vector<16x16x16xbf16> to vector<256x16xbf16>
    %c32 = arith.constant 32 : index
    %c0_62 = arith.constant 0 : index
    %56 = vector.load %arg2[%c32, %c0_62] : memref<144x128xbf16, #tpu.memory_space<vmem>>, vector<16x128xbf16>
    %cst_63 = arith.constant dense<0.000000e+00> : vector<256x128xf32>
    %57 = tpu.matmul %55, %56, %cst_63 {dimension_numbers = #tpu.dot_dimension_numbers<[1], [0], [0], [1], [0, 0, 1, 1], [], []>} : vector<256x16xbf16>, vector<16x128xbf16>, vector<256x128xf32> -> vector<256x128xf32>
    %58 = arith.addf %52, %57 : vector<256x128xf32>
    %c0_64 = arith.constant 0 : index
    %c1_65 = arith.constant 1 : index
    %c0_66 = arith.constant 0 : index
    %c0_67 = arith.constant 0 : index
    %59 = vector.load %arg9[%c0_64, %c1_65, %c0_66, %c0_67] : memref<3x18x16x16xbf16, #tpu.memory_space<vmem>>, vector<1x16x16x16xbf16>
    %60 = vector.shape_cast %59 : vector<1x16x16x16xbf16> to vector<16x16x16xbf16>
    %61 = vector.shape_cast %60 : vector<16x16x16xbf16> to vector<256x16xbf16>
    %c48 = arith.constant 48 : index
    %c0_68 = arith.constant 0 : index
    %62 = vector.load %arg2[%c48, %c0_68] : memref<144x128xbf16, #tpu.memory_space<vmem>>, vector<16x128xbf16>
    %cst_69 = arith.constant dense<0.000000e+00> : vector<256x128xf32>
    %63 = tpu.matmul %61, %62, %cst_69 {dimension_numbers = #tpu.dot_dimension_numbers<[1], [0], [0], [1], [0, 0, 1, 1], [], []>} : vector<256x16xbf16>, vector<16x128xbf16>, vector<256x128xf32> -> vector<256x128xf32>
    %64 = arith.addf %58, %63 : vector<256x128xf32>
    %c1_70 = arith.constant 1 : index
    %c1_71 = arith.constant 1 : index
    %c0_72 = arith.constant 0 : index
    %c0_73 = arith.constant 0 : index
    %65 = vector.load %arg9[%c1_70, %c1_71, %c0_72, %c0_73] : memref<3x18x16x16xbf16, #tpu.memory_space<vmem>>, vector<1x16x16x16xbf16>
    %66 = vector.shape_cast %65 : vector<1x16x16x16xbf16> to vector<16x16x16xbf16>
    %67 = vector.shape_cast %66 : vector<16x16x16xbf16> to vector<256x16xbf16>
    %c64 = arith.constant 64 : index
    %c0_74 = arith.constant 0 : index
    %68 = vector.load %arg2[%c64, %c0_74] : memref<144x128xbf16, #tpu.memory_space<vmem>>, vector<16x128xbf16>
    %cst_75 = arith.constant dense<0.000000e+00> : vector<256x128xf32>
    %69 = tpu.matmul %67, %68, %cst_75 {dimension_numbers = #tpu.dot_dimension_numbers<[1], [0], [0], [1], [0, 0, 1, 1], [], []>} : vector<256x16xbf16>, vector<16x128xbf16>, vector<256x128xf32> -> vector<256x128xf32>
    %70 = arith.addf %64, %69 : vector<256x128xf32>
    %c2_76 = arith.constant 2 : index
    %c1_77 = arith.constant 1 : index
    %c0_78 = arith.constant 0 : index
    %c0_79 = arith.constant 0 : index
    %71 = vector.load %arg9[%c2_76, %c1_77, %c0_78, %c0_79] : memref<3x18x16x16xbf16, #tpu.memory_space<vmem>>, vector<1x16x16x16xbf16>
    %72 = vector.shape_cast %71 : vector<1x16x16x16xbf16> to vector<16x16x16xbf16>
    %73 = vector.shape_cast %72 : vector<16x16x16xbf16> to vector<256x16xbf16>
    %c80 = arith.constant 80 : index
    %c0_80 = arith.constant 0 : index
    %74 = vector.load %arg2[%c80, %c0_80] : memref<144x128xbf16, #tpu.memory_space<vmem>>, vector<16x128xbf16>
    %cst_81 = arith.constant dense<0.000000e+00> : vector<256x128xf32>
    %75 = tpu.matmul %73, %74, %cst_81 {dimension_numbers = #tpu.dot_dimension_numbers<[1], [0], [0], [1], [0, 0, 1, 1], [], []>} : vector<256x16xbf16>, vector<16x128xbf16>, vector<256x128xf32> -> vector<256x128xf32>
    %76 = arith.addf %70, %75 : vector<256x128xf32>
    %c0_82 = arith.constant 0 : index
    %c2_83 = arith.constant 2 : index
    %c0_84 = arith.constant 0 : index
    %c0_85 = arith.constant 0 : index
    %77 = vector.load %arg9[%c0_82, %c2_83, %c0_84, %c0_85] : memref<3x18x16x16xbf16, #tpu.memory_space<vmem>>, vector<1x16x16x16xbf16>
    %78 = vector.shape_cast %77 : vector<1x16x16x16xbf16> to vector<16x16x16xbf16>
    %79 = vector.shape_cast %78 : vector<16x16x16xbf16> to vector<256x16xbf16>
    %c96 = arith.constant 96 : index
    %c0_86 = arith.constant 0 : index
    %80 = vector.load %arg2[%c96, %c0_86] : memref<144x128xbf16, #tpu.memory_space<vmem>>, vector<16x128xbf16>
    %cst_87 = arith.constant dense<0.000000e+00> : vector<256x128xf32>
    %81 = tpu.matmul %79, %80, %cst_87 {dimension_numbers = #tpu.dot_dimension_numbers<[1], [0], [0], [1], [0, 0, 1, 1], [], []>} : vector<256x16xbf16>, vector<16x128xbf16>, vector<256x128xf32> -> vector<256x128xf32>
    %82 = arith.addf %76, %81 : vector<256x128xf32>
    %c1_88 = arith.constant 1 : index
    %c2_89 = arith.constant 2 : index
    %c0_90 = arith.constant 0 : index
    %c0_91 = arith.constant 0 : index
    %83 = vector.load %arg9[%c1_88, %c2_89, %c0_90, %c0_91] : memref<3x18x16x16xbf16, #tpu.memory_space<vmem>>, vector<1x16x16x16xbf16>
    %84 = vector.shape_cast %83 : vector<1x16x16x16xbf16> to vector<16x16x16xbf16>
    %85 = vector.shape_cast %84 : vector<16x16x16xbf16> to vector<256x16xbf16>
    %c112 = arith.constant 112 : index
    %c0_92 = arith.constant 0 : index
    %86 = vector.load %arg2[%c112, %c0_92] : memref<144x128xbf16, #tpu.memory_space<vmem>>, vector<16x128xbf16>
    %cst_93 = arith.constant dense<0.000000e+00> : vector<256x128xf32>
    %87 = tpu.matmul %85, %86, %cst_93 {dimension_numbers = #tpu.dot_dimension_numbers<[1], [0], [0], [1], [0, 0, 1, 1], [], []>} : vector<256x16xbf16>, vector<16x128xbf16>, vector<256x128xf32> -> vector<256x128xf32>
    %88 = arith.addf %82, %87 : vector<256x128xf32>
    %c2_94 = arith.constant 2 : index
    %c2_95 = arith.constant 2 : index
    %c0_96 = arith.constant 0 : index
    %c0_97 = arith.constant 0 : index
    %89 = vector.load %arg9[%c2_94, %c2_95, %c0_96, %c0_97] : memref<3x18x16x16xbf16, #tpu.memory_space<vmem>>, vector<1x16x16x16xbf16>
    %90 = vector.shape_cast %89 : vector<1x16x16x16xbf16> to vector<16x16x16xbf16>
    %91 = vector.shape_cast %90 : vector<16x16x16xbf16> to vector<256x16xbf16>
    %c128 = arith.constant 128 : index
    %c0_98 = arith.constant 0 : index
    %92 = vector.load %arg2[%c128, %c0_98] : memref<144x128xbf16, #tpu.memory_space<vmem>>, vector<16x128xbf16>
    %cst_99 = arith.constant dense<0.000000e+00> : vector<256x128xf32>
    %93 = tpu.matmul %91, %92, %cst_99 {dimension_numbers = #tpu.dot_dimension_numbers<[1], [0], [0], [1], [0, 0, 1, 1], [], []>} : vector<256x16xbf16>, vector<16x128xbf16>, vector<256x128xf32> -> vector<256x128xf32>
    %94 = arith.addf %88, %93 : vector<256x128xf32>
    %c0_100 = arith.constant 0 : index
    %c0_101 = arith.constant 0 : index
    %95 = vector.load %arg3[%c0_100, %c0_101] : memref<1x128xf32, #tpu.memory_space<vmem>>, vector<1x128xf32>
    %96 = vector.broadcast %95 : vector<1x128xf32> to vector<256x128xf32>
    %97 = arith.addf %94, %96 : vector<256x128xf32>
    %cst_102 = arith.constant 0.000000e+00 : f32
    %98 = vector.broadcast %cst_102 : f32 to vector<256x128xf32>
    %99 = arith.maximumf %97, %98 : vector<256x128xf32>
    %100 = vector.shape_cast %99 : vector<256x128xf32> to vector<16x16x128xf32>
    %101 = arith.truncf %100 : vector<16x16x128xf32> to vector<16x16x128xbf16>
    %cst_103 = arith.constant 0.000000e+00 : bf16
    %102 = vector.broadcast %cst_103 : bf16 to vector<1x16x128xbf16>
    %c0_104 = arith.constant 0 : index
    %c0_105 = arith.constant 0 : index
    %c0_106 = arith.constant 0 : index
    %c0_107 = arith.constant 0 : index
    %103 = vector.load %arg10[%c0_104, %c0_105, %c0_106, %c0_107] : memref<3x18x16x128xbf16, #tpu.memory_space<vmem>>, vector<1x1x16x128xbf16>
    %104 = vector.shape_cast %103 : vector<1x1x16x128xbf16> to vector<1x16x128xbf16>
    %105 = vector.shape_cast %102 : vector<1x16x128xbf16> to vector<1x1x16x128xbf16>
    tpu.vector_store %arg10[%c0_104, %c0_105, %c0_106, %c0_107], %105 {strides = array<i32>} : memref<3x18x16x128xbf16, #tpu.memory_space<vmem>>, vector<1x1x16x128xbf16>,
    %c0_108 = arith.constant 0 : index
    %c17_109 = arith.constant 17 : index
    %c0_110 = arith.constant 0 : index
    %c0_111 = arith.constant 0 : index
    %106 = vector.load %arg10[%c0_108, %c17_109, %c0_110, %c0_111] : memref<3x18x16x128xbf16, #tpu.memory_space<vmem>>, vector<1x1x16x128xbf16>
    %107 = vector.shape_cast %106 : vector<1x1x16x128xbf16> to vector<1x16x128xbf16>
    %108 = vector.shape_cast %102 : vector<1x16x128xbf16> to vector<1x1x16x128xbf16>
    tpu.vector_store %arg10[%c0_108, %c17_109, %c0_110, %c0_111], %108 {strides = array<i32>} : memref<3x18x16x128xbf16, #tpu.memory_space<vmem>>, vector<1x1x16x128xbf16>,
    %c1_112 = arith.constant 1 : index
    %c0_113 = arith.constant 0 : index
    %c0_114 = arith.constant 0 : index
    %c0_115 = arith.constant 0 : index
    %109 = vector.load %arg10[%c1_112, %c0_113, %c0_114, %c0_115] : memref<3x18x16x128xbf16, #tpu.memory_space<vmem>>, vector<1x1x16x128xbf16>
    %110 = vector.shape_cast %109 : vector<1x1x16x128xbf16> to vector<1x16x128xbf16>
    %111 = vector.shape_cast %102 : vector<1x16x128xbf16> to vector<1x1x16x128xbf16>
    tpu.vector_store %arg10[%c1_112, %c0_113, %c0_114, %c0_115], %111 {strides = array<i32>} : memref<3x18x16x128xbf16, #tpu.memory_space<vmem>>, vector<1x1x16x128xbf16>,
    %c1_116 = arith.constant 1 : index
    %c17_117 = arith.constant 17 : index
    %c0_118 = arith.constant 0 : index
    %c0_119 = arith.constant 0 : index
    %112 = vector.load %arg10[%c1_116, %c17_117, %c0_118, %c0_119] : memref<3x18x16x128xbf16, #tpu.memory_space<vmem>>, vector<1x1x16x128xbf16>
    %113 = vector.shape_cast %112 : vector<1x1x16x128xbf16> to vector<1x16x128xbf16>
    %114 = vector.shape_cast %102 : vector<1x16x128xbf16> to vector<1x1x16x128xbf16>
    tpu.vector_store %arg10[%c1_116, %c17_117, %c0_118, %c0_119], %114 {strides = array<i32>} : memref<3x18x16x128xbf16, #tpu.memory_space<vmem>>, vector<1x1x16x128xbf16>,
    %c2_120 = arith.constant 2 : index
    %c0_121 = arith.constant 0 : index
    %c0_122 = arith.constant 0 : index
    %c0_123 = arith.constant 0 : index
    %115 = vector.load %arg10[%c2_120, %c0_121, %c0_122, %c0_123] : memref<3x18x16x128xbf16, #tpu.memory_space<vmem>>, vector<1x1x16x128xbf16>
    %116 = vector.shape_cast %115 : vector<1x1x16x128xbf16> to vector<1x16x128xbf16>
    %117 = vector.shape_cast %102 : vector<1x16x128xbf16> to vector<1x1x16x128xbf16>
    tpu.vector_store %arg10[%c2_120, %c0_121, %c0_122, %c0_123], %117 {strides = array<i32>} : memref<3x18x16x128xbf16, #tpu.memory_space<vmem>>, vector<1x1x16x128xbf16>,
    %c2_124 = arith.constant 2 : index
    %c17_125 = arith.constant 17 : index
    %c0_126 = arith.constant 0 : index
    %c0_127 = arith.constant 0 : index
    %118 = vector.load %arg10[%c2_124, %c17_125, %c0_126, %c0_127] : memref<3x18x16x128xbf16, #tpu.memory_space<vmem>>, vector<1x1x16x128xbf16>
    %119 = vector.shape_cast %118 : vector<1x1x16x128xbf16> to vector<1x16x128xbf16>
    %120 = vector.shape_cast %102 : vector<1x16x128xbf16> to vector<1x1x16x128xbf16>
    tpu.vector_store %arg10[%c2_124, %c17_125, %c0_126, %c0_127], %120 {strides = array<i32>} : memref<3x18x16x128xbf16, #tpu.memory_space<vmem>>, vector<1x1x16x128xbf16>,
    %cst_128 = arith.constant 0.000000e+00 : bf16
    %121 = vector.broadcast %cst_128 : bf16 to vector<18x1x128xbf16>
    %c0_129 = arith.constant 0 : index
    %c0_130 = arith.constant 0 : index
    %c0_131 = arith.constant 0 : index
    %c0_132 = arith.constant 0 : index
    %122 = vector.load %arg10[%c0_129, %c0_130, %c0_131, %c0_132] : memref<3x18x16x128xbf16, #tpu.memory_space<vmem>>, vector<1x18x1x128xbf16>
    %123 = vector.shape_cast %122 : vector<1x18x1x128xbf16> to vector<18x1x128xbf16>
    %124 = vector.shape_cast %121 : vector<18x1x128xbf16> to vector<1x18x1x128xbf16>
    tpu.vector_store %arg10[%c0_129, %c0_130, %c0_131, %c0_132], %124 {strides = array<i32>} : memref<3x18x16x128xbf16, #tpu.memory_space<vmem>>, vector<1x18x1x128xbf16>,
    %c2_133 = arith.constant 2 : index
    %c0_134 = arith.constant 0 : index
    %c15_135 = arith.constant 15 : index
    %c0_136 = arith.constant 0 : index
    %125 = vector.load %arg10[%c2_133, %c0_134, %c15_135, %c0_136] : memref<3x18x16x128xbf16, #tpu.memory_space<vmem>>, vector<1x18x1x128xbf16>
    %126 = vector.shape_cast %125 : vector<1x18x1x128xbf16> to vector<18x1x128xbf16>
    %127 = vector.shape_cast %121 : vector<18x1x128xbf16> to vector<1x18x1x128xbf16>
    tpu.vector_store %arg10[%c2_133, %c0_134, %c15_135, %c0_136], %127 {strides = array<i32>} : memref<3x18x16x128xbf16, #tpu.memory_space<vmem>>, vector<1x18x1x128xbf16>,
    %c1_137 = arith.constant 1 : index
    %c1_138 = arith.constant 1 : index
    %c0_139 = arith.constant 0 : index
    %c0_140 = arith.constant 0 : index
    %128 = vector.load %arg10[%c1_137, %c1_138, %c0_139, %c0_140] : memref<3x18x16x128xbf16, #tpu.memory_space<vmem>>, vector<1x16x16x128xbf16>
    %129 = vector.shape_cast %128 : vector<1x16x16x128xbf16> to vector<16x16x128xbf16>
    %130 = vector.shape_cast %101 : vector<16x16x128xbf16> to vector<1x16x16x128xbf16>
    tpu.vector_store %arg10[%c1_137, %c1_138, %c0_139, %c0_140], %130 {strides = array<i32>} : memref<3x18x16x128xbf16, #tpu.memory_space<vmem>>, vector<1x16x16x128xbf16>,
    %131 = vector.extract_strided_slice %101 {offsets = [0, 0, 0], sizes = [16, 15, 128], strides = [1, 1, 1]} : vector<16x16x128xbf16> to vector<16x15x128xbf16>
    %c0_141 = arith.constant 0 : index
    %c1_142 = arith.constant 1 : index
    %c1_143 = arith.constant 1 : index
    %c0_144 = arith.constant 0 : index
    %132 = vector.load %arg10[%c0_141, %c1_142, %c1_143, %c0_144] : memref<3x18x16x128xbf16, #tpu.memory_space<vmem>>, vector<1x16x15x128xbf16>
    %133 = vector.shape_cast %132 : vector<1x16x15x128xbf16> to vector<16x15x128xbf16>
    %134 = vector.shape_cast %131 : vector<16x15x128xbf16> to vector<1x16x15x128xbf16>
    tpu.vector_store %arg10[%c0_141, %c1_142, %c1_143, %c0_144], %134 {strides = array<i32>} : memref<3x18x16x128xbf16, #tpu.memory_space<vmem>>, vector<1x16x15x128xbf16>,
    %135 = vector.extract_strided_slice %101 {offsets = [0, 1, 0], sizes = [16, 15, 128], strides = [1, 1, 1]} : vector<16x16x128xbf16> to vector<16x15x128xbf16>
    %c2_145 = arith.constant 2 : index
    %c1_146 = arith.constant 1 : index
    %c0_147 = arith.constant 0 : index
    %c0_148 = arith.constant 0 : index
    %136 = vector.load %arg10[%c2_145, %c1_146, %c0_147, %c0_148] : memref<3x18x16x128xbf16, #tpu.memory_space<vmem>>, vector<1x16x15x128xbf16>
    %137 = vector.shape_cast %136 : vector<1x16x15x128xbf16> to vector<16x15x128xbf16>
    %138 = vector.shape_cast %135 : vector<16x15x128xbf16> to vector<1x16x15x128xbf16>
    tpu.vector_store %arg10[%c2_145, %c1_146, %c0_147, %c0_148], %138 {strides = array<i32>} : memref<3x18x16x128xbf16, #tpu.memory_space<vmem>>, vector<1x16x15x128xbf16>,
    %c0_149 = arith.constant 0 : index
    %c0_150 = arith.constant 0 : index
    %c0_151 = arith.constant 0 : index
    %c0_152 = arith.constant 0 : index
    %139 = vector.load %arg10[%c0_149, %c0_150, %c0_151, %c0_152] : memref<3x18x16x128xbf16, #tpu.memory_space<vmem>>, vector<1x16x16x128xbf16>
    %140 = vector.shape_cast %139 : vector<1x16x16x128xbf16> to vector<16x16x128xbf16>
    %c1_153 = arith.constant 1 : index
    %c0_154 = arith.constant 0 : index
    %c0_155 = arith.constant 0 : index
    %c0_156 = arith.constant 0 : index
    %141 = vector.load %arg10[%c1_153, %c0_154, %c0_155, %c0_156] : memref<3x18x16x128xbf16, #tpu.memory_space<vmem>>, vector<1x16x16x128xbf16>
    %142 = vector.shape_cast %141 : vector<1x16x16x128xbf16> to vector<16x16x128xbf16>
    %c2_157 = arith.constant 2 : index
    %c0_158 = arith.constant 0 : index
    %c0_159 = arith.constant 0 : index
    %c0_160 = arith.constant 0 : index
    %143 = vector.load %arg10[%c2_157, %c0_158, %c0_159, %c0_160] : memref<3x18x16x128xbf16, #tpu.memory_space<vmem>>, vector<1x16x16x128xbf16>
    %144 = vector.shape_cast %143 : vector<1x16x16x128xbf16> to vector<16x16x128xbf16>
    %c0_161 = arith.constant 0 : index
    %c1_162 = arith.constant 1 : index
    %c0_163 = arith.constant 0 : index
    %c0_164 = arith.constant 0 : index
    %145 = vector.load %arg10[%c0_161, %c1_162, %c0_163, %c0_164] : memref<3x18x16x128xbf16, #tpu.memory_space<vmem>>, vector<1x16x16x128xbf16>
    %146 = vector.shape_cast %145 : vector<1x16x16x128xbf16> to vector<16x16x128xbf16>
    %c1_165 = arith.constant 1 : index
    %c1_166 = arith.constant 1 : index
    %c0_167 = arith.constant 0 : index
    %c0_168 = arith.constant 0 : index
    %147 = vector.load %arg10[%c1_165, %c1_166, %c0_167, %c0_168] : memref<3x18x16x128xbf16, #tpu.memory_space<vmem>>, vector<1x16x16x128xbf16>
    %148 = vector.shape_cast %147 : vector<1x16x16x128xbf16> to vector<16x16x128xbf16>
    %c2_169 = arith.constant 2 : index
    %c1_170 = arith.constant 1 : index
    %c0_171 = arith.constant 0 : index
    %c0_172 = arith.constant 0 : index
    %149 = vector.load %arg10[%c2_169, %c1_170, %c0_171, %c0_172] : memref<3x18x16x128xbf16, #tpu.memory_space<vmem>>, vector<1x16x16x128xbf16>
    %150 = vector.shape_cast %149 : vector<1x16x16x128xbf16> to vector<16x16x128xbf16>
    %c0_173 = arith.constant 0 : index
    %c2_174 = arith.constant 2 : index
    %c0_175 = arith.constant 0 : index
    %c0_176 = arith.constant 0 : index
    %151 = vector.load %arg10[%c0_173, %c2_174, %c0_175, %c0_176] : memref<3x18x16x128xbf16, #tpu.memory_space<vmem>>, vector<1x16x16x128xbf16>
    %152 = vector.shape_cast %151 : vector<1x16x16x128xbf16> to vector<16x16x128xbf16>
    %c1_177 = arith.constant 1 : index
    %c2_178 = arith.constant 2 : index
    %c0_179 = arith.constant 0 : index
    %c0_180 = arith.constant 0 : index
    %153 = vector.load %arg10[%c1_177, %c2_178, %c0_179, %c0_180] : memref<3x18x16x128xbf16, #tpu.memory_space<vmem>>, vector<1x16x16x128xbf16>
    %154 = vector.shape_cast %153 : vector<1x16x16x128xbf16> to vector<16x16x128xbf16>
    %c2_181 = arith.constant 2 : index
    %c2_182 = arith.constant 2 : index
    %c0_183 = arith.constant 0 : index
    %c0_184 = arith.constant 0 : index
    %155 = vector.load %arg10[%c2_181, %c2_182, %c0_183, %c0_184] : memref<3x18x16x128xbf16, #tpu.memory_space<vmem>>, vector<1x16x16x128xbf16>
    %156 = vector.shape_cast %155 : vector<1x16x16x128xbf16> to vector<16x16x128xbf16>
    %157 = tpu.concatenate %140, %142, %144, %146, %148, %150, %152, %154, %156 in 2 : vector<16x16x128xbf16>, vector<16x16x128xbf16>, vector<16x16x128xbf16>, vector<16x16x128xbf16>, vector<16x16x128xbf16>, vector<16x16x128xbf16>, vector<16x16x128xbf16>, vector<16x16x128xbf16>, vector<16x16x128xbf16> -> vector<16x16x1152xbf16>
    %158 = vector.shape_cast %157 : vector<16x16x1152xbf16> to vector<256x1152xbf16>
    %c0_185 = arith.constant 0 : index
    %c0_186 = arith.constant 0 : index
    %159 = vector.load %arg4[%c0_185, %c0_186] : memref<1152x128xbf16, #tpu.memory_space<vmem>>, vector<1152x128xbf16>
    %cst_187 = arith.constant dense<0.000000e+00> : vector<256x128xf32>
    %160 = tpu.matmul %158, %159, %cst_187 {dimension_numbers = #tpu.dot_dimension_numbers<[1], [0], [0], [1], [0, 0, 1, 1], [], []>} : vector<256x1152xbf16>, vector<1152x128xbf16>, vector<256x128xf32> -> vector<256x128xf32>
    %c0_188 = arith.constant 0 : index
    %c0_189 = arith.constant 0 : index
    %161 = vector.load %arg5[%c0_188, %c0_189] : memref<1x128xf32, #tpu.memory_space<vmem>>, vector<1x128xf32>
    %162 = vector.broadcast %161 : vector<1x128xf32> to vector<256x128xf32>
    %163 = arith.addf %160, %162 : vector<256x128xf32>
    %c0_190 = arith.constant 0 : index
    %c0_191 = arith.constant 0 : index
    %c0_192 = arith.constant 0 : index
    %c0_193 = arith.constant 0 : index
    %164 = vector.load %arg1[%c0_190, %c0_191, %c0_192, %c0_193] : memref<1x16x16x16xf32, #tpu.memory_space<vmem>>, vector<1x16x16x16xf32>
    %165 = vector.shape_cast %164 : vector<1x16x16x16xf32> to vector<16x16x16xf32>
    %166 = vector.shape_cast %165 : vector<16x16x16xf32> to vector<256x16xf32>
    %167 = arith.truncf %166 : vector<256x16xf32> to vector<256x16xbf16>
    %c0_194 = arith.constant 0 : index
    %c0_195 = arith.constant 0 : index
    %168 = vector.load %arg6[%c0_194, %c0_195] : memref<16x128xbf16, #tpu.memory_space<vmem>>, vector<16x128xbf16>
    %cst_196 = arith.constant dense<0.000000e+00> : vector<256x128xf32>
    %169 = tpu.matmul %167, %168, %cst_196 {dimension_numbers = #tpu.dot_dimension_numbers<[1], [0], [0], [1], [0, 0, 1, 1], [], []>} : vector<256x16xbf16>, vector<16x128xbf16>, vector<256x128xf32> -> vector<256x128xf32>
    %c0_197 = arith.constant 0 : index
    %c0_198 = arith.constant 0 : index
    %170 = vector.load %arg7[%c0_197, %c0_198] : memref<1x128xf32, #tpu.memory_space<vmem>>, vector<1x128xf32>
    %171 = vector.broadcast %170 : vector<1x128xf32> to vector<256x128xf32>
    %172 = arith.addf %169, %171 : vector<256x128xf32>
    %173 = arith.addf %163, %172 : vector<256x128xf32>
    %cst_199 = arith.constant 0.000000e+00 : f32
    %174 = vector.broadcast %cst_199 : f32 to vector<256x128xf32>
    %175 = arith.maximumf %173, %174 : vector<256x128xf32>
    %176 = vector.shape_cast %175 : vector<256x128xf32> to vector<16x16x128xf32>
    %c0_200 = arith.constant 0 : index
    %c0_201 = arith.constant 0 : index
    %c0_202 = arith.constant 0 : index
    %c0_203 = arith.constant 0 : index
    %177 = vector.load %arg8[%c0_200, %c0_201, %c0_202, %c0_203] : memref<1x16x16x128xf32, #tpu.memory_space<vmem>>, vector<1x16x16x128xf32>
    %178 = vector.shape_cast %177 : vector<1x16x16x128xf32> to vector<16x16x128xf32>
    %179 = vector.shape_cast %176 : vector<16x16x128xf32> to vector<1x16x16x128xf32>
    tpu.vector_store %arg8[%c0_200, %c0_201, %c0_202, %c0_203], %179 {strides = array<i32>} : memref<1x16x16x128xf32, #tpu.memory_space<vmem>>, vector<1x16x16x128xf32>,
    return
  }
  func.func @transform_0(%arg0: i32) -> (i32, i32, i32, i32) {
    %c0_i32 = arith.constant 0 : i32
    %c0_i32_0 = arith.constant 0 : i32
    %c0_i32_1 = arith.constant 0 : i32
    %c0_i32_2 = arith.constant 0 : i32
    return %arg0, %c0_i32, %c0_i32_0, %c0_i32_1 : i32, i32, i32, i32
  }
  func.func @transform_1(%arg0: i32) -> (i32, i32) {
    %c0_i32 = arith.constant 0 : i32
    %c0_i32_0 = arith.constant 0 : i32
    %c0_i32_1 = arith.constant 0 : i32
    return %c0_i32, %c0_i32_0 : i32, i32
  }
  func.func @transform_2(%arg0: i32) -> (i32, i32) {
    %c0_i32 = arith.constant 0 : i32
    %c0_i32_0 = arith.constant 0 : i32
    %c0_i32_1 = arith.constant 0 : i32
    return %c0_i32, %c0_i32_0 : i32, i32
  }
  func.func @transform_3(%arg0: i32) -> (i32, i32) {
    %c0_i32 = arith.constant 0 : i32
    %c0_i32_0 = arith.constant 0 : i32
    %c0_i32_1 = arith.constant 0 : i32
    return %c0_i32, %c0_i32_0 : i32, i32
  }
  func.func @transform_4(%arg0: i32) -> (i32, i32) {
    %c0_i32 = arith.constant 0 : i32
    %c0_i32_0 = arith.constant 0 : i32
    %c0_i32_1 = arith.constant 0 : i32
    return %c0_i32, %c0_i32_0 : i32, i32
  }
  func.func @transform_5(%arg0: i32) -> (i32, i32) {
    %c0_i32 = arith.constant 0 : i32
    %c0_i32_0 = arith.constant 0 : i32
    %c0_i32_1 = arith.constant 0 : i32
    return %c0_i32, %c0_i32_0 : i32, i32
  }
  func.func @transform_6(%arg0: i32) -> (i32, i32) {
    %c0_i32 = arith.constant 0 : i32
    %c0_i32_0 = arith.constant 0 : i32
    %c0_i32_1 = arith.constant 0 : i32
    return %c0_i32, %c0_i32_0 : i32, i32
  }
  func.func @transform_7(%arg0: i32) -> (i32, i32, i32, i32) {
    %c0_i32 = arith.constant 0 : i32
    %c0_i32_0 = arith.constant 0 : i32
    %c0_i32_1 = arith.constant 0 : i32
    %c0_i32_2 = arith.constant 0 : i32
    return %arg0, %c0_i32, %c0_i32_0, %c0_i32_1 : i32, i32, i32, i32
  }
}

</mosaic_0001>

<bundles_post_ra>
// kernel: fwd.3
= control target key start
LH: loop header
LB: loop body
LE: loop exit
PB: predicated region body
PF: predicated region fallthrough
CT: control target
= control target key end

     0   :  { %10 = vsyncpa [#allocation5], 0  ;;  %s7867_s0 = inlined_call_operand.vmem [shape: f32[2,16,16,128], index: 0, kind: input, shape index: {}]   ;;  %s7868_s1 = inlined_call_operand.vmem [shape: bf16[1152,128], index: 1, kind: input, shape index: {}]   ;;  %s7869_s2 = inlined_call_operand.vmem [shape: f32[1,128], index: 2, kind: input, shape index: {}]   ;;  %s7870_s3 = inlined_call_operand.vmem [shape: bf16[1152,128], index: 3, kind: input, shape index: {}]   ;;  %s7871_s4 = inlined_call_operand.vmem [shape: f32[1,128], index: 4, kind: input, shape index: {}]   ;;  %s7872_s5 = inlined_call_operand.hbm [shape: f32[2,16,16,128], index: 5, kind: output, shape index: {}]  }
   0x1   :  { %12 = vsyncpa [#allocation5 + $0x1], 0  ;;  %s5930_s18 = smov 0   ;;  %s5932_s19 = smov 0  }
   0x2   :  { %s5934_s20 = smov 0   ;;  %s5936_s21 = smov 0  }
   0x3 LB: > { %s5951_s22 = sadd.s32 4294967295, %s5894_s21   ;;  %s4425_s23 = sadd.s32 4294967294, %s5894_s21   ;;  %s5894_s21 = sphi %s5936_s21, %s7886_s21   ;;  %s5890_s20 = sphi %s5934_s20, %s7885_s20   ;;  %s5886_s19 = sphi %s5932_s19, %s7884_s19   ;;  %s5882_s18 = sphi %s5930_s18, %s7883_s18  }
   0x4   : > { %s5955_s24 = sadd.s32 1, %s5894_s21   ;;  %s135_s25 = sadd.s32 1, %s5890_s20 }
   0x5   : > { %s132_s26 = ssub.s32 %s5894_s21, %s5955_s24  ;;  %p145_p0 = scmp.ne.s32.totalorder %s5890_s20, %s5886_s19 }
   0x6   : > { %p133_p1 = scmp.eq.s32.totalorder %s132_s26, 0  ;;  %p146_p2 = scmp.eq.s32.totalorder %s5951_s22, 1 }
   0x7   : > { %p151_p3 = scmp.ne.s32.totalorder %s5886_s19, %s5882_s18  ;;  %p152_p4 = scmp.eq.s32.totalorder %s4425_s23, 1 }
   0x8   : > { %s5966_s27 = scalar_select %p133_p1, %s5890_s20, %s135_s25  }
   0x9   : > { %p5968_p5 = por %p146_p2, %p145_p0  ;;  %p5972_p6 = por %p152_p4, %p151_p3 }
   0xa   : > { %p4428_p7 = scmp.ge.s32.totalorder %s5894_s21, 1  ;;  %p190_p8 = scmp.lt.s32.totalorder %s5894_s21, 3 }
   0xc   : > { %p191_p9 = pnand %p4428_p7, %p190_p8 }
   0xd   : > { %v5667_v0 = vld [vmem:[%s7868_s1 + $0x40] sm:$0xff] (!%p191_p9)   ;;  %v5896_v2 = vmov (!%p191_p9), 0   ;;  %v5671_v5 = vld [vmem:[%s7868_s1 + $0x48] sm:$0xff] (!%p191_p9)   ;;  %v5675_v9 = vld [vmem:[%s7868_s1 + $0x50] sm:$0xff] (!%p191_p9)   ;;  %p218_p10 = scmp.lt.s32.totalorder (!%p191_p9), %s5951_s22, 1  ;;  %vm283_vm0 = vcmask (!%p191_p9), 1040384  }
   0xe   : > { %194 = sbr.rel (%p191_p9) target bundleno = 1070 (0x42e), region = 40  ;;  %v5668_v1 = vld [vmem:[%s7868_s1] sm:$0xff] (!%p191_p9)   ;;  %276 = vst [vmem:[#allocation2 + $0x90] sm:$0xff] (!%p191_p9), %v5896_v2  ;;  %1455 = vmatprep.mubr.bf16.mxu0 (!%p191_p9), %v5896_v2  ;;  %272 = vst [vmem:[#allocation2] sm:$0xff] (!%p191_p9), %v5896_v2  ;;  %4585 = vmatprep.subr.bf16.mxu0 (!%p191_p9), %v5667_v0  ;;  %v5672_v6 = vld [vmem:[%s7868_s1 + $0x8] sm:$0xff] (!%p191_p9)   ;;  %vm340_vm4 = vcmask (!%p191_p9), 1047559  }
   0xf   : > { %274 = vst [vmem:[#allocation2 + $0x88] sm:$0xff] (!%p191_p9), %v5896_v2  ;;  %280 = vst [vmem:[#allocation2 + $0x120] sm:$0xff] (!%p191_p9), %v5896_v2  ;;  %v5669_v3 = vld [vmem:[%s7868_s1 + $0xc0] sm:$0xff] (!%p191_p9)   ;;  %4586 = vmatpush3.bf16.msra.mxu0 (!%p191_p9), %v5668_v1  ;;  %v5673_v7 = vld [vmem:[%s7868_s1 + $0xc8] sm:$0xff] (!%p191_p9)   ;;  %vm284_vm1 = vsmask.f32 (!%p191_p9), 256 }
  0x10   : > { %282 = vst [vmem:[#allocation2 + $0x1a8] sm:$0xff] (!%p191_p9), %v5896_v2  ;;  %2276 = vst [vmem:[#allocation3] sm:$0xff] (!%p191_p9), %v5896_v2  ;;  %v5670_v4 = vld [vmem:[%s7868_s1 + $0x80] sm:$0xff] (!%p191_p9)   ;;  %4697 = vmatprep.subr.bf16.mxu1 (!%p191_p9), %v5669_v3  ;;  %4587 = vmatprep.subr.bf16.mxu0 (!%p191_p9), %v5671_v5  ;;  %v5674_v8 = vld [vmem:[%s7868_s1 + $0x88] sm:$0xff] (!%p191_p9)   ;;  %vm544_vm3 = vsmask.f32 (!%p191_p9), 7938 }
  0x11   : > { %2278 = vst [vmem:[#allocation3 + $0x88] sm:$0xff] (!%p191_p9), %v5896_v2  ;;  %2284 = vst [vmem:[#allocation3 + $0x120] sm:$0xff] (!%p191_p9), %v5896_v2  ;;  %4698 = vmatpush3.bf16.msra.mxu1 (!%p191_p9), %v5670_v4  ;;  %v5676_v10 = vld [vmem:[%s7868_s1 + $0x10] sm:$0xff] (!%p191_p9)   ;;  %v5679_v13 = vld [vmem:[%s7868_s1 + $0x58] sm:$0xff] (!%p191_p9)   ;;  %vm543_vm5 = vcmask (!%p191_p9), 1047552   ;;  %s215_s13 = sand.u32 (!%p191_p9), 1, %s5886_s19  }
  0x12   : > { %2286 = vst [vmem:[#allocation3 + $0x1a8] sm:$0xff] (!%p191_p9), %v5896_v2  ;;  %4699 = vmatprep.subr.bf16.mxu1 (!%p191_p9), %v5673_v7  ;;  %v5677_v11 = vld [vmem:[%s7868_s1 + $0xd0] sm:$0xff] (!%p191_p9)   ;;  %v5680_v14 = vld [vmem:[%s7868_s1 + $0x18] sm:$0xff] (!%p191_p9)   ;;  %v5683_v17 = vld [vmem:[%s7868_s1 + $0x60] sm:$0xff] (!%p191_p9)   ;;  %vm341_vm6 = vsmask.f32 (!%p191_p9), 7966 }
  0x13   : > { %4588 = vmatpush3.bf16.msra.mxu0 (!%p191_p9), %v5672_v6  ;;  %v5678_v12 = vld [vmem:[%s7868_s1 + $0x90] sm:$0xff] (!%p191_p9)   ;;  %v5681_v15 = vld [vmem:[%s7868_s1 + $0xd8] sm:$0xff] (!%p191_p9)   ;;  %v5684_v18 = vld [vmem:[%s7868_s1 + $0x20] sm:$0xff] (!%p191_p9)   ;;  %vm643_vm8 = vsmask.f32 (!%p191_p9), 7424  ;;  %s4429_s14 = sshll.u32 (!%p191_p9), %s215_s13, 8 }
  0x14   : > { %4589 = vmatprep.subr.bf16.mxu0 (!%p191_p9), %v5675_v9  ;;  %v5682_v16 = vld [vmem:[%s7868_s1 + $0x98] sm:$0xff] (!%p191_p9)   ;;  %v5685_v19 = vld [vmem:[%s7868_s1 + $0xe0] sm:$0xff] (!%p191_p9)   ;;  %v5687_v21 = vld [vmem:[%s7868_s1 + $0x68] sm:$0xff] (!%p191_p9)   ;;  %s7723_s15 = scalar_lea.vmem (!%p191_p9), [#allocation4], %s4429_s14  ;;  %s5897_s30 = smov (!%p191_p9), [#allocation4]  }
  0x15   : > { %4700 = vmatpush3.bf16.msra.mxu1 %v5674_v8  ;;  %v5686_v20 = vld [vmem:[%s7868_s1 + $0xa0] sm:$0xff]   ;;  %v5688_v22 = vld [vmem:[%s7868_s1 + $0x28] sm:$0xff]   ;;  %v5691_v25 = vld [vmem:[%s7868_s1 + $0x70] sm:$0xff]   ;;  %s219_s7 = scalar_select %p218_p10, %s5951_s22, 1 }
  0x16   : > { %4701 = vmatprep.subr.bf16.mxu1 %v5677_v11  ;;  %v5689_v23 = vld [vmem:[%s7868_s1 + $0xe8] sm:$0xff]   ;;  %v5692_v26 = vld [vmem:[%s7868_s1 + $0x30] sm:$0xff]   ;;  %v5695_v29 = vld [vmem:[%s7868_s1 + $0x78] sm:$0xff]   ;;  %s4363_s17 = sshll.u32 %s7723_s15, 4  ;;  %s5836_s6 = sshll.u32 %s5897_s30, 4  ;;  %s7819_s17 = int_to_ptr.vmem [resolvable:$true] %s4363_s17  ;;  %s5837_s6 = int_to_ptr.vmem [resolvable:$false] %s5836_s6 }
  0x17   : > { %4590 = vmatpush3.bf16.msra.mxu0 %v5676_v10  ;;  %v5690_v24 = vld [vmem:[%s7868_s1 + $0xa8] sm:$0xff]   ;;  %v5693_v27 = vld [vmem:[%s7868_s1 + $0xf0] sm:$0xff]   ;;  %s4583_s16 = sshll.u32 %s219_s7, 8  ;;  %v5696_v30 = vld [vmem:[%s7868_s1 + $0x38] sm:$0xff]   ;;  %s5838_s8 = scalar_lea.vmem %s5837_s6, 8192 }
  0x18   : > { %4591 = vmatprep.subr.bf16.mxu0 %v5679_v13  ;;  %v5694_v28 = vld [vmem:[%s7868_s1 + $0xb0] sm:$0xff]   ;;  %v5697_v31 = vld [vmem:[%s7868_s1 + $0xf8] sm:$0xff]   ;;  %s6079_s7 = scalar_lea.vmem %s7867_s0, %s4583_s16  ;;  %v286_v33 = vld [vmem:[#allocation2] sm:$0x1]  ;;  %s4584_s16 = sshll.u32 %s5951_s22, 12 }
  0x19   : > { %4702 = vmatpush3.bf16.msra.mxu1 %v5678_v12  ;;  %v5698_v32 = vld [vmem:[%s7868_s1 + $0xb8] sm:$0xff]   ;;  %vm6081_vm2 = vmand %vm283_vm0, %vm284_vm1  ;;  %v5699_v35 = vld [vmem:[%s7868_s1 + $0x140] sm:$0xff]   ;;  %s7817_s26 = scalar_lea.hbm %s7872_s5, %s4584_s16  ;;  %s7826_s22 = scalar_lea.sflag [#allocation5], %s215_s13 }
  0x1a   : > { %4703 = vmatprep.subr.bf16.mxu1 %v5681_v15  ;;  %v287_v36 = vsel %vm6081_vm2, 0, %v286_v33  ;;  %v224_v37 = vld [vmem:[%s6079_s7] sm:$0xff]  ;;  %v225_v38 = vld [vmem:[%s6079_s7 + $0x8] sm:$0xff]  ;;  %v226_v43 = vld [vmem:[%s6079_s7 + $0x10] sm:$0xff]  ;;  %p5839_p0 = scmp.lt.s32.totalorder %s7819_s17, %s5837_s6 }
  0x1b   : > { %4592 = vmatpush3.bf16.msra.mxu0 %v5680_v14  ;;  %v289_v39 = vld [vmem:[#allocation2 + $0x8] sm:$0x1]  ;;  %288 = vst [vmem:[#allocation2] sm:$0x1] %v287_v36  ;;  %v256_v40 = vpack.c.bf16 %v225_v38, %v224_v37  ;;  %v343_v42 = vld [vmem:[#allocation2 + $0x120] sm:$0x80]  ;;  %vm6095_vm7 = vmand %vm340_vm4, %vm341_vm6 }
  0x1c   : > { %4593 = vmatprep.subr.bf16.mxu0 %v5683_v17  ;;  %v290_v41 = vsel %vm6081_vm2, 0, %v289_v39  ;;  %v227_v47 = vld [vmem:[%s6079_s7 + $0x18] sm:$0xff]  ;;  %v292_v48 = vld [vmem:[#allocation2 + $0x10] sm:$0x1]  ;;  %v5700_v49 = vld [vmem:[%s7868_s1 + $0x100] sm:$0xff]   ;;  %v344_v50 = vsel %vm6095_vm7, 0, %v343_v42 }
  0x1d   : > { %4704 = vmatpush3.bf16.msra.mxu1 %v5682_v16  ;;  %291 = vst [vmem:[#allocation2 + $0x8] sm:$0x1] %v290_v41  ;;  %v415_v44 = vshrl.u32 %v256_v40, 16  ;;  %v418_v45 = vshll.u32 %v256_v40, 16  ;;  %398 = vst [vmem:[#allocation2 + $0x98] sm:$0xff] %v256_v40  ;;  %v6105_v51 = vpack.c.bf16 %v227_v47, %v226_v43  ;;  %v293_v52 = vsel %vm6081_vm2, 0, %v292_v48 }
  0x1e   : > { %4705 = vmatprep.subr.bf16.mxu1 %v5685_v19  ;;  %v346_v53 = vld [vmem:[#allocation2 + $0x128] sm:$0x80]  ;;  %vm6111_vm9 = vmand %vm543_vm5, %vm544_vm3  ;;  %345 = vst [vmem:[#allocation2 + $0x120] sm:$0x80] %v344_v50  ;;  %v228_v61 = vld [vmem:[%s6079_s7 + $0x20] sm:$0xff] }
  0x1f   : > { %4594 = vmatpush3.bf16.msra.mxu0 %v5684_v18  ;;  %v417_v54 = vrot.slane %v415_v44, 7  ;;  %294 = vst [vmem:[#allocation2 + $0x10] sm:$0x1] %v293_v52  ;;  %v347_v56 = vsel %vm6095_vm7, 0, %v346_v53  ;;  %v594_v57 = vrot.slane %v418_v45, 1  ;;  %v5701_v58 = vld [vmem:[%s7868_s1 + $0x148] sm:$0xff]   ;;  %vm6143_vm10 = vmand %vm543_vm5, %vm643_vm8 }
  0x20   : > { %4595 = vmatprep.subr.bf16.mxu0 %v5687_v21  ;;  %v422_v59 = vshrl.u32 %v6105_v51, 16  ;;  %v425_v60 = vshll.u32 %v6105_v51, 16  ;;  %399 = vst [vmem:[#allocation2 + $0xa0] sm:$0xff] %v6105_v51  ;;  %348 = vst [vmem:[#allocation2 + $0x128] sm:$0x80] %v347_v56  ;;  %v229_v62 = vld [vmem:[%s6079_s7 + $0x28] sm:$0xff] }
  0x21   : > { %4706 = vmatpush3.bf16.msra.mxu1 %v5686_v20  ;;  %v420_v63 = vor.u32 %v418_v45, %v417_v54  ;;  %v6125_v0 = vpack.c.bf16 %v229_v62, %v228_v61  ;;  %v295_v1 = vld [vmem:[#allocation2 + $0x18] sm:$0x1]  ;;  %v349_v5 = vld [vmem:[#allocation2 + $0x130] sm:$0x80]  ;;  %v5702_v9 = vld [vmem:[%s7868_s1 + $0x108] sm:$0xff]   ;;  %v595_v14 = vor.u32 %v594_v57, %v415_v44 }
  0x22   : > { %4707 = vmatprep.subr.bf16.mxu1 %v5689_v23  ;;  %v693_v2 = vld [vmem:[#allocation2] sm:$0xff]  ;;  %v424_v3 = vrot.slane %v422_v59, 7  ;;  %v296_v4 = vsel %vm6081_vm2, 0, %v295_v1  ;;  %v350_v10 = vsel %vm6095_vm7, 0, %v349_v5  ;;  %v230_v11 = vld [vmem:[%s6079_s7 + $0x30] sm:$0xff]  ;;  %v596_v15 = vrot.slane %v425_v60, 1 }
  0x23   : > { %4596 = vmatpush3.bf16.msra.mxu0 %v5688_v22  ;;  %297 = vst [vmem:[#allocation2 + $0x18] sm:$0x1] %v296_v4  ;;  %v429_v7 = vshrl.u32 %v6125_v0, 16  ;;  %v432_v8 = vshll.u32 %v6125_v0, 16  ;;  %400 = vst [vmem:[#allocation2 + $0xa8] sm:$0xff] %v6125_v0  ;;  %v231_v16 = vld [vmem:[%s6079_s7 + $0x38] sm:$0xff] }
  0x24   : > { %4597 = vmatprep.subr.bf16.mxu0 %v5691_v25  ;;  %v546_v6 = vld [vmem:[#allocation2 + $0x8] sm:$0xff]  ;;  %v427_v13 = vor.u32 %v425_v60, %v424_v3  ;;  %351 = vst [vmem:[#allocation2 + $0x130] sm:$0x80] %v350_v10  ;;  %v298_v17 = vld [vmem:[#allocation2 + $0x20] sm:$0x1]  ;;  %v6147_v21 = vpack.c.bf16 %v231_v16, %v230_v11  ;;  %v597_v37 = vor.u32 %v596_v15, %v422_v59  ;;  %v5704_v42 = vld [vmem:[%s7868_s1 + $0x110] sm:$0xff]  }
  0x25   : > { %4708 = vmatpush3.bf16.msra.mxu1 %v5690_v24  ;;  %v547_v12 = vsel %vm6111_vm9, %v420_v63, %v546_v6  ;;  %v352_v18 = vld [vmem:[#allocation2 + $0x138] sm:$0x80]  ;;  %v431_v20 = vrot.slane %v429_v7, 7  ;;  %v299_v22 = vsel %vm6081_vm2, 0, %v298_v17  ;;  %v725_v23 = vld [vmem:[#allocation2 + $0x120] sm:$0xff]  ;;  %v234_v50 = vld [vmem:[%s6079_s7 + $0x50] sm:$0xff] }
  0x26   : > { %4709 = vmatprep.subr.bf16.mxu1 %v5693_v27  ;;  %548 = vst [vmem:[#allocation2 + $0x8] sm:$0xff] %v547_v12  ;;  %1616 = vmatprep.mubr.bf16.mxu1 %v547_v12  ;;  %v549_v24 = vld [vmem:[#allocation2 + $0x10] sm:$0xff]  ;;  %300 = vst [vmem:[#allocation2 + $0x20] sm:$0x1] %v299_v22  ;;  %v353_v25 = vsel %vm6095_vm7, 0, %v352_v18  ;;  %v232_v33 = vld [vmem:[%s6079_s7 + $0x40] sm:$0xff] }
  0x27   : > { %4598 = vmatpush3.bf16.msra.mxu0 %v5692_v26  ;;  %v598_v26 = vrot.slane %v432_v8, 1  ;;  %v5703_v27 = vld [vmem:[%s7868_s1 + $0x150] sm:$0xff]   ;;  %401 = vst [vmem:[#allocation2 + $0xb0] sm:$0xff] %v6147_v21  ;;  %354 = vst [vmem:[#allocation2 + $0x138] sm:$0x80] %v353_v25  ;;  %v235_v52 = vld [vmem:[%s6079_s7 + $0x58] sm:$0xff] }
  0x28   : > { %4599 = vmatprep.subr.bf16.mxu0 %v5695_v29  ;;  %v645_v29 = vld [vmem:[#allocation2 + $0x128] sm:$0xff]  ;;  %v355_v43 = vld [vmem:[#allocation2 + $0x140] sm:$0x80]  ;;  %v304_v59 = vld [vmem:[#allocation2 + $0x30] sm:$0x1] }
  0x29   : > { %4710 = vmatpush3.bf16.msra.mxu1 %v5694_v28  ;;  %v6158_v28 = vsel %vm6111_vm9, %v427_v13, %v549_v24  ;;  %v646_v36 = vsel %vm6143_vm10, %v595_v14, %v645_v29  ;;  %v301_v39 = vld [vmem:[#allocation2 + $0x28] sm:$0x1]  ;;  %v599_v45 = vor.u32 %v598_v26, %v429_v7  ;;  %v358_v60 = vld [vmem:[#allocation2 + $0x148] sm:$0x80]  ;;  %v305_v63 = vsel %vm6081_vm2, 0, %v304_v59  ;;  %v5706_v16 = vld [vmem:[%s7868_s1 + $0x118] sm:$0xff]  }
  0x2a   : > { %4711 = vmatprep.subr.bf16.mxu1 %v5697_v31  ;;  %v436_v31 = vshrl.u32 %v6147_v21, 16  ;;  %551 = vst [vmem:[#allocation2 + $0x10] sm:$0xff] %v6158_v28  ;;  %647 = vst [vmem:[#allocation2 + $0x128] sm:$0xff] %v646_v36  ;;  %v302_v41 = vsel %vm6081_vm2, 0, %v301_v39  ;;  %v552_v44 = vld [vmem:[#allocation2 + $0x18] sm:$0xff]  ;;  %v359_v1 = vsel %vm6095_vm7, 0, %v358_v60 }
  0x2b   : > { %4600 = vmatpush3.bf16.msra.mxu0 %v5696_v30  ;;  %v434_v30 = vor.u32 %v432_v8, %v431_v20  ;;  %303 = vst [vmem:[#allocation2 + $0x28] sm:$0x1] %v302_v41  ;;  %v648_v54 = vld [vmem:[#allocation2 + $0x130] sm:$0xff]  ;;  %306 = vst [vmem:[#allocation2 + $0x30] sm:$0x1] %v305_v63  ;;  %v237_v10 = vld [vmem:[%s6079_s7 + $0x68] sm:$0xff] }
  0x2c   : > { %4809 = vmatprep.subr.bf16.mxu0 %v5699_v35  ;;  %v233_v35 = vld [vmem:[%s6079_s7 + $0x48] sm:$0xff]  ;;  %v6195_v61 = vsel %vm6143_vm10, %v597_v37, %v648_v54  ;;  %360 = vst [vmem:[#allocation2 + $0x148] sm:$0x80] %v359_v1  ;;  %v307_v15 = vld [vmem:[#allocation2 + $0x38] sm:$0x1]  ;;  %v5708_v63 = vld [vmem:[%s7868_s1 + $0x120] sm:$0xff]  }
  0x2d   : > { %4712 = vmatpush3.bf16.msra.mxu1 %v5698_v32  ;;  %v439_v32 = vshll.u32 %v6147_v21, 16  ;;  %v6169_v38 = vpack.c.bf16 %v233_v35, %v232_v33  ;;  %v6187_v53 = vsel %vm6111_vm9, %v434_v30, %v552_v44  ;;  %650 = vst [vmem:[#allocation2 + $0x130] sm:$0xff] %v6195_v61  ;;  %v308_v18 = vsel %vm6081_vm2, 0, %v307_v15  ;;  %v361_v20 = vld [vmem:[#allocation2 + $0x150] sm:$0x80]  ;;  %v239_v29 = vld [vmem:[%s6079_s7 + $0x78] sm:$0xff] }
  0x2e   : > { %1456 = vmatmul.mubr.bf16.vlgmr.msra.gmra.mrb[0].mxu0 %v693_v2  ;;  %554 = vst [vmem:[#allocation2 + $0x18] sm:$0xff] %v6187_v53  ;;  %v555_v2 = vld [vmem:[#allocation2 + $0x20] sm:$0xff]  ;;  %v651_v7 = vld [vmem:[#allocation2 + $0x138] sm:$0xff]  ;;  %309 = vst [vmem:[#allocation2 + $0x38] sm:$0x1] %v308_v18  ;;  %v362_v26 = vsel %vm6095_vm7, 0, %v361_v20 }
  0x2f   : > { %4810 = vmatpush3.bf16.msra.mxu0 %v5700_v49  ;;  %1463 = vmatprep.mubr.bf16.mxu0 %v256_v40  ;;  %v438_v40 = vrot.slane %v436_v31, 7  ;;  %v443_v47 = vshrl.u32 %v6169_v38, 16  ;;  %v446_v48 = vshll.u32 %v6169_v38, 16  ;;  %402 = vst [vmem:[#allocation2 + $0xb8] sm:$0xff] %v6169_v38  ;;  %v356_v49 = vsel %vm6095_vm7, 0, %v355_v43  ;;  %v5805_v34 = vld [vmem:[%s7870_s3 + $0x210] sm:$0xff]  }
  0x30   : > { %4811 = vmatprep.subr.bf16.mxu0 %v5701_v58  ;;  %1617 = vmatmul.mubr.bf16.vlgmr.msra.gmra.mrb[0].mxu1 %v725_v23  ;;  %357 = vst [vmem:[#allocation2 + $0x140] sm:$0x80] %v356_v49  ;;  %v600_v57 = vrot.slane %v439_v32, 1  ;;  %v6189_v58 = vpack.c.bf16 %v235_v52, %v234_v50  ;;  %v6217_v11 = vsel %vm6143_vm10, %v599_v45, %v651_v7  ;;  %363 = vst [vmem:[#allocation2 + $0x150] sm:$0x80] %v362_v26  ;;  %v241_v52 = vld [vmem:[%s6079_s7 + $0x88] sm:$0xff] }
  0x31   : > { %1624 = vmatprep.mubr.bf16.mxu1 %v6158_v28  ;;  %v441_v56 = vor.u32 %v439_v32, %v438_v40  ;;  %v445_v62 = vrot.slane %v443_v47, 7  ;;  %v602_v5 = vrot.slane %v446_v48, 1  ;;  %653 = vst [vmem:[#allocation2 + $0x138] sm:$0xff] %v6217_v11  ;;  %v310_v35 = vld [vmem:[#allocation2 + $0x40] sm:$0x1]  ;;  %v243_v7 = vld [vmem:[%s6079_s7 + $0x98] sm:$0xff] }
  0x32   : > { %v450_v3 = vshrl.u32 %v6189_v58, 16  ;;  %v453_v4 = vshll.u32 %v6189_v58, 16  ;;  %403 = vst [vmem:[#allocation2 + $0xc0] sm:$0xff] %v6189_v58  ;;  %v558_v22 = vld [vmem:[#allocation2 + $0x28] sm:$0xff]  ;;  %v311_v40 = vsel %vm6081_vm2, 0, %v310_v35 }
  0x33   : > { %4812 = vmatpush3.bf16.msra.mxu0 %v5702_v9  ;;  %v6210_v6 = vsel %vm6111_vm9, %v441_v56, %v555_v2  ;;  %v448_v8 = vor.u32 %v446_v48, %v445_v62  ;;  %v236_v9 = vld [vmem:[%s6079_s7 + $0x60] sm:$0xff]  ;;  %v603_v17 = vor.u32 %v602_v5, %v443_v47  ;;  %v657_v43 = vld [vmem:[#allocation2 + $0x148] sm:$0xff]  ;;  %312 = vst [vmem:[#allocation2 + $0x40] sm:$0x1] %v311_v40  ;;  %v316_v15 = vld [vmem:[#allocation2 + $0x50] sm:$0x1] }
  0x34   : > { %4813 = vmatprep.subr.bf16.mxu0 %v5703_v27  ;;  %557 = vst [vmem:[#allocation2 + $0x20] sm:$0xff] %v6210_v6  ;;  %v452_v13 = vrot.slane %v450_v3, 7  ;;  %v6223_v14 = vpack.c.bf16 %v237_v10, %v236_v9  ;;  %v238_v27 = vld [vmem:[%s6079_s7 + $0x70] sm:$0xff]  ;;  %v604_v32 = vrot.slane %v453_v4, 1  ;;  %v240_v48 = vld [vmem:[%s6079_s7 + $0x80] sm:$0xff]  ;;  %v317_v20 = vsel %vm6081_vm2, 0, %v316_v15 }
  0x35   : > { %v6241_v30 = vsel %vm6111_vm9, %v448_v8, %v558_v22  ;;  %v6243_v33 = vpack.c.bf16 %v239_v29, %v238_v27  ;;  %v313_v54 = vld [vmem:[#allocation2 + $0x48] sm:$0x1]  ;;  %v6279_v59 = vpack.c.bf16 %v241_v52, %v240_v48  ;;  %v367_v1 = vld [vmem:[#allocation2 + $0x160] sm:$0x80]  ;;  %v564_v2 = vld [vmem:[#allocation2 + $0x38] sm:$0xff] }
  0x36   : > { %1464 = vmatmul.mubr.bf16.gmra.mrb[4].mxu0 %v547_v12  ;;  %v601_v12 = vor.u32 %v600_v57, %v436_v31  ;;  %v455_v23 = vor.u32 %v453_v4, %v452_v13  ;;  %v457_v24 = vshrl.u32 %v6223_v14, 16  ;;  %v460_v25 = vshll.u32 %v6223_v14, 16  ;;  %404 = vst [vmem:[#allocation2 + $0xc8] sm:$0xff] %v6223_v14  ;;  %560 = vst [vmem:[#allocation2 + $0x28] sm:$0xff] %v6241_v30  ;;  %v5709_v8 = vld [vmem:[%s7868_s1 + $0x168] sm:$0xff]  }
  0x37   : > { %1471 = vmatprep.mubr.bf16.mxu0 %v6105_v51  ;;  %4814 = vmatpush3.bf16.msra.mxu0 %v5704_v42  ;;  %v5705_v51 = vld [vmem:[%s7868_s1 + $0x158] sm:$0xff]   ;;  %v654_v31 = vld [vmem:[#allocation2 + $0x140] sm:$0xff]  ;;  %v464_v44 = vshrl.u32 %v6243_v33, 16  ;;  %v467_v45 = vshll.u32 %v6243_v33, 16  ;;  %405 = vst [vmem:[#allocation2 + $0xd0] sm:$0xff] %v6243_v33  ;;  %v605_v56 = vor.u32 %v604_v32, %v450_v3  ;;  %v314_v60 = vsel %vm6081_vm2, 0, %v313_v54 }
  0x38   : > { %4815 = vmatprep.subr.bf16.mxu0 %v5705_v51  ;;  %1625 = vmatmul.mubr.bf16.gmra.mrb[4].mxu1 %v646_v36  ;;  %v364_v36 = vld [vmem:[#allocation2 + $0x158] sm:$0x80]  ;;  %v6249_v37 = vsel %vm6143_vm10, %v601_v12, %v654_v31  ;;  %v459_v39 = vrot.slane %v457_v24, 7  ;;  %v5707_v42 = vld [vmem:[%s7868_s1 + $0x160] sm:$0xff]   ;;  %v606_v47 = vrot.slane %v460_v25, 1  ;;  %v242_v51 = vld [vmem:[%s6079_s7 + $0x90] sm:$0xff] }
  0x39   : > { %1632 = vmatprep.mubr.bf16.mxu1 %v6187_v53  ;;  %v365_v41 = vsel %vm6095_vm7, 0, %v364_v36  ;;  %656 = vst [vmem:[#allocation2 + $0x140] sm:$0xff] %v6249_v37  ;;  %v466_v57 = vrot.slane %v464_v44, 7  ;;  %315 = vst [vmem:[#allocation2 + $0x48] sm:$0x1] %v314_v60  ;;  %v471_v4 = vshrl.u32 %v6279_v59, 16  ;;  %v6302_v13 = vpack.c.bf16 %v243_v7, %v242_v51 }
  0x3a   : > { %366 = vst [vmem:[#allocation2 + $0x158] sm:$0x80] %v365_v41  ;;  %v462_v50 = vor.u32 %v460_v25, %v459_v39  ;;  %v607_v62 = vor.u32 %v606_v47, %v457_v24  ;;  %v474_v5 = vshll.u32 %v6279_v59, 16  ;;  %406 = vst [vmem:[#allocation2 + $0xd8] sm:$0xff] %v6279_v59  ;;  %v660_v10 = vld [vmem:[#allocation2 + $0x150] sm:$0xff]  ;;  %v608_v12 = vrot.slane %v467_v45, 1 }
  0x3b   : > { %4816 = vmatpush3.bf16.msra.mxu0 %v5706_v16  ;;  %v469_v3 = vor.u32 %v467_v45, %v466_v57  ;;  %v370_v16 = vld [vmem:[#allocation2 + $0x168] sm:$0x80]  ;;  %v473_v18 = vrot.slane %v471_v4, 7  ;;  %v567_v24 = vld [vmem:[#allocation2 + $0x40] sm:$0xff]  ;;  %318 = vst [vmem:[#allocation2 + $0x50] sm:$0x1] %v317_v20 }
  0x3c   : > { %4817 = vmatprep.subr.bf16.mxu0 %v5707_v42  ;;  %v6300_v9 = vsel %vm6111_vm9, %v462_v50, %v564_v2  ;;  %v371_v22 = vsel %vm6095_vm7, 0, %v370_v16  ;;  %v478_v26 = vshrl.u32 %v6302_v13, 16  ;;  %v481_v27 = vshll.u32 %v6302_v13, 16  ;;  %407 = vst [vmem:[#allocation2 + $0xe0] sm:$0xff] %v6302_v13  ;;  %v245_v31 = vld [vmem:[%s6079_s7 + $0xa8] sm:$0xff]  ;;  %v247_v57 = vld [vmem:[%s6079_s7 + $0xb8] sm:$0xff] }
  0x3d   : > { %566 = vst [vmem:[#allocation2 + $0x38] sm:$0xff] %v6300_v9  ;;  %372 = vst [vmem:[#allocation2 + $0x168] sm:$0x80] %v371_v22  ;;  %v610_v29 = vrot.slane %v474_v5, 1  ;;  %v6323_v32 = vsel %vm6111_vm9, %v469_v3, %v567_v24  ;;  %v476_v35 = vor.u32 %v474_v5, %v473_v18  ;;  %v319_v39 = vld [vmem:[#allocation2 + $0x58] sm:$0x1] }
  0x3e   : > { %1472 = vmatmul.mubr.bf16.gmra.mrb[8].mxu0 %v6158_v28  ;;  %v561_v28 = vld [vmem:[#allocation2 + $0x30] sm:$0xff]  ;;  %569 = vst [vmem:[#allocation2 + $0x40] sm:$0xff] %v6323_v32  ;;  %v480_v40 = vrot.slane %v478_v26, 7  ;;  %v320_v41 = vsel %vm6081_vm2, 0, %v319_v39  ;;  %v5710_v42 = vld [vmem:[%s7868_s1 + $0x128] sm:$0xff]  }
  0x3f   : > { %1479 = vmatprep.mubr.bf16.mxu0 %v6125_v0  ;;  %v6266_v49 = vsel %vm6111_vm9, %v455_v23, %v561_v28  ;;  %v6270_v0 = vsel %vm6143_vm10, %v603_v17, %v657_v43  ;;  %4818 = vmatpush3.bf16.msra.mxu0 %v5708_v63  ;;  %v6307_v17 = vsel %vm6143_vm10, %v605_v56, %v660_v10  ;;  %v244_v23 = vld [vmem:[%s6079_s7 + $0xa0] sm:$0xff]  ;;  %v612_v28 = vrot.slane %v481_v27, 1  ;;  %v373_v48 = vld [vmem:[#allocation2 + $0x170] sm:$0x80]  ;;  %v249_v16 = vld [vmem:[%s6079_s7 + $0xc8] sm:$0xff] }
  0x40   : > { %563 = vst [vmem:[#allocation2 + $0x30] sm:$0xff] %v6266_v49  ;;  %659 = vst [vmem:[#allocation2 + $0x148] sm:$0xff] %v6270_v0  ;;  %1633 = vmatmul.mubr.bf16.gmra.mrb[8].mxu1 %v6195_v61  ;;  %v368_v61 = vsel %vm6095_vm7, 0, %v367_v1  ;;  %4819 = vmatprep.subr.bf16.mxu0 %v5709_v8  ;;  %v6329_v36 = vpack.c.bf16 %v245_v31, %v244_v23  ;;  %v570_v43 = vld [vmem:[#allocation2 + $0x48] sm:$0xff]  ;;  %v483_v52 = vor.u32 %v481_v27, %v480_v40  ;;  %v322_v60 = vld [vmem:[#allocation2 + $0x60] sm:$0x1] }
  0x41   : > { %1640 = vmatprep.mubr.bf16.mxu1 %v6210_v6  ;;  %369 = vst [vmem:[#allocation2 + $0x160] sm:$0x80] %v368_v61  ;;  %662 = vst [vmem:[#allocation2 + $0x150] sm:$0xff] %v6307_v17  ;;  %v663_v25 = vld [vmem:[#allocation2 + $0x158] sm:$0xff]  ;;  %v6347_v50 = vsel %vm6111_vm9, %v476_v35, %v570_v43  ;;  %v611_v54 = vor.u32 %v610_v29, %v471_v4  ;;  %v374_v56 = vsel %vm6095_vm7, 0, %v373_v48  ;;  %v323_v51 = vsel %vm6081_vm2, 0, %v322_v60 }
  0x42   : > { %321 = vst [vmem:[#allocation2 + $0x58] sm:$0x1] %v320_v41  ;;  %v485_v45 = vshrl.u32 %v6329_v36, 16  ;;  %v488_v47 = vshll.u32 %v6329_v36, 16  ;;  %408 = vst [vmem:[#allocation2 + $0xe8] sm:$0xff] %v6329_v36  ;;  %v5711_v5 = vld [vmem:[%s7868_s1 + $0x170] sm:$0xff]   ;;  %v613_v22 = vor.u32 %v612_v28, %v478_v26 }
  0x43   : > { %4820 = vmatpush3.bf16.msra.mxu0 %v5710_v42  ;;  %572 = vst [vmem:[#allocation2 + $0x48] sm:$0xff] %v6347_v50  ;;  %375 = vst [vmem:[#allocation2 + $0x170] sm:$0x80] %v374_v56  ;;  %v248_v61 = vld [vmem:[%s6079_s7 + $0xc0] sm:$0xff]  ;;  %v573_v7 = vld [vmem:[#allocation2 + $0x50] sm:$0xff] }
  0x44   : > { %324 = vst [vmem:[#allocation2 + $0x60] sm:$0x1] %v323_v51  ;;  %v614_v4 = vrot.slane %v488_v47, 1  ;;  %v669_v8 = vld [vmem:[#allocation2 + $0x168] sm:$0xff]  ;;  %v6375_v18 = vsel %vm6111_vm9, %v483_v52, %v573_v7  ;;  %4821 = vmatprep.subr.bf16.mxu0 %v5711_v5  ;;  %v5712_v27 = vld [vmem:[%s7868_s1 + $0x130] sm:$0xff]   ;;  %v5713_v42 = vld [vmem:[%s7868_s1 + $0x1c0] sm:$0xff]  }
  0x45   : > { %v6379_v20 = vsel %vm6143_vm10, %v611_v54, %v669_v8  ;;  %v325_v23 = vld [vmem:[#allocation2 + $0x68] sm:$0x1]  ;;  %575 = vst [vmem:[#allocation2 + $0x50] sm:$0xff] %v6375_v18  ;;  %v379_v29 = vld [vmem:[#allocation2 + $0x180] sm:$0x80]  ;;  %4921 = vmatprep.subr.bf16.mxu1 %v5713_v42  ;;  %v5717_v8 = vld [vmem:[%s7868_s1 + $0x1d0] sm:$0xff]  }
  0x46   : > { %1480 = vmatmul.mubr.bf16.gmra.mrb[12].mxu0 %v6187_v53  ;;  %v6327_v53 = vsel %vm6143_vm10, %v607_v62, %v663_v25  ;;  %v376_v62 = vld [vmem:[#allocation2 + $0x178] sm:$0x80]  ;;  %671 = vst [vmem:[#allocation2 + $0x168] sm:$0xff] %v6379_v20  ;;  %v6384_v25 = vpack.c.bf16 %v249_v16, %v248_v61  ;;  %v615_v35 = vor.u32 %v614_v4, %v485_v45  ;;  %v5714_v28 = vld [vmem:[%s7868_s1 + $0x180] sm:$0xff]   ;;  %v5715_v54 = vld [vmem:[%s7868_s1 + $0x1c8] sm:$0xff]  }
  0x47   : > { %1487 = vmatprep.mubr.bf16.mxu0 %v6147_v21  ;;  %665 = vst [vmem:[#allocation2 + $0x158] sm:$0xff] %v6327_v53  ;;  %v609_v21 = vor.u32 %v608_v12, %v464_v44  ;;  %v246_v44 = vld [vmem:[%s6079_s7 + $0xb0] sm:$0xff]  ;;  %v377_v2 = vsel %vm6095_vm7, 0, %v376_v62  ;;  %4822 = vmatpush3.bf16.msra.mxu0 %v5712_v27  ;;  %v5716_v60 = vld [vmem:[%s7868_s1 + $0x188] sm:$0xff]  }
  0x48   : > { %1641 = vmatmul.mubr.bf16.gmra.mrb[12].mxu1 %v6217_v11  ;;  %v666_v63 = vld [vmem:[#allocation2 + $0x160] sm:$0xff]  ;;  %v487_v11 = vrot.slane %v485_v45, 7  ;;  %v6354_v1 = vpack.c.bf16 %v247_v57, %v246_v44  ;;  %378 = vst [vmem:[#allocation2 + $0x178] sm:$0x80] %v377_v2  ;;  %v499_v40 = vshrl.u32 %v6384_v25, 16  ;;  %v502_v41 = vshll.u32 %v6384_v25, 16 }
  0x49   : > { %1648 = vmatprep.mubr.bf16.mxu1 %v6241_v30  ;;  %v6362_v3 = vsel %vm6143_vm10, %v609_v21, %v666_v63  ;;  %v576_v31 = vld [vmem:[#allocation2 + $0x58] sm:$0xff]  ;;  %4922 = vmatpush3.bf16.msra.mxu1 %v5714_v28  ;;  %v250_v62 = vld [vmem:[%s6079_s7 + $0xd0] sm:$0xff]  ;;  %v382_v4 = vld [vmem:[#allocation2 + $0x188] sm:$0x80] }
  0x4a   : > { %668 = vst [vmem:[#allocation2 + $0x160] sm:$0xff] %v6362_v3  ;;  %v490_v10 = vor.u32 %v488_v47, %v487_v11  ;;  %v492_v12 = vshrl.u32 %v6354_v1, 16  ;;  %v495_v15 = vshll.u32 %v6354_v1, 16  ;;  %v672_v43 = vld [vmem:[#allocation2 + $0x170] sm:$0xff]  ;;  %v501_v44 = vrot.slane %v499_v40, 7  ;;  %v251_v63 = vld [vmem:[%s6079_s7 + $0xd8] sm:$0xff]  ;;  %4923 = vmatprep.subr.bf16.mxu1 %v5715_v54 }
  0x4b   : > { %v6410_v45 = vsel %vm6143_vm10, %v613_v22, %v672_v43  ;;  %v579_v47 = vld [vmem:[#allocation2 + $0x60] sm:$0xff]  ;;  %v618_v11 = vrot.slane %v502_v41, 1  ;;  %v6432_v51 = vpack.c.bf16 %v251_v63, %v250_v62  ;;  %v328_v2 = vld [vmem:[#allocation2 + $0x70] sm:$0x1]  ;;  %v383_v7 = vsel %vm6095_vm7, 0, %v382_v4  ;;  %v5726_v62 = vld [vmem:[%s7868_s1 + $0x1a8] sm:$0xff]  }
  0x4c   : > { %v494_v24 = vrot.slane %v492_v12, 7  ;;  %v616_v26 = vrot.slane %v495_v15, 1  ;;  %v6395_v39 = vsel %vm6111_vm9, %v490_v10, %v576_v31  ;;  %674 = vst [vmem:[#allocation2 + $0x170] sm:$0xff] %v6410_v45  ;;  %v504_v56 = vor.u32 %v502_v41, %v501_v44  ;;  %384 = vst [vmem:[#allocation2 + $0x188] sm:$0x80] %v383_v7  ;;  %v254_v63 = vld [vmem:[%s6079_s7 + $0xf0] sm:$0xff] }
  0x4d   : > { %578 = vst [vmem:[#allocation2 + $0x58] sm:$0xff] %v6395_v39  ;;  %v329_v61 = vsel %vm6081_vm2, 0, %v328_v2  ;;  %4924 = vmatpush3.bf16.msra.mxu1 %v5716_v60  ;;  %v619_v27 = vor.u32 %v618_v11, %v499_v40  ;;  %v5722_v40 = vld [vmem:[%s7868_s1 + $0x138] sm:$0xff]   ;;  %v385_v41 = vld [vmem:[#allocation2 + $0x190] sm:$0x80] }
  0x4e   : > { %1488 = vmatmul.mubr.bf16.gmra.mrb[16].mxu0 %v6210_v6  ;;  %v326_v6 = vsel %vm6081_vm2, 0, %v325_v23  ;;  %v497_v21 = vor.u32 %v495_v15, %v494_v24  ;;  %v617_v57 = vor.u32 %v616_v26, %v492_v12  ;;  %330 = vst [vmem:[#allocation2 + $0x70] sm:$0x1] %v329_v61  ;;  %v509_v12 = vshll.u32 %v6432_v51, 16  ;;  %v5718_v15 = vld [vmem:[%s7868_s1 + $0x190] sm:$0xff]   ;;  %4925 = vmatprep.subr.bf16.mxu1 %v5717_v8  ;;  %v5719_v23 = vld [vmem:[%s7868_s1 + $0x1d8] sm:$0xff]  }
  0x4f   : > { %1495 = vmatprep.mubr.bf16.mxu0 %v6169_v38  ;;  %327 = vst [vmem:[#allocation2 + $0x68] sm:$0x1] %v326_v6  ;;  %v380_v38 = vsel %vm6095_vm7, 0, %v379_v29  ;;  %v675_v48 = vld [vmem:[#allocation2 + $0x178] sm:$0xff]  ;;  %v252_v29 = vld [vmem:[%s6079_s7 + $0xe0] sm:$0xff]  ;;  %v253_v26 = vld [vmem:[%s6079_s7 + $0xe8] sm:$0xff] }
  0x50   : > { %381 = vst [vmem:[#allocation2 + $0x180] sm:$0x80] %v380_v38  ;;  %1649 = vmatmul.mubr.bf16.gmra.mrb[16].mxu1 %v6249_v37  ;;  %v6415_v37 = vsel %vm6111_vm9, %v497_v21, %v579_v47  ;;  %v6419_v52 = vsel %vm6143_vm10, %v615_v35, %v675_v48  ;;  %v5720_v24 = vld [vmem:[%s7868_s1 + $0x198] sm:$0xff]   ;;  %v620_v31 = vrot.slane %v509_v12, 1  ;;  %v6470_v35 = vpack.c.bf16 %v253_v26, %v252_v29  ;;  %v5723_v48 = vld [vmem:[%s7868_s1 + $0x1e0] sm:$0xff]   ;;  %v5727_v8 = vld [vmem:[%s7868_s1 + $0x1f0] sm:$0xff]  }
  0x51   : > { %1656 = vmatprep.mubr.bf16.mxu1 %v6266_v49  ;;  %581 = vst [vmem:[#allocation2 + $0x60] sm:$0xff] %v6415_v37  ;;  %677 = vst [vmem:[#allocation2 + $0x178] sm:$0xff] %v6419_v52  ;;  %4926 = vmatpush3.bf16.msra.mxu1 %v5718_v15  ;;  %v331_v38 = vld [vmem:[#allocation2 + $0x78] sm:$0x1]  ;;  %v388_v61 = vld [vmem:[#allocation2 + $0x198] sm:$0x80] }
  0x52   : > { %4927 = vmatprep.subr.bf16.mxu1 %v5719_v23  ;;  %v332_v21 = vsel %vm6081_vm2, 0, %v331_v38  ;;  %v513_v43 = vshrl.u32 %v6470_v35, 16  ;;  %v516_v47 = vshll.u32 %v6470_v35, 16  ;;  %v255_v11 = vld [vmem:[%s6079_s7 + $0xf8] sm:$0xff]  ;;  %v389_v7 = vsel %vm6095_vm7, 0, %v388_v61  ;;  %v5731_v29 = vld [vmem:[%s7868_s1 + $0x200] sm:$0xff]  }
  0x53   : > { %v681_v28 = vld [vmem:[#allocation2 + $0x188] sm:$0xff]  ;;  %333 = vst [vmem:[#allocation2 + $0x78] sm:$0x1] %v332_v21  ;;  %v6509_v4 = vpack.c.bf16 %v255_v11, %v254_v63  ;;  %390 = vst [vmem:[#allocation2 + $0x198] sm:$0x80] %v389_v7  ;;  %v5730_v26 = vld [vmem:[%s7868_s1 + $0x1b8] sm:$0xff]  }
  0x54   : > { %v515_v54 = vrot.slane %v513_v43, 7  ;;  %v622_v15 = vrot.slane %v516_v47, 1  ;;  %v5733_v63 = vld [vmem:[%s7868_s1 + $0x210] sm:$0xff]   ;;  %v5734_v11 = vld [vmem:[%s7868_s1 + $0x218] sm:$0xff]   ;;  %v5735_v61 = vld [vmem:[%s7868_s1 + $0x220] sm:$0xff]  }
  0x55   : > { %v585_v42 = vld [vmem:[#allocation2 + $0x70] sm:$0xff]  ;;  %4928 = vmatpush3.bf16.msra.mxu1 %v5720_v24  ;;  %v5736_v7 = vld [vmem:[%s7868_s1 + $0x228] sm:$0xff]  }
  0x56   : > { %1496 = vmatmul.mubr.bf16.gmra.mrb[20].mxu0 %v6241_v30  ;;  %v582_v5 = vld [vmem:[#allocation2 + $0x68] sm:$0xff]  ;;  %4929 = vmatprep.subr.bf16.mxu1 %v5723_v48  ;;  %v518_v60 = vor.u32 %v516_v47, %v515_v54  ;;  %v807_v48 = vld [vmem:[#allocation2 + $0xa0] sm:$0xff]  ;;  %v757_v54 = vld [vmem:[#allocation2 + $0x98] sm:$0xff] }
  0x57   : > { %1503 = vmatprep.mubr.bf16.mxu0 %v6189_v58  ;;  %v6444_v30 = vsel %vm6111_vm9, %v504_v56, %v582_v5  ;;  %v678_v10 = vld [vmem:[#allocation2 + $0x180] sm:$0xff]  ;;  %v506_v58 = vshrl.u32 %v6432_v51, 16 }
  0x58   : > { %584 = vst [vmem:[#allocation2 + $0x68] sm:$0xff] %v6444_v30  ;;  %v6454_v16 = vsel %vm6143_vm10, %v617_v57, %v678_v10  ;;  %1657 = vmatmul.mubr.bf16.gmra.mrb[20].mxu1 %v6270_v0  ;;  %v5721_v0 = vld [vmem:[%s7868_s1 + $0x178] sm:$0xff]   ;;  %v5724_v56 = vld [vmem:[%s7868_s1 + $0x1a0] sm:$0xff]   ;;  %v5725_v57 = vld [vmem:[%s7868_s1 + $0x1e8] sm:$0xff]  }
  0x59   : > { %680 = vst [vmem:[#allocation2 + $0x180] sm:$0xff] %v6454_v16  ;;  %v508_v22 = vrot.slane %v506_v58, 7  ;;  %1664 = vmatprep.mubr.bf16.mxu1 %v6300_v9  ;;  %4823 = vmatprep.subr.bf16.mxu0 %v5721_v0  ;;  %v621_v2 = vor.u32 %v620_v31, %v506_v58  ;;  %v334_v5 = vld [vmem:[#allocation2 + $0x80] sm:$0x1]  ;;  %v520_v58 = vshrl.u32 %v6509_v4, 16  ;;  %v623_v0 = vor.u32 %v622_v15, %v513_v43  ;;  %v5814_v15 = vld [vmem:[#allocation2 + $0xb8] sm:$0xff] }
  0x5a   : > { %4824 = vmatpush3.bf16.msra.mxu0 %v5722_v40  ;;  %4930 = vmatpush3.bf16.msra.mxu1 %v5724_v56  ;;  %v588_v10 = vld [vmem:[#allocation2 + $0x78] sm:$0xff]  ;;  %v6599_v56 = vld [vmem:[#allocation2 + $0x130] sm:$0xff] }
  0x5b   : > { %v511_v6 = vor.u32 %v509_v12, %v508_v22  ;;  %4931 = vmatprep.subr.bf16.mxu1 %v5725_v57  ;;  %v523_v12 = vshll.u32 %v6509_v4, 16  ;;  %v6524_v22 = vsel %vm6111_vm9, %v518_v60, %v588_v10  ;;  %v522_v24 = vrot.slane %v520_v58, 7  ;;  %5529 = vmatprep.subr.bf16.mxu0 %v5731_v29  ;;  %v687_v38 = vld [vmem:[#allocation2 + $0x198] sm:$0xff]  ;;  %v5732_v57 = vld [vmem:[%s7868_s1 + $0x208] sm:$0xff]   ;;  %v790_v60 = vld [vmem:[#allocation2 + $0x10] sm:$0xff] }
  0x5c   : > { %590 = vst [vmem:[#allocation2 + $0x78] sm:$0xff] %v6524_v22  ;;  %v6555_v40 = vsel %vm6143_vm10, %v623_v0, %v687_v38  ;;  %v5813_v10 = vld [vmem:[#allocation2 + $0x140] sm:$0xff]  ;;  %v5819_v0 = vld [vmem:[#allocation2 + $0x30] sm:$0xff]  ;;  %v394_v38 = vld [vmem:[#allocation2 + $0x1a8] sm:$0x80] }
  0x5d   : > { %v6488_v44 = vsel %vm6111_vm9, %v511_v6, %v585_v42  ;;  %v5728_v6 = vld [vmem:[%s7868_s1 + $0x1b0] sm:$0xff]   ;;  %689 = vst [vmem:[#allocation2 + $0x198] sm:$0xff] %v6555_v40  ;;  %v773_v42 = vld [vmem:[#allocation2 + $0x128] sm:$0xff] }
  0x5e   : > { %1504 = vmatmul.mubr.bf16.gmra.mrb[24].mxu0 %v6266_v49  ;;  %v386_v49 = vsel %vm6095_vm7, 0, %v385_v41  ;;  %587 = vst [vmem:[#allocation2 + $0x70] sm:$0xff] %v6488_v44  ;;  %4932 = vmatpush3.bf16.msra.mxu1 %v5726_v62  ;;  %v808_v62 = vld [vmem:[#allocation2 + $0xa8] sm:$0xff] }
  0x5f   : > { %1511 = vmatprep.mubr.bf16.mxu0 %v6223_v14  ;;  %v6492_v14 = vsel %vm6143_vm10, %v619_v27, %v681_v28  ;;  %387 = vst [vmem:[#allocation2 + $0x190] sm:$0x80] %v386_v49  ;;  %4933 = vmatprep.subr.bf16.mxu1 %v5727_v8  ;;  %v525_v27 = vor.u32 %v523_v12, %v522_v24  ;;  %v624_v28 = vrot.slane %v523_v12, 1  ;;  %v792_v8 = vld [vmem:[#allocation2 + $0x20] sm:$0xff]  ;;  %v760_v12 = vld [vmem:[#allocation2 + $0xb0] sm:$0xff]  ;;  %v5815_v24 = vld [vmem:[#allocation2 + $0x148] sm:$0xff] }
  0x60   : > { %683 = vst [vmem:[#allocation2 + $0x188] sm:$0xff] %v6492_v14  ;;  %1665 = vmatmul.mubr.bf16.gmra.mrb[24].mxu1 %v6307_v17  ;;  %v335_v17 = vsel %vm6081_vm2, 0, %v334_v5  ;;  %v5811_v5 = vld [vmem:[#allocation2 + $0x138] sm:$0xff] }
  0x61   : > { %1672 = vmatprep.mubr.bf16.mxu1 %v6323_v32  ;;  %336 = vst [vmem:[#allocation2 + $0x80] sm:$0x1] %v335_v17  ;;  %v625_v43 = vor.u32 %v624_v28, %v520_v58  ;;  %v5812_v17 = vld [vmem:[#allocation2 + $0xb0] sm:$0xff] }
  0x62   : > { %4934 = vmatpush3.bf16.msra.mxu1 %v5728_v6  ;;  %v5737_v58 = vld [vmem:[%s7868_s1 + $0x230] sm:$0xff]   ;;  %v5816_v6 = vld [vmem:[#allocation2 + $0x28] sm:$0xff] }
  0x66   : > { %1512 = vmatmul.mubr.bf16.gmra.mrb[28].mxu0 %v6300_v9  ;;  %v684_v23 = vld [vmem:[#allocation2 + $0x190] sm:$0xff] }
  0x67   : > { %1519 = vmatprep.mubr.bf16.mxu0 %v6243_v33  ;;  %v6529_v9 = vsel %vm6143_vm10, %v621_v2, %v684_v23  ;;  %v5729_v33 = vld [vmem:[%s7868_s1 + $0x1f8] sm:$0xff]  }
  0x68   : > { %686 = vst [vmem:[#allocation2 + $0x190] sm:$0xff] %v6529_v9  ;;  %1673 = vmatmul.mubr.bf16.gmra.mrb[28].mxu1 %v6327_v53  ;;  %v591_v31 = vld [vmem:[#allocation2 + $0x80] sm:$0xff]  ;;  %4935 = vmatprep.subr.bf16.mxu1 %v5729_v33  ;;  %v791_v2 = vld [vmem:[#allocation2 + $0x18] sm:$0xff] }
  0x69   : > { %1680 = vmatprep.mubr.bf16.mxu1 %v6347_v50  ;;  %v6551_v21 = vsel %vm6111_vm9, %v525_v27, %v591_v31  ;;  %4936 = vmatpush3.bf16.msra.mxu1 %v5730_v26  ;;  %v5738_v23 = vld [vmem:[%s7868_s1 + $0x238] sm:$0xff]   ;;  %v5817_v33 = vld [vmem:[#allocation2 + $0xc0] sm:$0xff]  ;;  %v5818_v27 = vld [vmem:[#allocation2 + $0x150] sm:$0xff] }
  0x6a   : > { %593 = vst [vmem:[#allocation2 + $0x80] sm:$0xff] %v6551_v21  ;;  %v5821_v26 = vld [vmem:[#allocation2 + $0x38] sm:$0xff]  ;;  %v5822_v31 = vld [vmem:[#allocation2 + $0xd0] sm:$0xff] }
  0x6e   : > { %1520 = vmatmul.mubr.bf16.gmra.mrb[32].mxu0 %v6323_v32  ;;  %v337_v32 = vld [vmem:[#allocation2 + $0x88] sm:$0x1] }
  0x6f   : > { %1527 = vmatprep.mubr.bf16.mxu0 %v6279_v59  ;;  %v391_v59 = vld [vmem:[#allocation2 + $0x1a0] sm:$0x80]  ;;  %v338_v41 = vsel %vm6081_vm2, 0, %v337_v32  ;;  %v5824_v32 = vld [vmem:[#allocation2 + $0xd8] sm:$0xff] }
  0x70   : > { %1681 = vmatmul.mubr.bf16.gmra.mrb[32].mxu1 %v6362_v3  ;;  %339 = vst [vmem:[#allocation2 + $0x88] sm:$0x1] %v338_v41 }
  0x71   : > { %1688 = vmatprep.mubr.bf16.mxu1 %v6375_v18 }
  0x76   : > { %1528 = vmatmul.mubr.bf16.gmra.mrb[36].mxu0 %v6347_v50 }
  0x77   : > { %1535 = vmatprep.mubr.bf16.mxu0 %v6302_v13  ;;  %v392_v13 = vsel %vm6095_vm7, 0, %v391_v59  ;;  %v395_v59 = vsel %vm6095_vm7, 0, %v394_v38 }
  0x78   : > { %1689 = vmatmul.mubr.bf16.gmra.mrb[36].mxu1 %v6379_v20  ;;  %393 = vst [vmem:[#allocation2 + $0x1a0] sm:$0x80] %v392_v13  ;;  %396 = vst [vmem:[#allocation2 + $0x1a8] sm:$0x80] %v395_v59  ;;  %v5823_v13 = vld [vmem:[#allocation2 + $0x40] sm:$0xff] }
  0x79   : > { %1696 = vmatprep.mubr.bf16.mxu1 %v6395_v39 }
  0x7e   : > { %1536 = vmatmul.mubr.bf16.gmra.mrb[40].mxu0 %v6375_v18 }
  0x7f   : > { %1543 = vmatprep.mubr.bf16.mxu0 %v6329_v36  ;;  %v690_v47 = vld [vmem:[#allocation2 + $0x1a0] sm:$0xff] }
  0x80   : > { %1697 = vmatmul.mubr.bf16.gmra.mrb[40].mxu1 %v6410_v45  ;;  %v6595_v49 = vsel %vm6143_vm10, %v625_v43, %v690_v47 }
  0x81   : > { %1704 = vmatprep.mubr.bf16.mxu1 %v6415_v37  ;;  %692 = vst [vmem:[#allocation2 + $0x1a0] sm:$0xff] %v6595_v49 }
  0x86   : > { %1544 = vmatmul.mubr.bf16.gmra.mrb[44].mxu0 %v6395_v39 }
  0x87   : > { %1551 = vmatprep.mubr.bf16.mxu0 %v6354_v1 }
  0x88   : > { %1705 = vmatmul.mubr.bf16.gmra.mrb[44].mxu1 %v6419_v52 }
  0x89   : > { %1712 = vmatprep.mubr.bf16.mxu1 %v6444_v30 }
  0x8e   : > { %1552 = vmatmul.mubr.bf16.gmra.mrb[48].mxu0 %v6415_v37 }
  0x8f   : > { %1559 = vmatprep.mubr.bf16.mxu0 %v6384_v25 }
  0x90   : > { %1713 = vmatmul.mubr.bf16.gmra.mrb[48].mxu1 %v6454_v16 }
  0x91   : > { %1720 = vmatprep.mubr.bf16.mxu1 %v6488_v44 }
  0x96   : > { %1560 = vmatmul.mubr.bf16.gmra.mrb[52].mxu0 %v6444_v30 }
  0x97   : > { %1567 = vmatprep.mubr.bf16.mxu0 %v6432_v51 }
  0x98   : > { %1721 = vmatmul.mubr.bf16.gmra.mrb[52].mxu1 %v6492_v14 }
  0x99   : > { %1728 = vmatprep.mubr.bf16.mxu1 %v6524_v22 }
  0x9e   : > { %1568 = vmatmul.mubr.bf16.gmra.mrb[56].mxu0 %v6488_v44 }
  0x9f   : > { %1575 = vmatprep.mubr.bf16.mxu0 %v6470_v35 }
  0xa0   : > { %1729 = vmatmul.mubr.bf16.gmra.mrb[56].mxu1 %v6529_v9 }
  0xa1   : > { %1736 = vmatprep.mubr.bf16.mxu1 %v6551_v21 }
  0xa6   : > { %1576 = vmatmul.mubr.bf16.gmra.mrb[60].mxu0 %v6524_v22 }
  0xa7   : > { %1777 = vmatprep.mubr.bf16.mxu0 %v773_v42 }
  0xa8   : > { %1737 = vmatmul.mubr.bf16.gmra.mrb[60].mxu1 %v6555_v40 }
  0xa9   : > { %1938 = vmatprep.mubr.bf16.mxu1 %v807_v48 }
  0xae   : > { %1778 = vmatmul.mubr.bf16.vlgmr.msra.gmra.mrb[64].mxu0 %v757_v54 }
  0xaf   : > { %5530 = vmatpush3.bf16.msra.mxu0 %v5731_v29  ;;  %1785 = vmatprep.mubr.bf16.mxu0 %v6599_v56  ;;  %v5820_v29 = vld [vmem:[#allocation2 + $0xc8] sm:$0xff] }
  0xb0   : > { %5531 = vmatprep.subr.bf16.mxu0 %v5732_v57  ;;  %1939 = vmatmul.mubr.bf16.vlgmr.msra.gmra.mrb[64].mxu1 %v790_v60 }
  0xb1   : > { %1946 = vmatprep.mubr.bf16.mxu1 %v808_v62 }
  0xb3   : > { %5532 = vmatpush3.bf16.msra.mxu0 %v5732_v57 }
  0xb4   : > { %5533 = vmatprep.subr.bf16.mxu0 %v5733_v63 }
  0xb6   : > { %1786 = vmatmul.mubr.bf16.gmra.mrb[68].mxu0 %v807_v48 }
  0xb7   : > { %1793 = vmatprep.mubr.bf16.mxu0 %v5811_v5  ;;  %5534 = vmatpush3.bf16.msra.mxu0 %v5733_v63 }
  0xb8   : > { %5535 = vmatprep.subr.bf16.mxu0 %v5734_v11  ;;  %1947 = vmatmul.mubr.bf16.gmra.mrb[68].mxu1 %v791_v2 }
  0xb9   : > { %1954 = vmatprep.mubr.bf16.mxu1 %v5812_v17 }
  0xbb   : > { %5536 = vmatpush3.bf16.msra.mxu0 %v5734_v11 }
  0xbc   : > { %5537 = vmatprep.subr.bf16.mxu0 %v5735_v61 }
  0xbe   : > { %1794 = vmatmul.mubr.bf16.gmra.mrb[72].mxu0 %v808_v62 }
  0xbf   : > { %1801 = vmatprep.mubr.bf16.mxu0 %v5813_v10  ;;  %5538 = vmatpush3.bf16.msra.mxu0 %v5735_v61 }
  0xc0   : > { %5539 = vmatprep.subr.bf16.mxu0 %v5736_v7  ;;  %1955 = vmatmul.mubr.bf16.gmra.mrb[72].mxu1 %v792_v8 }
  0xc1   : > { %1962 = vmatprep.mubr.bf16.mxu1 %v5814_v15 }
  0xc3   : > { %5540 = vmatpush3.bf16.msra.mxu0 %v5736_v7 }
  0xc4   : > { %5541 = vmatprep.subr.bf16.mxu0 %v5737_v58 }
  0xc6   : > { %1802 = vmatmul.mubr.bf16.gmra.mrb[76].mxu0 %v760_v12 }
  0xc7   : > { %1809 = vmatprep.mubr.bf16.mxu0 %v5815_v24  ;;  %5542 = vmatpush3.bf16.msra.mxu0 %v5737_v58 }
  0xc8   : > { %5543 = vmatprep.subr.bf16.mxu0 %v5738_v23  ;;  %1963 = vmatmul.mubr.bf16.gmra.mrb[76].mxu1 %v5816_v6 }
  0xc9   : > { %1970 = vmatprep.mubr.bf16.mxu1 %v5817_v33 }
  0xcb   : > { %5544 = vmatpush3.bf16.msra.mxu0 %v5738_v23 }
  0xce   : > { %1810 = vmatmul.mubr.bf16.gmra.mrb[80].mxu0 %v5814_v15 }
  0xcf   : > { %1817 = vmatprep.mubr.bf16.mxu0 %v5818_v27 }
  0xd0   : > { %1971 = vmatmul.mubr.bf16.gmra.mrb[80].mxu1 %v5819_v0 }
  0xd1   : > { %1978 = vmatprep.mubr.bf16.mxu1 %v5820_v29 }
  0xd6   : > { %1818 = vmatmul.mubr.bf16.gmra.mrb[84].mxu0 %v5817_v33 }
  0xd7   : > { %1825 = vmatprep.mubr.bf16.mxu0 %v6327_v53  ;;  %v5825_v53 = vld [vmem:[#allocation2 + $0xe0] sm:$0xff] }
  0xd8   : > { %1979 = vmatmul.mubr.bf16.gmra.mrb[84].mxu1 %v5821_v26 }
  0xd9   : > { %1986 = vmatprep.mubr.bf16.mxu1 %v5822_v31 }
  0xde   : > { %1826 = vmatmul.mubr.bf16.gmra.mrb[88].mxu0 %v5820_v29 }
  0xdf   : > { %1833 = vmatprep.mubr.bf16.mxu0 %v6362_v3  ;;  %v5826_v3 = vld [vmem:[#allocation2 + $0xe8] sm:$0xff] }
  0xe0   : > { %1987 = vmatmul.mubr.bf16.gmra.mrb[88].mxu1 %v5823_v13 }
  0xe1   : > { %1994 = vmatprep.mubr.bf16.mxu1 %v5824_v32 }
  0xe6   : > { %1834 = vmatmul.mubr.bf16.gmra.mrb[92].mxu0 %v5822_v31 }
  0xe7   : > { %1841 = vmatprep.mubr.bf16.mxu0 %v6379_v20 }
  0xe8   : > { %1995 = vmatmul.mubr.bf16.gmra.mrb[92].mxu1 %v6347_v50 }
  0xe9   : > { %2002 = vmatprep.mubr.bf16.mxu1 %v5825_v53 }
  0xee   : > { %1842 = vmatmul.mubr.bf16.gmra.mrb[96].mxu0 %v5824_v32 }
  0xef   : > { %1849 = vmatprep.mubr.bf16.mxu0 %v6410_v45 }
  0xf0   : > { %2003 = vmatmul.mubr.bf16.gmra.mrb[96].mxu1 %v6375_v18  ;;  %v6640_v18 = vld [vmem:[%s7869_s2] ss:$0 sm:$0xff] }
  0xf1   : > { %2010 = vmatprep.mubr.bf16.mxu1 %v6329_v36 }
  0xf6   : > { %1850 = vmatmul.mubr.bf16.gmra.mrb[100].mxu0 %v5825_v53 }
  0xf7   : > { %1857 = vmatprep.mubr.bf16.mxu0 %v6419_v52 }
  0xf8   : > { %2011 = vmatmul.mubr.bf16.gmra.mrb[100].mxu1 %v6395_v39 }
  0xf9   : > { %2018 = vmatprep.mubr.bf16.mxu1 %v6354_v1 }
  0xfe   : > { %1858 = vmatmul.mubr.bf16.gmra.mrb[104].mxu0 %v5826_v3 }
  0xff   : > { %1865 = vmatprep.mubr.bf16.mxu0 %v6454_v16 }
 0x100   : > { %2019 = vmatmul.mubr.bf16.gmra.mrb[104].mxu1 %v6415_v37 }
 0x101   : > { %v4601_v50 = vpop.f32.mrb[0].mxu0  ;;  %2026 = vmatprep.mubr.bf16.mxu1 %v6384_v25 }
 0x102   : > { %v4602_v36 = vpop.f32.mrb[1].mxu0 }
 0x103   : > { %v4603_v20 = vadd.f32 %v4602_v36, %v4601_v50  ;;  %v4604_v45 = vpop.f32.mrb[2].mxu0  ;;  %v4713_v41 = vpop.f32.mrb[0].mxu1 }
 0x104   : > { %v4605_v39 = vpop.f32.mrb[3].mxu0  ;;  %v4714_v28 = vpop.f32.mrb[1].mxu1 }
 0x105   : > { %v1458_v52 = vadd.f32 %v4603_v20, %v6640_v18  ;;  %v4606_v42 = vadd.f32 %v4605_v39, %v4604_v45  ;;  %v4715_v16 = vadd.f32 %v4714_v28, %v4713_v41  ;;  %v4716_v43 = vpop.f32.mrb[2].mxu1 }
 0x106   : > { %1866 = vmatmul.mubr.bf16.gmra.mrb[108].mxu0 %v6354_v1  ;;  %v4717_v47 = vpop.f32.mrb[3].mxu1 }
 0x107   : > { %v1461_v37 = vadd.f32 %v4606_v42, %v6640_v18  ;;  %1873 = vmatprep.mubr.bf16.mxu0 %v6492_v14  ;;  %v4718_v48 = vadd.f32 %v4717_v47, %v4716_v43  ;;  %v6647_v57 = vadd.f32 %v4715_v16, %v1458_v52 }
 0x108   : > { %2027 = vmatmul.mubr.bf16.gmra.mrb[108].mxu1 %v6444_v30 }
 0x109   : > { %v4607_v54 = vpop.f32.mrb[4].mxu0  ;;  %2034 = vmatprep.mubr.bf16.mxu1 %v6432_v51  ;;  %v6651_v11 = vadd.f32 %v4718_v48, %v1461_v37 }
 0x10a   : > { %v4608_v60 = vpop.f32.mrb[5].mxu0 }
 0x10b   : > { %v4609_v62 = vadd.f32 %v4608_v60, %v4607_v54  ;;  %v4610_v63 = vpop.f32.mrb[6].mxu0  ;;  %v4719_v5 = vpop.f32.mrb[4].mxu1  ;;  %v5827_v60 = vld [vmem:[#allocation2 + $0x90] sm:$0xff] }
 0x10c   : > { %v4611_v1 = vpop.f32.mrb[7].mxu0  ;;  %v4720_v14 = vpop.f32.mrb[5].mxu1 }
 0x10d   : > { %v1466_v2 = vadd.f32 %v4609_v62, %v6640_v18  ;;  %v4612_v61 = vadd.f32 %v4611_v1, %v4610_v63  ;;  %v4721_v7 = vadd.f32 %v4720_v14, %v4719_v5  ;;  %v4722_v8 = vpop.f32.mrb[6].mxu1  ;;  %v5741_v5 = vld [vmem:[%s7870_s3 + $0x48] sm:$0xff]  }
 0x10e   : > { %1874 = vmatmul.mubr.bf16.gmra.mrb[112].mxu0 %v6384_v25  ;;  %v4723_v30 = vpop.f32.mrb[7].mxu1 }
 0x10f   : > { %v1469_v17 = vadd.f32 %v4612_v61, %v6640_v18  ;;  %1881 = vmatprep.mubr.bf16.mxu0 %v6529_v9  ;;  %v4724_v10 = vadd.f32 %v4723_v30, %v4722_v8  ;;  %v6657_v12 = vadd.f32 %v4721_v7, %v1466_v2  ;;  %v5739_v9 = vld [vmem:[%s7870_s3 + $0x40] sm:$0xff]   ;;  %v805_v8 = vld [vmem:[#allocation2 + $0x88] sm:$0xff] }
 0x110   : > { %2035 = vmatmul.mubr.bf16.gmra.mrb[112].mxu1 %v6488_v44  ;;  %v5740_v44 = vld [vmem:[%s7870_s3] sm:$0xff]   ;;  %5057 = vmatprep.subr.bf16.mxu1 %v5739_v9 }
 0x111   : > { %v4613_v58 = vpop.f32.mrb[8].mxu0  ;;  %2042 = vmatprep.mubr.bf16.mxu1 %v6470_v35  ;;  %v6661_v6 = vadd.f32 %v4724_v10, %v1469_v17  ;;  %5058 = vmatpush3.bf16.msra.mxu1 %v5740_v44 }
 0x112   : > { %v4614_v15 = vpop.f32.mrb[9].mxu0  ;;  %5059 = vmatprep.subr.bf16.mxu1 %v5741_v5 }
 0x113   : > { %v4615_v23 = vadd.f32 %v4614_v15, %v4613_v58  ;;  %v4616_v24 = vpop.f32.mrb[10].mxu0  ;;  %v4725_v27 = vpop.f32.mrb[8].mxu1 }
 0x114   : > { %v4617_v25 = vpop.f32.mrb[11].mxu0  ;;  %v4726_v29 = vpop.f32.mrb[9].mxu1 }
 0x115   : > { %v1474_v33 = vadd.f32 %v4615_v23, %v6640_v18  ;;  %v4618_v0 = vadd.f32 %v4617_v25, %v4616_v24  ;;  %v4727_v31 = vadd.f32 %v4726_v29, %v4725_v27  ;;  %v4728_v38 = vpop.f32.mrb[10].mxu1 }
 0x116   : > { %1882 = vmatmul.mubr.bf16.gmra.mrb[116].mxu0 %v6432_v51  ;;  %v4729_v59 = vpop.f32.mrb[11].mxu1 }
 0x117   : > { %v1477_v26 = vadd.f32 %v4618_v0, %v6640_v18  ;;  %1889 = vmatprep.mubr.bf16.mxu0 %v6555_v40  ;;  %v4730_v13 = vadd.f32 %v4729_v59, %v4728_v38  ;;  %v6673_v53 = vadd.f32 %v4727_v31, %v1474_v33  ;;  %v825_v33 = vld [vmem:[#allocation2 + $0x138] sm:$0xff]  ;;  %v826_v0 = vld [vmem:[#allocation2 + $0x140] sm:$0xff] }
 0x118   : > { %2043 = vmatmul.mubr.bf16.gmra.mrb[116].mxu1 %v6524_v22 }
 0x119   : > { %v4619_v32 = vpop.f32.mrb[12].mxu0  ;;  %2050 = vmatprep.mubr.bf16.mxu1 %v6509_v4  ;;  %v6677_v51 = vadd.f32 %v4730_v13, %v1477_v26 }
 0x11a   : > { %v4620_v3 = vpop.f32.mrb[13].mxu0 }
 0x11b   : > { %v4621_v50 = vadd.f32 %v4620_v3, %v4619_v32  ;;  %v4622_v36 = vpop.f32.mrb[14].mxu0  ;;  %v4731_v40 = vpop.f32.mrb[12].mxu1 }
 0x11c   : > { %v4623_v20 = vpop.f32.mrb[15].mxu0  ;;  %v4732_v52 = vpop.f32.mrb[13].mxu1 }
 0x11d   : > { %v1482_v45 = vadd.f32 %v4621_v50, %v6640_v18  ;;  %v4624_v39 = vadd.f32 %v4623_v20, %v4622_v36  ;;  %v4733_v42 = vadd.f32 %v4732_v52, %v4731_v40  ;;  %v4734_v28 = vpop.f32.mrb[14].mxu1  ;;  %v828_v52 = vld [vmem:[#allocation2 + $0x150] sm:$0xff] }
 0x11e   : > { %1890 = vmatmul.mubr.bf16.gmra.mrb[120].mxu0 %v6470_v35  ;;  %v4735_v22 = vpop.f32.mrb[15].mxu1 }
 0x11f   : > { %v1485_v41 = vadd.f32 %v4624_v39, %v6640_v18  ;;  %1897 = vmatprep.mubr.bf16.mxu0 %v6595_v49  ;;  %v4736_v37 = vadd.f32 %v4735_v22, %v4734_v28  ;;  %v6683_v43 = vadd.f32 %v4733_v42, %v1482_v45  ;;  %v827_v45 = vld [vmem:[#allocation2 + $0x148] sm:$0xff]  ;;  %v5743_v22 = vld [vmem:[%s7870_s3 + $0x50] sm:$0xff]  }
 0x120   : > { %2051 = vmatmul.mubr.bf16.gmra.mrb[120].mxu1 %v6551_v21  ;;  %v5742_v21 = vld [vmem:[%s7870_s3 + $0x8] sm:$0xff]  }
 0x121   : > { %v4625_v16 = vpop.f32.mrb[16].mxu0  ;;  %2058 = vmatprep.mubr.bf16.mxu1 %v5827_v60  ;;  %v6686_v62 = vadd.f32 %v4736_v37, %v1485_v41  ;;  %5060 = vmatpush3.bf16.msra.mxu1 %v5742_v21  ;;  %v5744_v37 = vld [vmem:[%s7870_s3 + $0x10] sm:$0xff]  }
 0x122   : > { %v4626_v47 = vpop.f32.mrb[17].mxu0  ;;  %5061 = vmatprep.subr.bf16.mxu1 %v5743_v22 }
 0x123   : > { %v4627_v48 = vadd.f32 %v4626_v47, %v4625_v16  ;;  %v4628_v54 = vpop.f32.mrb[18].mxu0  ;;  %v4737_v1 = vpop.f32.mrb[16].mxu1 }
 0x124   : > { %v4629_v35 = vpop.f32.mrb[19].mxu0  ;;  %v4738_v61 = vpop.f32.mrb[17].mxu1 }
 0x125   : > { %v1490_v63 = vadd.f32 %v4627_v48, %v6640_v18  ;;  %v4630_v2 = vadd.f32 %v4629_v35, %v4628_v54  ;;  %v4739_v17 = vadd.f32 %v4738_v61, %v4737_v1  ;;  %v4740_v7 = vpop.f32.mrb[18].mxu1  ;;  %5062 = vmatpush3.bf16.msra.mxu1 %v5744_v37  ;;  %v829_v61 = vld [vmem:[#allocation2 + $0x158] sm:$0xff] }
 0x126   : > { %1898 = vmatmul.mubr.bf16.gmra.mrb[124].mxu0 %v6509_v4  ;;  %v4741_v30 = vpop.f32.mrb[19].mxu1 }
 0x127   : > { %v1493_v14 = vadd.f32 %v4630_v2, %v6640_v18  ;;  %5545 = vmatprep.mubr.bf16.mxu0 %v6599_v56  ;;  %v4742_v10 = vadd.f32 %v4741_v30, %v4740_v7  ;;  %v6698_v15 = vadd.f32 %v4739_v17, %v1490_v63  ;;  %v830_v7 = vld [vmem:[#allocation2 + $0x160] sm:$0xff] }
 0x128   : > { %2059 = vmatmul.mubr.bf16.gmra.mrb[124].mxu1 %v805_v8 }
 0x129   : > { %v4631_v58 = vpop.f32.mrb[20].mxu0  ;;  %v6700_v4 = vadd.f32 %v4742_v10, %v1493_v14  ;;  %3448 = vmatprep.mubr.bf16.mxu1 %v5827_v60 }
 0x12a   : > { %v4632_v23 = vpop.f32.mrb[21].mxu0 }
 0x12b   : > { %v4633_v24 = vadd.f32 %v4632_v23, %v4631_v58  ;;  %v4634_v25 = vpop.f32.mrb[22].mxu0  ;;  %v4743_v56 = vpop.f32.mrb[20].mxu1 }
 0x12c   : > { %v4635_v27 = vpop.f32.mrb[23].mxu0  ;;  %v4744_v29 = vpop.f32.mrb[21].mxu1 }
 0x12d   : > { %v1498_v9 = vadd.f32 %v4633_v24, %v6640_v18  ;;  %v4636_v44 = vadd.f32 %v4635_v27, %v4634_v25  ;;  %v4745_v31 = vadd.f32 %v4744_v29, %v4743_v56  ;;  %v4746_v38 = vpop.f32.mrb[22].mxu1 }
 0x12e   : > { %5546 = vmatmul.mubr.bf16.vlgmr.msra.gmra.mrb[128].mxu0 %v825_v33  ;;  %v4747_v59 = vpop.f32.mrb[23].mxu1 }
 0x12f   : > { %v1501_v26 = vadd.f32 %v4636_v44, %v6640_v18  ;;  %5549 = vmatprep.mubr.bf16.mxu0 %v826_v0  ;;  %v4748_v13 = vadd.f32 %v4747_v59, %v4746_v38  ;;  %v6704_v3 = vadd.f32 %v4745_v31, %v1498_v9  ;;  %v832_v59 = vld [vmem:[#allocation2 + $0x170] sm:$0xff] }
 0x131   : > { %v4637_v32 = vpop.f32.mrb[24].mxu0  ;;  %v6706_v40 = vadd.f32 %v4748_v13, %v1501_v26  ;;  %v831_v26 = vld [vmem:[#allocation2 + $0x168] sm:$0xff] }
 0x132   : > { %v4638_v50 = vpop.f32.mrb[25].mxu0 }
 0x133   : > { %v4639_v36 = vadd.f32 %v4638_v50, %v4637_v32  ;;  %v4640_v20 = vpop.f32.mrb[26].mxu0  ;;  %v4749_v42 = vpop.f32.mrb[24].mxu1 }
 0x134   : > { %v4641_v39 = vpop.f32.mrb[27].mxu0  ;;  %v4750_v16 = vpop.f32.mrb[25].mxu1 }
 0x135   : > { %v1506_v41 = vadd.f32 %v4639_v36, %v6640_v18  ;;  %v4642_v28 = vadd.f32 %v4641_v39, %v4640_v20  ;;  %v4751_v48 = vadd.f32 %v4750_v16, %v4749_v42  ;;  %v4752_v54 = vpop.f32.mrb[26].mxu1  ;;  %v5745_v36 = vld [vmem:[%s7870_s3 + $0x58] sm:$0xff]  }
 0x136   : > { %5550 = vmatmul.mubr.bf16.gmra.mrb[132].mxu0 %v827_v45  ;;  %v4753_v60 = vpop.f32.mrb[27].mxu1  ;;  %v5746_v20 = vld [vmem:[%s7870_s3 + $0x18] sm:$0xff]   ;;  %5063 = vmatprep.subr.bf16.mxu1 %v5745_v36 }
 0x137   : > { %v1509_v47 = vadd.f32 %v4642_v28, %v6640_v18  ;;  %5553 = vmatprep.mubr.bf16.mxu0 %v828_v52  ;;  %v4754_v35 = vadd.f32 %v4753_v60, %v4752_v54  ;;  %v6716_v1 = vadd.f32 %v4751_v48, %v1506_v41  ;;  %5064 = vmatpush3.bf16.msra.mxu1 %v5746_v20  ;;  %v833_v60 = vld [vmem:[#allocation2 + $0x178] sm:$0xff]  ;;  %v5829_v20 = vld [vmem:[#allocation2 + $0x190] sm:$0xff] }
 0x139   : > { %v4643_v63 = vpop.f32.mrb[28].mxu0  ;;  %v6718_v14 = vadd.f32 %v4754_v35, %v1509_v47 }
 0x13a   : > { %v4644_v2 = vpop.f32.mrb[29].mxu0 }
 0x13b   : > { %v4645_v5 = vadd.f32 %v4644_v2, %v4643_v63  ;;  %v4646_v21 = vpop.f32.mrb[30].mxu0  ;;  %v4755_v30 = vpop.f32.mrb[28].mxu1  ;;  %v834_v63 = vld [vmem:[#allocation2 + $0x180] sm:$0xff] }
 0x13c   : > { %v4647_v17 = vpop.f32.mrb[31].mxu0  ;;  %v4756_v58 = vpop.f32.mrb[29].mxu1 }
 0x13d   : > { %v1514_v8 = vadd.f32 %v4645_v5, %v6640_v18  ;;  %v4648_v10 = vadd.f32 %v4647_v17, %v4646_v21  ;;  %v4757_v24 = vadd.f32 %v4756_v58, %v4755_v30  ;;  %v4758_v25 = vpop.f32.mrb[30].mxu1 }
 0x13e   : > { %5554 = vmatmul.mubr.bf16.gmra.mrb[136].mxu0 %v829_v61  ;;  %v4759_v33 = vpop.f32.mrb[31].mxu1 }
 0x13f   : > { %v1517_v23 = vadd.f32 %v4648_v10, %v6640_v18  ;;  %5557 = vmatprep.mubr.bf16.mxu0 %v830_v7  ;;  %v4760_v27 = vadd.f32 %v4759_v33, %v4758_v25  ;;  %v6722_v9 = vadd.f32 %v4757_v24, %v1514_v8 }
 0x141   : > { %v4649_v0 = vpop.f32.mrb[32].mxu0  ;;  %v6724_v31 = vadd.f32 %v4760_v27, %v1517_v23 }
 0x142   : > { %v4650_v56 = vpop.f32.mrb[33].mxu0 }
 0x143   : > { %v4651_v44 = vadd.f32 %v4650_v56, %v4649_v0  ;;  %v4652_v29 = vpop.f32.mrb[34].mxu0  ;;  %v4761_v32 = vpop.f32.mrb[32].mxu1 }
 0x144   : > { %v4653_v38 = vpop.f32.mrb[35].mxu0  ;;  %v4762_v45 = vpop.f32.mrb[33].mxu1 }
 0x145   : > { %v1522_v13 = vadd.f32 %v4651_v44, %v6640_v18  ;;  %v4654_v50 = vadd.f32 %v4653_v38, %v4652_v29  ;;  %v4763_v52 = vadd.f32 %v4762_v45, %v4761_v32  ;;  %v4764_v41 = vpop.f32.mrb[34].mxu1  ;;  %v5748_v38 = vld [vmem:[%s7870_s3 + $0x20] sm:$0xff]  }
 0x146   : > { %5558 = vmatmul.mubr.bf16.gmra.mrb[140].mxu0 %v831_v26  ;;  %v4765_v42 = vpop.f32.mrb[35].mxu1  ;;  %v5747_v26 = vld [vmem:[%s7870_s3 + $0x60] sm:$0xff]  }
 0x147   : > { %v1525_v39 = vadd.f32 %v4654_v50, %v6640_v18  ;;  %5561 = vmatprep.mubr.bf16.mxu0 %v832_v59  ;;  %v6734_v28 = vadd.f32 %v4763_v52, %v1522_v13  ;;  %v4766_v22 = vadd.f32 %v4765_v42, %v4764_v41  ;;  %v5828_v13 = vld [vmem:[#allocation2 + $0x188] sm:$0xff]  ;;  %5065 = vmatprep.subr.bf16.mxu1 %v5747_v26 }
 0x148   : > { %5066 = vmatpush3.bf16.msra.mxu1 %v5748_v38  ;;  %v5750_v26 = vld [vmem:[%s7870_s3 + $0x28] sm:$0xff]  }
 0x149   : > { %v4655_v37 = vpop.f32.mrb[36].mxu0  ;;  %v6736_v47 = vadd.f32 %v4766_v22, %v1525_v39 }
 0x14a   : > { %v4656_v16 = vpop.f32.mrb[37].mxu0 }
 0x14b   : > { %v4657_v48 = vadd.f32 %v4656_v16, %v4655_v37  ;;  %v4658_v54 = vpop.f32.mrb[38].mxu0  ;;  %v4767_v5 = vpop.f32.mrb[36].mxu1 }
 0x14c   : > { %v4659_v35 = vpop.f32.mrb[39].mxu0  ;;  %v4768_v61 = vpop.f32.mrb[37].mxu1 }
 0x14d   : > { %v1530_v2 = vadd.f32 %v4657_v48, %v6640_v18  ;;  %v4660_v21 = vadd.f32 %v4659_v35, %v4658_v54  ;;  %v4769_v7 = vadd.f32 %v4768_v61, %v4767_v5  ;;  %v4770_v8 = vpop.f32.mrb[38].mxu1 }
 0x14e   : > { %5562 = vmatmul.mubr.bf16.gmra.mrb[144].mxu0 %v833_v60  ;;  %v4771_v30 = vpop.f32.mrb[39].mxu1 }
 0x14f   : > { %v1533_v17 = vadd.f32 %v4660_v21, %v6640_v18  ;;  %5565 = vmatprep.mubr.bf16.mxu0 %v834_v63  ;;  %v6740_v10 = vadd.f32 %v4769_v7, %v1530_v2  ;;  %v4772_v58 = vadd.f32 %v4771_v30, %v4770_v8  ;;  %v5830_v2 = vld [vmem:[#allocation2 + $0x198] sm:$0xff] }
 0x151   : > { %v4661_v23 = vpop.f32.mrb[40].mxu0  ;;  %v6742_v25 = vadd.f32 %v4772_v58, %v1533_v17 }
 0x152   : > { %v4662_v24 = vpop.f32.mrb[41].mxu0 }
 0x153   : > { %v4663_v33 = vadd.f32 %v4662_v24, %v4661_v23  ;;  %v4664_v27 = vpop.f32.mrb[42].mxu0  ;;  %v4773_v44 = vpop.f32.mrb[40].mxu1 }
 0x154   : > { %v4665_v0 = vpop.f32.mrb[43].mxu0  ;;  %v4774_v59 = vpop.f32.mrb[41].mxu1 }
 0x155   : > { %v1538_v56 = vadd.f32 %v4663_v33, %v6640_v18  ;;  %v4666_v29 = vadd.f32 %v4665_v0, %v4664_v27  ;;  %v4775_v50 = vadd.f32 %v4774_v59, %v4773_v44  ;;  %v4776_v36 = vpop.f32.mrb[42].mxu1  ;;  %v839_v27 = vld [vmem:[#allocation2 + $0x1a8] sm:$0xff] }
 0x156   : > { %5566 = vmatmul.mubr.bf16.gmra.mrb[148].mxu0 %v5828_v13  ;;  %v4777_v45 = vpop.f32.mrb[43].mxu1 }
 0x157   : > { %v1541_v32 = vadd.f32 %v4666_v29, %v6640_v18  ;;  %5569 = vmatprep.mubr.bf16.mxu0 %v5829_v20  ;;  %v6752_v39 = vadd.f32 %v4775_v50, %v1538_v56  ;;  %v4778_v52 = vadd.f32 %v4777_v45, %v4776_v36 }
 0x159   : > { %v4667_v41 = vpop.f32.mrb[44].mxu0  ;;  %v6754_v22 = vadd.f32 %v4778_v52, %v1541_v32 }
 0x15a   : > { %v4668_v42 = vpop.f32.mrb[45].mxu0 }
 0x15b   : > { %v4669_v37 = vadd.f32 %v4668_v42, %v4667_v41  ;;  %v4670_v16 = vpop.f32.mrb[46].mxu0  ;;  %v4779_v60 = vpop.f32.mrb[44].mxu1 }
 0x15c   : > { %v4671_v48 = vpop.f32.mrb[47].mxu0  ;;  %v4780_v63 = vpop.f32.mrb[45].mxu1 }
 0x15d   : > { %v1546_v54 = vadd.f32 %v4669_v37, %v6640_v18  ;;  %v4672_v35 = vadd.f32 %v4671_v48, %v4670_v16  ;;  %v4781_v21 = vadd.f32 %v4780_v63, %v4779_v60  ;;  %v4782_v61 = vpop.f32.mrb[46].mxu1 }
 0x15e   : > { %5570 = vmatmul.mubr.bf16.gmra.mrb[152].mxu0 %v5830_v2  ;;  %v4783_v17 = vpop.f32.mrb[47].mxu1 }
 0x15f   : > { %v1549_v5 = vadd.f32 %v4672_v35, %v6640_v18  ;;  %5573 = vmatprep.mubr.bf16.mxu0 %v6595_v49  ;;  %v6759_v7 = vadd.f32 %v4781_v21, %v1546_v54  ;;  %v4784_v8 = vadd.f32 %v4783_v17, %v4782_v61  ;;  %v5749_v49 = vld [vmem:[%s7870_s3 + $0x68] sm:$0xff]  }
 0x160   : > { %5067 = vmatprep.subr.bf16.mxu1 %v5749_v49 }
 0x161   : > { %v4673_v30 = vpop.f32.mrb[48].mxu0  ;;  %v6761_v23 = vadd.f32 %v4784_v8, %v1549_v5  ;;  %5068 = vmatpush3.bf16.msra.mxu1 %v5750_v26  ;;  %v5751_v26 = vld [vmem:[%s7870_s3 + $0x70] sm:$0xff]  }
 0x162   : > { %v4674_v58 = vpop.f32.mrb[49].mxu0  ;;  %5069 = vmatprep.subr.bf16.mxu1 %v5751_v26 }
 0x163   : > { %v4675_v24 = vadd.f32 %v4674_v58, %v4673_v30  ;;  %v4676_v33 = vpop.f32.mrb[50].mxu0  ;;  %v4785_v44 = vpop.f32.mrb[48].mxu1 }
 0x164   : > { %v4677_v0 = vpop.f32.mrb[51].mxu0  ;;  %v4786_v38 = vpop.f32.mrb[49].mxu1 }
 0x165   : > { %v1554_v56 = vadd.f32 %v4675_v24, %v6640_v18  ;;  %v4678_v29 = vadd.f32 %v4677_v0, %v4676_v33  ;;  %v4787_v13 = vadd.f32 %v4786_v38, %v4785_v44  ;;  %v4788_v32 = vpop.f32.mrb[50].mxu1  ;;  %v5752_v38 = vld [vmem:[%s7870_s3 + $0x30] sm:$0xff]  }
 0x166   : > { %5574 = vmatmul.mubr.bf16.gmra.mrb[156].mxu0 %v839_v27  ;;  %v4789_v50 = vpop.f32.mrb[51].mxu1  ;;  %v5753_v27 = vld [vmem:[%s7870_s3 + $0xc0] sm:$0xff]   ;;  %5070 = vmatpush3.bf16.msra.mxu1 %v5752_v38 }
 0x167   : > { %v1557_v59 = vadd.f32 %v4678_v29, %v6640_v18  ;;  %v6771_v36 = vadd.f32 %v4787_v13, %v1554_v56  ;;  %v4790_v20 = vadd.f32 %v4789_v50, %v4788_v32  ;;  %v5754_v56 = vld [vmem:[%s7870_s3 + $0x80] sm:$0xff]   ;;  %5169 = vmatprep.subr.bf16.mxu0 %v5753_v27 }
 0x168   : > { %5170 = vmatpush3.bf16.msra.mxu0 %v5754_v56  ;;  %v2287_v56 = vld [vmem:[#allocation3] sm:$0x1] }
 0x169   : > { %v4679_v45 = vpop.f32.mrb[52].mxu0  ;;  %v6773_v41 = vadd.f32 %v4790_v20, %v1557_v59  ;;  %v5755_v20 = vld [vmem:[%s7870_s3 + $0xc8] sm:$0xff]  }
 0x16a   : > { %v4680_v52 = vpop.f32.mrb[53].mxu0  ;;  %5171 = vmatprep.subr.bf16.mxu0 %v5755_v20  ;;  %v5757_v20 = vld [vmem:[%s7870_s3 + $0x78] sm:$0xff]  }
 0x16b   : > { %v4681_v42 = vadd.f32 %v4680_v52, %v4679_v45  ;;  %v4682_v37 = vpop.f32.mrb[54].mxu0  ;;  %v4791_v54 = vpop.f32.mrb[52].mxu1  ;;  %v5756_v52 = vld [vmem:[%s7870_s3 + $0x88] sm:$0xff]   ;;  %5071 = vmatprep.subr.bf16.mxu1 %v5757_v20 }
 0x16c   : > { %v4683_v16 = vpop.f32.mrb[55].mxu0  ;;  %v4792_v35 = vpop.f32.mrb[53].mxu1  ;;  %5172 = vmatpush3.bf16.msra.mxu0 %v5756_v52 }
 0x16d   : > { %v1562_v48 = vadd.f32 %v4681_v42, %v6640_v18  ;;  %v4684_v60 = vadd.f32 %v4683_v16, %v4682_v37  ;;  %v4793_v2 = vadd.f32 %v4792_v35, %v4791_v54  ;;  %v4794_v5 = vpop.f32.mrb[54].mxu1 }
 0x16e   : > { %v4795_v21 = vpop.f32.mrb[55].mxu1 }
 0x16f   : > { %v1565_v63 = vadd.f32 %v4684_v60, %v6640_v18  ;;  %v6777_v61 = vadd.f32 %v4793_v2, %v1562_v48  ;;  %v4796_v17 = vadd.f32 %v4795_v21, %v4794_v5  ;;  %v5760_v5 = vld [vmem:[%s7870_s3 + $0x90] sm:$0xff]  }
 0x171   : > { %v4685_v8 = vpop.f32.mrb[56].mxu0  ;;  %v6779_v58 = vadd.f32 %v4796_v17, %v1565_v63  ;;  %v5759_v63 = vld [vmem:[%s7870_s3 + $0xd0] sm:$0xff]  }
 0x172   : > { %v4686_v30 = vpop.f32.mrb[57].mxu0  ;;  %5173 = vmatprep.subr.bf16.mxu0 %v5759_v63 }
 0x173   : > { %v4687_v24 = vadd.f32 %v4686_v30, %v4685_v8  ;;  %v4688_v33 = vpop.f32.mrb[58].mxu0  ;;  %v4797_v29 = vpop.f32.mrb[56].mxu1  ;;  %5174 = vmatpush3.bf16.msra.mxu0 %v5760_v5 }
 0x174   : > { %v4689_v0 = vpop.f32.mrb[59].mxu0  ;;  %v4798_v59 = vpop.f32.mrb[57].mxu1 }
 0x175   : > { %v1570_v44 = vadd.f32 %v4687_v24, %v6640_v18  ;;  %v4690_v49 = vadd.f32 %v4689_v0, %v4688_v33  ;;  %v4799_v32 = vadd.f32 %v4798_v59, %v4797_v29  ;;  %v4800_v50 = vpop.f32.mrb[58].mxu1  ;;  %v5761_v0 = vld [vmem:[%s7870_s3 + $0xd8] sm:$0xff]  }
 0x176   : > { %v4801_v45 = vpop.f32.mrb[59].mxu1  ;;  %v5762_v29 = vld [vmem:[%s7870_s3 + $0x98] sm:$0xff]   ;;  %5175 = vmatprep.subr.bf16.mxu0 %v5761_v0 }
 0x177   : > { %v1573_v13 = vadd.f32 %v4690_v49, %v6640_v18  ;;  %v6801_v42 = vadd.f32 %v4799_v32, %v1570_v44  ;;  %v4802_v37 = vadd.f32 %v4801_v45, %v4800_v50  ;;  %v2288_v49 = vsel %vm6081_vm2, 0, %v2287_v56  ;;  %5176 = vmatpush3.bf16.msra.mxu0 %v5762_v29  ;;  %v5763_v45 = vld [vmem:[%s7870_s3 + $0xe0] sm:$0xff]   ;;  %v5766_v29 = vld [vmem:[%s7870_s3 + $0xa8] sm:$0xff]  }
 0x178   : > { %2289 = vst [vmem:[#allocation3] sm:$0x1] %v2288_v49  ;;  %5177 = vmatprep.subr.bf16.mxu0 %v5763_v45  ;;  %v5768_v45 = vld [vmem:[%s7870_s3 + $0xf0] sm:$0xff]  }
 0x179   : > { %v4691_v16 = vpop.f32.mrb[60].mxu0  ;;  %v6803_v54 = vadd.f32 %v4802_v37, %v1573_v13  ;;  %v5758_v37 = vld [vmem:[%s7870_s3 + $0x38] sm:$0xff]  }
 0x17a   : > { %v4692_v48 = vpop.f32.mrb[61].mxu0  ;;  %5072 = vmatpush3.bf16.msra.mxu1 %v5758_v37 }
 0x17b   : > { %v4693_v60 = vadd.f32 %v4692_v48, %v4691_v16  ;;  %v4694_v35 = vpop.f32.mrb[62].mxu0  ;;  %v4803_v17 = vpop.f32.mrb[60].mxu1  ;;  %v5764_v16 = vld [vmem:[%s7870_s3 + $0xa0] sm:$0xff]  }
 0x17c   : > { %v4695_v2 = vpop.f32.mrb[63].mxu0  ;;  %v4804_v30 = vpop.f32.mrb[61].mxu1  ;;  %5178 = vmatpush3.bf16.msra.mxu0 %v5764_v16  ;;  %v5770_v16 = vld [vmem:[%s7870_s3 + $0xb0] sm:$0xff]  }
 0x17d   : > { %v1578_v21 = vadd.f32 %v4693_v60, %v6640_v18  ;;  %v4696_v8 = vadd.f32 %v4695_v2, %v4694_v35  ;;  %v4805_v33 = vadd.f32 %v4804_v30, %v4803_v17  ;;  %v4806_v27 = vpop.f32.mrb[62].mxu1  ;;  %v5765_v17 = vld [vmem:[%s7870_s3 + $0xe8] sm:$0xff]   ;;  %v2293_v30 = vld [vmem:[#allocation3 + $0x10] sm:$0x1] }
 0x17e   : > { %v4807_v44 = vpop.f32.mrb[63].mxu1  ;;  %v2294_v56 = vsel %vm6081_vm2, 0, %v2293_v30  ;;  %5179 = vmatprep.subr.bf16.mxu0 %v5765_v17 }
 0x17f   : > { %v1581_v24 = vadd.f32 %v4696_v8, %v6640_v18  ;;  %v6821_v26 = vadd.f32 %v4805_v33, %v1578_v21  ;;  %v4808_v38 = vadd.f32 %v4807_v44, %v4806_v27  ;;  %v2686_v33 = vld [vmem:[#allocation3] sm:$0xff]  ;;  %v2290_v44 = vld [vmem:[#allocation3 + $0x8] sm:$0x1]  ;;  %2295 = vst [vmem:[#allocation3 + $0x10] sm:$0x1] %v2294_v56 }
 0x180   : > { %3449 = vmatmul.mubr.bf16.vlgmr.msra.gmra.mrb[128].mxu1 %v2686_v33  ;;  %5180 = vmatpush3.bf16.msra.mxu0 %v5766_v29  ;;  %v2353_v33 = vld [vmem:[#allocation3 + $0x140] sm:$0x80]  ;;  %v2296_v29 = vld [vmem:[#allocation3 + $0x18] sm:$0x1] }
 0x181   : > { %v4825_v59 = vpop.f32.mrb[64].mxu0  ;;  %v6823_v13 = vadd.f32 %v4808_v38, %v1581_v24  ;;  %v2347_v24 = vld [vmem:[#allocation3 + $0x130] sm:$0x80]  ;;  %v2291_v38 = vsel %vm6081_vm2, 0, %v2290_v44  ;;  %5181 = vmatprep.subr.bf16.mxu0 %v5768_v45 }
 0x182   : > { %v4826_v18 = vpop.f32.mrb[65].mxu0  ;;  %2292 = vst [vmem:[#allocation3 + $0x8] sm:$0x1] %v2291_v38 }
 0x183   : > { %v4827_v32 = vadd.f32 %v4826_v18, %v4825_v59  ;;  %v4828_v50 = vpop.f32.mrb[66].mxu0  ;;  %v4937_v60 = vpop.f32.mrb[64].mxu1  ;;  %v2344_v59 = vld [vmem:[#allocation3 + $0x128] sm:$0x80] }
 0x184   : > { %v4829_v52 = vpop.f32.mrb[67].mxu0  ;;  %v4938_v63 = vpop.f32.mrb[65].mxu1  ;;  %v2345_v20 = vsel %vm6095_vm7, 0, %v2344_v59  ;;  %5182 = vmatpush3.bf16.msra.mxu0 %v5770_v16 }
 0x185   : > { %v1780_v48 = vadd.f32 %v4827_v32, %v6647_v57  ;;  %v4830_v35 = vadd.f32 %v4829_v52, %v4828_v50  ;;  %v4939_v5 = vadd.f32 %v4938_v63, %v4937_v60  ;;  %v4940_v21 = vpop.f32.mrb[66].mxu1  ;;  %v2341_v52 = vld [vmem:[#allocation3 + $0x120] sm:$0x80]  ;;  %2346 = vst [vmem:[#allocation3 + $0x128] sm:$0x80] %v2345_v20 }
 0x186   : > { %v4941_v8 = vpop.f32.mrb[67].mxu1 }
 0x187   : > { %v1783_v2 = vadd.f32 %v4830_v35, %v6651_v11  ;;  %v4942_v57 = vadd.f32 %v4941_v8, %v4940_v21  ;;  %v6842_v0 = vadd.f32 %v4939_v5, %v1780_v48  ;;  %v2348_v11 = vsel %vm6095_vm7, 0, %v2347_v24  ;;  %v5771_v8 = vld [vmem:[%s7870_s3 + $0xf8] sm:$0xff]   ;;  %v2299_v24 = vld [vmem:[#allocation3 + $0x20] sm:$0x1] }
 0x188   : > { %2349 = vst [vmem:[#allocation3 + $0x130] sm:$0x80] %v2348_v11  ;;  %v2342_v48 = vsel %vm6095_vm7, 0, %v2341_v52  ;;  %v2354_v11 = vsel %vm6095_vm7, 0, %v2353_v33  ;;  %5183 = vmatprep.subr.bf16.mxu0 %v5771_v8 }
 0x189   : > { %v4831_v27 = vpop.f32.mrb[68].mxu0  ;;  %v6853_v50 = vadd.f32 %v4942_v57, %v1783_v2  ;;  %2343 = vst [vmem:[#allocation3 + $0x120] sm:$0x80] %v2342_v48  ;;  %2355 = vst [vmem:[#allocation3 + $0x140] sm:$0x80] %v2354_v11 }
 0x18a   : > { %v4832_v49 = vpop.f32.mrb[69].mxu0 }
 0x18b   : > { %v4833_v18 = vadd.f32 %v4832_v49, %v4831_v27  ;;  %v4834_v32 = vpop.f32.mrb[70].mxu0  ;;  %v4943_v35 = vpop.f32.mrb[68].mxu1  ;;  %v2350_v49 = vld [vmem:[#allocation3 + $0x138] sm:$0x80] }
 0x18c   : > { %v4835_v37 = vpop.f32.mrb[71].mxu0  ;;  %v4944_v2 = vpop.f32.mrb[69].mxu1  ;;  %v2351_v20 = vsel %vm6095_vm7, 0, %v2350_v49 }
 0x18d   : > { %v1788_v60 = vadd.f32 %v4833_v18, %v6657_v12  ;;  %v4836_v63 = vadd.f32 %v4835_v37, %v4834_v32  ;;  %v4945_v21 = vadd.f32 %v4944_v2, %v4943_v35  ;;  %v4946_v17 = vpop.f32.mrb[70].mxu1  ;;  %v5772_v12 = vld [vmem:[%s7870_s3 + $0xb8] sm:$0xff]   ;;  %v2297_v32 = vsel %vm6081_vm2, 0, %v2296_v29  ;;  %2352 = vst [vmem:[#allocation3 + $0x138] sm:$0x80] %v2351_v20 }
 0x18e   : > { %v4947_v30 = vpop.f32.mrb[71].mxu1  ;;  %5184 = vmatpush3.bf16.msra.mxu0 %v5772_v12  ;;  %2298 = vst [vmem:[#allocation3 + $0x18] sm:$0x1] %v2297_v32  ;;  %v2302_v12 = vld [vmem:[#allocation3 + $0x28] sm:$0x1] }
 0x18f   : > { %v1791_v5 = vadd.f32 %v4836_v63, %v6661_v6  ;;  %v4948_v57 = vadd.f32 %v4947_v30, %v4946_v17  ;;  %v6873_v56 = vadd.f32 %v4945_v21, %v1788_v60  ;;  %v2300_v6 = vsel %vm6081_vm2, 0, %v2299_v24  ;;  %v2359_v21 = vld [vmem:[#allocation3 + $0x150] sm:$0x80] }
 0x190   : > { %2301 = vst [vmem:[#allocation3 + $0x20] sm:$0x1] %v2300_v6 }
 0x191   : > { %v4837_v27 = vpop.f32.mrb[72].mxu0  ;;  %v6879_v18 = vadd.f32 %v4948_v57, %v1791_v5  ;;  %v2305_v5 = vld [vmem:[#allocation3 + $0x30] sm:$0x1]  ;;  %v2356_v57 = vld [vmem:[#allocation3 + $0x148] sm:$0x80] }
 0x192   : > { %v4838_v44 = vpop.f32.mrb[73].mxu0  ;;  %v2306_v24 = vsel %vm6081_vm2, 0, %v2305_v5  ;;  %v2357_v29 = vsel %vm6095_vm7, 0, %v2356_v57  ;;  %v5769_v5 = vld [vmem:[%s7870_s3 + $0x100] sm:$0xff]  }
 0x193   : > { %v4839_v38 = vadd.f32 %v4838_v44, %v4837_v27  ;;  %v4840_v59 = vpop.f32.mrb[74].mxu0  ;;  %v4949_v37 = vpop.f32.mrb[72].mxu1  ;;  %2307 = vst [vmem:[#allocation3 + $0x30] sm:$0x1] %v2306_v24  ;;  %v2303_v44 = vsel %vm6081_vm2, 0, %v2302_v12 }
 0x194   : > { %v4841_v45 = vpop.f32.mrb[75].mxu0  ;;  %v4950_v48 = vpop.f32.mrb[73].mxu1  ;;  %2304 = vst [vmem:[#allocation3 + $0x28] sm:$0x1] %v2303_v44  ;;  %2358 = vst [vmem:[#allocation3 + $0x148] sm:$0x80] %v2357_v29 }
 0x195   : > { %v1796_v52 = vadd.f32 %v4839_v38, %v6673_v53  ;;  %v4842_v16 = vadd.f32 %v4841_v45, %v4840_v59  ;;  %v4951_v35 = vadd.f32 %v4950_v48, %v4949_v37  ;;  %v4952_v63 = vpop.f32.mrb[74].mxu1  ;;  %v2360_v53 = vsel %vm6095_vm7, 0, %v2359_v21  ;;  %v2311_v48 = vld [vmem:[#allocation3 + $0x40] sm:$0x1] }
 0x196   : > { %v4953_v2 = vpop.f32.mrb[75].mxu1  ;;  %2361 = vst [vmem:[#allocation3 + $0x150] sm:$0x80] %v2360_v53 }
 0x197   : > { %v1799_v60 = vadd.f32 %v4842_v16, %v6677_v51  ;;  %v4954_v17 = vadd.f32 %v4953_v2, %v4952_v63  ;;  %v6887_v30 = vadd.f32 %v4951_v35, %v1796_v52  ;;  %v5767_v51 = vld [vmem:[%s7870_s3 + $0x140] sm:$0xff]  }
 0x198   : > { %5281 = vmatprep.subr.bf16.mxu1 %v5767_v51 }
 0x199   : > { %v4843_v8 = vpop.f32.mrb[76].mxu0  ;;  %v6896_v11 = vadd.f32 %v4954_v17, %v1799_v60  ;;  %v2365_v60 = vld [vmem:[#allocation3 + $0x160] sm:$0x80]  ;;  %v2308_v17 = vld [vmem:[#allocation3 + $0x38] sm:$0x1]  ;;  %5282 = vmatpush3.bf16.msra.mxu1 %v5769_v5 }
 0x19a   : > { %v4844_v33 = vpop.f32.mrb[77].mxu0  ;;  %v2366_v21 = vsel %vm6095_vm7, 0, %v2365_v60  ;;  %v2309_v51 = vsel %vm6081_vm2, 0, %v2308_v17 }
 0x19b   : > { %v4845_v27 = vadd.f32 %v4844_v33, %v4843_v8  ;;  %v4846_v6 = vpop.f32.mrb[78].mxu0  ;;  %v4955_v59 = vpop.f32.mrb[76].mxu1  ;;  %2367 = vst [vmem:[#allocation3 + $0x160] sm:$0x80] %v2366_v21  ;;  %v2362_v8 = vld [vmem:[#allocation3 + $0x158] sm:$0x80] }
 0x19c   : > { %v4847_v49 = vpop.f32.mrb[79].mxu0  ;;  %v4956_v20 = vpop.f32.mrb[77].mxu1  ;;  %v2363_v12 = vsel %vm6095_vm7, 0, %v2362_v8  ;;  %2310 = vst [vmem:[#allocation3 + $0x38] sm:$0x1] %v2309_v51 }
 0x19d   : > { %v1804_v38 = vadd.f32 %v4845_v27, %v6683_v43  ;;  %v4848_v32 = vadd.f32 %v4847_v49, %v4846_v6  ;;  %v4957_v52 = vadd.f32 %v4956_v20, %v4955_v59  ;;  %v4958_v37 = vpop.f32.mrb[78].mxu1  ;;  %v2312_v43 = vsel %vm6081_vm2, 0, %v2311_v48  ;;  %2364 = vst [vmem:[#allocation3 + $0x158] sm:$0x80] %v2363_v12  ;;  %v2317_v20 = vld [vmem:[#allocation3 + $0x50] sm:$0x1] }
 0x19e   : > { %v4959_v16 = vpop.f32.mrb[79].mxu1  ;;  %2313 = vst [vmem:[#allocation3 + $0x40] sm:$0x1] %v2312_v43  ;;  %v2318_v48 = vsel %vm6081_vm2, 0, %v2317_v20  ;;  %v5774_v20 = vld [vmem:[%s7870_s3 + $0x108] sm:$0xff]  }
 0x19f   : > { %v1807_v45 = vadd.f32 %v4848_v32, %v6686_v62  ;;  %v4960_v35 = vadd.f32 %v4959_v16, %v4958_v37  ;;  %v6904_v2 = vadd.f32 %v4957_v52, %v1804_v38  ;;  %2319 = vst [vmem:[#allocation3 + $0x50] sm:$0x1] %v2318_v48 }
 0x1a1   : > { %v4849_v63 = vpop.f32.mrb[80].mxu0  ;;  %v6913_v33 = vadd.f32 %v4960_v35, %v1807_v45  ;;  %v2371_v45 = vld [vmem:[#allocation3 + $0x170] sm:$0x80]  ;;  %v2314_v35 = vld [vmem:[#allocation3 + $0x48] sm:$0x1] }
 0x1a2   : > { %v4850_v62 = vpop.f32.mrb[81].mxu0 }
 0x1a3   : > { %v4851_v24 = vadd.f32 %v4850_v62, %v4849_v63  ;;  %v4852_v53 = vpop.f32.mrb[82].mxu0  ;;  %v4961_v6 = vpop.f32.mrb[80].mxu1  ;;  %v2368_v63 = vld [vmem:[#allocation3 + $0x168] sm:$0x80]  ;;  %v2315_v62 = vsel %vm6081_vm2, 0, %v2314_v35 }
 0x1a4   : > { %v4853_v57 = vpop.f32.mrb[83].mxu0  ;;  %v4962_v29 = vpop.f32.mrb[81].mxu1  ;;  %v2369_v17 = vsel %vm6095_vm7, 0, %v2368_v63  ;;  %2316 = vst [vmem:[#allocation3 + $0x48] sm:$0x1] %v2315_v62 }
 0x1a5   : > { %v1812_v27 = vadd.f32 %v4851_v24, %v6698_v15  ;;  %v4854_v44 = vadd.f32 %v4853_v57, %v4852_v53  ;;  %v4963_v38 = vadd.f32 %v4962_v29, %v4961_v6  ;;  %v4964_v59 = vpop.f32.mrb[82].mxu1  ;;  %v2372_v15 = vsel %vm6095_vm7, 0, %v2371_v45  ;;  %2370 = vst [vmem:[#allocation3 + $0x168] sm:$0x80] %v2369_v17  ;;  %v2323_v29 = vld [vmem:[#allocation3 + $0x60] sm:$0x1] }
 0x1a6   : > { %v4965_v32 = vpop.f32.mrb[83].mxu1  ;;  %2373 = vst [vmem:[#allocation3 + $0x170] sm:$0x80] %v2372_v15 }
 0x1a7   : > { %v1815_v49 = vadd.f32 %v4854_v44, %v6700_v4  ;;  %v4966_v52 = vadd.f32 %v4965_v32, %v4964_v59  ;;  %v6921_v16 = vadd.f32 %v4963_v38, %v1812_v27  ;;  %v5773_v4 = vld [vmem:[%s7870_s3 + $0x148] sm:$0xff]  }
 0x1a8   : > { %5283 = vmatprep.subr.bf16.mxu1 %v5773_v4 }
 0x1a9   : > { %v4855_v37 = vpop.f32.mrb[84].mxu0  ;;  %v6930_v21 = vadd.f32 %v4966_v52, %v1815_v49  ;;  %v2377_v49 = vld [vmem:[#allocation3 + $0x180] sm:$0x80]  ;;  %v2320_v52 = vld [vmem:[#allocation3 + $0x58] sm:$0x1]  ;;  %5284 = vmatpush3.bf16.msra.mxu1 %v5774_v20 }
 0x1aa   : > { %v4856_v60 = vpop.f32.mrb[85].mxu0  ;;  %v2378_v45 = vsel %vm6095_vm7, 0, %v2377_v49  ;;  %v2321_v4 = vsel %vm6081_vm2, 0, %v2320_v52 }
 0x1ab   : > { %v4857_v5 = vadd.f32 %v4856_v60, %v4855_v37  ;;  %v4858_v43 = vpop.f32.mrb[86].mxu0  ;;  %v4967_v53 = vpop.f32.mrb[84].mxu1  ;;  %2379 = vst [vmem:[#allocation3 + $0x180] sm:$0x80] %v2378_v45  ;;  %v2374_v37 = vld [vmem:[#allocation3 + $0x178] sm:$0x80] }
 0x1ac   : > { %v4859_v8 = vpop.f32.mrb[87].mxu0  ;;  %v4968_v12 = vpop.f32.mrb[85].mxu1  ;;  %v2375_v35 = vsel %vm6095_vm7, 0, %v2374_v37  ;;  %2322 = vst [vmem:[#allocation3 + $0x58] sm:$0x1] %v2321_v4 }
 0x1ad   : > { %v1820_v24 = vadd.f32 %v4857_v5, %v6704_v3  ;;  %v4860_v51 = vadd.f32 %v4859_v8, %v4858_v43  ;;  %v4969_v27 = vadd.f32 %v4968_v12, %v4967_v53  ;;  %v4970_v6 = vpop.f32.mrb[86].mxu1  ;;  %v2324_v3 = vsel %vm6081_vm2, 0, %v2323_v29  ;;  %2376 = vst [vmem:[#allocation3 + $0x178] sm:$0x80] %v2375_v35  ;;  %v2329_v12 = vld [vmem:[#allocation3 + $0x70] sm:$0x1] }
 0x1ae   : > { %v4971_v44 = vpop.f32.mrb[87].mxu1  ;;  %2325 = vst [vmem:[#allocation3 + $0x60] sm:$0x1] %v2324_v3  ;;  %v2330_v29 = vsel %vm6081_vm2, 0, %v2329_v12  ;;  %v5776_v12 = vld [vmem:[%s7870_s3 + $0x110] sm:$0xff]  }
 0x1af   : > { %v1823_v57 = vadd.f32 %v4860_v51, %v6706_v40  ;;  %v4972_v38 = vadd.f32 %v4971_v44, %v4970_v6  ;;  %v6938_v32 = vadd.f32 %v4969_v27, %v1820_v24  ;;  %2331 = vst [vmem:[#allocation3 + $0x70] sm:$0x1] %v2330_v29 }
 0x1b1   : > { %v4861_v59 = vpop.f32.mrb[88].mxu0  ;;  %v6947_v60 = vadd.f32 %v4972_v38, %v1823_v57  ;;  %v2383_v57 = vld [vmem:[#allocation3 + $0x190] sm:$0x80]  ;;  %v2326_v38 = vld [vmem:[#allocation3 + $0x68] sm:$0x1] }
 0x1b2   : > { %v4862_v40 = vpop.f32.mrb[89].mxu0 }
 0x1b3   : > { %v4863_v48 = vadd.f32 %v4862_v40, %v4861_v59  ;;  %v4864_v15 = vpop.f32.mrb[90].mxu0  ;;  %v4973_v43 = vpop.f32.mrb[88].mxu1  ;;  %v2380_v59 = vld [vmem:[#allocation3 + $0x188] sm:$0x80]  ;;  %v2327_v40 = vsel %vm6081_vm2, 0, %v2326_v38 }
 0x1b4   : > { %v4865_v63 = vpop.f32.mrb[91].mxu0  ;;  %v4974_v17 = vpop.f32.mrb[89].mxu1  ;;  %v2381_v52 = vsel %vm6095_vm7, 0, %v2380_v59  ;;  %2328 = vst [vmem:[#allocation3 + $0x68] sm:$0x1] %v2327_v40 }
 0x1b5   : > { %v1828_v5 = vadd.f32 %v4863_v48, %v6716_v1  ;;  %v4866_v62 = vadd.f32 %v4865_v63, %v4864_v15  ;;  %v4975_v24 = vadd.f32 %v4974_v17, %v4973_v43  ;;  %v4976_v53 = vpop.f32.mrb[90].mxu1  ;;  %v2384_v1 = vsel %vm6095_vm7, 0, %v2383_v57  ;;  %2382 = vst [vmem:[#allocation3 + $0x188] sm:$0x80] %v2381_v52  ;;  %v2335_v17 = vld [vmem:[#allocation3 + $0x80] sm:$0x1] }
 0x1b6   : > { %v4977_v51 = vpop.f32.mrb[91].mxu1  ;;  %2385 = vst [vmem:[#allocation3 + $0x190] sm:$0x80] %v2384_v1 }
 0x1b7   : > { %v1831_v8 = vadd.f32 %v4866_v62, %v6718_v14  ;;  %v4978_v27 = vadd.f32 %v4977_v51, %v4976_v53  ;;  %v6955_v44 = vadd.f32 %v4975_v24, %v1828_v5  ;;  %v5775_v14 = vld [vmem:[%s7870_s3 + $0x150] sm:$0xff]  }
 0x1b8   : > { %5285 = vmatprep.subr.bf16.mxu1 %v5775_v14 }
 0x1b9   : > { %v4867_v6 = vpop.f32.mrb[92].mxu0  ;;  %v6964_v45 = vadd.f32 %v4978_v27, %v1831_v8  ;;  %v2389_v8 = vld [vmem:[#allocation3 + $0x1a0] sm:$0x80]  ;;  %v2332_v27 = vld [vmem:[#allocation3 + $0x78] sm:$0x1]  ;;  %5286 = vmatpush3.bf16.msra.mxu1 %v5776_v12  ;;  %v5781_v12 = vld [vmem:[%s7870_s3 + $0x160] sm:$0xff]  }
 0x1ba   : > { %v4868_v49 = vpop.f32.mrb[93].mxu0  ;;  %v2390_v57 = vsel %vm6095_vm7, 0, %v2389_v8  ;;  %v2333_v14 = vsel %vm6081_vm2, 0, %v2332_v27  ;;  %v5782_v27 = vld [vmem:[%s7870_s3 + $0x120] sm:$0xff]  }
 0x1bb   : > { %v4869_v20 = vadd.f32 %v4868_v49, %v4867_v6  ;;  %v4870_v3 = vpop.f32.mrb[94].mxu0  ;;  %v4979_v15 = vpop.f32.mrb[92].mxu1  ;;  %2391 = vst [vmem:[#allocation3 + $0x1a0] sm:$0x80] %v2390_v57  ;;  %v2386_v6 = vld [vmem:[#allocation3 + $0x198] sm:$0x80] }
 0x1bc   : > { %v4871_v37 = vpop.f32.mrb[95].mxu0  ;;  %v4980_v35 = vpop.f32.mrb[93].mxu1  ;;  %v2387_v38 = vsel %vm6095_vm7, 0, %v2386_v6  ;;  %2334 = vst [vmem:[#allocation3 + $0x78] sm:$0x1] %v2333_v14 }
 0x1bd   : > { %v1836_v48 = vadd.f32 %v4869_v20, %v6722_v9  ;;  %v4872_v4 = vadd.f32 %v4871_v37, %v4870_v3  ;;  %v4981_v5 = vadd.f32 %v4980_v35, %v4979_v15  ;;  %v4982_v43 = vpop.f32.mrb[94].mxu1  ;;  %v2336_v9 = vsel %vm6081_vm2, 0, %v2335_v17  ;;  %2388 = vst [vmem:[#allocation3 + $0x198] sm:$0x80] %v2387_v38 }
 0x1be   : > { %v4983_v62 = vpop.f32.mrb[95].mxu1  ;;  %2337 = vst [vmem:[#allocation3 + $0x80] sm:$0x1] %v2336_v9 }
 0x1bf   : > { %v1839_v63 = vadd.f32 %v4872_v4, %v6724_v31  ;;  %v4984_v24 = vadd.f32 %v4983_v62, %v4982_v43  ;;  %v6972_v51 = vadd.f32 %v4981_v5, %v1836_v48  ;;  %v5777_v62 = vld [vmem:[%s7870_s3 + $0x158] sm:$0xff]  }
 0x1c0   : > { %5287 = vmatprep.subr.bf16.mxu1 %v5777_v62 }
 0x1c1   : > { %v4873_v53 = vpop.f32.mrb[96].mxu0  ;;  %v6981_v49 = vadd.f32 %v4984_v24, %v1839_v63 }
 0x1c2   : > { %v4874_v31 = vpop.f32.mrb[97].mxu0 }
 0x1c3   : > { %v4875_v29 = vadd.f32 %v4874_v31, %v4873_v53  ;;  %v4876_v1 = vpop.f32.mrb[98].mxu0  ;;  %v4985_v3 = vpop.f32.mrb[96].mxu1 }
 0x1c4   : > { %v4877_v59 = vpop.f32.mrb[99].mxu0  ;;  %v4986_v52 = vpop.f32.mrb[97].mxu1 }
 0x1c5   : > { %v1844_v20 = vadd.f32 %v4875_v29, %v6734_v28  ;;  %v4878_v40 = vadd.f32 %v4877_v59, %v4876_v1  ;;  %v4987_v48 = vadd.f32 %v4986_v52, %v4985_v3  ;;  %v4988_v15 = vpop.f32.mrb[98].mxu1  ;;  %v5778_v28 = vld [vmem:[%s7870_s3 + $0x118] sm:$0xff]  }
 0x1c6   : > { %v4989_v4 = vpop.f32.mrb[99].mxu1  ;;  %5288 = vmatpush3.bf16.msra.mxu1 %v5778_v28 }
 0x1c7   : > { %v1847_v37 = vadd.f32 %v4878_v40, %v6736_v47  ;;  %v4990_v35 = vadd.f32 %v4989_v4, %v4988_v15  ;;  %v6989_v5 = vadd.f32 %v4987_v48, %v1844_v20  ;;  %v5779_v47 = vld [vmem:[%s7870_s3 + $0x1c0] sm:$0xff]   ;;  %5289 = vmatprep.subr.bf16.mxu1 %v5781_v12  ;;  %v5785_v12 = vld [vmem:[%s7870_s3 + $0x168] sm:$0xff]  }
 0x1c8   : > { %5393 = vmatprep.subr.bf16.mxu0 %v5779_v47 }
 0x1c9   : > { %v4879_v63 = vpop.f32.mrb[100].mxu0  ;;  %v7000_v24 = vadd.f32 %v4990_v35, %v1847_v37 }
 0x1ca   : > { %v4880_v43 = vpop.f32.mrb[101].mxu0  ;;  %5290 = vmatpush3.bf16.msra.mxu1 %v5782_v27 }
 0x1cb   : > { %v4881_v17 = vadd.f32 %v4880_v43, %v4879_v63  ;;  %v4882_v8 = vpop.f32.mrb[102].mxu0  ;;  %v4991_v57 = vpop.f32.mrb[100].mxu1  ;;  %5291 = vmatprep.subr.bf16.mxu1 %v5785_v12 }
 0x1cc   : > { %v4883_v53 = vpop.f32.mrb[103].mxu0  ;;  %v4992_v6 = vpop.f32.mrb[101].mxu1 }
 0x1cd   : > { %v1852_v9 = vadd.f32 %v4881_v17, %v6740_v10  ;;  %v4884_v31 = vadd.f32 %v4883_v53, %v4882_v8  ;;  %v4993_v1 = vadd.f32 %v4992_v6, %v4991_v57  ;;  %v4994_v14 = vpop.f32.mrb[102].mxu1 }
 0x1ce   : > { %v4995_v38 = vpop.f32.mrb[103].mxu1 }
 0x1cf   : > { %v1855_v29 = vadd.f32 %v4884_v31, %v6742_v25  ;;  %v4996_v59 = vadd.f32 %v4995_v38, %v4994_v14  ;;  %v7010_v3 = vadd.f32 %v4993_v1, %v1852_v9 }
 0x1d1   : > { %v4885_v20 = vpop.f32.mrb[104].mxu0  ;;  %v7012_v37 = vadd.f32 %v4996_v59, %v1855_v29 }
 0x1d2   : > { %v4886_v10 = vpop.f32.mrb[105].mxu0 }
 0x1d3   : > { %v4887_v40 = vadd.f32 %v4886_v10, %v4885_v20  ;;  %v4888_v52 = vpop.f32.mrb[106].mxu0  ;;  %v4997_v4 = vpop.f32.mrb[104].mxu1 }
 0x1d4   : > { %v4889_v48 = vpop.f32.mrb[107].mxu0  ;;  %v4998_v63 = vpop.f32.mrb[105].mxu1 }
 0x1d5   : > { %v1860_v15 = vadd.f32 %v4887_v40, %v6752_v39  ;;  %v4890_v35 = vadd.f32 %v4889_v48, %v4888_v52  ;;  %v4999_v43 = vadd.f32 %v4998_v63, %v4997_v4  ;;  %v5000_v62 = vpop.f32.mrb[106].mxu1 }
 0x1d6   : > { %v5001_v28 = vpop.f32.mrb[107].mxu1 }
 0x1d7   : > { %v1863_v25 = vadd.f32 %v4890_v35, %v6754_v22  ;;  %v5002_v47 = vadd.f32 %v5001_v28, %v5000_v62  ;;  %v7016_v8 = vadd.f32 %v4999_v43, %v1860_v15  ;;  %v5786_v22 = vld [vmem:[%s7870_s3 + $0x128] sm:$0xff]  }
 0x1d8   : > { %5292 = vmatpush3.bf16.msra.mxu1 %v5786_v22  ;;  %v5789_v22 = vld [vmem:[%s7870_s3 + $0x170] sm:$0xff]  }
 0x1d9   : > { %v4891_v17 = vpop.f32.mrb[108].mxu0  ;;  %v7021_v39 = vadd.f32 %v5002_v47, %v1863_v25  ;;  %5293 = vmatprep.subr.bf16.mxu1 %v5789_v22 }
 0x1da   : > { %v4892_v53 = vpop.f32.mrb[109].mxu0 }
 0x1db   : > { %v4893_v9 = vadd.f32 %v4892_v53, %v4891_v17  ;;  %v4894_v57 = vpop.f32.mrb[110].mxu0  ;;  %v5003_v6 = vpop.f32.mrb[108].mxu1 }
 0x1dc   : > { %v4895_v31 = vpop.f32.mrb[111].mxu0  ;;  %v5004_v1 = vpop.f32.mrb[109].mxu1 }
 0x1dd   : > { %v1868_v27 = vadd.f32 %v4893_v9, %v6759_v7  ;;  %v4896_v29 = vadd.f32 %v4895_v31, %v4894_v57  ;;  %v5005_v38 = vadd.f32 %v5004_v1, %v5003_v6  ;;  %v5006_v59 = vpop.f32.mrb[110].mxu1 }
 0x1de   : > { %v5007_v20 = vpop.f32.mrb[111].mxu1 }
 0x1df   : > { %v1871_v14 = vadd.f32 %v4896_v29, %v6761_v23  ;;  %v5008_v10 = vadd.f32 %v5007_v20, %v5006_v59  ;;  %v7028_v52 = vadd.f32 %v5005_v38, %v1868_v27 }
 0x1e1   : > { %v4897_v40 = vpop.f32.mrb[112].mxu0  ;;  %v7030_v35 = vadd.f32 %v5008_v10, %v1871_v14 }
 0x1e2   : > { %v4898_v48 = vpop.f32.mrb[113].mxu0 }
 0x1e3   : > { %v4899_v15 = vadd.f32 %v4898_v48, %v4897_v40  ;;  %v4900_v4 = vpop.f32.mrb[114].mxu0  ;;  %v5009_v25 = vpop.f32.mrb[112].mxu1 }
 0x1e4   : > { %v4901_v63 = vpop.f32.mrb[115].mxu0  ;;  %v5010_v62 = vpop.f32.mrb[113].mxu1 }
 0x1e5   : > { %v1876_v7 = vadd.f32 %v4899_v15, %v6771_v36  ;;  %v4902_v43 = vadd.f32 %v4901_v63, %v4900_v4  ;;  %v5011_v28 = vadd.f32 %v5010_v62, %v5009_v25  ;;  %v5012_v47 = vpop.f32.mrb[114].mxu1 }
 0x1e6   : > { %v5013_v17 = vpop.f32.mrb[115].mxu1 }
 0x1e7   : > { %v1879_v23 = vadd.f32 %v4902_v43, %v6773_v41  ;;  %v5014_v53 = vadd.f32 %v5013_v17, %v5012_v47  ;;  %v7034_v9 = vadd.f32 %v5011_v28, %v1876_v7  ;;  %v5790_v41 = vld [vmem:[%s7870_s3 + $0x130] sm:$0xff]  }
 0x1e8   : > { %5294 = vmatpush3.bf16.msra.mxu1 %v5790_v41  ;;  %v5793_v41 = vld [vmem:[%s7870_s3 + $0x178] sm:$0xff]  }
 0x1e9   : > { %v4903_v12 = vpop.f32.mrb[116].mxu0  ;;  %v7039_v36 = vadd.f32 %v5014_v53, %v1879_v23  ;;  %5295 = vmatprep.subr.bf16.mxu1 %v5793_v41 }
 0x1ea   : > { %v4904_v57 = vpop.f32.mrb[117].mxu0 }
 0x1eb   : > { %v4905_v31 = vadd.f32 %v4904_v57, %v4903_v12  ;;  %v4906_v27 = vpop.f32.mrb[118].mxu0  ;;  %v5015_v1 = vpop.f32.mrb[116].mxu1 }
 0x1ec   : > { %v4907_v6 = vpop.f32.mrb[119].mxu0  ;;  %v5016_v38 = vpop.f32.mrb[117].mxu1 }
 0x1ed   : > { %v1884_v29 = vadd.f32 %v4905_v31, %v6777_v61  ;;  %v4908_v14 = vadd.f32 %v4907_v6, %v4906_v27  ;;  %v5017_v20 = vadd.f32 %v5016_v38, %v5015_v1  ;;  %v5018_v10 = vpop.f32.mrb[118].mxu1 }
 0x1ee   : > { %v5019_v40 = vpop.f32.mrb[119].mxu1 }
 0x1ef   : > { %v1887_v59 = vadd.f32 %v4908_v14, %v6779_v58  ;;  %v5020_v48 = vadd.f32 %v5019_v40, %v5018_v10  ;;  %v7046_v4 = vadd.f32 %v5017_v20, %v1884_v29 }
 0x1f1   : > { %v4909_v15 = vpop.f32.mrb[120].mxu0  ;;  %v7048_v43 = vadd.f32 %v5020_v48, %v1887_v59 }
 0x1f2   : > { %v4910_v63 = vpop.f32.mrb[121].mxu0 }
 0x1f3   : > { %v4911_v7 = vadd.f32 %v4910_v63, %v4909_v15  ;;  %v4912_v25 = vpop.f32.mrb[122].mxu0  ;;  %v5021_v23 = vpop.f32.mrb[120].mxu1 }
 0x1f4   : > { %v4913_v62 = vpop.f32.mrb[123].mxu0  ;;  %v5022_v47 = vpop.f32.mrb[121].mxu1 }
 0x1f5   : > { %v1892_v61 = vadd.f32 %v4911_v7, %v6801_v42  ;;  %v4914_v28 = vadd.f32 %v4913_v62, %v4912_v25  ;;  %v5023_v17 = vadd.f32 %v5022_v47, %v5021_v23  ;;  %v5024_v53 = vpop.f32.mrb[122].mxu1 }
 0x1f6   : > { %v5025_v12 = vpop.f32.mrb[123].mxu1 }
 0x1f7   : > { %v1895_v58 = vadd.f32 %v4914_v28, %v6803_v54  ;;  %v5026_v57 = vadd.f32 %v5025_v12, %v5024_v53  ;;  %v7052_v31 = vadd.f32 %v5023_v17, %v1892_v61  ;;  %v5794_v54 = vld [vmem:[%s7870_s3 + $0x138] sm:$0xff]  }
 0x1f8   : > { %5296 = vmatpush3.bf16.msra.mxu1 %v5794_v54 }
 0x1f9   : > { %v4915_v22 = vpop.f32.mrb[124].mxu0  ;;  %v7057_v42 = vadd.f32 %v5026_v57, %v1895_v58 }
 0x1fa   : > { %v4916_v27 = vpop.f32.mrb[125].mxu0 }
 0x1fb   : > { %v4917_v6 = vadd.f32 %v4916_v27, %v4915_v22  ;;  %v4918_v29 = vpop.f32.mrb[126].mxu0  ;;  %v5027_v38 = vpop.f32.mrb[124].mxu1 }
 0x1fc   : > { %v4919_v1 = vpop.f32.mrb[127].mxu0  ;;  %v5028_v20 = vpop.f32.mrb[125].mxu1 }
 0x1fd   : > { %v1900_v14 = vadd.f32 %v4917_v6, %v6821_v26  ;;  %v4920_v59 = vadd.f32 %v4919_v1, %v4918_v29  ;;  %v5029_v40 = vadd.f32 %v5028_v20, %v5027_v38  ;;  %v5030_v48 = vpop.f32.mrb[126].mxu1 }
 0x1fe   : > { %v5031_v15 = vpop.f32.mrb[127].mxu1 }
 0x1ff   : > { %v1903_v10 = vadd.f32 %v4920_v59, %v6823_v13  ;;  %v5032_v63 = vadd.f32 %v5031_v15, %v5030_v48  ;;  %v7064_v25 = vadd.f32 %v5029_v40, %v1900_v14  ;;  %v2641_v40 = vld [vmem:[#allocation3 + $0x130] sm:$0xff] }
 0x201   : > { %v5547_v7 = vpop.f32.mrb[128].mxu0  ;;  %v7068_v26 = vadd.f32 %v5032_v63, %v1903_v10 }
 0x202   : > { %v2110_v62 = vadd.f32 %v5547_v7, %v6873_v56  ;;  %v2101_v61 = vpop.f32.mrb[129].mxu0 }
 0x203   : > { %v2102_v23 = vadd.f32 %v2101_v61, %v6842_v0  ;;  %v5548_v28 = vpop.f32.mrb[130].mxu0  ;;  %v2541_v61 = vld [vmem:[#allocation3 + $0x8] sm:$0xff] }
 0x204   : > { %v2113_v47 = vadd.f32 %v5548_v28, %v6879_v18  ;;  %v2104_v58 = vpop.f32.mrb[131].mxu0  ;;  %v2230_v17 = vmax.f32 %v2110_v62, 0.0  ;;  %v7076_v18 = vld [vmem:[%s7870_s3 + $0x200] sm:$0xff]  }
 0x205   : > { %v2105_v13 = vadd.f32 %v2104_v58, %v6853_v50  ;;  %v2228_v12 = vmax.f32 %v2102_v23, 0.0  ;;  %5577 = vmatprep.subr.bf16.mxu1 %v7076_v18  ;;  %v2638_v23 = vld [vmem:[#allocation3 + $0x128] sm:$0xff] }
 0x206   : > { %v2231_v53 = vmax.f32 %v2113_v47, 0.0 }
 0x207   : > { %v2229_v57 = vmax.f32 %v2105_v13, 0.0 }
 0x208   : > { %v2261_v22 = vpack.c.bf16 %v2231_v53, %v2230_v17 }
 0x209   : > { %v2260_v27 = vpack.c.bf16 %v2229_v57, %v2228_v12  ;;  %v5551_v41 = vpop.f32.mrb[132].mxu0  ;;  %v5780_v57 = vld [vmem:[%s7870_s3 + $0x180] sm:$0xff]  }
 0x20a   : > { %2397 = vst [vmem:[#allocation3 + $0xa0] sm:$0xff] %v2261_v22  ;;  %v2420_v56 = vshrl.u32 %v2261_v22, 16  ;;  %v2423_v6 = vshll.u32 %v2261_v22, 16  ;;  %v2126_v0 = vadd.f32 %v5551_v41, %v6904_v2  ;;  %v2117_v29 = vpop.f32.mrb[133].mxu0  ;;  %v2544_v2 = vld [vmem:[#allocation3 + $0x10] sm:$0xff] }
 0x20b   : > { %2396 = vst [vmem:[#allocation3 + $0x98] sm:$0xff] %v2260_v27  ;;  %v2413_v50 = vshrl.u32 %v2260_v27, 16  ;;  %v2416_v54 = vshll.u32 %v2260_v27, 16  ;;  %v2118_v1 = vadd.f32 %v2117_v29, %v6887_v30  ;;  %v5552_v14 = vpop.f32.mrb[134].mxu0  ;;  %3456 = vmatprep.mubr.bf16.mxu1 %v2260_v27 }
 0x20c   : > { %v2422_v38 = vrot.slane %v2420_v56, 7  ;;  %v2591_v59 = vrot.slane %v2423_v6, 1  ;;  %v2129_v20 = vadd.f32 %v5552_v14, %v6913_v33  ;;  %v2120_v10 = vpop.f32.mrb[135].mxu0  ;;  %v2234_v30 = vmax.f32 %v2126_v0, 0.0  ;;  %v5783_v0 = vld [vmem:[%s7870_s3 + $0x1c8] sm:$0xff]  }
 0x20d   : > { %v2415_v48 = vrot.slane %v2413_v50, 7  ;;  %v2589_v15 = vrot.slane %v2416_v54, 1  ;;  %v2121_v63 = vadd.f32 %v2120_v10, %v6896_v11  ;;  %v2232_v13 = vmax.f32 %v2118_v1, 0.0  ;;  %v2718_v11 = vld [vmem:[#allocation3 + $0x120] sm:$0xff] }
 0x20e   : > { %v2425_v7 = vor.u32 %v2423_v6, %v2422_v38  ;;  %v2592_v62 = vor.u32 %v2591_v59, %v2420_v56  ;;  %v2235_v28 = vmax.f32 %v2129_v20, 0.0 }
 0x20f   : > { %v2418_v47 = vor.u32 %v2416_v54, %v2415_v48  ;;  %v2590_v58 = vor.u32 %v2589_v15, %v2413_v50  ;;  %v2233_v17 = vmax.f32 %v2121_v63, 0.0  ;;  %v2550_v15 = vld [vmem:[#allocation3 + $0x20] sm:$0xff] }
 0x210   : > { %v7084_v33 = vsel %vm6111_vm9, %v2425_v7, %v2544_v2  ;;  %v7088_v53 = vsel %vm6143_vm10, %v2592_v62, %v2641_v40  ;;  %v7090_v12 = vpack.c.bf16 %v2235_v28, %v2234_v30  ;;  %v2647_v63 = vld [vmem:[#allocation3 + $0x140] sm:$0xff]  ;;  %v2644_v30 = vld [vmem:[#allocation3 + $0x138] sm:$0xff] }
 0x211   : > { %2546 = vst [vmem:[#allocation3 + $0x10] sm:$0xff] %v7084_v33  ;;  %2643 = vst [vmem:[#allocation3 + $0x130] sm:$0xff] %v7088_v53  ;;  %v2542_v27 = vsel %vm6111_vm9, %v2418_v47, %v2541_v61  ;;  %v7101_v41 = vsel %vm6143_vm10, %v2590_v58, %v2638_v23  ;;  %v7103_v56 = vpack.c.bf16 %v2233_v17, %v2232_v13  ;;  %v5555_v6 = vpop.f32.mrb[136].mxu0  ;;  %v2547_v23 = vld [vmem:[#allocation3 + $0x18] sm:$0xff] }
 0x212   : > { %2543 = vst [vmem:[#allocation3 + $0x8] sm:$0xff] %v2542_v27  ;;  %2640 = vst [vmem:[#allocation3 + $0x128] sm:$0xff] %v7101_v41  ;;  %v2434_v29 = vshrl.u32 %v7090_v12, 16  ;;  %v2437_v50 = vshll.u32 %v7090_v12, 16  ;;  %v2142_v54 = vadd.f32 %v5555_v6, %v6938_v32  ;;  %v2133_v1 = vpop.f32.mrb[137].mxu0  ;;  %3457 = vmatmul.mubr.bf16.gmra.mrb[132].mxu1 %v2542_v27  ;;  %3609 = vmatprep.mubr.bf16.mxu0 %v2542_v27  ;;  %v5784_v32 = vld [vmem:[%s7870_s3 + $0x188] sm:$0xff]  }
 0x213   : > { %2399 = vst [vmem:[#allocation3 + $0xb0] sm:$0xff] %v7090_v12  ;;  %2398 = vst [vmem:[#allocation3 + $0xa8] sm:$0xff] %v7103_v56  ;;  %v2427_v14 = vshrl.u32 %v7103_v56, 16  ;;  %v2430_v38 = vshll.u32 %v7103_v56, 16  ;;  %v2134_v59 = vadd.f32 %v2133_v1, %v6921_v16  ;;  %v5556_v20 = vpop.f32.mrb[138].mxu0  ;;  %3464 = vmatprep.mubr.bf16.mxu1 %v2261_v22  ;;  %3610 = vmatmul.mubr.bf16.vlgmr.msra.gmra.mrb[160].mxu0 %v2718_v11  ;;  %v5787_v22 = vld [vmem:[%s7870_s3 + $0x1d0] sm:$0xff]  }
 0x214   : > { %v2436_v10 = vrot.slane %v2434_v29, 7  ;;  %v2595_v2 = vrot.slane %v2437_v50, 1  ;;  %v2145_v40 = vadd.f32 %v5556_v20, %v6947_v60  ;;  %v2136_v48 = vpop.f32.mrb[139].mxu0  ;;  %3617 = vmatprep.mubr.bf16.mxu0 %v7084_v33  ;;  %5394 = vmatpush3.bf16.msra.mxu0 %v5780_v57  ;;  %v2238_v28 = vmax.f32 %v2142_v54, 0.0  ;;  %v5788_v6 = vld [vmem:[%s7870_s3 + $0x190] sm:$0xff]   ;;  %v5791_v1 = vld [vmem:[%s7870_s3 + $0x1d8] sm:$0xff]  }
 0x215   : > { %v2429_v7 = vrot.slane %v2427_v14, 7  ;;  %v2593_v62 = vrot.slane %v2430_v38, 1  ;;  %v2137_v16 = vadd.f32 %v2136_v48, %v6930_v21  ;;  %5395 = vmatprep.subr.bf16.mxu0 %v5783_v0  ;;  %v2236_v17 = vmax.f32 %v2134_v59, 0.0 }
 0x216   : > { %v2439_v60 = vor.u32 %v2437_v50, %v2436_v10  ;;  %v2596_v61 = vor.u32 %v2595_v2, %v2434_v29  ;;  %v2239_v47 = vmax.f32 %v2145_v40, 0.0 }
 0x217   : > { %v2432_v58 = vor.u32 %v2430_v38, %v2429_v7  ;;  %v2594_v13 = vor.u32 %v2593_v62, %v2427_v14  ;;  %v2237_v11 = vmax.f32 %v2137_v16, 0.0  ;;  %v2556_v7 = vld [vmem:[#allocation3 + $0x30] sm:$0xff] }
 0x218   : > { %v7128_v57 = vsel %vm6111_vm9, %v2439_v60, %v2550_v15  ;;  %v7132_v21 = vsel %vm6143_vm10, %v2596_v61, %v2647_v63  ;;  %v7134_v27 = vpack.c.bf16 %v2239_v47, %v2238_v28  ;;  %5396 = vmatpush3.bf16.msra.mxu0 %v5784_v32  ;;  %v2653_v62 = vld [vmem:[#allocation3 + $0x150] sm:$0xff]  ;;  %v2553_v60 = vld [vmem:[#allocation3 + $0x28] sm:$0xff] }
 0x219   : > { %2552 = vst [vmem:[#allocation3 + $0x20] sm:$0xff] %v7128_v57  ;;  %2649 = vst [vmem:[#allocation3 + $0x140] sm:$0xff] %v7132_v21  ;;  %v7143_v0 = vsel %vm6111_vm9, %v2432_v58, %v2547_v23  ;;  %v7147_v29 = vsel %vm6143_vm10, %v2594_v13, %v2644_v30  ;;  %v7149_v50 = vpack.c.bf16 %v2237_v11, %v2236_v17  ;;  %v5559_v54 = vpop.f32.mrb[140].mxu0  ;;  %5397 = vmatprep.subr.bf16.mxu0 %v5787_v22  ;;  %v2650_v61 = vld [vmem:[#allocation3 + $0x148] sm:$0xff] }
 0x21a   : > { %2549 = vst [vmem:[#allocation3 + $0x18] sm:$0xff] %v7143_v0  ;;  %2646 = vst [vmem:[#allocation3 + $0x138] sm:$0xff] %v7147_v29  ;;  %v2448_v14 = vshrl.u32 %v7134_v27, 16  ;;  %v2451_v38 = vshll.u32 %v7134_v27, 16  ;;  %v2158_v59 = vadd.f32 %v5559_v54, %v6972_v51  ;;  %v2149_v20 = vpop.f32.mrb[141].mxu0  ;;  %3465 = vmatmul.mubr.bf16.gmra.mrb[136].mxu1 %v7084_v33  ;;  %v5792_v33 = vld [vmem:[%s7870_s3 + $0x198] sm:$0xff]  }
 0x21b   : > { %2401 = vst [vmem:[#allocation3 + $0xc0] sm:$0xff] %v7134_v27  ;;  %2400 = vst [vmem:[#allocation3 + $0xb8] sm:$0xff] %v7149_v50  ;;  %v2441_v10 = vshrl.u32 %v7149_v50, 16  ;;  %v2444_v2 = vshll.u32 %v7149_v50, 16  ;;  %v2150_v40 = vadd.f32 %v2149_v20, %v6955_v44  ;;  %v5560_v48 = vpop.f32.mrb[142].mxu0  ;;  %3472 = vmatprep.mubr.bf16.mxu1 %v7103_v56  ;;  %3618 = vmatmul.mubr.bf16.gmra.mrb[164].mxu0 %v7101_v41  ;;  %v5795_v41 = vld [vmem:[%s7870_s3 + $0x1e0] sm:$0xff]  }
 0x21c   : > { %v2450_v32 = vrot.slane %v2448_v14, 7  ;;  %v2599_v15 = vrot.slane %v2451_v38, 1  ;;  %v2161_v51 = vadd.f32 %v5560_v48, %v6981_v49  ;;  %v2152_v63 = vpop.f32.mrb[143].mxu0  ;;  %3625 = vmatprep.mubr.bf16.mxu0 %v7143_v0  ;;  %5398 = vmatpush3.bf16.msra.mxu0 %v5788_v6  ;;  %v2242_v23 = vmax.f32 %v2158_v59, 0.0  ;;  %v5796_v6 = vld [vmem:[%s7870_s3 + $0x1a0] sm:$0xff]   ;;  %v5797_v59 = vld [vmem:[%s7870_s3 + $0x1e8] sm:$0xff]  }
 0x21d   : > { %v2443_v44 = vrot.slane %v2441_v10, 7  ;;  %v2597_v16 = vrot.slane %v2444_v2, 1  ;;  %v2153_v56 = vadd.f32 %v2152_v63, %v6964_v45  ;;  %5399 = vmatprep.subr.bf16.mxu0 %v5791_v1  ;;  %v2240_v58 = vmax.f32 %v2150_v40, 0.0 }
 0x21e   : > { %v2453_v49 = vor.u32 %v2451_v38, %v2450_v32  ;;  %v2600_v22 = vor.u32 %v2599_v15, %v2448_v14  ;;  %v2243_v30 = vmax.f32 %v2161_v51, 0.0 }
 0x21f   : > { %v2446_v28 = vor.u32 %v2444_v2, %v2443_v44  ;;  %v2598_v47 = vor.u32 %v2597_v16, %v2441_v10  ;;  %v2241_v13 = vmax.f32 %v2153_v56, 0.0  ;;  %v2659_v44 = vld [vmem:[#allocation3 + $0x160] sm:$0xff] }
 0x220   : > { %v7178_v17 = vsel %vm6111_vm9, %v2453_v49, %v2556_v7  ;;  %v7182_v45 = vsel %vm6143_vm10, %v2600_v22, %v2653_v62  ;;  %v7184_v11 = vpack.c.bf16 %v2243_v30, %v2242_v23  ;;  %5400 = vmatpush3.bf16.msra.mxu0 %v5792_v33  ;;  %v2562_v62 = vld [vmem:[#allocation3 + $0x40] sm:$0xff]  ;;  %v2656_v49 = vld [vmem:[#allocation3 + $0x158] sm:$0xff] }
 0x221   : > { %2558 = vst [vmem:[#allocation3 + $0x30] sm:$0xff] %v7178_v17  ;;  %2655 = vst [vmem:[#allocation3 + $0x150] sm:$0xff] %v7182_v45  ;;  %v7193_v54 = vsel %vm6111_vm9, %v2446_v28, %v2553_v60  ;;  %v7197_v1 = vsel %vm6143_vm10, %v2598_v47, %v2650_v61  ;;  %v7199_v14 = vpack.c.bf16 %v2241_v13, %v2240_v58  ;;  %v5563_v38 = vpop.f32.mrb[144].mxu0  ;;  %5401 = vmatprep.subr.bf16.mxu0 %v5795_v41  ;;  %v2559_v41 = vld [vmem:[#allocation3 + $0x38] sm:$0xff]  ;;  %v5801_v13 = vld [vmem:[%s7870_s3 + $0x1b0] sm:$0xff]  }
 0x222   : > { %2555 = vst [vmem:[#allocation3 + $0x28] sm:$0xff] %v7193_v54  ;;  %2652 = vst [vmem:[#allocation3 + $0x148] sm:$0xff] %v7197_v1  ;;  %v2462_v20 = vshrl.u32 %v7184_v11, 16  ;;  %v2465_v10 = vshll.u32 %v7184_v11, 16  ;;  %v2174_v2 = vadd.f32 %v5563_v38, %v7010_v3  ;;  %v2165_v40 = vpop.f32.mrb[145].mxu0  ;;  %3473 = vmatmul.mubr.bf16.gmra.mrb[140].mxu1 %v7143_v0  ;;  %v5798_v0 = vld [vmem:[%s7870_s3 + $0x1a8] sm:$0xff]  }
 0x223   : > { %2403 = vst [vmem:[#allocation3 + $0xd0] sm:$0xff] %v7184_v11  ;;  %2402 = vst [vmem:[#allocation3 + $0xc8] sm:$0xff] %v7199_v14  ;;  %v2455_v48 = vshrl.u32 %v7199_v14, 16  ;;  %v2458_v32 = vshll.u32 %v7199_v14, 16  ;;  %v2166_v15 = vadd.f32 %v2165_v40, %v6989_v5  ;;  %v5564_v51 = vpop.f32.mrb[146].mxu0  ;;  %3480 = vmatprep.mubr.bf16.mxu1 %v7090_v12  ;;  %3626 = vmatmul.mubr.bf16.gmra.mrb[168].mxu0 %v7088_v53  ;;  %v5800_v53 = vld [vmem:[%s7870_s3 + $0x1f0] sm:$0xff]  }
 0x224   : > { %v2464_v63 = vrot.slane %v2462_v20, 7  ;;  %v2603_v33 = vrot.slane %v2465_v10, 1  ;;  %v2177_v3 = vadd.f32 %v5564_v51, %v7012_v37  ;;  %v2168_v7 = vpop.f32.mrb[147].mxu0  ;;  %3633 = vmatprep.mubr.bf16.mxu0 %v7128_v57  ;;  %5402 = vmatpush3.bf16.msra.mxu0 %v5796_v6  ;;  %v2246_v22 = vmax.f32 %v2174_v2, 0.0 }
 0x225   : > { %v2457_v5 = vrot.slane %v2455_v48, 7  ;;  %v2601_v16 = vrot.slane %v2458_v32, 1  ;;  %v2169_v12 = vadd.f32 %v2168_v7, %v7000_v24  ;;  %5403 = vmatprep.subr.bf16.mxu0 %v5797_v59  ;;  %v2244_v30 = vmax.f32 %v2166_v15, 0.0 }
 0x226   : > { %v2467_v37 = vor.u32 %v2465_v10, %v2464_v63  ;;  %v2604_v56 = vor.u32 %v2603_v33, %v2462_v20  ;;  %v2247_v60 = vmax.f32 %v2177_v3, 0.0  ;;  %v5802_v10 = vld [vmem:[%s7870_s3 + $0x1f8] sm:$0xff]  }
 0x227   : > { %v2460_v61 = vor.u32 %v2458_v32, %v2457_v5  ;;  %v2602_v23 = vor.u32 %v2601_v16, %v2455_v48  ;;  %v2245_v28 = vmax.f32 %v2169_v12, 0.0  ;;  %v2565_v12 = vld [vmem:[#allocation3 + $0x48] sm:$0xff] }
 0x228   : > { %v7228_v47 = vsel %vm6111_vm9, %v2467_v37, %v2562_v62  ;;  %v7232_v24 = vsel %vm6143_vm10, %v2604_v56, %v2659_v44  ;;  %v7234_v58 = vpack.c.bf16 %v2247_v60, %v2246_v22  ;;  %5404 = vmatpush3.bf16.msra.mxu0 %v5798_v0  ;;  %v2665_v44 = vld [vmem:[#allocation3 + $0x170] sm:$0xff] }
 0x229   : > { %2564 = vst [vmem:[#allocation3 + $0x40] sm:$0xff] %v7228_v47  ;;  %2661 = vst [vmem:[#allocation3 + $0x160] sm:$0xff] %v7232_v24  ;;  %v7243_v6 = vsel %vm6111_vm9, %v2460_v61, %v2559_v41  ;;  %v7247_v38 = vsel %vm6143_vm10, %v2602_v23, %v2656_v49  ;;  %v7249_v59 = vpack.c.bf16 %v2245_v28, %v2244_v30  ;;  %v5567_v20 = vpop.f32.mrb[148].mxu0  ;;  %5405 = vmatprep.subr.bf16.mxu0 %v5800_v53  ;;  %v2662_v53 = vld [vmem:[#allocation3 + $0x168] sm:$0xff] }
 0x22a   : > { %2561 = vst [vmem:[#allocation3 + $0x38] sm:$0xff] %v7243_v6  ;;  %2658 = vst [vmem:[#allocation3 + $0x158] sm:$0xff] %v7247_v38  ;;  %v2476_v2 = vshrl.u32 %v7234_v58, 16  ;;  %v2479_v40 = vshll.u32 %v7234_v58, 16  ;;  %v2190_v48 = vadd.f32 %v5567_v20, %v7028_v52  ;;  %v2181_v32 = vpop.f32.mrb[149].mxu0  ;;  %3481 = vmatmul.mubr.bf16.gmra.mrb[144].mxu1 %v7128_v57  ;;  %v5803_v52 = vld [vmem:[%s7870_s3 + $0x1b8] sm:$0xff]  }
 0x22b   : > { %2405 = vst [vmem:[#allocation3 + $0xe0] sm:$0xff] %v7234_v58  ;;  %v2469_v15 = vshrl.u32 %v7249_v59, 16  ;;  %v2472_v51 = vshll.u32 %v7249_v59, 16  ;;  %v2182_v63 = vadd.f32 %v2181_v32, %v7016_v8  ;;  %v5568_v33 = vpop.f32.mrb[150].mxu0  ;;  %3488 = vmatprep.mubr.bf16.mxu1 %v7149_v50  ;;  %3634 = vmatmul.mubr.bf16.gmra.mrb[172].mxu0 %v7147_v29  ;;  %v2568_v57 = vld [vmem:[#allocation3 + $0x50] sm:$0xff] }
 0x22c   : > { %v2478_v3 = vrot.slane %v2476_v2, 7  ;;  %v2607_v7 = vrot.slane %v2479_v40, 1  ;;  %v2193_v0 = vadd.f32 %v5568_v33, %v7030_v35  ;;  %v2184_v62 = vpop.f32.mrb[151].mxu0  ;;  %3641 = vmatprep.mubr.bf16.mxu0 %v7193_v54  ;;  %5406 = vmatpush3.bf16.msra.mxu0 %v5801_v13  ;;  %v2250_v35 = vmax.f32 %v2190_v48, 0.0 }
 0x22d   : > { %v2471_v8 = vrot.slane %v2469_v15, 7  ;;  %v2605_v5 = vrot.slane %v2472_v51, 1  ;;  %v2185_v50 = vadd.f32 %v2184_v62, %v7021_v39  ;;  %5407 = vmatprep.subr.bf16.mxu0 %v5802_v10  ;;  %v2248_v49 = vmax.f32 %v2182_v63, 0.0 }
 0x22e   : > { %v2481_v29 = vor.u32 %v2479_v40, %v2478_v3  ;;  %v2608_v16 = vor.u32 %v2607_v7, %v2476_v2  ;;  %v2251_v37 = vmax.f32 %v2193_v0, 0.0 }
 0x22f   : > { %v2474_v56 = vor.u32 %v2472_v51, %v2471_v8  ;;  %v2606_v41 = vor.u32 %v2605_v5, %v2469_v15  ;;  %v2249_v22 = vmax.f32 %v2185_v50, 0.0  ;;  %v2668_v8 = vld [vmem:[#allocation3 + $0x178] sm:$0xff] }
 0x230   : > { %v7274_v60 = vsel %vm6111_vm9, %v2481_v29, %v2568_v57  ;;  %v7278_v61 = vsel %vm6143_vm10, %v2608_v16, %v2665_v44  ;;  %v7280_v39 = vpack.c.bf16 %v2251_v37, %v2250_v35  ;;  %5408 = vmatpush3.bf16.msra.mxu0 %v5803_v52  ;;  %v2571_v44 = vld [vmem:[#allocation3 + $0x58] sm:$0xff] }
 0x231   : > { %2570 = vst [vmem:[#allocation3 + $0x50] sm:$0xff] %v7274_v60  ;;  %2667 = vst [vmem:[#allocation3 + $0x170] sm:$0xff] %v7278_v61  ;;  %v7286_v23 = vsel %vm6111_vm9, %v2474_v56, %v2565_v12  ;;  %v7290_v30 = vsel %vm6143_vm10, %v2606_v41, %v2662_v53  ;;  %v7292_v28 = vpack.c.bf16 %v2249_v22, %v2248_v49  ;;  %v5571_v13 = vpop.f32.mrb[152].mxu0 }
 0x232   : > { %2567 = vst [vmem:[#allocation3 + $0x48] sm:$0xff] %v7286_v23  ;;  %2664 = vst [vmem:[#allocation3 + $0x168] sm:$0xff] %v7290_v30  ;;  %v2490_v20 = vshrl.u32 %v7280_v39, 16  ;;  %v2493_v10 = vshll.u32 %v7280_v39, 16  ;;  %v2206_v2 = vadd.f32 %v5571_v13, %v7046_v4  ;;  %v2197_v40 = vpop.f32.mrb[153].mxu0  ;;  %3489 = vmatmul.mubr.bf16.gmra.mrb[148].mxu1 %v7193_v54  ;;  %v2574_v4 = vld [vmem:[#allocation3 + $0x60] sm:$0xff] }
 0x233   : > { %v2483_v48 = vshrl.u32 %v7292_v28, 16  ;;  %v2486_v32 = vshll.u32 %v7292_v28, 16  ;;  %v2198_v15 = vadd.f32 %v2197_v40, %v7034_v9  ;;  %v5572_v51 = vpop.f32.mrb[154].mxu0  ;;  %3496 = vmatprep.mubr.bf16.mxu1 %v7134_v27  ;;  %3642 = vmatmul.mubr.bf16.gmra.mrb[176].mxu0 %v7132_v21  ;;  %v2671_v54 = vld [vmem:[#allocation3 + $0x180] sm:$0xff] }
 0x234   : > { %v2492_v63 = vrot.slane %v2490_v20, 7  ;;  %v2611_v33 = vrot.slane %v2493_v10, 1  ;;  %v2209_v3 = vadd.f32 %v5572_v51, %v7048_v43  ;;  %v2200_v7 = vpop.f32.mrb[155].mxu0  ;;  %3649 = vmatprep.mubr.bf16.mxu0 %v7178_v17  ;;  %v2254_v27 = vmax.f32 %v2206_v2, 0.0 }
 0x235   : > { %v2485_v0 = vrot.slane %v2483_v48, 7  ;;  %v2609_v62 = vrot.slane %v2486_v32, 1  ;;  %v2201_v52 = vadd.f32 %v2200_v7, %v7039_v36  ;;  %v2252_v29 = vmax.f32 %v2198_v15, 0.0 }
 0x236   : > { %v2495_v57 = vor.u32 %v2493_v10, %v2492_v63  ;;  %v2612_v9 = vor.u32 %v2611_v33, %v2490_v20  ;;  %v2255_v5 = vmax.f32 %v2209_v3, 0.0 }
 0x237   : > { %v2488_v21 = vor.u32 %v2486_v32, %v2485_v0  ;;  %v2610_v50 = vor.u32 %v2609_v62, %v2483_v48  ;;  %v2253_v16 = vmax.f32 %v2201_v52, 0.0 }
 0x238   : > { %v7310_v43 = vsel %vm6111_vm9, %v2495_v57, %v2574_v4  ;;  %v7314_v12 = vsel %vm6143_vm10, %v2612_v9, %v2671_v54  ;;  %v7316_v53 = vpack.c.bf16 %v2255_v5, %v2254_v27  ;;  %v2577_v4 = vld [vmem:[#allocation3 + $0x68] sm:$0xff]  ;;  %v2791_v46 = vld [vmem:[#allocation3 + $0x50] sm:$0xff] }
 0x239   : > { %2576 = vst [vmem:[#allocation3 + $0x60] sm:$0xff] %v7310_v43  ;;  %2673 = vst [vmem:[#allocation3 + $0x180] sm:$0xff] %v7314_v12  ;;  %v7322_v36 = vsel %vm6111_vm9, %v2488_v21, %v2571_v44  ;;  %v7326_v35 = vsel %vm6143_vm10, %v2610_v50, %v2668_v8  ;;  %v7328_v37 = vpack.c.bf16 %v2253_v16, %v2252_v29  ;;  %v5575_v56 = vpop.f32.mrb[156].mxu0  ;;  %v2674_v54 = vld [vmem:[#allocation3 + $0x188] sm:$0xff] }
 0x23a   : > { %2573 = vst [vmem:[#allocation3 + $0x58] sm:$0xff] %v7322_v36  ;;  %2670 = vst [vmem:[#allocation3 + $0x178] sm:$0xff] %v7326_v35  ;;  %v2504_v41 = vshrl.u32 %v7316_v53, 16  ;;  %v2507_v49 = vshll.u32 %v7316_v53, 16  ;;  %v2222_v22 = vadd.f32 %v5575_v56, %v7064_v25  ;;  %v2213_v13 = vpop.f32.mrb[157].mxu0  ;;  %3497 = vmatmul.mubr.bf16.gmra.mrb[152].mxu1 %v7178_v17  ;;  %v2580_v25 = vld [vmem:[#allocation3 + $0x70] sm:$0xff] }
 0x23b   : > { %v2497_v20 = vshrl.u32 %v7328_v37, 16  ;;  %v2500_v10 = vshll.u32 %v7328_v37, 16  ;;  %v2214_v2 = vadd.f32 %v2213_v13, %v7052_v31  ;;  %v5576_v40 = vpop.f32.mrb[158].mxu0  ;;  %3504 = vmatprep.mubr.bf16.mxu1 %v7199_v14  ;;  %3650 = vmatmul.mubr.bf16.gmra.mrb[180].mxu0 %v7197_v1  ;;  %v2677_v17 = vld [vmem:[#allocation3 + $0x190] sm:$0xff] }
 0x23c   : > { %v2506_v48 = vrot.slane %v2504_v41, 7  ;;  %v2615_v32 = vrot.slane %v2507_v49, 1  ;;  %v2225_v15 = vadd.f32 %v5576_v40, %v7068_v26  ;;  %v2216_v51 = vpop.f32.mrb[159].mxu0  ;;  %3657 = vmatprep.mubr.bf16.mxu0 %v7243_v6  ;;  %v2258_v14 = vmax.f32 %v2222_v22, 0.0 }
 0x23d   : > { %v2499_v63 = vrot.slane %v2497_v20, 7  ;;  %v2613_v33 = vrot.slane %v2500_v10, 1  ;;  %v2217_v3 = vadd.f32 %v2216_v51, %v7057_v42  ;;  %v2256_v52 = vmax.f32 %v2214_v2, 0.0  ;;  %v2583_v2 = vld [vmem:[#allocation3 + $0x78] sm:$0xff] }
 0x23e   : > { %v2509_v7 = vor.u32 %v2507_v49, %v2506_v48  ;;  %v2616_v31 = vor.u32 %v2615_v32, %v2504_v41  ;;  %v2259_v0 = vmax.f32 %v2225_v15, 0.0  ;;  %v2586_v41 = vld [vmem:[#allocation3 + $0x80] sm:$0xff] }
 0x23f   : > { %v2502_v1 = vor.u32 %v2500_v10, %v2499_v63  ;;  %v2614_v62 = vor.u32 %v2613_v33, %v2497_v20  ;;  %v2257_v57 = vmax.f32 %v2217_v3, 0.0  ;;  %v2683_v49 = vld [vmem:[#allocation3 + $0x1a0] sm:$0xff]  ;;  %v5804_v63 = vld [vmem:[%s7870_s3 + $0x208] sm:$0xff]   ;;  %v7436_v33 = vld [vmem:[#allocation3 + $0x130] sm:$0xff] }
 0x240   : > { %v7346_v26 = vsel %vm6111_vm9, %v2509_v7, %v2580_v25  ;;  %v7350_v9 = vsel %vm6143_vm10, %v2616_v31, %v2677_v17  ;;  %v7352_v44 = vpack.c.bf16 %v2259_v0, %v2258_v14  ;;  %v2750_v17 = vld [vmem:[#allocation3 + $0x98] sm:$0xff]  ;;  %v2800_v3 = vld [vmem:[#allocation3 + $0xa0] sm:$0xff]  ;;  %v5806_v7 = vld [vmem:[%s7870_s3 + $0x218] sm:$0xff]  }
 0x241   : > { %2582 = vst [vmem:[#allocation3 + $0x70] sm:$0xff] %v7346_v26  ;;  %2679 = vst [vmem:[#allocation3 + $0x190] sm:$0xff] %v7350_v9  ;;  %v7358_v42 = vsel %vm6111_vm9, %v2502_v1, %v2577_v4  ;;  %v7362_v8 = vsel %vm6143_vm10, %v2614_v62, %v2674_v54  ;;  %v7364_v27 = vpack.c.bf16 %v2257_v57, %v2256_v52  ;;  %v7447_v31 = vld [vmem:[#allocation3 + $0x138] sm:$0xff]  ;;  %v2783_v4 = vld [vmem:[#allocation3 + $0x10] sm:$0xff] }
 0x242   : > { %2579 = vst [vmem:[#allocation3 + $0x68] sm:$0xff] %v7358_v42  ;;  %2676 = vst [vmem:[#allocation3 + $0x188] sm:$0xff] %v7362_v8  ;;  %v2518_v5 = vshrl.u32 %v7352_v44, 16  ;;  %v2521_v21 = vshll.u32 %v7352_v44, 16  ;;  %3505 = vmatmul.mubr.bf16.gmra.mrb[156].mxu1 %v7243_v6  ;;  %v2680_v6 = vld [vmem:[#allocation3 + $0x198] sm:$0xff]  ;;  %v5807_v54 = vld [vmem:[%s7870_s3 + $0x220] sm:$0xff]  }
 0x243   : > { %v2511_v50 = vshrl.u32 %v7364_v27, 16  ;;  %v2514_v29 = vshll.u32 %v7364_v27, 16  ;;  %3512 = vmatprep.mubr.bf16.mxu1 %v7184_v11  ;;  %3658 = vmatmul.mubr.bf16.gmra.mrb[184].mxu0 %v7182_v45  ;;  %v5808_v14 = vld [vmem:[%s7870_s3 + $0x228] sm:$0xff]   ;;  %v7456_v0 = vld [vmem:[#allocation3 + $0x140] sm:$0xff]  ;;  %v2802_v62 = vld [vmem:[#allocation3 + $0xb0] sm:$0xff] }
 0x244   : > { %v2520_v16 = vrot.slane %v2518_v5, 7  ;;  %v2619_v56 = vrot.slane %v2521_v21, 1  ;;  %3665 = vmatprep.mubr.bf16.mxu0 %v7228_v47  ;;  %v2784_v1 = vld [vmem:[#allocation3 + $0x18] sm:$0xff]  ;;  %v5809_v52 = vld [vmem:[%s7870_s3 + $0x230] sm:$0xff]   ;;  %v5810_v57 = vld [vmem:[%s7870_s3 + $0x238] sm:$0xff]  }
 0x245   : > { %v2513_v22 = vrot.slane %v2511_v50, 7  ;;  %v2617_v13 = vrot.slane %v2514_v29, 1 }
 0x246   : > { %v2523_v20 = vor.u32 %v2521_v21, %v2520_v16  ;;  %v2620_v10 = vor.u32 %v2619_v56, %v2518_v5  ;;  %v7465_v5 = vld [vmem:[#allocation3 + $0x148] sm:$0xff]  ;;  %v2785_v21 = vld [vmem:[#allocation3 + $0x20] sm:$0xff] }
 0x247   : > { %v2516_v40 = vor.u32 %v2514_v29, %v2513_v22  ;;  %v2618_v48 = vor.u32 %v2617_v13, %v2511_v50  ;;  %v2803_v50 = vld [vmem:[#allocation3 + $0xb8] sm:$0xff]  ;;  %v7468_v29 = vld [vmem:[#allocation3 + $0x150] sm:$0xff]  ;;  %v2786_v16 = vld [vmem:[#allocation3 + $0x28] sm:$0xff] }
 0x248   : > { %v7378_v32 = vsel %vm6111_vm9, %v2523_v20, %v2586_v41  ;;  %v7382_v45 = vsel %vm6143_vm10, %v2620_v10, %v2683_v49  ;;  %v2804_v56 = vld [vmem:[#allocation3 + $0xc0] sm:$0xff]  ;;  %v7471_v41 = vld [vmem:[#allocation3 + $0x158] sm:$0xff]  ;;  %v2787_v49 = vld [vmem:[#allocation3 + $0x30] sm:$0xff] }
 0x249   : > { %2588 = vst [vmem:[#allocation3 + $0x80] sm:$0xff] %v7378_v32  ;;  %2685 = vst [vmem:[#allocation3 + $0x1a0] sm:$0xff] %v7382_v45  ;;  %v7388_v11 = vsel %vm6111_vm9, %v2516_v40, %v2583_v2  ;;  %v7392_v15 = vsel %vm6143_vm10, %v2618_v48, %v2680_v6  ;;  %v2805_v22 = vld [vmem:[#allocation3 + $0xc8] sm:$0xff]  ;;  %v7474_v13 = vld [vmem:[#allocation3 + $0x160] sm:$0xff] }
 0x24a   : > { %2585 = vst [vmem:[#allocation3 + $0x78] sm:$0xff] %v7388_v11  ;;  %2682 = vst [vmem:[#allocation3 + $0x198] sm:$0xff] %v7392_v15  ;;  %3513 = vmatmul.mubr.bf16.gmra.mrb[160].mxu1 %v7228_v47  ;;  %v2788_v20 = vld [vmem:[#allocation3 + $0x38] sm:$0xff]  ;;  %v2392_v10 = vld [vmem:[#allocation3 + $0x1a8] sm:$0x80] }
 0x24b   : > { %3520 = vmatprep.mubr.bf16.mxu1 %v7249_v59  ;;  %3666 = vmatmul.mubr.bf16.gmra.mrb[188].mxu0 %v7247_v38  ;;  %v2806_v2 = vld [vmem:[#allocation3 + $0xd0] sm:$0xff]  ;;  %v2393_v6 = vsel %vm6095_vm7, 0, %v2392_v10  ;;  %v2789_v40 = vld [vmem:[#allocation3 + $0x40] sm:$0xff] }
 0x24c   : > { %3673 = vmatprep.mubr.bf16.mxu0 %v7286_v23  ;;  %2394 = vst [vmem:[#allocation3 + $0x1a8] sm:$0x80] %v2393_v6  ;;  %v2808_v48 = vld [vmem:[#allocation3 + $0xe0] sm:$0xff] }
 0x252   : > { %3521 = vmatmul.mubr.bf16.gmra.mrb[164].mxu1 %v7286_v23 }
 0x253   : > { %3528 = vmatprep.mubr.bf16.mxu1 %v7234_v58  ;;  %3674 = vmatmul.mubr.bf16.gmra.mrb[192].mxu0 %v7232_v24  ;;  %v5073_v55 = vpop.f32.mrb[128].mxu1  ;;  %v2766_v24 = vld [vmem:[#allocation3 + $0x128] sm:$0xff] }
 0x254   : > { %3681 = vmatprep.mubr.bf16.mxu0 %v7274_v60  ;;  %v5074_v19 = vpop.f32.mrb[129].mxu1  ;;  %v2338_v58 = vld [vmem:[#allocation3 + $0x88] sm:$0x1] }
 0x255   : > { %v7408_v47 = vadd.f32 %v5074_v19, %v5073_v55  ;;  %v5076_v38 = vpop.f32.mrb[130].mxu1 }
 0x256   : > { %v5077_v51 = vpop.f32.mrb[131].mxu1 }
 0x257   : > { %v7410_v25 = vadd.f32 %v5077_v51, %v5076_v38 }
 0x25a   : > { %3529 = vmatmul.mubr.bf16.gmra.mrb[168].mxu1 %v7274_v60  ;;  %v2339_v60 = vsel %vm6081_vm2, 0, %v2338_v58 }
 0x25b   : > { %3536 = vmatprep.mubr.bf16.mxu1 %v7292_v28  ;;  %3682 = vmatmul.mubr.bf16.gmra.mrb[196].mxu0 %v7290_v30  ;;  %2340 = vst [vmem:[#allocation3 + $0x88] sm:$0x1] %v2339_v60 }
 0x25c   : > { %3689 = vmatprep.mubr.bf16.mxu0 %v7322_v36 }
 0x262   : > { %3537 = vmatmul.mubr.bf16.gmra.mrb[172].mxu1 %v7322_v36 }
 0x263   : > { %3544 = vmatprep.mubr.bf16.mxu1 %v7280_v39  ;;  %3690 = vmatmul.mubr.bf16.gmra.mrb[200].mxu0 %v7278_v61 }
 0x264   : > { %3697 = vmatprep.mubr.bf16.mxu0 %v7310_v43 }
 0x26a   : > { %3545 = vmatmul.mubr.bf16.gmra.mrb[176].mxu1 %v7310_v43 }
 0x26b   : > { %3552 = vmatprep.mubr.bf16.mxu1 %v7328_v37  ;;  %3698 = vmatmul.mubr.bf16.gmra.mrb[204].mxu0 %v7326_v35 }
 0x26c   : > { %3705 = vmatprep.mubr.bf16.mxu0 %v7358_v42 }
 0x272   : > { %3553 = vmatmul.mubr.bf16.gmra.mrb[180].mxu1 %v7358_v42 }
 0x273   : > { %3560 = vmatprep.mubr.bf16.mxu1 %v7316_v53  ;;  %3706 = vmatmul.mubr.bf16.gmra.mrb[208].mxu0 %v7314_v12 }
 0x274   : > { %3713 = vmatprep.mubr.bf16.mxu0 %v7346_v26 }
 0x27a   : > { %3561 = vmatmul.mubr.bf16.gmra.mrb[184].mxu1 %v7346_v26 }
 0x27b   : > { %3568 = vmatprep.mubr.bf16.mxu1 %v7364_v27  ;;  %3714 = vmatmul.mubr.bf16.gmra.mrb[212].mxu0 %v7362_v8 }
 0x27c   : > { %3721 = vmatprep.mubr.bf16.mxu0 %v7388_v11 }
 0x282   : > { %3569 = vmatmul.mubr.bf16.gmra.mrb[188].mxu1 %v7388_v11 }
 0x283   : > { %3722 = vmatmul.mubr.bf16.gmra.mrb[216].mxu0 %v7350_v9  ;;  %3770 = vmatprep.mubr.bf16.mxu1 %v2766_v24 }
 0x284   : > { %3729 = vmatprep.mubr.bf16.mxu0 %v7378_v32 }
 0x28a   : > { %3771 = vmatmul.mubr.bf16.vlgmr.msra.gmra.mrb[192].mxu1 %v2750_v17 }
 0x28b   : > { %3730 = vmatmul.mubr.bf16.gmra.mrb[220].mxu0 %v7392_v15  ;;  %3778 = vmatprep.mubr.bf16.mxu1 %v7436_v33 }
 0x28c   : > { %5578 = vmatpush3.bf16.msra.mxu1 %v7076_v18  ;;  %3931 = vmatprep.mubr.bf16.mxu0 %v2800_v3  ;;  %v2801_v18 = vld [vmem:[#allocation3 + $0xa8] sm:$0xff] }
 0x28d   : > { %5579 = vmatprep.subr.bf16.mxu1 %v5804_v63 }
 0x290   : > { %5580 = vmatpush3.bf16.msra.mxu1 %v5804_v63 }
 0x291   : > { %5581 = vmatprep.subr.bf16.mxu1 %v5805_v34 }
 0x292   : > { %3779 = vmatmul.mubr.bf16.gmra.mrb[196].mxu1 %v2800_v3 }
 0x293   : > { %3786 = vmatprep.mubr.bf16.mxu1 %v7447_v31  ;;  %3932 = vmatmul.mubr.bf16.vlgmr.msra.gmra.mrb[224].mxu0 %v2783_v4 }
 0x294   : > { %3939 = vmatprep.mubr.bf16.mxu0 %v2801_v18  ;;  %5582 = vmatpush3.bf16.msra.mxu1 %v5805_v34 }
 0x295   : > { %5583 = vmatprep.subr.bf16.mxu1 %v5806_v7 }
 0x298   : > { %5584 = vmatpush3.bf16.msra.mxu1 %v5806_v7 }
 0x299   : > { %5585 = vmatprep.subr.bf16.mxu1 %v5807_v54 }
 0x29a   : > { %3787 = vmatmul.mubr.bf16.gmra.mrb[200].mxu1 %v2801_v18 }
 0x29b   : > { %3794 = vmatprep.mubr.bf16.mxu1 %v7456_v0  ;;  %3940 = vmatmul.mubr.bf16.gmra.mrb[228].mxu0 %v2784_v1 }
 0x29c   : > { %3947 = vmatprep.mubr.bf16.mxu0 %v2802_v62  ;;  %5586 = vmatpush3.bf16.msra.mxu1 %v5807_v54 }
 0x29d   : > { %5587 = vmatprep.subr.bf16.mxu1 %v5808_v14 }
 0x2a0   : > { %5588 = vmatpush3.bf16.msra.mxu1 %v5808_v14 }
 0x2a1   : > { %5589 = vmatprep.subr.bf16.mxu1 %v5809_v52 }
 0x2a2   : > { %3795 = vmatmul.mubr.bf16.gmra.mrb[204].mxu1 %v2802_v62 }
 0x2a3   : > { %3802 = vmatprep.mubr.bf16.mxu1 %v7465_v5  ;;  %3948 = vmatmul.mubr.bf16.gmra.mrb[232].mxu0 %v2785_v21 }
 0x2a4   : > { %3955 = vmatprep.mubr.bf16.mxu0 %v2803_v50  ;;  %5590 = vmatpush3.bf16.msra.mxu1 %v5809_v52 }
 0x2a5   : > { %5591 = vmatprep.subr.bf16.mxu1 %v5810_v57 }
 0x2a8   : > { %5592 = vmatpush3.bf16.msra.mxu1 %v5810_v57 }
 0x2aa   : > { %3803 = vmatmul.mubr.bf16.gmra.mrb[208].mxu1 %v2803_v50 }
 0x2ab   : > { %3810 = vmatprep.mubr.bf16.mxu1 %v7468_v29  ;;  %3956 = vmatmul.mubr.bf16.gmra.mrb[236].mxu0 %v2786_v16 }
 0x2ac   : > { %3963 = vmatprep.mubr.bf16.mxu0 %v2804_v56 }
 0x2b2   : > { %3811 = vmatmul.mubr.bf16.gmra.mrb[212].mxu1 %v2804_v56 }
 0x2b3   : > { %3818 = vmatprep.mubr.bf16.mxu1 %v7471_v41  ;;  %3964 = vmatmul.mubr.bf16.gmra.mrb[240].mxu0 %v2787_v49 }
 0x2b4   : > { %3971 = vmatprep.mubr.bf16.mxu0 %v2805_v22 }
 0x2ba   : > { %3819 = vmatmul.mubr.bf16.gmra.mrb[216].mxu1 %v2805_v22 }
 0x2bb   : > { %3826 = vmatprep.mubr.bf16.mxu1 %v7474_v13  ;;  %3972 = vmatmul.mubr.bf16.gmra.mrb[244].mxu0 %v2788_v20 }
 0x2bc   : > { %3979 = vmatprep.mubr.bf16.mxu0 %v2806_v2 }
 0x2c2   : > { %3827 = vmatmul.mubr.bf16.gmra.mrb[220].mxu1 %v2806_v2 }
 0x2c3   : > { %3834 = vmatprep.mubr.bf16.mxu1 %v7290_v30  ;;  %3980 = vmatmul.mubr.bf16.gmra.mrb[248].mxu0 %v2789_v40 }
 0x2c4   : > { %3987 = vmatprep.mubr.bf16.mxu0 %v7249_v59 }
 0x2ca   : > { %3835 = vmatmul.mubr.bf16.gmra.mrb[224].mxu1 %v7249_v59  ;;  %v7497_v59 = vld [vmem:[%s7871_s4] ss:$0 sm:$0xff] }
 0x2cb   : > { %3842 = vmatprep.mubr.bf16.mxu1 %v7278_v61  ;;  %3988 = vmatmul.mubr.bf16.gmra.mrb[252].mxu0 %v7286_v23  ;;  %v3454_v38 = vadd.f32 %v7410_v25, %v7497_v59 }
 0x2cc   : > { %3995 = vmatprep.mubr.bf16.mxu0 %v2808_v48 }
 0x2d2   : > { %3843 = vmatmul.mubr.bf16.gmra.mrb[228].mxu1 %v2808_v48 }
 0x2d3   : > { %3850 = vmatprep.mubr.bf16.mxu1 %v7326_v35  ;;  %3996 = vmatmul.mubr.bf16.gmra.mrb[0].mxu0 %v2791_v46 }
 0x2d4   : > { %4003 = vmatprep.mubr.bf16.mxu0 %v7292_v28 }
 0x2da   : > { %3851 = vmatmul.mubr.bf16.gmra.mrb[232].mxu1 %v7292_v28 }
 0x2db   : > { %3858 = vmatprep.mubr.bf16.mxu1 %v7314_v12  ;;  %4004 = vmatmul.mubr.bf16.gmra.mrb[4].mxu0 %v7322_v36 }
 0x2dc   : > { %4011 = vmatprep.mubr.bf16.mxu0 %v7280_v39 }
 0x2e2   : > { %3859 = vmatmul.mubr.bf16.gmra.mrb[236].mxu1 %v7280_v39  ;;  %v3451_v39 = vadd.f32 %v7408_v47, %v7497_v59 }
 0x2e3   : > { %3866 = vmatprep.mubr.bf16.mxu1 %v7362_v8  ;;  %4012 = vmatmul.mubr.bf16.gmra.mrb[8].mxu0 %v7310_v43 }
 0x2e4   : > { %4019 = vmatprep.mubr.bf16.mxu0 %v7328_v37 }
 0x2e5   : > { %v5079_v61 = vpop.f32.mrb[132].mxu1 }
 0x2e6   : > { %v5080_v23 = vpop.f32.mrb[133].mxu1  ;;  %v5185_v30 = vpop.f32.mrb[160].mxu0 }
 0x2e7   : > { %v5081_v28 = vadd.f32 %v5080_v23, %v5079_v61  ;;  %v5082_v12 = vpop.f32.mrb[134].mxu1  ;;  %v5186_v36 = vpop.f32.mrb[161].mxu0 }
 0x2e8   : > { %v5187_v35 = vadd.f32 %v5186_v36, %v5185_v30  ;;  %v5083_v8 = vpop.f32.mrb[135].mxu1  ;;  %v5188_v55 = vpop.f32.mrb[162].mxu0 }
 0x2e9   : > { %v5084_v43 = vadd.f32 %v5083_v8, %v5082_v12  ;;  %v5189_v19 = vpop.f32.mrb[163].mxu0  ;;  %v3459_v25 = vadd.f32 %v5081_v28, %v7497_v59 }
 0x2ea   : > { %v7503_v51 = vadd.f32 %v5187_v35, %v3451_v39  ;;  %v5190_v24 = vadd.f32 %v5189_v19, %v5188_v55  ;;  %3867 = vmatmul.mubr.bf16.gmra.mrb[240].mxu1 %v7328_v37 }
 0x2eb   : > { %3874 = vmatprep.mubr.bf16.mxu1 %v7350_v9  ;;  %4020 = vmatmul.mubr.bf16.gmra.mrb[12].mxu0 %v7358_v42  ;;  %v3462_v9 = vadd.f32 %v5084_v43, %v7497_v59  ;;  %v5831_v43 = vld [vmem:[#allocation2 + $0x90] sm:$0xff] }
 0x2ec   : > { %v7508_v58 = vadd.f32 %v5190_v24, %v3454_v38  ;;  %4027 = vmatprep.mubr.bf16.mxu0 %v7316_v53 }
 0x2ed   : > { %v5085_v47 = vpop.f32.mrb[136].mxu1 }
 0x2ee   : > { %v5086_v60 = vpop.f32.mrb[137].mxu1  ;;  %v5191_v17 = vpop.f32.mrb[164].mxu0 }
 0x2ef   : > { %v5087_v63 = vadd.f32 %v5086_v60, %v5085_v47  ;;  %v5088_v3 = vpop.f32.mrb[138].mxu1  ;;  %v5192_v34 = vpop.f32.mrb[165].mxu0 }
 0x2f0   : > { %v5193_v7 = vadd.f32 %v5192_v34, %v5191_v17  ;;  %v5089_v4 = vpop.f32.mrb[139].mxu1  ;;  %v5194_v18 = vpop.f32.mrb[166].mxu0 }
 0x2f1   : > { %v5090_v37 = vadd.f32 %v5089_v4, %v5088_v3  ;;  %v5195_v54 = vpop.f32.mrb[167].mxu0  ;;  %v3467_v56 = vadd.f32 %v5087_v63, %v7497_v59 }
 0x2f2   : > { %v7513_v42 = vadd.f32 %v5193_v7, %v3459_v25  ;;  %v5196_v14 = vadd.f32 %v5195_v54, %v5194_v18  ;;  %3875 = vmatmul.mubr.bf16.gmra.mrb[244].mxu1 %v7316_v53 }
 0x2f3   : > { %3882 = vmatprep.mubr.bf16.mxu1 %v7392_v15  ;;  %4028 = vmatmul.mubr.bf16.gmra.mrb[16].mxu0 %v7346_v26  ;;  %v3470_v15 = vadd.f32 %v5090_v37, %v7497_v59 }
 0x2f4   : > { %v7518_v1 = vadd.f32 %v5196_v14, %v3462_v9  ;;  %4035 = vmatprep.mubr.bf16.mxu0 %v7364_v27 }
 0x2f5   : > { %v5091_v62 = vpop.f32.mrb[140].mxu1 }
 0x2f6   : > { %v5092_v52 = vpop.f32.mrb[141].mxu1  ;;  %v5197_v57 = vpop.f32.mrb[168].mxu0 }
 0x2f7   : > { %v5093_v21 = vadd.f32 %v5092_v52, %v5091_v62  ;;  %v5094_v50 = vpop.f32.mrb[142].mxu1  ;;  %v5198_v16 = vpop.f32.mrb[169].mxu0 }
 0x2f8   : > { %v5199_v49 = vadd.f32 %v5198_v16, %v5197_v57  ;;  %v5095_v22 = vpop.f32.mrb[143].mxu1  ;;  %v5200_v20 = vpop.f32.mrb[170].mxu0 }
 0x2f9   : > { %v5096_v53 = vadd.f32 %v5095_v22, %v5094_v50  ;;  %v5201_v10 = vpop.f32.mrb[171].mxu0  ;;  %v3475_v28 = vadd.f32 %v5093_v21, %v7497_v59 }
 0x2fa   : > { %v7523_v26 = vadd.f32 %v5199_v49, %v3467_v56  ;;  %v5202_v2 = vadd.f32 %v5201_v10, %v5200_v20  ;;  %3883 = vmatmul.mubr.bf16.gmra.mrb[248].mxu1 %v7364_v27 }
 0x2fb   : > { %3890 = vmatprep.mubr.bf16.mxu1 %v7382_v45  ;;  %4036 = vmatmul.mubr.bf16.gmra.mrb[20].mxu0 %v7388_v11  ;;  %v3478_v45 = vadd.f32 %v5096_v53, %v7497_v59 }
 0x2fc   : > { %v7528_v6 = vadd.f32 %v5202_v2, %v3470_v15  ;;  %4043 = vmatprep.mubr.bf16.mxu0 %v7352_v44 }
 0x2fd   : > { %v5097_v40 = vpop.f32.mrb[144].mxu1 }
 0x2fe   : > { %v5098_v48 = vpop.f32.mrb[145].mxu1  ;;  %v5203_v46 = vpop.f32.mrb[172].mxu0 }
 0x2ff   : > { %v5099_v61 = vadd.f32 %v5098_v48, %v5097_v40  ;;  %v5100_v23 = vpop.f32.mrb[146].mxu1  ;;  %v5204_v30 = vpop.f32.mrb[173].mxu0 }
 0x300   : > { %v5205_v12 = vadd.f32 %v5204_v30, %v5203_v46  ;;  %v5101_v36 = vpop.f32.mrb[147].mxu1  ;;  %v5206_v39 = vpop.f32.mrb[174].mxu0 }
 0x301   : > { %v5102_v27 = vadd.f32 %v5101_v36, %v5100_v23  ;;  %v5207_v35 = vpop.f32.mrb[175].mxu0  ;;  %v3483_v63 = vadd.f32 %v5099_v61, %v7497_v59 }
 0x302   : > { %v7533_v11 = vadd.f32 %v5205_v12, %v3475_v28  ;;  %v5208_v8 = vadd.f32 %v5207_v35, %v5206_v39  ;;  %3891 = vmatmul.mubr.bf16.gmra.mrb[252].mxu1 %v7352_v44  ;;  %v2798_v44 = vld [vmem:[#allocation3 + $0x88] sm:$0xff] }
 0x303   : > { %4044 = vmatmul.mubr.bf16.gmra.mrb[24].mxu0 %v7378_v32  ;;  %5593 = vmatprep.mubr.bf16.mxu1 %v7436_v33  ;;  %v3486_v33 = vadd.f32 %v5102_v27, %v7497_v59 }
 0x304   : > { %v7538_v55 = vadd.f32 %v5208_v8, %v3478_v45  ;;  %4051 = vmatprep.mubr.bf16.mxu0 %v5831_v43 }
 0x305   : > { %v5103_v19 = vpop.f32.mrb[148].mxu1 }
 0x306   : > { %v5104_v38 = vpop.f32.mrb[149].mxu1  ;;  %v5209_v24 = vpop.f32.mrb[176].mxu0 }
 0x307   : > { %v5105_v47 = vadd.f32 %v5104_v38, %v5103_v19  ;;  %v5106_v60 = vpop.f32.mrb[150].mxu1  ;;  %v5210_v17 = vpop.f32.mrb[177].mxu0 }
 0x308   : > { %v5211_v3 = vadd.f32 %v5210_v17, %v5209_v24  ;;  %v5107_v34 = vpop.f32.mrb[151].mxu1  ;;  %v5212_v25 = vpop.f32.mrb[178].mxu0 }
 0x309   : > { %v5108_v7 = vadd.f32 %v5107_v34, %v5106_v60  ;;  %v5213_v32 = vpop.f32.mrb[179].mxu0  ;;  %v3491_v21 = vadd.f32 %v5105_v47, %v7497_v59  ;;  %v2824_v34 = vld [vmem:[#allocation3 + $0x168] sm:$0xff] }
 0x30a   : > { %v7542_v4 = vadd.f32 %v5211_v3, %v3483_v63  ;;  %v5214_v18 = vadd.f32 %v5213_v32, %v5212_v25  ;;  %5594 = vmatmul.mubr.bf16.vlgmr.msra.gmra.mrb[0].mxu1 %v7447_v31 }
 0x30b   : > { %4052 = vmatmul.mubr.bf16.gmra.mrb[28].mxu0 %v2798_v44  ;;  %5597 = vmatprep.mubr.bf16.mxu1 %v7456_v0  ;;  %v3494_v31 = vadd.f32 %v5108_v7, %v7497_v59  ;;  %v2825_v44 = vld [vmem:[#allocation3 + $0x170] sm:$0xff] }
 0x30c   : > { %v7546_v37 = vadd.f32 %v5214_v18, %v3486_v33 }
 0x30d   : > { %v5109_v54 = vpop.f32.mrb[152].mxu1 }
 0x30e   : > { %v5110_v9 = vpop.f32.mrb[153].mxu1  ;;  %v5215_v14 = vpop.f32.mrb[180].mxu0 }
 0x30f   : > { %v5111_v62 = vadd.f32 %v5110_v9, %v5109_v54  ;;  %v5112_v52 = vpop.f32.mrb[154].mxu1  ;;  %v5216_v57 = vpop.f32.mrb[181].mxu0 }
 0x310   : > { %v5217_v50 = vadd.f32 %v5216_v57, %v5215_v14  ;;  %v5113_v16 = vpop.f32.mrb[155].mxu1  ;;  %v5218_v56 = vpop.f32.mrb[182].mxu0 }
 0x311   : > { %v5114_v49 = vadd.f32 %v5113_v16, %v5112_v52  ;;  %v5219_v22 = vpop.f32.mrb[183].mxu0  ;;  %v3499_v61 = vadd.f32 %v5111_v62, %v7497_v59 }
 0x312   : > { %v7550_v20 = vadd.f32 %v5217_v50, %v3491_v21  ;;  %v5220_v0 = vadd.f32 %v5219_v22, %v5218_v56  ;;  %5598 = vmatmul.mubr.bf16.gmra.mrb[4].mxu1 %v7465_v5  ;;  %v2826_v56 = vld [vmem:[#allocation3 + $0x178] sm:$0xff] }
 0x313   : > { %5601 = vmatprep.mubr.bf16.mxu1 %v7468_v29  ;;  %v3502_v39 = vadd.f32 %v5114_v49, %v7497_v59 }
 0x314   : > { %v7554_v53 = vadd.f32 %v5220_v0, %v3494_v31  ;;  %v2827_v0 = vld [vmem:[#allocation3 + $0x180] sm:$0xff] }
 0x315   : > { %v5115_v10 = vpop.f32.mrb[156].mxu1 }
 0x316   : > { %v5116_v15 = vpop.f32.mrb[157].mxu1  ;;  %v5221_v2 = vpop.f32.mrb[184].mxu0 }
 0x317   : > { %v5117_v40 = vadd.f32 %v5116_v15, %v5115_v10  ;;  %v5118_v48 = vpop.f32.mrb[158].mxu1  ;;  %v5222_v46 = vpop.f32.mrb[185].mxu0 }
 0x318   : > { %v5223_v23 = vadd.f32 %v5222_v46, %v5221_v2  ;;  %v5119_v30 = vpop.f32.mrb[159].mxu1  ;;  %v5224_v28 = vpop.f32.mrb[186].mxu0 }
 0x319   : > { %v5120_v12 = vadd.f32 %v5119_v30, %v5118_v48  ;;  %v5225_v36 = vpop.f32.mrb[187].mxu0  ;;  %v3507_v24 = vadd.f32 %v5117_v40, %v7497_v59 }
 0x31a   : > { %v7558_v5 = vadd.f32 %v5223_v23, %v3499_v61  ;;  %v5226_v29 = vadd.f32 %v5225_v36, %v5224_v28  ;;  %5602 = vmatmul.mubr.bf16.gmra.mrb[8].mxu1 %v7471_v41 }
 0x31b   : > { %5605 = vmatprep.mubr.bf16.mxu1 %v7474_v13  ;;  %v3510_v41 = vadd.f32 %v5120_v12, %v7497_v59 }
 0x31c   : > { %v7562_v27 = vadd.f32 %v5226_v29, %v3502_v39  ;;  %v2828_v29 = vld [vmem:[#allocation3 + $0x188] sm:$0xff] }
 0x31d   : > { %v5121_v35 = vpop.f32.mrb[160].mxu1 }
 0x31e   : > { %v5122_v45 = vpop.f32.mrb[161].mxu1  ;;  %v5227_v8 = vpop.f32.mrb[188].mxu0 }
 0x31f   : > { %v5123_v43 = vadd.f32 %v5122_v45, %v5121_v35  ;;  %v5124_v19 = vpop.f32.mrb[162].mxu1  ;;  %v5228_v38 = vpop.f32.mrb[189].mxu0 }
 0x320   : > { %v5229_v47 = vadd.f32 %v5228_v38, %v5227_v8  ;;  %v5125_v60 = vpop.f32.mrb[163].mxu1  ;;  %v5230_v17 = vpop.f32.mrb[190].mxu0 }
 0x321   : > { %v5126_v63 = vadd.f32 %v5125_v60, %v5124_v19  ;;  %v5231_v3 = vpop.f32.mrb[191].mxu0  ;;  %v3515_v62 = vadd.f32 %v5123_v43, %v7497_v59  ;;  %v2829_v43 = vld [vmem:[#allocation3 + $0x190] sm:$0xff] }
 0x322   : > { %v7566_v25 = vadd.f32 %v5229_v47, %v3507_v24  ;;  %v5232_v13 = vadd.f32 %v5231_v3, %v5230_v17  ;;  %5606 = vmatmul.mubr.bf16.gmra.mrb[12].mxu1 %v2824_v34 }
 0x323   : > { %5609 = vmatprep.mubr.bf16.mxu1 %v2825_v44  ;;  %v3518_v49 = vadd.f32 %v5126_v63, %v7497_v59 }
 0x324   : > { %v7568_v7 = vadd.f32 %v5232_v13, %v3510_v41 }
 0x325   : > { %v5127_v32 = vpop.f32.mrb[164].mxu1 }
 0x326   : > { %v5128_v33 = vpop.f32.mrb[165].mxu1  ;;  %v5233_v18 = vpop.f32.mrb[192].mxu0 }
 0x327   : > { %v5129_v54 = vadd.f32 %v5128_v33, %v5127_v32  ;;  %v5130_v9 = vpop.f32.mrb[166].mxu1  ;;  %v5234_v14 = vpop.f32.mrb[193].mxu0  ;;  %v2830_v33 = vld [vmem:[#allocation3 + $0x198] sm:$0xff] }
 0x328   : > { %v5235_v52 = vadd.f32 %v5234_v14, %v5233_v18  ;;  %v5131_v57 = vpop.f32.mrb[167].mxu1  ;;  %v5236_v21 = vpop.f32.mrb[194].mxu0  ;;  %v2831_v14 = vld [vmem:[#allocation3 + $0x1a0] sm:$0xff] }
 0x329   : > { %v5132_v50 = vadd.f32 %v5131_v57, %v5130_v9  ;;  %v5237_v16 = vpop.f32.mrb[195].mxu0  ;;  %v3523_v23 = vadd.f32 %v5129_v54, %v7497_v59 }
 0x32a   : > { %v7572_v22 = vadd.f32 %v5235_v52, %v3515_v62  ;;  %v5238_v31 = vadd.f32 %v5237_v16, %v5236_v21  ;;  %5610 = vmatmul.mubr.bf16.gmra.mrb[16].mxu1 %v2826_v56 }
 0x32b   : > { %5613 = vmatprep.mubr.bf16.mxu1 %v2827_v0  ;;  %v3526_v35 = vadd.f32 %v5132_v50, %v7497_v59 }
 0x32c   : > { %v7574_v10 = vadd.f32 %v5238_v31, %v3518_v49  ;;  %v2832_v49 = vld [vmem:[#allocation3 + $0x1a8] sm:$0xff] }
 0x32d   : > { %v5133_v15 = vpop.f32.mrb[168].mxu1 }
 0x32e   : > { %v5134_v2 = vpop.f32.mrb[169].mxu1  ;;  %v5239_v40 = vpop.f32.mrb[196].mxu0 }
 0x32f   : > { %v5135_v48 = vadd.f32 %v5134_v2, %v5133_v15  ;;  %v5136_v46 = vpop.f32.mrb[170].mxu1  ;;  %v5240_v61 = vpop.f32.mrb[197].mxu0 }
 0x330   : > { %v5241_v30 = vadd.f32 %v5240_v61, %v5239_v40  ;;  %v5137_v28 = vpop.f32.mrb[171].mxu1  ;;  %v5242_v12 = vpop.f32.mrb[198].mxu0 }
 0x331   : > { %v5138_v36 = vadd.f32 %v5137_v28, %v5136_v46  ;;  %v5243_v39 = vpop.f32.mrb[199].mxu0  ;;  %v3531_v3 = vadd.f32 %v5135_v48, %v7497_v59 }
 0x332   : > { %v7578_v45 = vadd.f32 %v5241_v30, %v3523_v23  ;;  %v5244_v8 = vadd.f32 %v5243_v39, %v5242_v12  ;;  %5614 = vmatmul.mubr.bf16.gmra.mrb[20].mxu1 %v2828_v29 }
 0x333   : > { %5617 = vmatprep.mubr.bf16.mxu1 %v2829_v43  ;;  %v3534_v18 = vadd.f32 %v5138_v36, %v7497_v59 }
 0x334   : > { %v7580_v19 = vadd.f32 %v5244_v8, %v3526_v35 }
 0x335   : > { %v5139_v38 = vpop.f32.mrb[172].mxu1 }
 0x336   : > { %v5140_v24 = vpop.f32.mrb[173].mxu1  ;;  %v5245_v47 = vpop.f32.mrb[200].mxu0 }
 0x337   : > { %v5141_v60 = vadd.f32 %v5140_v24, %v5139_v38  ;;  %v5142_v17 = vpop.f32.mrb[174].mxu1  ;;  %v5246_v63 = vpop.f32.mrb[201].mxu0 }
 0x338   : > { %v5247_v34 = vadd.f32 %v5246_v63, %v5245_v47  ;;  %v5143_v41 = vpop.f32.mrb[175].mxu1  ;;  %v5248_v13 = vpop.f32.mrb[202].mxu0 }
 0x339   : > { %v5144_v44 = vadd.f32 %v5143_v41, %v5142_v17  ;;  %v5249_v32 = vpop.f32.mrb[203].mxu0  ;;  %v3539_v31 = vadd.f32 %v5141_v60, %v7497_v59 }
 0x33a   : > { %v7584_v54 = vadd.f32 %v5247_v34, %v3531_v3  ;;  %v5250_v9 = vadd.f32 %v5249_v32, %v5248_v13  ;;  %5618 = vmatmul.mubr.bf16.gmra.mrb[24].mxu1 %v2830_v33 }
 0x33b   : > { %5621 = vmatprep.mubr.bf16.mxu1 %v2831_v14  ;;  %v3542_v46 = vadd.f32 %v5144_v44, %v7497_v59 }
 0x33c   : > { %v7586_v62 = vadd.f32 %v5250_v9, %v3534_v18 }
 0x33d   : > { %v5145_v52 = vpop.f32.mrb[176].mxu1 }
 0x33e   : > { %v5146_v57 = vpop.f32.mrb[177].mxu1  ;;  %v5251_v21 = vpop.f32.mrb[204].mxu0 }
 0x33f   : > { %v5147_v50 = vadd.f32 %v5146_v57, %v5145_v52  ;;  %v5148_v16 = vpop.f32.mrb[178].mxu1  ;;  %v5252_v56 = vpop.f32.mrb[205].mxu0 }
 0x340   : > { %v5253_v0 = vadd.f32 %v5252_v56, %v5251_v21  ;;  %v5149_v15 = vpop.f32.mrb[179].mxu1  ;;  %v5254_v2 = vpop.f32.mrb[206].mxu0 }
 0x341   : > { %v5150_v40 = vadd.f32 %v5149_v15, %v5148_v16  ;;  %v5255_v48 = vpop.f32.mrb[207].mxu0  ;;  %v3547_v8 = vadd.f32 %v5147_v50, %v7497_v59 }
 0x342   : > { %v7590_v61 = vadd.f32 %v5253_v0, %v3539_v31  ;;  %v5256_v23 = vadd.f32 %v5255_v48, %v5254_v2  ;;  %5622 = vmatmul.mubr.bf16.gmra.mrb[28].mxu1 %v2832_v49 }
 0x343   : > { %v3550_v17 = vadd.f32 %v5150_v40, %v7497_v59 }
 0x344   : > { %v7592_v30 = vadd.f32 %v5256_v23, %v3542_v46 }
 0x345   : > { %v5151_v28 = vpop.f32.mrb[180].mxu1 }
 0x346   : > { %v5152_v12 = vpop.f32.mrb[181].mxu1  ;;  %v5257_v36 = vpop.f32.mrb[208].mxu0 }
 0x347   : > { %v5153_v39 = vadd.f32 %v5152_v12, %v5151_v28  ;;  %v5154_v29 = vpop.f32.mrb[182].mxu1  ;;  %v5258_v35 = vpop.f32.mrb[209].mxu0 }
 0x348   : > { %v5259_v43 = vadd.f32 %v5258_v35, %v5257_v36  ;;  %v5155_v38 = vpop.f32.mrb[183].mxu1  ;;  %v5260_v24 = vpop.f32.mrb[210].mxu0 }
 0x349   : > { %v5156_v47 = vadd.f32 %v5155_v38, %v5154_v29  ;;  %v5261_v60 = vpop.f32.mrb[211].mxu0  ;;  %v3555_v9 = vadd.f32 %v5153_v39, %v7497_v59 }
 0x34a   : > { %v7596_v63 = vadd.f32 %v5259_v43, %v3547_v8  ;;  %v5262_v3 = vadd.f32 %v5261_v60, %v5260_v24 }
 0x34b   : > { %v3558_v16 = vadd.f32 %v5156_v47, %v7497_v59 }
 0x34c   : > { %v7598_v34 = vadd.f32 %v5262_v3, %v3550_v17 }
 0x34d   : > { %v5157_v41 = vpop.f32.mrb[184].mxu1 }
 0x34e   : > { %v5158_v13 = vpop.f32.mrb[185].mxu1  ;;  %v5263_v44 = vpop.f32.mrb[212].mxu0 }
 0x34f   : > { %v5159_v32 = vadd.f32 %v5158_v13, %v5157_v41  ;;  %v5160_v33 = vpop.f32.mrb[186].mxu1  ;;  %v5264_v18 = vpop.f32.mrb[213].mxu0 }
 0x350   : > { %v5265_v14 = vadd.f32 %v5264_v18, %v5263_v44  ;;  %v5161_v52 = vpop.f32.mrb[187].mxu1  ;;  %v5266_v57 = vpop.f32.mrb[214].mxu0 }
 0x351   : > { %v5162_v21 = vadd.f32 %v5161_v52, %v5160_v33  ;;  %v5267_v50 = vpop.f32.mrb[215].mxu0  ;;  %v3563_v23 = vadd.f32 %v5159_v32, %v7497_v59 }
 0x352   : > { %v7602_v56 = vadd.f32 %v5265_v14, %v3555_v9  ;;  %v5268_v49 = vadd.f32 %v5267_v50, %v5266_v57 }
 0x353   : > { %v3566_v35 = vadd.f32 %v5162_v21, %v7497_v59 }
 0x354   : > { %v7604_v31 = vadd.f32 %v5268_v49, %v3558_v16 }
 0x355   : > { %v5163_v0 = vpop.f32.mrb[188].mxu1 }
 0x356   : > { %v5164_v15 = vpop.f32.mrb[189].mxu1  ;;  %v5269_v2 = vpop.f32.mrb[216].mxu0 }
 0x357   : > { %v5165_v40 = vadd.f32 %v5164_v15, %v5163_v0  ;;  %v5166_v48 = vpop.f32.mrb[190].mxu1  ;;  %v5270_v46 = vpop.f32.mrb[217].mxu0 }
 0x358   : > { %v5271_v28 = vadd.f32 %v5270_v46, %v5269_v2  ;;  %v5167_v12 = vpop.f32.mrb[191].mxu1  ;;  %v5272_v36 = vpop.f32.mrb[218].mxu0 }
 0x359   : > { %v5168_v39 = vadd.f32 %v5167_v12, %v5166_v48  ;;  %v5273_v29 = vpop.f32.mrb[219].mxu0  ;;  %v3571_v13 = vadd.f32 %v5165_v40, %v7497_v59 }
 0x35a   : > { %v7608_v8 = vadd.f32 %v5271_v28, %v3563_v23  ;;  %v5274_v43 = vadd.f32 %v5273_v29, %v5272_v36 }
 0x35b   : > { %v3574_v52 = vadd.f32 %v5168_v39, %v7497_v59 }
 0x35c   : > { %v7610_v38 = vadd.f32 %v5274_v43, %v3566_v35 }
 0x35d   : > { %v5297_v24 = vpop.f32.mrb[192].mxu1 }
 0x35e   : > { %v5275_v47 = vpop.f32.mrb[220].mxu0  ;;  %v5298_v60 = vpop.f32.mrb[193].mxu1 }
 0x35f   : > { %v5299_v17 = vadd.f32 %v5298_v60, %v5297_v24  ;;  %v5276_v3 = vpop.f32.mrb[221].mxu0  ;;  %v5300_v41 = vpop.f32.mrb[194].mxu1 }
 0x360   : > { %v5277_v44 = vadd.f32 %v5276_v3, %v5275_v47  ;;  %v5278_v32 = vpop.f32.mrb[222].mxu0  ;;  %v5301_v33 = vpop.f32.mrb[195].mxu1 }
 0x361   : > { %v3773_v18 = vadd.f32 %v5299_v17, %v7503_v51  ;;  %v5302_v9 = vadd.f32 %v5301_v33, %v5300_v41  ;;  %v5279_v14 = vpop.f32.mrb[223].mxu0 }
 0x362   : > { %v7615_v57 = vadd.f32 %v5277_v44, %v3571_v13  ;;  %v5280_v21 = vadd.f32 %v5279_v14, %v5278_v32 }
 0x363   : > { %v3776_v50 = vadd.f32 %v5302_v9, %v7508_v58 }
 0x364   : > { %v7618_v16 = vadd.f32 %v5280_v21, %v3574_v52 }
 0x365   : > { %v5303_v49 = vpop.f32.mrb[196].mxu1 }
 0x366   : > { %v5304_v0 = vpop.f32.mrb[197].mxu1  ;;  %v5409_v15 = vpop.f32.mrb[224].mxu0 }
 0x367   : > { %v5305_v2 = vadd.f32 %v5304_v0, %v5303_v49  ;;  %v5306_v40 = vpop.f32.mrb[198].mxu1  ;;  %v5410_v48 = vpop.f32.mrb[225].mxu0 }
 0x368   : > { %v5411_v46 = vadd.f32 %v5410_v48, %v5409_v15  ;;  %v5307_v23 = vpop.f32.mrb[199].mxu1  ;;  %v5412_v51 = vpop.f32.mrb[226].mxu0 }
 0x369   : > { %v3781_v28 = vadd.f32 %v5305_v2, %v7513_v42  ;;  %v5308_v12 = vadd.f32 %v5307_v23, %v5306_v40  ;;  %v5413_v59 = vpop.f32.mrb[227].mxu0 }
 0x36a   : > { %v5414_v36 = vadd.f32 %v5413_v59, %v5412_v51  ;;  %v7621_v39 = vadd.f32 %v5411_v46, %v3773_v18 }
 0x36b   : > { %v3784_v58 = vadd.f32 %v5308_v12, %v7518_v1 }
 0x36c   : > { %v7624_v29 = vadd.f32 %v5414_v36, %v3776_v50 }
 0x36d   : > { %v5309_v35 = vpop.f32.mrb[200].mxu1 }
 0x36e   : > { %v5310_v43 = vpop.f32.mrb[201].mxu1  ;;  %v5415_v24 = vpop.f32.mrb[228].mxu0 }
 0x36f   : > { %v5311_v47 = vadd.f32 %v5310_v43, %v5309_v35  ;;  %v5312_v60 = vpop.f32.mrb[202].mxu1  ;;  %v5416_v17 = vpop.f32.mrb[229].mxu0 }
 0x370   : > { %v5417_v3 = vadd.f32 %v5416_v17, %v5415_v24  ;;  %v5313_v41 = vpop.f32.mrb[203].mxu1  ;;  %v5418_v13 = vpop.f32.mrb[230].mxu0 }
 0x371   : > { %v3789_v42 = vadd.f32 %v5311_v47, %v7523_v26  ;;  %v5314_v44 = vadd.f32 %v5313_v41, %v5312_v60  ;;  %v5419_v32 = vpop.f32.mrb[231].mxu0 }
 0x372   : > { %v5420_v33 = vadd.f32 %v5419_v32, %v5418_v13  ;;  %v7627_v18 = vadd.f32 %v5417_v3, %v3781_v28 }
 0x373   : > { %v3792_v1 = vadd.f32 %v5314_v44, %v7528_v6 }
 0x374   : > { %v7630_v9 = vadd.f32 %v5420_v33, %v3784_v58 }
 0x375   : > { %v5315_v14 = vpop.f32.mrb[204].mxu1 }
 0x376   : > { %v5316_v52 = vpop.f32.mrb[205].mxu1  ;;  %v5421_v21 = vpop.f32.mrb[232].mxu0 }
 0x377   : > { %v5317_v50 = vadd.f32 %v5316_v52, %v5315_v14  ;;  %v5318_v49 = vpop.f32.mrb[206].mxu1  ;;  %v5422_v0 = vpop.f32.mrb[233].mxu0 }
 0x378   : > { %v5423_v15 = vadd.f32 %v5422_v0, %v5421_v21  ;;  %v5319_v2 = vpop.f32.mrb[207].mxu1  ;;  %v5424_v40 = vpop.f32.mrb[234].mxu0 }
 0x379   : > { %v3797_v26 = vadd.f32 %v5317_v50, %v7533_v11  ;;  %v5320_v48 = vadd.f32 %v5319_v2, %v5318_v49  ;;  %v5425_v46 = vpop.f32.mrb[235].mxu0 }
 0x37a   : > { %v5426_v23 = vadd.f32 %v5425_v46, %v5424_v40  ;;  %v7633_v51 = vadd.f32 %v5423_v15, %v3789_v42 }
 0x37b   : > { %v3800_v6 = vadd.f32 %v5320_v48, %v7538_v55 }
 0x37c   : > { %v7636_v28 = vadd.f32 %v5426_v23, %v3792_v1 }
 0x37d   : > { %v5321_v12 = vpop.f32.mrb[208].mxu1 }
 0x37e   : > { %v5322_v59 = vpop.f32.mrb[209].mxu1  ;;  %v5427_v36 = vpop.f32.mrb[236].mxu0 }
 0x37f   : > { %v5323_v58 = vadd.f32 %v5322_v59, %v5321_v12  ;;  %v5324_v35 = vpop.f32.mrb[210].mxu1  ;;  %v5428_v43 = vpop.f32.mrb[237].mxu0 }
 0x380   : > { %v5429_v24 = vadd.f32 %v5428_v43, %v5427_v36  ;;  %v5325_v47 = vpop.f32.mrb[211].mxu1  ;;  %v5430_v60 = vpop.f32.mrb[238].mxu0 }
 0x381   : > { %v3805_v11 = vadd.f32 %v5323_v58, %v7542_v4  ;;  %v5326_v17 = vadd.f32 %v5325_v47, %v5324_v35  ;;  %v5431_v3 = vpop.f32.mrb[239].mxu0 }
 0x382   : > { %v5432_v41 = vadd.f32 %v5431_v3, %v5430_v60  ;;  %v7639_v13 = vadd.f32 %v5429_v24, %v3797_v26 }
 0x383   : > { %v3808_v55 = vadd.f32 %v5326_v17, %v7546_v37 }
 0x384   : > { %v7642_v42 = vadd.f32 %v5432_v41, %v3800_v6 }
 0x385   : > { %v5327_v44 = vpop.f32.mrb[212].mxu1 }
 0x386   : > { %v5328_v32 = vpop.f32.mrb[213].mxu1  ;;  %v5433_v33 = vpop.f32.mrb[240].mxu0 }
 0x387   : > { %v5329_v1 = vadd.f32 %v5328_v32, %v5327_v44  ;;  %v5330_v14 = vpop.f32.mrb[214].mxu1  ;;  %v5434_v52 = vpop.f32.mrb[241].mxu0 }
 0x388   : > { %v5435_v21 = vadd.f32 %v5434_v52, %v5433_v33  ;;  %v5331_v50 = vpop.f32.mrb[215].mxu1  ;;  %v5436_v49 = vpop.f32.mrb[242].mxu0 }
 0x389   : > { %v3813_v4 = vadd.f32 %v5329_v1, %v7550_v20  ;;  %v5332_v0 = vadd.f32 %v5331_v50, %v5330_v14  ;;  %v5437_v15 = vpop.f32.mrb[243].mxu0 }
 0x38a   : > { %v5438_v2 = vadd.f32 %v5437_v15, %v5436_v49  ;;  %v7645_v40 = vadd.f32 %v5435_v21, %v3805_v11 }
 0x38b   : > { %v3816_v37 = vadd.f32 %v5332_v0, %v7554_v53 }
 0x38c   : > { %v7648_v26 = vadd.f32 %v5438_v2, %v3808_v55 }
 0x38d   : > { %v5333_v48 = vpop.f32.mrb[216].mxu1 }
 0x38e   : > { %v5334_v46 = vpop.f32.mrb[217].mxu1  ;;  %v5439_v23 = vpop.f32.mrb[244].mxu0 }
 0x38f   : > { %v5335_v6 = vadd.f32 %v5334_v46, %v5333_v48  ;;  %v5336_v12 = vpop.f32.mrb[218].mxu1  ;;  %v5440_v59 = vpop.f32.mrb[245].mxu0 }
 0x390   : > { %v5441_v36 = vadd.f32 %v5440_v59, %v5439_v23  ;;  %v5337_v58 = vpop.f32.mrb[219].mxu1  ;;  %v5442_v35 = vpop.f32.mrb[246].mxu0 }
 0x391   : > { %v3821_v20 = vadd.f32 %v5335_v6, %v7558_v5  ;;  %v5338_v43 = vadd.f32 %v5337_v58, %v5336_v12  ;;  %v5443_v24 = vpop.f32.mrb[247].mxu0 }
 0x392   : > { %v5444_v47 = vadd.f32 %v5443_v24, %v5442_v35  ;;  %v7651_v60 = vadd.f32 %v5441_v36, %v3813_v4 }
 0x393   : > { %v3824_v53 = vadd.f32 %v5338_v43, %v7562_v27 }
 0x394   : > { %v7654_v11 = vadd.f32 %v5444_v47, %v3816_v37 }
 0x395   : > { %v5339_v17 = vpop.f32.mrb[220].mxu1 }
 0x396   : > { %v5340_v3 = vpop.f32.mrb[221].mxu1  ;;  %v5445_v41 = vpop.f32.mrb[248].mxu0 }
 0x397   : > { %v5341_v55 = vadd.f32 %v5340_v3, %v5339_v17  ;;  %v5342_v44 = vpop.f32.mrb[222].mxu1  ;;  %v5446_v32 = vpop.f32.mrb[249].mxu0 }
 0x398   : > { %v5447_v33 = vadd.f32 %v5446_v32, %v5445_v41  ;;  %v5343_v1 = vpop.f32.mrb[223].mxu1  ;;  %v5448_v14 = vpop.f32.mrb[250].mxu0 }
 0x399   : > { %v3829_v5 = vadd.f32 %v5341_v55, %v7566_v25  ;;  %v5344_v52 = vadd.f32 %v5343_v1, %v5342_v44  ;;  %v5449_v21 = vpop.f32.mrb[251].mxu0 }
 0x39a   : > { %v5450_v50 = vadd.f32 %v5449_v21, %v5448_v14  ;;  %v7657_v49 = vadd.f32 %v5447_v33, %v3821_v20 }
 0x39b   : > { %v3832_v27 = vadd.f32 %v5344_v52, %v7568_v7 }
 0x39c   : > { %v7660_v4 = vadd.f32 %v5450_v50, %v3824_v53 }
 0x39d   : > { %v5345_v0 = vpop.f32.mrb[224].mxu1 }
 0x39e   : > { %v5346_v15 = vpop.f32.mrb[225].mxu1  ;;  %v5451_v2 = vpop.f32.mrb[252].mxu0 }
 0x39f   : > { %v5347_v37 = vadd.f32 %v5346_v15, %v5345_v0  ;;  %v5348_v48 = vpop.f32.mrb[226].mxu1  ;;  %v5452_v46 = vpop.f32.mrb[253].mxu0 }
 0x3a0   : > { %v5453_v23 = vadd.f32 %v5452_v46, %v5451_v2  ;;  %v5349_v6 = vpop.f32.mrb[227].mxu1  ;;  %v5454_v12 = vpop.f32.mrb[254].mxu0 }
 0x3a1   : > { %v3837_v25 = vadd.f32 %v5347_v37, %v7572_v22  ;;  %v5350_v59 = vadd.f32 %v5349_v6, %v5348_v48  ;;  %v5455_v36 = vpop.f32.mrb[255].mxu0 }
 0x3a2   : > { %v5456_v58 = vadd.f32 %v5455_v36, %v5454_v12  ;;  %v7663_v35 = vadd.f32 %v5453_v23, %v3829_v5 }
 0x3a3   : > { %v3840_v7 = vadd.f32 %v5350_v59, %v7574_v10 }
 0x3a4   : > { %v7666_v20 = vadd.f32 %v5456_v58, %v3832_v27 }
 0x3a5   : > { %v5351_v43 = vpop.f32.mrb[228].mxu1 }
 0x3a6   : > { %v5352_v24 = vpop.f32.mrb[229].mxu1  ;;  %v5457_v47 = vpop.f32.mrb[0].mxu0 }
 0x3a7   : > { %v5353_v53 = vadd.f32 %v5352_v24, %v5351_v43  ;;  %v5354_v17 = vpop.f32.mrb[230].mxu1  ;;  %v5458_v3 = vpop.f32.mrb[1].mxu0 }
 0x3a8   : > { %v5459_v41 = vadd.f32 %v5458_v3, %v5457_v47  ;;  %v5355_v55 = vpop.f32.mrb[231].mxu1  ;;  %v5460_v44 = vpop.f32.mrb[2].mxu0 }
 0x3a9   : > { %v3845_v22 = vadd.f32 %v5353_v53, %v7578_v45  ;;  %v5356_v32 = vadd.f32 %v5355_v55, %v5354_v17  ;;  %v5461_v33 = vpop.f32.mrb[3].mxu0 }
 0x3aa   : > { %v5462_v1 = vadd.f32 %v5461_v33, %v5460_v44  ;;  %v7669_v14 = vadd.f32 %v5459_v41, %v3837_v25 }
 0x3ab   : > { %v3848_v10 = vadd.f32 %v5356_v32, %v7580_v19 }
 0x3ac   : > { %v7672_v5 = vadd.f32 %v5462_v1, %v3840_v7 }
 0x3ad   : > { %v5357_v52 = vpop.f32.mrb[232].mxu1 }
 0x3ae   : > { %v5358_v21 = vpop.f32.mrb[233].mxu1  ;;  %v5463_v50 = vpop.f32.mrb[4].mxu0 }
 0x3af   : > { %v5359_v27 = vadd.f32 %v5358_v21, %v5357_v52  ;;  %v5360_v0 = vpop.f32.mrb[234].mxu1  ;;  %v5464_v15 = vpop.f32.mrb[5].mxu0 }
 0x3b0   : > { %v5465_v2 = vadd.f32 %v5464_v15, %v5463_v50  ;;  %v5361_v37 = vpop.f32.mrb[235].mxu1  ;;  %v5466_v48 = vpop.f32.mrb[6].mxu0 }
 0x3b1   : > { %v3853_v45 = vadd.f32 %v5359_v27, %v7584_v54  ;;  %v5362_v46 = vadd.f32 %v5361_v37, %v5360_v0  ;;  %v5467_v23 = vpop.f32.mrb[7].mxu0 }
 0x3b2   : > { %v5468_v6 = vadd.f32 %v5467_v23, %v5466_v48  ;;  %v7675_v12 = vadd.f32 %v5465_v2, %v3845_v22 }
 0x3b3   : > { %v3856_v19 = vadd.f32 %v5362_v46, %v7586_v62 }
 0x3b4   : > { %v7678_v25 = vadd.f32 %v5468_v6, %v3848_v10 }
 0x3b5   : > { %v5363_v59 = vpop.f32.mrb[236].mxu1 }
 0x3b6   : > { %v5364_v36 = vpop.f32.mrb[237].mxu1  ;;  %v5469_v58 = vpop.f32.mrb[8].mxu0 }
 0x3b7   : > { %v5365_v7 = vadd.f32 %v5364_v36, %v5363_v59  ;;  %v5366_v43 = vpop.f32.mrb[238].mxu1  ;;  %v5470_v24 = vpop.f32.mrb[9].mxu0 }
 0x3b8   : > { %v5471_v47 = vadd.f32 %v5470_v24, %v5469_v58  ;;  %v5367_v53 = vpop.f32.mrb[239].mxu1  ;;  %v5472_v17 = vpop.f32.mrb[10].mxu0 }
 0x3b9   : > { %v3861_v54 = vadd.f32 %v5365_v7, %v7590_v61  ;;  %v5368_v3 = vadd.f32 %v5367_v53, %v5366_v43  ;;  %v5473_v41 = vpop.f32.mrb[11].mxu0 }
 0x3ba   : > { %v5474_v55 = vadd.f32 %v5473_v41, %v5472_v17  ;;  %v7681_v44 = vadd.f32 %v5471_v47, %v3853_v45 }
 0x3bb   : > { %v3864_v62 = vadd.f32 %v5368_v3, %v7592_v30 }
 0x3bc   : > { %v7684_v22 = vadd.f32 %v5474_v55, %v3856_v19 }
 0x3bd   : > { %v5369_v32 = vpop.f32.mrb[240].mxu1 }
 0x3be   : > { %v5370_v33 = vpop.f32.mrb[241].mxu1  ;;  %v5475_v1 = vpop.f32.mrb[12].mxu0 }
 0x3bf   : > { %v5371_v10 = vadd.f32 %v5370_v33, %v5369_v32  ;;  %v5372_v52 = vpop.f32.mrb[242].mxu1  ;;  %v5476_v21 = vpop.f32.mrb[13].mxu0 }
 0x3c0   : > { %v5477_v50 = vadd.f32 %v5476_v21, %v5475_v1  ;;  %v5373_v27 = vpop.f32.mrb[243].mxu1  ;;  %v5478_v0 = vpop.f32.mrb[14].mxu0 }
 0x3c1   : > { %v3869_v61 = vadd.f32 %v5371_v10, %v7596_v63  ;;  %v5374_v15 = vadd.f32 %v5373_v27, %v5372_v52  ;;  %v5479_v2 = vpop.f32.mrb[15].mxu0 }
 0x3c2   : > { %v5480_v37 = vadd.f32 %v5479_v2, %v5478_v0  ;;  %v7687_v48 = vadd.f32 %v5477_v50, %v3861_v54 }
 0x3c3   : > { %v3872_v30 = vadd.f32 %v5374_v15, %v7598_v34 }
 0x3c4   : > { %v7690_v45 = vadd.f32 %v5480_v37, %v3864_v62 }
 0x3c5   : > { %v5375_v46 = vpop.f32.mrb[244].mxu1 }
 0x3c6   : > { %v5376_v23 = vpop.f32.mrb[245].mxu1  ;;  %v5481_v6 = vpop.f32.mrb[16].mxu0 }
 0x3c7   : > { %v5377_v19 = vadd.f32 %v5376_v23, %v5375_v46  ;;  %v5378_v59 = vpop.f32.mrb[246].mxu1  ;;  %v5482_v36 = vpop.f32.mrb[17].mxu0 }
 0x3c8   : > { %v5483_v58 = vadd.f32 %v5482_v36, %v5481_v6  ;;  %v5379_v7 = vpop.f32.mrb[247].mxu1  ;;  %v5484_v43 = vpop.f32.mrb[18].mxu0 }
 0x3c9   : > { %v3877_v63 = vadd.f32 %v5377_v19, %v7602_v56  ;;  %v5380_v24 = vadd.f32 %v5379_v7, %v5378_v59  ;;  %v5485_v47 = vpop.f32.mrb[19].mxu0 }
 0x3ca   : > { %v5486_v53 = vadd.f32 %v5485_v47, %v5484_v43  ;;  %v7693_v17 = vadd.f32 %v5483_v58, %v3869_v61  ;;  %v4223_v47 = vld [vmem:[%s6079_s7 + $0x10] sm:$0xff] }
 0x3cb   : > { %v3880_v34 = vadd.f32 %v5380_v24, %v7604_v31 }
 0x3cc   : > { %v7696_v54 = vadd.f32 %v5486_v53, %v3872_v30 }
 0x3cd   : > { %v5381_v3 = vpop.f32.mrb[248].mxu1 }
 0x3ce   : > { %v5382_v41 = vpop.f32.mrb[249].mxu1  ;;  %v5487_v55 = vpop.f32.mrb[20].mxu0 }
 0x3cf   : > { %v5383_v62 = vadd.f32 %v5382_v41, %v5381_v3  ;;  %v5384_v32 = vpop.f32.mrb[250].mxu1  ;;  %v5488_v33 = vpop.f32.mrb[21].mxu0  ;;  %v4221_v3 = vld [vmem:[%s6079_s7] sm:$0xff] }
 0x3d0   : > { %v5489_v1 = vadd.f32 %v5488_v33, %v5487_v55  ;;  %v5385_v10 = vpop.f32.mrb[251].mxu1  ;;  %v5490_v52 = vpop.f32.mrb[22].mxu0 }
 0x3d1   : > { %v3885_v56 = vadd.f32 %v5383_v62, %v7608_v8  ;;  %v5386_v21 = vadd.f32 %v5385_v10, %v5384_v32  ;;  %v5491_v50 = vpop.f32.mrb[23].mxu0  ;;  %v4224_v32 = vld [vmem:[%s6079_s7 + $0x18] sm:$0xff] }
 0x3d2   : > { %v5492_v27 = vadd.f32 %v5491_v50, %v5490_v52  ;;  %v7699_v0 = vadd.f32 %v5489_v1, %v3877_v63 }
 0x3d3   : > { %v3888_v31 = vadd.f32 %v5386_v21, %v7610_v38 }
 0x3d4   : > { %v7702_v61 = vadd.f32 %v5492_v27, %v3880_v34 }
 0x3d5   : > { %v5387_v15 = vpop.f32.mrb[252].mxu1 }
 0x3d6   : > { %v5388_v2 = vpop.f32.mrb[253].mxu1  ;;  %v5493_v37 = vpop.f32.mrb[24].mxu0 }
 0x3d7   : > { %v5389_v30 = vadd.f32 %v5388_v2, %v5387_v15  ;;  %v5390_v46 = vpop.f32.mrb[254].mxu1  ;;  %v5494_v23 = vpop.f32.mrb[25].mxu0 }
 0x3d8   : > { %v5495_v6 = vadd.f32 %v5494_v23, %v5493_v37  ;;  %v5391_v8 = vpop.f32.mrb[255].mxu1  ;;  %v5496_v19 = vpop.f32.mrb[26].mxu0  ;;  %v4227_v23 = vld [vmem:[%s6079_s7 + $0x30] sm:$0xff] }
 0x3d9   : > { %v3893_v59 = vadd.f32 %v5389_v30, %v7615_v57  ;;  %v5392_v36 = vadd.f32 %v5391_v8, %v5390_v46  ;;  %v5497_v58 = vpop.f32.mrb[27].mxu0 }
 0x3da   : > { %v5498_v38 = vadd.f32 %v5497_v58, %v5496_v19  ;;  %v7705_v7 = vadd.f32 %v5495_v6, %v3885_v56  ;;  %v4222_v56 = vld [vmem:[%s6079_s7 + $0x8] sm:$0xff]  ;;  %v4225_v19 = vld [vmem:[%s6079_s7 + $0x20] sm:$0xff]  ;;  %v4228_v58 = vld [vmem:[%s6079_s7 + $0x38] sm:$0xff] }
 0x3db   : > { %v3896_v43 = vadd.f32 %v5392_v36, %v7618_v16 }
 0x3dc   : > { %v7709_v63 = vadd.f32 %v5498_v38, %v3888_v31 }
 0x3dd   : > { %v5595_v24 = vpop.f32.mrb[0].mxu1 }
 0x3de   : > { %v4103_v53 = vadd.f32 %v5595_v24, %v7627_v18  ;;  %v5499_v34 = vpop.f32.mrb[28].mxu0  ;;  %v4094_v57 = vpop.f32.mrb[1].mxu1 }
 0x3df   : > { %v4095_v41 = vadd.f32 %v4094_v57, %v7621_v39  ;;  %v5500_v55 = vpop.f32.mrb[29].mxu0  ;;  %v5596_v62 = vpop.f32.mrb[2].mxu1 }
 0x3e0   : > { %v4255_v33 = vadd.f32 %v4223_v47, %v4103_v53  ;;  %v5501_v16 = vadd.f32 %v5500_v55, %v5499_v34  ;;  %v4106_v1 = vadd.f32 %v5596_v62, %v7630_v9  ;;  %v5502_v10 = vpop.f32.mrb[30].mxu0  ;;  %v4097_v52 = vpop.f32.mrb[3].mxu1  ;;  %v4226_v47 = vld [vmem:[%s6079_s7 + $0x28] sm:$0xff] }
 0x3e1   : > { %v4253_v21 = vadd.f32 %v4221_v3, %v4095_v41  ;;  %v4098_v50 = vadd.f32 %v4097_v52, %v7624_v29  ;;  %v5503_v18 = vpop.f32.mrb[31].mxu0 }
 0x3e2   : > { %v4287_v27 = vmax.f32 %v4255_v33, 0.0  ;;  %v4256_v31 = vadd.f32 %v4224_v32, %v4106_v1  ;;  %v5504_v15 = vadd.f32 %v5503_v18, %v5502_v10  ;;  %v7721_v39 = vadd.f32 %v5501_v16, %v3893_v59  ;;  %v4231_v32 = vld [vmem:[%s6079_s7 + $0x50] sm:$0xff]  ;;  %v4229_v16 = vld [vmem:[%s6079_s7 + $0x40] sm:$0xff]  ;;  %v4232_v10 = vld [vmem:[%s6079_s7 + $0x58] sm:$0xff] }
 0x3e3   : > { %v4285_v2 = vmax.f32 %v4253_v21, 0.0  ;;  %v4254_v37 = vadd.f32 %v4222_v56, %v4098_v50  ;;  %v4230_v50 = vld [vmem:[%s6079_s7 + $0x48] sm:$0xff] }
 0x3e4   : > { %4319 = vst [vmem:[%s7723_s15 + $0x10] sm:$0xff] %v4287_v27  ;;  %v4288_v9 = vmax.f32 %v4256_v31, 0.0  ;;  %v7726_v30 = vadd.f32 %v5504_v15, %v3896_v43 }
 0x3e5   : > { %4317 = vst [vmem:[%s7723_s15] sm:$0xff] %v4285_v2  ;;  %v4286_v29 = vmax.f32 %v4254_v37, 0.0  ;;  %v5599_v46 = vpop.f32.mrb[4].mxu1 }
 0x3e6   : > { %4320 = vst [vmem:[%s7723_s15 + $0x18] sm:$0xff] %v4288_v9  ;;  %v4119_v6 = vadd.f32 %v5599_v46, %v7639_v13  ;;  %v4110_v8 = vpop.f32.mrb[5].mxu1 }
 0x3e7   : > { %4318 = vst [vmem:[%s7723_s15 + $0x8] sm:$0xff] %v4286_v29  ;;  %v4111_v59 = vadd.f32 %v4110_v8, %v7633_v51  ;;  %v5600_v36 = vpop.f32.mrb[6].mxu1  ;;  %v4235_v29 = vld [vmem:[%s6079_s7 + $0x70] sm:$0xff]  ;;  %v4236_v8 = vld [vmem:[%s6079_s7 + $0x78] sm:$0xff] }
 0x3e8   : > { %v4259_v38 = vadd.f32 %v4227_v23, %v4119_v6  ;;  %v4122_v43 = vadd.f32 %v5600_v36, %v7642_v42  ;;  %v4113_v24 = vpop.f32.mrb[7].mxu1  ;;  %v4233_v23 = vld [vmem:[%s6079_s7 + $0x60] sm:$0xff] }
 0x3e9   : > { %v4257_v53 = vadd.f32 %v4225_v19, %v4111_v59  ;;  %v4114_v13 = vadd.f32 %v4113_v24, %v7636_v28 }
 0x3ea   : > { %v4291_v34 = vmax.f32 %v4259_v38, 0.0  ;;  %v4260_v57 = vadd.f32 %v4228_v58, %v4122_v43  ;;  %v4234_v58 = vld [vmem:[%s6079_s7 + $0x68] sm:$0xff] }
 0x3eb   : > { %v4289_v3 = vmax.f32 %v4257_v53, 0.0  ;;  %v4258_v41 = vadd.f32 %v4226_v47, %v4114_v13 }
 0x3ec   : > { %4323 = vst [vmem:[%s7723_s15 + $0x30] sm:$0xff] %v4291_v34  ;;  %v4292_v51 = vmax.f32 %v4260_v57, 0.0  ;;  %v4239_v57 = vld [vmem:[%s6079_s7 + $0x90] sm:$0xff] }
 0x3ed   : > { %4321 = vst [vmem:[%s7723_s15 + $0x20] sm:$0xff] %v4289_v3  ;;  %v4290_v55 = vmax.f32 %v4258_v41, 0.0  ;;  %v5603_v62 = vpop.f32.mrb[8].mxu1  ;;  %v4237_v41 = vld [vmem:[%s6079_s7 + $0x80] sm:$0xff] }
 0x3ee   : > { %4324 = vst [vmem:[%s7723_s15 + $0x38] sm:$0xff] %v4292_v51  ;;  %v4135_v42 = vadd.f32 %v5603_v62, %v7651_v60  ;;  %v4126_v33 = vpop.f32.mrb[9].mxu1 }
 0x3ef   : > { %4322 = vst [vmem:[%s7723_s15 + $0x28] sm:$0xff] %v4290_v55  ;;  %v4127_v28 = vadd.f32 %v4126_v33, %v7645_v40  ;;  %v5604_v1 = vpop.f32.mrb[10].mxu1  ;;  %v4240_v55 = vld [vmem:[%s6079_s7 + $0x98] sm:$0xff]  ;;  %v4238_v33 = vld [vmem:[%s6079_s7 + $0x88] sm:$0xff] }
 0x3f0   : > { %v4263_v52 = vadd.f32 %v4231_v32, %v4135_v42  ;;  %v4138_v56 = vadd.f32 %v5604_v1, %v7654_v11  ;;  %v4129_v21 = vpop.f32.mrb[11].mxu1 }
 0x3f1   : > { %v4261_v18 = vadd.f32 %v4229_v16, %v4127_v28  ;;  %v4130_v60 = vadd.f32 %v4129_v21, %v7648_v26 }
 0x3f2   : > { %v4295_v27 = vmax.f32 %v4263_v52, 0.0  ;;  %v4264_v31 = vadd.f32 %v4232_v10, %v4138_v56 }
 0x3f3   : > { %v4293_v15 = vmax.f32 %v4261_v18, 0.0  ;;  %v4262_v2 = vadd.f32 %v4230_v50, %v4130_v60  ;;  %v4243_v50 = vld [vmem:[%s6079_s7 + $0xb0] sm:$0xff]  ;;  %v4241_v60 = vld [vmem:[%s6079_s7 + $0xa0] sm:$0xff] }
 0x3f4   : > { %4327 = vst [vmem:[%s7723_s15 + $0x50] sm:$0xff] %v4295_v27  ;;  %v4296_v40 = vmax.f32 %v4264_v31, 0.0  ;;  %v4244_v31 = vld [vmem:[%s6079_s7 + $0xb8] sm:$0xff] }
 0x3f5   : > { %4325 = vst [vmem:[%s7723_s15 + $0x40] sm:$0xff] %v4293_v15  ;;  %v4294_v37 = vmax.f32 %v4262_v2, 0.0  ;;  %v5607_v9 = vpop.f32.mrb[12].mxu1 }
 0x3f6   : > { %4328 = vst [vmem:[%s7723_s15 + $0x58] sm:$0xff] %v4296_v40  ;;  %v4151_v11 = vadd.f32 %v5607_v9, %v7663_v35  ;;  %v4142_v46 = vpop.f32.mrb[13].mxu1 }
 0x3f7   : > { %4326 = vst [vmem:[%s7723_s15 + $0x48] sm:$0xff] %v4294_v37  ;;  %v4143_v26 = vadd.f32 %v4142_v46, %v7657_v49  ;;  %v5608_v6 = vpop.f32.mrb[14].mxu1  ;;  %v4242_v37 = vld [vmem:[%s6079_s7 + $0xa8] sm:$0xff] }
 0x3f8   : > { %v4267_v19 = vadd.f32 %v4235_v29, %v4151_v11  ;;  %v4154_v59 = vadd.f32 %v5608_v6, %v7666_v20  ;;  %v4145_v36 = vpop.f32.mrb[15].mxu1 }
 0x3f9   : > { %v4265_v38 = vadd.f32 %v4233_v23, %v4143_v26  ;;  %v4146_v35 = vadd.f32 %v4145_v36, %v7660_v4 }
 0x3fa   : > { %v4299_v43 = vmax.f32 %v4267_v19, 0.0  ;;  %v4268_v24 = vadd.f32 %v4236_v8, %v4154_v59  ;;  %v4247_v8 = vld [vmem:[%s6079_s7 + $0xd0] sm:$0xff]  ;;  %v4245_v59 = vld [vmem:[%s6079_s7 + $0xc0] sm:$0xff] }
 0x3fb   : > { %v4297_v47 = vmax.f32 %v4265_v38, 0.0  ;;  %v4266_v53 = vadd.f32 %v4234_v58, %v4146_v35  ;;  %v4248_v58 = vld [vmem:[%s6079_s7 + $0xd8] sm:$0xff] }
 0x3fc   : > { %4331 = vst [vmem:[%s7723_s15 + $0x70] sm:$0xff] %v4299_v43  ;;  %v4300_v49 = vmax.f32 %v4268_v24, 0.0  ;;  %v4246_v24 = vld [vmem:[%s6079_s7 + $0xc8] sm:$0xff] }
 0x3fd   : > { %4329 = vst [vmem:[%s7723_s15 + $0x60] sm:$0xff] %v4297_v47  ;;  %v4298_v13 = vmax.f32 %v4266_v53, 0.0  ;;  %v5611_v34 = vpop.f32.mrb[16].mxu1 }
 0x3fe   : > { %4332 = vst [vmem:[%s7723_s15 + $0x78] sm:$0xff] %v4300_v49  ;;  %v4167_v20 = vadd.f32 %v5611_v34, %v7675_v12  ;;  %v4158_v3 = vpop.f32.mrb[17].mxu1 }
 0x3ff   : > { %4330 = vst [vmem:[%s7723_s15 + $0x68] sm:$0xff] %v4298_v13  ;;  %v4159_v4 = vadd.f32 %v4158_v3, %v7669_v14  ;;  %v5612_v51 = vpop.f32.mrb[18].mxu1 }
 0x400   : > { %v4271_v62 = vadd.f32 %v4239_v57, %v4167_v20  ;;  %v4170_v32 = vadd.f32 %v5612_v51, %v7678_v25  ;;  %v4161_v42 = vpop.f32.mrb[19].mxu1 }
 0x401   : > { %v4269_v16 = vadd.f32 %v4237_v41, %v4159_v4  ;;  %v4162_v12 = vadd.f32 %v4161_v42, %v7672_v5  ;;  %v4249_v4 = vld [vmem:[%s6079_s7 + $0xe0] sm:$0xff] }
 0x402   : > { %v4303_v28 = vmax.f32 %v4271_v62, 0.0  ;;  %v4272_v1 = vadd.f32 %v4240_v55, %v4170_v32  ;;  %v4252_v55 = vld [vmem:[%s6079_s7 + $0xf8] sm:$0xff] }
 0x403   : > { %v4301_v10 = vmax.f32 %v4269_v16, 0.0  ;;  %v4270_v52 = vadd.f32 %v4238_v33, %v4162_v12  ;;  %v4250_v33 = vld [vmem:[%s6079_s7 + $0xe8] sm:$0xff] }
 0x404   : > { %4335 = vst [vmem:[%s7723_s15 + $0x90] sm:$0xff] %v4303_v28  ;;  %v4304_v14 = vmax.f32 %v4272_v1, 0.0 }
 0x405   : > { %4333 = vst [vmem:[%s7723_s15 + $0x80] sm:$0xff] %v4301_v10  ;;  %v4302_v56 = vmax.f32 %v4270_v52, 0.0  ;;  %v5615_v21 = vpop.f32.mrb[20].mxu1 }
 0x406   : > { %4336 = vst [vmem:[%s7723_s15 + $0x98] sm:$0xff] %v4304_v14  ;;  %v4183_v25 = vadd.f32 %v5615_v21, %v7687_v48  ;;  %v4174_v18 = vpop.f32.mrb[21].mxu1 }
 0x407   : > { %4334 = vst [vmem:[%s7723_s15 + $0x88] sm:$0xff] %v4302_v56  ;;  %v4175_v5 = vadd.f32 %v4174_v18, %v7681_v44  ;;  %v5616_v27 = vpop.f32.mrb[22].mxu1 }
 0x408   : > { %v4275_v15 = vadd.f32 %v4243_v50, %v4183_v25  ;;  %v4186_v2 = vadd.f32 %v5616_v27, %v7690_v45  ;;  %v4177_v40 = vpop.f32.mrb[23].mxu1 }
 0x409   : > { %v4273_v9 = vadd.f32 %v4241_v60, %v4175_v5  ;;  %v4178_v48 = vadd.f32 %v4177_v40, %v7684_v22 }
 0x40a   : > { %v4307_v29 = vmax.f32 %v4275_v15, 0.0  ;;  %v4276_v11 = vadd.f32 %v4244_v31, %v4186_v2 }
 0x40b   : > { %v4305_v46 = vmax.f32 %v4273_v9, 0.0  ;;  %v4274_v23 = vadd.f32 %v4242_v37, %v4178_v48 }
 0x40c   : > { %4339 = vst [vmem:[%s7723_s15 + $0xb0] sm:$0xff] %v4307_v29  ;;  %v4308_v44 = vmax.f32 %v4276_v11, 0.0 }
 0x40d   : > { %4337 = vst [vmem:[%s7723_s15 + $0xa0] sm:$0xff] %v4305_v46  ;;  %v4306_v26 = vmax.f32 %v4274_v23, 0.0  ;;  %v5619_v6 = vpop.f32.mrb[24].mxu1 }
 0x40e   : > { %4340 = vst [vmem:[%s7723_s15 + $0xb8] sm:$0xff] %v4308_v44  ;;  %v4199_v45 = vadd.f32 %v5619_v6, %v7699_v0  ;;  %v4190_v19 = vpop.f32.mrb[25].mxu1 }
 0x40f   : > { %4338 = vst [vmem:[%s7723_s15 + $0xa8] sm:$0xff] %v4306_v26  ;;  %v4191_v22 = vadd.f32 %v4190_v19, %v7693_v17  ;;  %v5620_v36 = vpop.f32.mrb[26].mxu1 }
 0x410   : > { %v4279_v38 = vadd.f32 %v4247_v8, %v4199_v45  ;;  %v4202_v35 = vadd.f32 %v5620_v36, %v7702_v61  ;;  %v4193_v43 = vpop.f32.mrb[27].mxu1  ;;  %v4251_v61 = vld [vmem:[%s6079_s7 + $0xf0] sm:$0xff]  ;;  %s5832_s7 = scalar_lea.vmem %s7819_s17, 4096 }
 0x411   : > { %v4277_v47 = vadd.f32 %v4245_v59, %v4191_v22  ;;  %v4194_v0 = vadd.f32 %v4193_v43, %v7696_v54  ;;  %p5833_p11 = scmp.ne.s32.totalorder %s7819_s17, %s5832_s7  ;;  %p5840_p1 = scmp.lt.s32.totalorder %s5838_s8, %s5832_s7 }
 0x412   : > { %v4311_v53 = vmax.f32 %v4279_v38, 0.0  ;;  %v4280_v49 = vadd.f32 %v4248_v58, %v4202_v35 }
 0x413   : > { %v4309_v13 = vmax.f32 %v4277_v47, 0.0  ;;  %v4278_v34 = vadd.f32 %v4246_v24, %v4194_v0  ;;  %p5834_p12 = pnand %p5833_p11, %p5968_p5  ;;  %p5841_p2 = por %p5840_p1, %p5839_p0 }
 0x414   : > { %4343 = vst [vmem:[%s7723_s15 + $0xd0] sm:$0xff] %v4311_v53  ;;  %v4312_v17 = vmax.f32 %v4280_v49, 0.0 }
 0x415   : > { %4341 = vst [vmem:[%s7723_s15 + $0xc0] sm:$0xff] %v4309_v13  ;;  %v4310_v57 = vmax.f32 %v4278_v34, 0.0  ;;  %v5623_v20 = vpop.f32.mrb[28].mxu1  ;;  %p5835_p13 = pneg %p5834_p12 }
 0x416   : > { %4344 = vst [vmem:[%s7723_s15 + $0xd8] sm:$0xff] %v4312_v17  ;;  %v4215_v3 = vadd.f32 %v5623_v20, %v7721_v39  ;;  %v4206_v41 = vpop.f32.mrb[29].mxu1 }
 0x417   : > { %4342 = vst [vmem:[%s7723_s15 + $0xc8] sm:$0xff] %v4310_v57  ;;  %v4207_v54 = vadd.f32 %v4206_v41, %v7705_v7  ;;  %v5624_v51 = vpop.f32.mrb[30].mxu1  ;;  %p5842_p3 = pnand %p5841_p2, %p5835_p13 }
 0x418   : > { %v4283_v62 = vadd.f32 %v4251_v61, %v4215_v3  ;;  %v4218_v32 = vadd.f32 %v5624_v51, %v7726_v30  ;;  %v4209_v42 = vpop.f32.mrb[31].mxu1 }
 0x419   : > { %v4281_v16 = vadd.f32 %v4249_v4, %v4207_v54  ;;  %v4210_v39 = vadd.f32 %v4209_v42, %v7709_v63 }
 0x41a   : > { %v4315_v12 = vmax.f32 %v4283_v62, 0.0  ;;  %v4284_v28 = vadd.f32 %v4252_v55, %v4218_v32 }
 0x41b   : > { %v4313_v7 = vmax.f32 %v4281_v16, 0.0  ;;  %v4282_v1 = vadd.f32 %v4250_v33, %v4210_v39 }
 0x41c   : > { %4347 = vst [vmem:[%s7723_s15 + $0xf0] sm:$0xff] %v4315_v12  ;;  %v4316_v10 = vmax.f32 %v4284_v28, 0.0 }
 0x41d   : > { %4345 = vst [vmem:[%s7723_s15 + $0xe0] sm:$0xff] %v4313_v7  ;;  %v4314_v63 = vmax.f32 %v4282_v1, 0.0 }
 0x41e   : > { %4348 = vst [vmem:[%s7723_s15 + $0xf8] sm:$0xff] %v4316_v10 }
 0x41f   : > { %4346 = vst [vmem:[%s7723_s15 + $0xe8] sm:$0xff] %v4314_v63 }
 0x420   : > { %5845 = shalt.err (!%p5842_p3)
}
 0x421   : > { %s5846_s9 = scalar_lea.hbm %s7817_s26, 4096  ;;  %s5850_s12 = scalar_lea.hbm %s7872_s5, 8192 }
 0x422   : > { %p5847_p4 = scmp.ne.s32.totalorder %s7817_s26, %s5846_s9  ;;  %p5851_p9 = scmp.lt.u32.totalorder %s7817_s26, %s7872_s5 }
 0x423   : > { %p5852_p10 = scmp.lt.u32.totalorder %s5850_s12, %s5846_s9  ;;  %p5854_p12 = scmp.lt.u32.totalorder %s5846_s9, %s7817_s26 }
 0x424   : > { %p5848_p7 = pnand %p5847_p4, %p5968_p5 }
 0x425   : > { %p5853_p11 = por %p5852_p10, %p5851_p9 }
 0x426   : > { %p5849_p8 = pneg %p5848_p7 }
 0x427   : > { %p5855_p13 = por %p5854_p12, %p5853_p11 }
 0x429   : > { %p5856_p0 = pnand %p5855_p13, %p5849_p8 }
 0x42b   : > { %5859 = shalt.err (!%p5856_p0)
}
 0x42c   : > { %s5898_s15 = smov 128   ;;  %s5899_s16 = smov 8  }
 0x42d   : > { %5625 = dma.vmem_to_hbm [thread:$0]  (%p5968_p5), %s7819_s17, 4096, %s7817_s26, %s7826_s22, %s5898_s15, %s5898_s15, %s5899_s16  }
 0x42e PF: > { %p5631_p1 = scmp.ge.s32.totalorder %s5894_s21, 2  ;;  %s4378_s23 = sand.u32 1, %s5882_s18  }
 0x42f   : > { %s4379_s25 = scalar_lea.sflag [#allocation5], %s4378_s23 }
 0x430   : > { %p5628_p2 = pnand %p5631_p1, %p5972_p6 }
 0x432   : > { %5877 = dma.done.wait (!%p5628_p2), %s4379_s25, 4096  }
 0x433   : > { %5879 = vsyncadd (!%p5628_p2), %s4379_s25, 4294963200  ;;  %p15_p3 = scmp.ge.s32.totalorder %s5955_s24, 4   ;;  %s7883_s18 = smov %s5886_s19 }
 0x434   : > { %s7884_s19 = smov %s5890_s20  ;;  %s7885_s20 = smov %s5966_s27 }
 0x435   : > { %s7886_s21 = smov %s5955_s24  ;;  %17 = sbr.rel (!%p15_p3) target bundleno = 3 (0x3), region = 97 }
 0x43c   :  { %4384 = vsyncpa [#allocation5], 1 }
 0x43d   :  { %4386 = vsyncpa [#allocation5 + $0x1], 1 }

// kernel: fwd.2
= control target key start
LH: loop header
LB: loop body
LE: loop exit
PB: predicated region body
PF: predicated region fallthrough
CT: control target
= control target key end

     0   :  { %s7338_s24 = smov 0   ;;  %s9459_s0 = inlined_call_operand.vmem [shape: f32[2,16,16,16], index: 0, kind: input, shape index: {}]   ;;  %s9460_s1 = inlined_call_operand.vmem [shape: bf16[144,128], index: 1, kind: input, shape index: {}]   ;;  %s9461_s2 = inlined_call_operand.vmem [shape: f32[1,128], index: 2, kind: input, shape index: {}]   ;;  %s9462_s3 = inlined_call_operand.vmem [shape: bf16[1152,128], index: 3, kind: input, shape index: {}]   ;;  %s9463_s4 = inlined_call_operand.vmem [shape: f32[1,128], index: 4, kind: input, shape index: {}]   ;;  %s9464_s5 = inlined_call_operand.vmem [shape: bf16[16,128], index: 5, kind: input, shape index: {}]   ;;  %s9465_s6 = inlined_call_operand.vmem [shape: f32[1,128], index: 6, kind: input, shape index: {}]   ;;  %s9466_s7 = inlined_call_operand.vmem [shape: f32[2,16,16,128], index: 7, kind: output, shape index: {}]  }
   0x1 LB: > { %s5536_s25 = sadd.s32 4294967295, %s7295_s24   ;;  %p5540_p0 = scmp.ge.s32.totalorder %s7295_s24, 1  ;;  %s7295_s24 = sphi %s7338_s24, %s17_s24  }
   0x2   : > { %p237_p1 = scmp.lt.s32.totalorder %s7295_s24, 3 }
   0x4   : > { %p238_p2 = pnand %p5540_p0, %p237_p1 }
   0x6   : > { %241 = sbr.rel (%p238_p2) target bundleno = 1602 (0x642), region = 48 }
   0xd   : > { %v7201_v0 = vld [vmem:[%s9460_s1 + $0x8] sm:$0xff]   ;;  %vm328_vm0 = vcmask 130048   ;;  %v7352_v1 = vld [vmem:[%s9460_s1] sm:$0xff]   ;;  %v7297_v2 = vmov 0   ;;  %p269_p3 = scmp.lt.s32.totalorder %s5536_s25, 1  ;;  %vm340_vm1 = vcmask 122880  }
   0xe   : > { %6436 = vmatprep.subr.bf16.mxu0 %v7201_v0  ;;  %333 = vst.msk [vmem:[#allocation2 + $0x90] sm:$0xff] %vm328_vm0, %v7297_v2  ;;  %329 = vst.msk [vmem:[#allocation2] sm:$0xff] %vm328_vm0, %v7297_v2  ;;  %vm341_vm2 = vsmask.f32 256  ;;  %v346_v4 = vld [vmem:[#allocation2 + $0x8] sm:$0x1] }
   0xf   : > { %331 = vst.msk [vmem:[#allocation2 + $0x88] sm:$0xff] %vm328_vm0, %v7297_v2  ;;  %335 = vst.msk [vmem:[#allocation2 + $0x118] sm:$0xff] %vm328_vm0, %v7297_v2  ;;  %6437 = vmatpush3.bf16.msra.mxu0 %v7201_v0  ;;  %s9550_s25 = smov (!%p269_p3, %s5536_s25), 1  ;;  %v349_v5 = vld [vmem:[#allocation2 + $0x10] sm:$0x1]  ;;  %vm397_vm6 = vcmask 130055  }
  0x10   : > { %337 = vst.msk [vmem:[#allocation2 + $0x120] sm:$0xff] %vm328_vm0, %v7297_v2  ;;  %339 = vst.msk [vmem:[#allocation2 + $0x1a8] sm:$0xff] %vm328_vm0, %v7297_v2  ;;  %6470 = vmatprep.subr.bf16.mxu0 %v7352_v1  ;;  %v352_v8 = vld [vmem:[#allocation2 + $0x18] sm:$0x1]  ;;  %v355_v9 = vld [vmem:[#allocation2 + $0x20] sm:$0x1] }
  0x11   : > { %3161 = vst [vmem:[#allocation3] sm:$0xff] %v7297_v2  ;;  %3163 = vst [vmem:[#allocation3 + $0x88] sm:$0xff] %v7297_v2  ;;  %s5792_s30 = sshll.u32 %s9550_s25, 8  ;;  %v358_v12 = vld [vmem:[#allocation2 + $0x28] sm:$0x1]  ;;  %v7208_v3 = vld [vmem:[%s9460_s1 + $0x38] sm:$0xff]  }
  0x12   : > { %3165 = vst [vmem:[#allocation3 + $0x90] sm:$0xff] %v7297_v2  ;;  %3169 = vst [vmem:[#allocation3 + $0x120] sm:$0xff] %v7297_v2  ;;  %s7382_s10 = scalar_lea.vmem %s9459_s0, %s5792_s30  ;;  %v361_v14 = vld [vmem:[#allocation2 + $0x30] sm:$0x1]  ;;  %v364_v15 = vld [vmem:[#allocation2 + $0x38] sm:$0x1]  ;;  %s9365_s28 = scalar_lea.vmem %s9466_s7, %s5792_s30 }
  0x13   : > { %3171 = vst [vmem:[#allocation3 + $0x1a8] sm:$0xff] %v7297_v2  ;;  %vm7361_vm3 = vmand %vm340_vm1, %vm341_vm2  ;;  %v280_v16 = vld [vmem:[%s7382_s10] sm:$0xff]  ;;  %v281_v17 = vld [vmem:[%s7382_s10 + $0x8] sm:$0xff]  ;;  %vm601_vm4 = vsmask.f32 7938  ;;  %vm3172_vm11 = vcmask 1040384  }
  0x14   : > { %v347_v6 = vsel %vm7361_vm3, 0, %v346_v4  ;;  %v350_v7 = vsel %vm7361_vm3, 0, %v349_v5  ;;  %v353_v10 = vsel %vm7361_vm3, 0, %v352_v8  ;;  %v356_v11 = vsel %vm7361_vm3, 0, %v355_v9  ;;  %v282_v18 = vld [vmem:[%s7382_s10 + $0x10] sm:$0xff]  ;;  %v283_v23 = vld [vmem:[%s7382_s10 + $0x18] sm:$0xff]  ;;  %vm7501_vm5 = vmand %vm328_vm0, %vm601_vm4 }
  0x15   : > { %348 = vst [vmem:[#allocation2 + $0x8] sm:$0x1] %v347_v6  ;;  %351 = vst [vmem:[#allocation2 + $0x10] sm:$0x1] %v350_v7  ;;  %v359_v13 = vsel %vm7361_vm3, 0, %v358_v12  ;;  %v362_v19 = vsel %vm7361_vm3, 0, %v361_v14  ;;  %v7393_v22 = vpack.c.bf16 %v281_v17, %v280_v16  ;;  %v7398_v25 = vpack.c.bf16 %v283_v23, %v282_v18 }
  0x16   : > { %354 = vst [vmem:[#allocation2 + $0x18] sm:$0x1] %v353_v10  ;;  %357 = vst [vmem:[#allocation2 + $0x20] sm:$0x1] %v356_v11  ;;  %v365_v20 = vsel %vm7361_vm3, 0, %v364_v15  ;;  %v768_v21 = vld [vmem:[#allocation2 + $0x90] sm:$0xff] }
  0x17   : > { %360 = vst [vmem:[#allocation2 + $0x28] sm:$0x1] %v359_v13  ;;  %v284_v24 = vld [vmem:[%s7382_s10 + $0x20] sm:$0xff]  ;;  %363 = vst [vmem:[#allocation2 + $0x30] sm:$0x1] %v362_v19  ;;  %6438 = vmatprep.mubr.msk.bf16.mxu0 %vm328_vm0, %v768_v21  ;;  %v285_v26 = vld [vmem:[%s7382_s10 + $0x28] sm:$0xff] }
  0x18   : > { %366 = vst [vmem:[#allocation2 + $0x38] sm:$0x1] %v365_v20  ;;  %v286_v27 = vld [vmem:[%s7382_s10 + $0x30] sm:$0xff]  ;;  %v287_v28 = vld [vmem:[%s7382_s10 + $0x38] sm:$0xff]  ;;  %455 = vst.msk [vmem:[#allocation2 + $0x98] sm:$0xff] %vm328_vm0, %v7393_v22  ;;  %v472_v29 = vshrl.u32 %v7393_v22, 16  ;;  %v7406_v30 = vpack.c.bf16 %v285_v26, %v284_v24 }
  0x19   : > { %v7408_v31 = vpack.c.bf16 %v287_v28, %v286_v27  ;;  %v288_v32 = vld [vmem:[%s7382_s10 + $0x40] sm:$0xff]  ;;  %v289_v33 = vld [vmem:[%s7382_s10 + $0x48] sm:$0xff]  ;;  %v290_v34 = vld [vmem:[%s7382_s10 + $0x50] sm:$0xff]  ;;  %v475_v35 = vshll.u32 %v7393_v22, 16  ;;  %456 = vst.msk [vmem:[#allocation2 + $0xa0] sm:$0xff] %vm328_vm0, %v7398_v25  ;;  %v479_v36 = vshrl.u32 %v7398_v25, 16 }
  0x1a   : > { %v7417_v37 = vpack.c.bf16 %v289_v33, %v288_v32  ;;  %v291_v38 = vld [vmem:[%s7382_s10 + $0x58] sm:$0xff]  ;;  %v292_v39 = vld [vmem:[%s7382_s10 + $0x60] sm:$0xff]  ;;  %v293_v40 = vld [vmem:[%s7382_s10 + $0x68] sm:$0xff]  ;;  %v474_v41 = vrot.slane %v472_v29, 7  ;;  %457 = vst.msk [vmem:[#allocation2 + $0xa8] sm:$0xff] %vm328_vm0, %v7406_v30  ;;  %v482_v45 = vshll.u32 %v7398_v25, 16 }
  0x1b   : > { %458 = vst.msk [vmem:[#allocation2 + $0xb0] sm:$0xff] %vm328_vm0, %v7408_v31  ;;  %v294_v42 = vld [vmem:[%s7382_s10 + $0x70] sm:$0xff]  ;;  %v295_v43 = vld [vmem:[%s7382_s10 + $0x78] sm:$0xff]  ;;  %v7430_v44 = vrot.slane %v475_v35, 1  ;;  %v486_v46 = vshrl.u32 %v7406_v30, 16  ;;  %v296_v47 = vld [vmem:[%s7382_s10 + $0x80] sm:$0xff]  ;;  %v7440_v51 = vpack.c.bf16 %v291_v38, %v290_v34  ;;  %v7442_v52 = vpack.c.bf16 %v293_v40, %v292_v39 }
  0x1c   : > { %459 = vst.msk [vmem:[#allocation2 + $0xb8] sm:$0xff] %vm328_vm0, %v7417_v37  ;;  %v297_v48 = vld [vmem:[%s7382_s10 + $0x88] sm:$0xff]  ;;  %v489_v49 = vshll.u32 %v7406_v30, 16  ;;  %v9477_v50 = vshrl.u32 %v7408_v31, 16  ;;  %v298_v53 = vld [vmem:[%s7382_s10 + $0x90] sm:$0xff]  ;;  %v299_v54 = vld [vmem:[%s7382_s10 + $0x98] sm:$0xff]  ;;  %v7447_v56 = vpack.c.bf16 %v295_v43, %v294_v42  ;;  %v477_v63 = vor.u32 %v475_v35, %v474_v41 }
  0x1d   : > { %v300_v55 = vld [vmem:[%s7382_s10 + $0xa0] sm:$0xff]  ;;  %v7449_v57 = vpack.c.bf16 %v297_v48, %v296_v47  ;;  %v7451_v58 = vpack.c.bf16 %v299_v54, %v298_v53  ;;  %v301_v59 = vld [vmem:[%s7382_s10 + $0xa8] sm:$0xff]  ;;  %v302_v60 = vld [vmem:[%s7382_s10 + $0xb0] sm:$0xff]  ;;  %v481_v62 = vrot.slane %v479_v36, 7  ;;  %v496_v0 = vshll.u32 %v7408_v31, 16  ;;  %460 = vst.msk [vmem:[#allocation2 + $0xc0] sm:$0xff] %vm328_vm0, %v7440_v51 }
  0x1e   : > { %v303_v61 = vld [vmem:[%s7382_s10 + $0xb8] sm:$0xff]  ;;  %v9469_v2 = vshrl.u32 %v7417_v37, 16  ;;  %v503_v4 = vshll.u32 %v7417_v37, 16  ;;  %461 = vst.msk [vmem:[#allocation2 + $0xc8] sm:$0xff] %vm328_vm0, %v7442_v52  ;;  %v304_v5 = vld [vmem:[%s7382_s10 + $0xc0] sm:$0xff]  ;;  %v305_v6 = vld [vmem:[%s7382_s10 + $0xc8] sm:$0xff]  ;;  %v7486_v17 = vpack.c.bf16 %v301_v59, %v300_v55 }
  0x1f   : > { %v7470_v7 = vld [vmem:[%s9460_s1 + $0x10] sm:$0xff]   ;;  %v769_v8 = vld [vmem:[#allocation2 + $0x98] sm:$0xff]  ;;  %v9468_v9 = vshrl.u32 %v7440_v51, 16  ;;  %v9478_v10 = vshll.u32 %v7440_v51, 16  ;;  %v9467_v11 = vshrl.u32 %v7442_v52, 16  ;;  %v9476_v12 = vshll.u32 %v7442_v52, 16  ;;  %vm8221_vm12 = vmand %vm3172_vm11, %vm341_vm2 }
  0x20   : > { %462 = vst.msk [vmem:[#allocation2 + $0xd0] sm:$0xff] %vm328_vm0, %v7447_v56  ;;  %463 = vst.msk [vmem:[#allocation2 + $0xd8] sm:$0xff] %vm328_vm0, %v7449_v57  ;;  %v306_v13 = vld [vmem:[%s7382_s10 + $0xd0] sm:$0xff]  ;;  %6439 = vmatmul.mubr.msk.bf16.vlgmr.msra.gmra.mrb[0].mxu0 %vm328_vm0, %v769_v8  ;;  %v770_v14 = vld [vmem:[#allocation2 + $0xa0] sm:$0xff]  ;;  %v9475_v15 = vshrl.u32 %v7447_v56, 16  ;;  %v524_v16 = vshll.u32 %v7447_v56, 16  ;;  %v7488_v18 = vpack.c.bf16 %v303_v61, %v302_v60  ;;  %v7493_v20 = vpack.c.bf16 %v305_v6, %v304_v5 }
  0x21   : > { %464 = vst.msk [vmem:[#allocation2 + $0xe0] sm:$0xff] %vm328_vm0, %v7451_v58  ;;  %v307_v19 = vld [vmem:[%s7382_s10 + $0xd8] sm:$0xff]  ;;  %6471 = vmatpush3.bf16.msra.mxu0 %v7352_v1  ;;  %6442 = vmatprep.mubr.msk.bf16.mxu0 %vm328_vm0, %v770_v14  ;;  %v308_v23 = vld [vmem:[%s7382_s10 + $0xe0] sm:$0xff]  ;;  %v309_v24 = vld [vmem:[%s7382_s10 + $0xe8] sm:$0xff]  ;;  %v484_v27 = vor.u32 %v482_v45, %v481_v62  ;;  %v488_v1 = vrot.slane %v486_v46, 7  ;;  %v9470_v28 = vshrl.u32 %v7449_v57, 16 }
  0x22   : > { %v7495_v21 = vpack.c.bf16 %v307_v19, %v306_v13  ;;  %vm398_vm7 = vsmask.f32 7966  ;;  %v531_v32 = vshll.u32 %v7449_v57, 16  ;;  %v9471_v33 = vshrl.u32 %v7451_v58, 16  ;;  %465 = vst.msk [vmem:[#allocation2 + $0xe8] sm:$0xff] %vm328_vm0, %v7486_v17  ;;  %466 = vst.msk [vmem:[#allocation2 + $0xf0] sm:$0xff] %vm328_vm0, %v7488_v18  ;;  %6504 = vmatprep.subr.bf16.mxu0 %v7470_v7 }
  0x23   : > { %v538_v34 = vshll.u32 %v7451_v58, 16  ;;  %v603_v35 = vld [vmem:[#allocation2 + $0x8] sm:$0xff]  ;;  %v9472_v38 = vshrl.u32 %v7486_v17, 16  ;;  %v545_v39 = vshll.u32 %v7486_v17, 16  ;;  %v9474_v40 = vshrl.u32 %v7488_v18, 16  ;;  %467 = vst.msk [vmem:[#allocation2 + $0xf8] sm:$0xff] %vm328_vm0, %v7493_v20  ;;  %vm7626_vm8 = vmand %vm397_vm6, %vm398_vm7 }
  0x24   : > { %v552_v41 = vshll.u32 %v7488_v18, 16  ;;  %468 = vst.msk [vmem:[#allocation2 + $0x100] sm:$0xff] %vm328_vm0, %v7495_v21  ;;  %v343_v42 = vld [vmem:[#allocation2] sm:$0x1]  ;;  %v7526_v43 = vpack.c.bf16 %v309_v24, %v308_v23  ;;  %v7532_v48 = vsel %vm7501_vm5, %v477_v63, %v603_v35  ;;  %v606_v53 = vld [vmem:[#allocation2 + $0x10] sm:$0xff]  ;;  %v491_v54 = vor.u32 %v489_v49, %v488_v1  ;;  %v609_v55 = vld [vmem:[#allocation2 + $0x18] sm:$0xff] }
  0x25   : > { %v344_v47 = vsel %vm7361_vm3, 0, %v343_v42  ;;  %v7536_v59 = vld [vmem:[#allocation2 + $0xa8] sm:$0xff]  ;;  %605 = vst [vmem:[#allocation2 + $0x8] sm:$0xff] %v7532_v48  ;;  %v7541_v60 = vsel %vm7501_vm5, %v484_v27, %v606_v53  ;;  %v495_v61 = vrot.slane %v9477_v50, 7  ;;  %v502_v62 = vrot.slane %v9469_v2, 7  ;;  %v7549_v5 = vld [vmem:[#allocation2 + $0xb0] sm:$0xff] }
  0x26   : > { %345 = vst [vmem:[#allocation2] sm:$0x1] %v344_v47  ;;  %v509_v63 = vrot.slane %v9468_v9, 7  ;;  %v9473_v6 = vshrl.u32 %v7493_v20, 16  ;;  %v9481_v8 = vshll.u32 %v7493_v20, 16  ;;  %469 = vst.msk [vmem:[#allocation2 + $0x108] sm:$0xff] %vm328_vm0, %v7526_v43  ;;  %v7558_v13 = vsel %vm7501_vm5, %v491_v54, %v609_v55 }
  0x27   : > { %608 = vst [vmem:[#allocation2 + $0x10] sm:$0xff] %v7541_v60  ;;  %v612_v14 = vld [vmem:[#allocation2 + $0x20] sm:$0xff]  ;;  %v615_v19 = vld [vmem:[#allocation2 + $0x28] sm:$0xff]  ;;  %v516_v23 = vrot.slane %v9467_v11, 7  ;;  %v9480_v24 = vshrl.u32 %v7495_v21, 16  ;;  %611 = vst [vmem:[#allocation2 + $0x18] sm:$0xff] %v7558_v13  ;;  %v498_v27 = vor.u32 %v496_v0, %v495_v61  ;;  %v505_v1 = vor.u32 %v503_v4, %v502_v62 }
  0x28   : > { %v512_v35 = vor.u32 %v9478_v10, %v509_v63  ;;  %v618_v42 = vld [vmem:[#allocation2 + $0x30] sm:$0xff]  ;;  %v621_v47 = vld [vmem:[#allocation2 + $0x38] sm:$0xff]  ;;  %v367_v53 = vld [vmem:[#allocation2 + $0x40] sm:$0x1]  ;;  %6443 = vmatmul.mubr.msk.bf16.gmra.mrb[4].mxu0 %vm328_vm0, %v7536_v59  ;;  %v9479_v54 = vshrl.u32 %v7526_v43, 16  ;;  %v9501_v30 = vshll.u32 %v7440_v51, 16 }
  0x29   : > { %v519_v55 = vor.u32 %v9476_v12, %v516_v23  ;;  %v368_v61 = vsel %vm7361_vm3, 0, %v367_v53  ;;  %v370_v11 = vld [vmem:[#allocation2 + $0x48] sm:$0x1]  ;;  %v373_v9 = vld [vmem:[#allocation2 + $0x50] sm:$0x1]  ;;  %6446 = vmatprep.mubr.msk.bf16.mxu0 %vm328_vm0, %v7549_v5  ;;  %v7581_v62 = vsel %vm7501_vm5, %v498_v27, %v612_v14  ;;  %v7585_v63 = vsel %vm7501_vm5, %v505_v1, %v615_v19  ;;  %v7216_v25 = vld [vmem:[%s9462_s3 + $0x58] sm:$0xff]  }
  0x2a   : > { %v7589_v2 = vsel %vm7501_vm5, %v512_v35, %v618_v42  ;;  %369 = vst [vmem:[#allocation2 + $0x40] sm:$0x1] %v368_v61  ;;  %v523_v23 = vrot.slane %v9475_v15, 7  ;;  %v376_v53 = vld [vmem:[#allocation2 + $0x58] sm:$0x1]  ;;  %614 = vst [vmem:[#allocation2 + $0x20] sm:$0xff] %v7581_v62 }
  0x2b   : > { %617 = vst [vmem:[#allocation2 + $0x28] sm:$0xff] %v7585_v63  ;;  %620 = vst [vmem:[#allocation2 + $0x30] sm:$0xff] %v7589_v2  ;;  %v7598_v14 = vsel %vm7501_vm5, %v519_v55, %v621_v47  ;;  %v371_v19 = vsel %vm7361_vm3, 0, %v370_v11  ;;  %v530_v27 = vrot.slane %v9470_v28, 7  ;;  %v374_v1 = vsel %vm7361_vm3, 0, %v373_v9  ;;  %v7606_v42 = vld [vmem:[#allocation2 + $0xb8] sm:$0xff] }
  0x2c   : > { %v379_v35 = vld [vmem:[#allocation2 + $0x60] sm:$0x1]  ;;  %623 = vst [vmem:[#allocation2 + $0x38] sm:$0xff] %v7598_v14  ;;  %372 = vst [vmem:[#allocation2 + $0x48] sm:$0x1] %v371_v19  ;;  %v537_v47 = vrot.slane %v9471_v33, 7 }
  0x2d   : > { %375 = vst [vmem:[#allocation2 + $0x50] sm:$0x1] %v374_v1  ;;  %v377_v55 = vsel %vm7361_vm3, 0, %v376_v53  ;;  %v544_v11 = vrot.slane %v9472_v38, 7  ;;  %v380_v61 = vsel %vm7361_vm3, 0, %v379_v35  ;;  %v9482_v28 = vshll.u32 %v7495_v21, 16 }
  0x2e   : > { %v382_v9 = vld [vmem:[#allocation2 + $0x68] sm:$0x1]  ;;  %378 = vst [vmem:[#allocation2 + $0x58] sm:$0x1] %v377_v55  ;;  %381 = vst [vmem:[#allocation2 + $0x60] sm:$0x1] %v380_v61  ;;  %v526_v61 = vor.u32 %v524_v16, %v523_v23  ;;  %v533_v10 = vor.u32 %v531_v32, %v530_v27  ;;  %v540_v23 = vor.u32 %v538_v34, %v537_v47 }
  0x2f   : > { %v551_v19 = vrot.slane %v9474_v40, 7  ;;  %v383_v1 = vsel %vm7361_vm3, 0, %v382_v9  ;;  %v558_v53 = vrot.slane %v9473_v6, 7  ;;  %v385_v33 = vld [vmem:[#allocation2 + $0x70] sm:$0x1]  ;;  %v7630_v35 = vld [vmem:[#allocation2 + $0xc0] sm:$0xff] }
  0x30   : > { %v573_v55 = vshll.u32 %v7526_v43, 16  ;;  %384 = vst [vmem:[#allocation2 + $0x68] sm:$0x1] %v383_v1  ;;  %v386_v9 = vsel %vm7361_vm3, 0, %v385_v33  ;;  %v565_v6 = vrot.slane %v9480_v24, 7  ;;  %v572_v12 = vrot.slane %v9479_v54, 7  ;;  %6447 = vmatmul.mubr.msk.bf16.gmra.mrb[8].mxu0 %vm328_vm0, %v7606_v42 }
  0x31   : > { %v388_v40 = vld [vmem:[#allocation2 + $0x78] sm:$0x1]  ;;  %387 = vst [vmem:[#allocation2 + $0x70] sm:$0x1] %v386_v9  ;;  %v400_v50 = vld [vmem:[#allocation2 + $0x120] sm:$0x80]  ;;  %v547_v33 = vor.u32 %v545_v39, %v544_v11  ;;  %v554_v54 = vor.u32 %v552_v41, %v551_v19  ;;  %v561_v27 = vor.u32 %v9481_v8, %v558_v53  ;;  %6450 = vmatprep.mubr.msk.bf16.mxu0 %vm328_vm0, %v7630_v35 }
  0x32   : > { %v389_v15 = vsel %vm7361_vm3, 0, %v388_v40  ;;  %v401_v1 = vsel %vm7626_vm8, 0, %v400_v50  ;;  %v403_v9 = vld [vmem:[#allocation2 + $0x128] sm:$0x80]  ;;  %v624_v40 = vld [vmem:[#allocation2 + $0x40] sm:$0xff]  ;;  %v568_v19 = vor.u32 %v9482_v28, %v565_v6  ;;  %vm3228_vm13 = vcmask 1047559  }
  0x33   : > { %390 = vst [vmem:[#allocation2 + $0x78] sm:$0x1] %v389_v15  ;;  %402 = vst [vmem:[#allocation2 + $0x120] sm:$0x80] %v401_v1  ;;  %v404_v47 = vsel %vm7626_vm8, 0, %v403_v9  ;;  %v653_v15 = vrot.slane %v482_v45, 1  ;;  %v7665_v50 = vsel %vm7501_vm5, %v526_v61, %v624_v40  ;;  %v575_v61 = vor.u32 %v573_v55, %v572_v12 }
  0x34   : > { %v406_v11 = vld [vmem:[#allocation2 + $0x130] sm:$0x80]  ;;  %405 = vst [vmem:[#allocation2 + $0x128] sm:$0x80] %v404_v47  ;;  %v409_v1 = vld [vmem:[#allocation2 + $0x138] sm:$0x80]  ;;  %vm8240_vm14 = vmand %vm3228_vm13, %vm398_vm7 }
  0x35   : > { %v407_v53 = vsel %vm7626_vm8, 0, %v406_v11  ;;  %v655_v9 = vrot.slane %v489_v49, 1  ;;  %v412_v24 = vld [vmem:[#allocation2 + $0x140] sm:$0x80]  ;;  %626 = vst [vmem:[#allocation2 + $0x40] sm:$0xff] %v7665_v50  ;;  %v627_v45 = vld [vmem:[#allocation2 + $0x48] sm:$0xff] }
  0x36   : > { %v630_v8 = vld [vmem:[#allocation2 + $0x50] sm:$0xff]  ;;  %vm700_vm9 = vsmask.f32 7424  ;;  %408 = vst [vmem:[#allocation2 + $0x130] sm:$0x80] %v407_v53  ;;  %v410_v6 = vsel %vm7626_vm8, 0, %v409_v1  ;;  %v7684_v49 = vsel %vm7501_vm5, %v533_v10, %v627_v45  ;;  %v652_v10 = vor.u32 %v7430_v44, %v472_v29 }
  0x37   : > { %v413_v40 = vsel %vm7626_vm8, 0, %v412_v24  ;;  %v7680_v47 = vld [vmem:[#allocation2 + $0xc8] sm:$0xff]  ;;  %v7688_v11 = vsel %vm7501_vm5, %v540_v23, %v630_v8  ;;  %v633_v28 = vld [vmem:[#allocation2 + $0x58] sm:$0xff]  ;;  %v636_v12 = vld [vmem:[#allocation2 + $0x60] sm:$0xff]  ;;  %411 = vst [vmem:[#allocation2 + $0x138] sm:$0x80] %v410_v6 }
  0x38   : > { %414 = vst [vmem:[#allocation2 + $0x140] sm:$0x80] %v413_v40  ;;  %v657_v53 = vrot.slane %v496_v0, 1  ;;  %v415_v1 = vld [vmem:[#allocation2 + $0x148] sm:$0x80]  ;;  %v659_v24 = vrot.slane %v503_v4, 1  ;;  %v7703_v8 = vsel %vm7501_vm5, %v547_v33, %v633_v28  ;;  %v7707_v0 = vsel %vm7501_vm5, %v554_v54, %v636_v12  ;;  %vm7730_vm10 = vmand %vm328_vm0, %vm700_vm9  ;;  %6451 = vmatmul.mubr.msk.bf16.gmra.mrb[12].mxu0 %vm328_vm0, %v7680_v47 }
  0x39   : > { %v7697_v45 = vld [vmem:[#allocation2 + $0xd0] sm:$0xff]  ;;  %629 = vst [vmem:[#allocation2 + $0x48] sm:$0xff] %v7684_v49  ;;  %632 = vst [vmem:[#allocation2 + $0x50] sm:$0xff] %v7688_v11  ;;  %v639_v23 = vld [vmem:[#allocation2 + $0x68] sm:$0xff]  ;;  %v416_v22 = vsel %vm7626_vm8, 0, %v415_v1  ;;  %v654_v33 = vor.u32 %v653_v15, %v479_v36  ;;  %v656_v54 = vor.u32 %v655_v9, %v486_v46  ;;  %v661_v36 = vrot.slane %v9501_v30, 1 }
  0x3a   : > { %v418_v4 = vld [vmem:[#allocation2 + $0x150] sm:$0x80]  ;;  %v421_v29 = vld [vmem:[#allocation2 + $0x158] sm:$0x80]  ;;  %635 = vst [vmem:[#allocation2 + $0x58] sm:$0xff] %v7703_v8  ;;  %638 = vst [vmem:[#allocation2 + $0x60] sm:$0xff] %v7707_v0  ;;  %v7715_v44 = vsel %vm7501_vm5, %v561_v27, %v639_v23  ;;  %6454 = vmatprep.mubr.msk.bf16.mxu0 %vm328_vm0, %v7697_v45 }
  0x3b   : > { %v642_v28 = vld [vmem:[#allocation2 + $0x70] sm:$0xff]  ;;  %417 = vst [vmem:[#allocation2 + $0x148] sm:$0x80] %v416_v22  ;;  %v419_v6 = vsel %vm7626_vm8, 0, %v418_v4  ;;  %v424_v40 = vld [vmem:[#allocation2 + $0x160] sm:$0x80] }
  0x3c   : > { %v427_v12 = vld [vmem:[#allocation2 + $0x168] sm:$0x80]  ;;  %641 = vst [vmem:[#allocation2 + $0x68] sm:$0xff] %v7715_v44  ;;  %v7726_v1 = vsel %vm7501_vm5, %v568_v19, %v642_v28  ;;  %v645_v27 = vld [vmem:[#allocation2 + $0x78] sm:$0xff]  ;;  %420 = vst [vmem:[#allocation2 + $0x150] sm:$0x80] %v419_v6 }
  0x3d   : > { %v422_v46 = vsel %vm7626_vm8, 0, %v421_v29  ;;  %v425_v15 = vsel %vm7626_vm8, 0, %v424_v40  ;;  %644 = vst [vmem:[#allocation2 + $0x70] sm:$0xff] %v7726_v1  ;;  %v7743_v19 = vsel %vm7501_vm5, %v575_v61, %v645_v27  ;;  %v9502_v9 = vshrl.u32 %v7408_v31, 16  ;;  %v702_v28 = vld [vmem:[#allocation2 + $0x128] sm:$0xff]  ;;  %v7211_v38 = vld [vmem:[%s9462_s3] sm:$0xff]  }
  0x3e   : > { %423 = vst [vmem:[#allocation2 + $0x158] sm:$0x80] %v422_v46  ;;  %v9503_v22 = vshll.u32 %v7442_v52, 16  ;;  %426 = vst [vmem:[#allocation2 + $0x160] sm:$0x80] %v425_v15  ;;  %v428_v29 = vsel %vm7626_vm8, 0, %v427_v12  ;;  %v7760_v31 = vsel %vm7730_vm10, %v652_v10, %v702_v28 }
  0x3f   : > { %v658_v23 = vor.u32 %v657_v53, %v9502_v9  ;;  %647 = vst [vmem:[#allocation2 + $0x78] sm:$0xff] %v7743_v19  ;;  %v665_v61 = vrot.slane %v524_v16, 1  ;;  %429 = vst [vmem:[#allocation2 + $0x168] sm:$0x80] %v428_v29  ;;  %v705_v53 = vld [vmem:[#allocation2 + $0x130] sm:$0xff]  ;;  %v9504_v6 = vshrl.u32 %v7417_v37, 16 }
  0x40   : > { %v663_v4 = vrot.slane %v9503_v22, 1  ;;  %v667_v12 = vrot.slane %v531_v32, 1  ;;  %704 = vst [vmem:[#allocation2 + $0x128] sm:$0xff] %v7760_v31  ;;  %v7769_v16 = vsel %vm7730_vm10, %v654_v33, %v705_v53  ;;  %v708_v27 = vld [vmem:[#allocation2 + $0x138] sm:$0xff]  ;;  %v711_v30 = vld [vmem:[#allocation2 + $0x140] sm:$0xff]  ;;  %v9505_v46 = vshrl.u32 %v7440_v51, 16 }
  0x41   : > { %v660_v40 = vor.u32 %v659_v24, %v9504_v6  ;;  %v7773_v10 = vld [vmem:[#allocation2 + $0xd8] sm:$0xff]  ;;  %707 = vst [vmem:[#allocation2 + $0x130] sm:$0xff] %v7769_v16  ;;  %v7778_v37 = vsel %vm7730_vm10, %v656_v54, %v708_v27  ;;  %v7782_v32 = vsel %vm7730_vm10, %v658_v23, %v711_v30  ;;  %v9506_v24 = vshrl.u32 %v7442_v52, 16  ;;  %v7788_v51 = vld [vmem:[#allocation2 + $0xe0] sm:$0xff]  ;;  %v430_v28 = vld [vmem:[#allocation2 + $0x170] sm:$0x80] }
  0x42   : > { %v662_v15 = vor.u32 %v661_v36, %v9505_v46  ;;  %v9507_v9 = vshrl.u32 %v7447_v56, 16  ;;  %710 = vst [vmem:[#allocation2 + $0x138] sm:$0xff] %v7778_v37  ;;  %713 = vst [vmem:[#allocation2 + $0x140] sm:$0xff] %v7782_v32  ;;  %v714_v36 = vld [vmem:[#allocation2 + $0x148] sm:$0xff]  ;;  %v9508_v54 = vshrl.u32 %v7449_v57, 16  ;;  %v431_v56 = vsel %vm7626_vm8, 0, %v430_v28  ;;  %6455 = vmatmul.mubr.msk.bf16.gmra.mrb[16].mxu0 %vm328_vm0, %v7773_v10 }
  0x43   : > { %v664_v33 = vor.u32 %v663_v4, %v9506_v24  ;;  %v7796_v23 = vsel %vm7730_vm10, %v660_v40, %v714_v36  ;;  %v717_v52 = vld [vmem:[#allocation2 + $0x150] sm:$0xff]  ;;  %v433_v4 = vld [vmem:[#allocation2 + $0x178] sm:$0x80]  ;;  %432 = vst [vmem:[#allocation2 + $0x170] sm:$0x80] %v431_v56  ;;  %v669_v46 = vrot.slane %v538_v34, 1  ;;  %6458 = vmatprep.mubr.msk.bf16.mxu0 %vm328_vm0, %v7788_v51 }
  0x44   : > { %v666_v22 = vor.u32 %v665_v61, %v9507_v9  ;;  %v668_v29 = vor.u32 %v667_v12, %v9508_v54  ;;  %716 = vst [vmem:[#allocation2 + $0x148] sm:$0xff] %v7796_v23  ;;  %v7803_v61 = vsel %vm7730_vm10, %v662_v15, %v717_v52  ;;  %v434_v57 = vsel %vm7626_vm8, 0, %v433_v4  ;;  %v7833_v9 = vld [vmem:[#allocation2 + $0xe8] sm:$0xff]  ;;  %v7837_v54 = vld [vmem:[#allocation2 + $0xf0] sm:$0xff] }
  0x45   : > { %v720_v53 = vld [vmem:[#allocation2 + $0x158] sm:$0xff]  ;;  %v723_v6 = vld [vmem:[#allocation2 + $0x160] sm:$0xff]  ;;  %719 = vst [vmem:[#allocation2 + $0x150] sm:$0xff] %v7803_v61  ;;  %435 = vst [vmem:[#allocation2 + $0x178] sm:$0x80] %v434_v57  ;;  %v671_v15 = vrot.slane %v545_v39, 1 }
  0x46   : > { %v7810_v40 = vsel %vm7730_vm10, %v664_v33, %v720_v53  ;;  %v7814_v12 = vsel %vm7730_vm10, %v666_v22, %v723_v6  ;;  %v726_v27 = vld [vmem:[#allocation2 + $0x168] sm:$0xff]  ;;  %v9509_v24 = vshrl.u32 %v7451_v58, 16  ;;  %v9510_v22 = vshrl.u32 %v7486_v17, 16 }
  0x47   : > { %722 = vst [vmem:[#allocation2 + $0x158] sm:$0xff] %v7810_v40  ;;  %725 = vst [vmem:[#allocation2 + $0x160] sm:$0xff] %v7814_v12  ;;  %v7822_v30 = vsel %vm7730_vm10, %v668_v29, %v726_v27  ;;  %v436_v29 = vld [vmem:[#allocation2 + $0x180] sm:$0x80]  ;;  %v439_v52 = vld [vmem:[#allocation2 + $0x188] sm:$0x80] }
  0x48   : > { %728 = vst [vmem:[#allocation2 + $0x168] sm:$0xff] %v7822_v30  ;;  %v670_v33 = vor.u32 %v669_v46, %v9509_v24  ;;  %v672_v36 = vor.u32 %v671_v15, %v9510_v22  ;;  %v437_v28 = vsel %vm7626_vm8, 0, %v436_v29  ;;  %v440_v58 = vsel %vm7626_vm8, 0, %v439_v52  ;;  %v7863_v46 = vld [vmem:[#allocation2 + $0xf8] sm:$0xff]  ;;  %v442_v22 = vld [vmem:[#allocation2 + $0x190] sm:$0x80] }
  0x49   : > { %438 = vst [vmem:[#allocation2 + $0x180] sm:$0x80] %v437_v28  ;;  %441 = vst [vmem:[#allocation2 + $0x188] sm:$0x80] %v440_v58  ;;  %v673_v4 = vrot.slane %v552_v41, 1  ;;  %v9511_v53 = vshll.u32 %v7493_v20, 16 }
  0x4a   : > { %v729_v34 = vld [vmem:[#allocation2 + $0x170] sm:$0xff]  ;;  %6459 = vmatmul.mubr.msk.bf16.gmra.mrb[20].mxu0 %vm328_vm0, %v7833_v9  ;;  %v9512_v57 = vshrl.u32 %v7488_v18, 16  ;;  %v9513_v15 = vshrl.u32 %v7493_v20, 16  ;;  %v443_v41 = vsel %vm7626_vm8, 0, %v442_v22  ;;  %v445_v29 = vld [vmem:[#allocation2 + $0x198] sm:$0x80] }
  0x4b   : > { %v7843_v56 = vsel %vm7730_vm10, %v670_v33, %v729_v34  ;;  %6462 = vmatprep.mubr.msk.bf16.mxu0 %vm328_vm0, %v7837_v54  ;;  %v675_v6 = vrot.slane %v9511_v53, 1  ;;  %v7867_v33 = vld [vmem:[#allocation2 + $0x100] sm:$0xff]  ;;  %444 = vst [vmem:[#allocation2 + $0x190] sm:$0x80] %v443_v41  ;;  %v446_v18 = vsel %vm7626_vm8, 0, %v445_v29  ;;  %v9514_v52 = vshll.u32 %v7495_v21, 16 }
  0x4c   : > { %v732_v39 = vld [vmem:[#allocation2 + $0x178] sm:$0xff]  ;;  %731 = vst [vmem:[#allocation2 + $0x170] sm:$0xff] %v7843_v56  ;;  %v674_v27 = vor.u32 %v673_v4, %v9512_v57  ;;  %447 = vst [vmem:[#allocation2 + $0x198] sm:$0x80] %v446_v18  ;;  %v679_v58 = vrot.slane %v573_v55, 1  ;;  %v9515_v4 = vshrl.u32 %v7495_v21, 16 }
  0x4d   : > { %v7850_v17 = vsel %vm7730_vm10, %v672_v36, %v732_v39  ;;  %v676_v24 = vor.u32 %v675_v6, %v9513_v15  ;;  %v677_v39 = vrot.slane %v9514_v52, 1  ;;  %v7893_v6 = vld [vmem:[#allocation2 + $0x108] sm:$0xff]  ;;  %v9516_v57 = vshrl.u32 %v7526_v43, 16  ;;  %v750_v15 = vld [vmem:[#allocation2] sm:$0xff]  ;;  %v7204_v21 = vld [vmem:[%s9460_s1 + $0x18] sm:$0xff]  }
  0x4e   : > { %734 = vst [vmem:[#allocation2 + $0x178] sm:$0xff] %v7850_v17  ;;  %v310_v43 = vld [vmem:[%s7382_s10 + $0xf0] sm:$0xff]  ;;  %v311_v41 = vld [vmem:[%s7382_s10 + $0xf8] sm:$0xff]  ;;  %v7206_v26 = vld [vmem:[%s9460_s1 + $0x28] sm:$0xff]   ;;  %vm3430_vm15 = vcmask 1047552  }
  0x4f   : > { %v678_v53 = vor.u32 %v677_v39, %v9515_v4  ;;  %v1216_v4 = vld [vmem:[#allocation2 + $0x120] sm:$0xff]  ;;  %vm8326_vm1 = vmand %vm3430_vm15, %vm601_vm4 }
  0x50   : > { %v735_v36 = vld [vmem:[#allocation2 + $0x180] sm:$0xff]  ;;  %v738_v28 = vld [vmem:[#allocation2 + $0x188] sm:$0xff]  ;;  %vm8333_vm2 = vmand %vm3430_vm15, %vm700_vm9 }
  0x51   : > { %v7873_v34 = vsel %vm7730_vm10, %v674_v27, %v735_v36  ;;  %v7880_v20 = vsel %vm7730_vm10, %v676_v24, %v738_v28  ;;  %v680_v27 = vor.u32 %v679_v58, %v9516_v57  ;;  %v327_v28 = vpack.c.bf16 %v311_v41, %v310_v43  ;;  %v7284_v43 = vld [vmem:[#allocation2 + $0xa0] sm:$0xff]  ;;  %v2554_v41 = vld [vmem:[#allocation2 + $0xf8] sm:$0xff] }
  0x52   : > { %737 = vst [vmem:[#allocation2 + $0x180] sm:$0xff] %v7873_v34  ;;  %6463 = vmatmul.mubr.msk.bf16.gmra.mrb[24].mxu0 %vm328_vm0, %v7863_v46  ;;  %740 = vst [vmem:[#allocation2 + $0x188] sm:$0xff] %v7880_v20  ;;  %v741_v24 = vld [vmem:[#allocation2 + $0x190] sm:$0xff] }
  0x53   : > { %6466 = vmatprep.mubr.msk.bf16.mxu0 %vm328_vm0, %v7867_v33  ;;  %v7899_v22 = vsel %vm7730_vm10, %v678_v53, %v741_v24  ;;  %v744_v36 = vld [vmem:[#allocation2 + $0x198] sm:$0xff]  ;;  %v577_v18 = vshrl.u32 %v327_v28, 16  ;;  %v580_v52 = vshll.u32 %v327_v28, 16  ;;  %470 = vst.msk [vmem:[#allocation2 + $0x110] sm:$0xff] %vm328_vm0, %v327_v28  ;;  %v2556_v28 = vld [vmem:[#allocation2 + $0x108] sm:$0xff] }
  0x54   : > { %743 = vst [vmem:[#allocation2 + $0x190] sm:$0xff] %v7899_v22  ;;  %v7904_v55 = vsel %vm7730_vm10, %v680_v27, %v744_v36  ;;  %v7205_v27 = vld [vmem:[%s9460_s1 + $0x20] sm:$0xff]  }
  0x55   : > { %746 = vst [vmem:[#allocation2 + $0x198] sm:$0xff] %v7904_v55  ;;  %v579_v39 = vrot.slane %v577_v18, 7 }
  0x57   : > { %v582_v58 = vor.u32 %v580_v52, %v579_v39  ;;  %v3236_v39 = vld [vmem:[#allocation3 + $0x130] sm:$0x80] }
  0x5a   : > { %6467 = vmatmul.mubr.msk.bf16.gmra.mrb[28].mxu0 %vm328_vm0, %v7893_v6 }
  0x5b   : > { %6472 = vmatprep.mubr.msk.bf16.mxu0 %vm328_vm0, %v750_v15 }
  0x62   : > { %6473 = vmatmul.mubr.msk.bf16.vlgmr.msra.gmra.mrb[0].mxu0 %vm328_vm0, %v7532_v48 }
  0x63   : > { %6505 = vmatpush3.bf16.msra.mxu0 %v7470_v7  ;;  %6476 = vmatprep.mubr.msk.bf16.mxu0 %vm328_vm0, %v7541_v60  ;;  %v391_v7 = vld [vmem:[#allocation2 + $0x80] sm:$0x1] }
  0x64   : > { %6538 = vmatprep.subr.bf16.mxu0 %v7204_v21  ;;  %v392_v29 = vsel %vm7361_vm3, 0, %v391_v7  ;;  %v7207_v7 = vld [vmem:[%s9460_s1 + $0x30] sm:$0xff]  }
  0x65   : > { %393 = vst [vmem:[#allocation2 + $0x80] sm:$0x1] %v392_v29  ;;  %v2555_v29 = vld [vmem:[#allocation2 + $0x100] sm:$0xff] }
  0x6a   : > { %6477 = vmatmul.mubr.msk.bf16.gmra.mrb[4].mxu0 %vm328_vm0, %v7558_v13 }
  0x6b   : > { %6480 = vmatprep.mubr.msk.bf16.mxu0 %vm328_vm0, %v7581_v62 }
  0x6c   : > { %v648_v53 = vld [vmem:[#allocation2 + $0x80] sm:$0xff] }
  0x6d   : > { %v7949_v57 = vsel %vm7501_vm5, %v582_v58, %v648_v53  ;;  %v3177_v53 = vld [vmem:[#allocation3 + $0x8] sm:$0x1] }
  0x6e   : > { %650 = vst [vmem:[#allocation2 + $0x80] sm:$0xff] %v7949_v57 }
  0x72   : > { %6481 = vmatmul.mubr.msk.bf16.gmra.mrb[8].mxu0 %vm328_vm0, %v7585_v63 }
  0x73   : > { %6484 = vmatprep.mubr.msk.bf16.mxu0 %vm328_vm0, %v7589_v2 }
  0x7a   : > { %6485 = vmatmul.mubr.msk.bf16.gmra.mrb[12].mxu0 %vm328_vm0, %v7598_v14 }
  0x7b   : > { %6488 = vmatprep.mubr.msk.bf16.mxu0 %vm328_vm0, %v7665_v50 }
  0x82   : > { %6489 = vmatmul.mubr.msk.bf16.gmra.mrb[16].mxu0 %vm328_vm0, %v7684_v49 }
  0x83   : > { %6492 = vmatprep.mubr.msk.bf16.mxu0 %vm328_vm0, %v7688_v11 }
  0x8a   : > { %6493 = vmatmul.mubr.msk.bf16.gmra.mrb[20].mxu0 %vm328_vm0, %v7703_v8 }
  0x8b   : > { %6496 = vmatprep.mubr.msk.bf16.mxu0 %vm328_vm0, %v7707_v0 }
  0x92   : > { %6497 = vmatmul.mubr.msk.bf16.gmra.mrb[24].mxu0 %vm328_vm0, %v7715_v44 }
  0x93   : > { %6500 = vmatprep.mubr.msk.bf16.mxu0 %vm328_vm0, %v7726_v1 }
  0x9a   : > { %6501 = vmatmul.mubr.msk.bf16.gmra.mrb[28].mxu0 %vm328_vm0, %v7743_v19 }
  0x9b   : > { %6506 = vmatprep.mubr.msk.bf16.mxu0 %vm328_vm0, %v1216_v4  ;;  %v3237_v4 = vsel %vm8240_vm14, 0, %v3236_v39 }
  0x9c   : > { %3238 = vst [vmem:[#allocation3 + $0x130] sm:$0x80] %v3237_v4 }
  0xa2   : > { %6507 = vmatmul.mubr.msk.bf16.vlgmr.msra.gmra.mrb[0].mxu0 %vm328_vm0, %v7760_v31 }
  0xa3   : > { %6539 = vmatpush3.bf16.msra.mxu0 %v7204_v21  ;;  %6510 = vmatprep.mubr.msk.bf16.mxu0 %vm328_vm0, %v7769_v16  ;;  %v7283_v21 = vld [vmem:[#allocation2 + $0x98] sm:$0xff] }
  0xa4   : > { %6572 = vmatprep.subr.bf16.mxu0 %v7205_v27 }
  0xaa   : > { %6511 = vmatmul.mubr.msk.bf16.gmra.mrb[4].mxu0 %vm328_vm0, %v7778_v37 }
  0xab   : > { %6514 = vmatprep.mubr.msk.bf16.mxu0 %vm328_vm0, %v7782_v32 }
  0xb2   : > { %6515 = vmatmul.mubr.msk.bf16.gmra.mrb[8].mxu0 %vm328_vm0, %v7796_v23 }
  0xb3   : > { %6518 = vmatprep.mubr.msk.bf16.mxu0 %vm328_vm0, %v7803_v61 }
  0xba   : > { %6519 = vmatmul.mubr.msk.bf16.gmra.mrb[12].mxu0 %vm328_vm0, %v7810_v40 }
  0xbb   : > { %6522 = vmatprep.mubr.msk.bf16.mxu0 %vm328_vm0, %v7814_v12 }
  0xc2   : > { %6523 = vmatmul.mubr.msk.bf16.gmra.mrb[16].mxu0 %vm328_vm0, %v7822_v30 }
  0xc3   : > { %6526 = vmatprep.mubr.msk.bf16.mxu0 %vm328_vm0, %v7843_v56 }
  0xca   : > { %6527 = vmatmul.mubr.msk.bf16.gmra.mrb[20].mxu0 %vm328_vm0, %v7850_v17 }
  0xcb   : > { %6530 = vmatprep.mubr.msk.bf16.mxu0 %vm328_vm0, %v7873_v34 }
  0xd2   : > { %6531 = vmatmul.mubr.msk.bf16.gmra.mrb[24].mxu0 %vm328_vm0, %v7880_v20 }
  0xd3   : > { %6534 = vmatprep.mubr.msk.bf16.mxu0 %vm328_vm0, %v7899_v22 }
  0xda   : > { %6535 = vmatmul.mubr.msk.bf16.gmra.mrb[28].mxu0 %vm328_vm0, %v7904_v55 }
  0xdb   : > { %6540 = vmatprep.mubr.msk.bf16.mxu0 %vm328_vm0, %v7532_v48  ;;  %v448_v48 = vld [vmem:[#allocation2 + $0x1a0] sm:$0x80] }
  0xe2   : > { %6541 = vmatmul.mubr.msk.bf16.vlgmr.msra.gmra.mrb[0].mxu0 %vm328_vm0, %v7541_v60  ;;  %v449_v60 = vsel %vm7626_vm8, 0, %v448_v48 }
  0xe3   : > { %6573 = vmatpush3.bf16.msra.mxu0 %v7205_v27  ;;  %6544 = vmatprep.mubr.msk.bf16.mxu0 %vm328_vm0, %v7558_v13  ;;  %450 = vst [vmem:[#allocation2 + $0x1a0] sm:$0x80] %v449_v60  ;;  %v681_v13 = vrot.slane %v580_v52, 1  ;;  %v3178_v27 = vsel %vm8221_vm12, 0, %v3177_v53  ;;  %v3186_v60 = vld [vmem:[#allocation3 + $0x20] sm:$0x1] }
  0xe4   : > { %6606 = vmatprep.subr.bf16.mxu0 %v7206_v26  ;;  %3179 = vst [vmem:[#allocation3 + $0x8] sm:$0x1] %v3178_v27  ;;  %v3230_v53 = vld [vmem:[#allocation3 + $0x120] sm:$0x80]  ;;  %v8316_v27 = vld [vmem:[%s9461_s2] ss:$0 sm:$0xff] }
  0xe5   : > { %v682_v15 = vor.u32 %v681_v13, %v577_v18  ;;  %v2558_v18 = vld [vmem:[#allocation2 + $0x118] sm:$0xff]  ;;  %v3242_v13 = vld [vmem:[#allocation3 + $0x140] sm:$0x80] }
  0xea   : > { %6545 = vmatmul.mubr.msk.bf16.gmra.mrb[4].mxu0 %vm328_vm0, %v7581_v62  ;;  %v747_v24 = vld [vmem:[#allocation2 + $0x1a0] sm:$0xff] }
  0xeb   : > { %6548 = vmatprep.mubr.msk.bf16.mxu0 %vm328_vm0, %v7585_v63  ;;  %v8025_v36 = vsel %vm7730_vm10, %v682_v15, %v747_v24  ;;  %v3187_v15 = vsel %vm8221_vm12, 0, %v3186_v60  ;;  %v3243_v24 = vsel %vm8240_vm14, 0, %v3242_v13 }
  0xec   : > { %749 = vst [vmem:[#allocation2 + $0x1a0] sm:$0xff] %v8025_v36  ;;  %3188 = vst [vmem:[#allocation3 + $0x20] sm:$0x1] %v3187_v15 }
  0xed   : > { %3244 = vst [vmem:[#allocation3 + $0x140] sm:$0x80] %v3243_v24 }
  0xf2   : > { %6549 = vmatmul.mubr.msk.bf16.gmra.mrb[8].mxu0 %vm328_vm0, %v7589_v2 }
  0xf3   : > { %6552 = vmatprep.mubr.msk.bf16.mxu0 %vm328_vm0, %v7598_v14 }
  0xfa   : > { %6553 = vmatmul.mubr.msk.bf16.gmra.mrb[12].mxu0 %vm328_vm0, %v7665_v50 }
  0xfb   : > { %6556 = vmatprep.mubr.msk.bf16.mxu0 %vm328_vm0, %v7684_v49 }
 0x102   : > { %6557 = vmatmul.mubr.msk.bf16.gmra.mrb[16].mxu0 %vm328_vm0, %v7688_v11 }
 0x103   : > { %6560 = vmatprep.mubr.msk.bf16.mxu0 %vm328_vm0, %v7703_v8 }
 0x10a   : > { %6561 = vmatmul.mubr.msk.bf16.gmra.mrb[20].mxu0 %vm328_vm0, %v7707_v0 }
 0x10b   : > { %6564 = vmatprep.mubr.msk.bf16.mxu0 %vm328_vm0, %v7715_v44 }
 0x112   : > { %6565 = vmatmul.mubr.msk.bf16.gmra.mrb[24].mxu0 %vm328_vm0, %v7726_v1 }
 0x113   : > { %6568 = vmatprep.mubr.msk.bf16.mxu0 %vm328_vm0, %v7743_v19 }
 0x11a   : > { %6569 = vmatmul.mubr.msk.bf16.gmra.mrb[28].mxu0 %vm328_vm0, %v7949_v57 }
 0x11b   : > { %6574 = vmatprep.mubr.msk.bf16.mxu0 %vm328_vm0, %v7283_v21  ;;  %v3239_v21 = vld [vmem:[#allocation3 + $0x138] sm:$0x80] }
 0x122   : > { %6575 = vmatmul.mubr.msk.bf16.vlgmr.msra.gmra.mrb[0].mxu0 %vm328_vm0, %v7284_v43  ;;  %v3240_v43 = vsel %vm8240_vm14, 0, %v3239_v21 }
 0x123   : > { %6607 = vmatpush3.bf16.msra.mxu0 %v7206_v26  ;;  %6578 = vmatprep.mubr.msk.bf16.mxu0 %vm328_vm0, %v7536_v59  ;;  %v394_v59 = vld [vmem:[#allocation2 + $0x88] sm:$0x1]  ;;  %3241 = vst [vmem:[#allocation3 + $0x138] sm:$0x80] %v3240_v43 }
 0x124   : > { %6640 = vmatprep.subr.bf16.mxu0 %v7207_v7 }
 0x12a   : > { %6579 = vmatmul.mubr.msk.bf16.gmra.mrb[4].mxu0 %vm328_vm0, %v7549_v5  ;;  %v395_v5 = vsel %vm7361_vm3, 0, %v394_v59  ;;  %v3192_v59 = vld [vmem:[#allocation3 + $0x30] sm:$0x1] }
 0x12b   : > { %6582 = vmatprep.mubr.msk.bf16.mxu0 %vm328_vm0, %v7606_v42  ;;  %396 = vst [vmem:[#allocation2 + $0x88] sm:$0x1] %v395_v5  ;;  %v8063_v42 = vld [vmem:[#allocation2 + $0x110] sm:$0xff]  ;;  %v3248_v5 = vld [vmem:[#allocation3 + $0x150] sm:$0x80] }
 0x132   : > { %6583 = vmatmul.mubr.msk.bf16.gmra.mrb[8].mxu0 %vm328_vm0, %v7630_v35  ;;  %v7285_v35 = vld [vmem:[#allocation2 + $0x10] sm:$0xff] }
 0x133   : > { %6586 = vmatprep.mubr.msk.bf16.mxu0 %vm328_vm0, %v7680_v47  ;;  %v7209_v47 = vld [vmem:[%s9460_s1 + $0x40] sm:$0xff]  }
 0x13a   : > { %6587 = vmatmul.mubr.msk.bf16.gmra.mrb[12].mxu0 %vm328_vm0, %v7697_v45  ;;  %v7286_v45 = vld [vmem:[#allocation2 + $0x18] sm:$0xff] }
 0x13b   : > { %6590 = vmatprep.mubr.msk.bf16.mxu0 %vm328_vm0, %v7773_v10  ;;  %v2547_v10 = vld [vmem:[#allocation2 + $0xc0] sm:$0xff] }
 0x142   : > { %6591 = vmatmul.mubr.msk.bf16.gmra.mrb[16].mxu0 %vm328_vm0, %v7788_v51  ;;  %v2548_v51 = vld [vmem:[#allocation2 + $0xc8] sm:$0xff] }
 0x143   : > { %6594 = vmatprep.mubr.msk.bf16.mxu0 %vm328_vm0, %v7833_v9  ;;  %v2549_v9 = vld [vmem:[#allocation2 + $0xd0] sm:$0xff] }
 0x14a   : > { %6595 = vmatmul.mubr.msk.bf16.gmra.mrb[20].mxu0 %vm328_vm0, %v7837_v54  ;;  %v2550_v54 = vld [vmem:[#allocation2 + $0xd8] sm:$0xff] }
 0x14b   : > { %6598 = vmatprep.mubr.msk.bf16.mxu0 %vm328_vm0, %v7863_v46  ;;  %v2551_v46 = vld [vmem:[#allocation2 + $0xe0] sm:$0xff] }
 0x152   : > { %6599 = vmatmul.mubr.msk.bf16.gmra.mrb[24].mxu0 %vm328_vm0, %v7867_v33  ;;  %v2552_v33 = vld [vmem:[#allocation2 + $0xe8] sm:$0xff] }
 0x153   : > { %6602 = vmatprep.mubr.msk.bf16.mxu0 %vm328_vm0, %v7893_v6  ;;  %v2553_v6 = vld [vmem:[#allocation2 + $0xf0] sm:$0xff] }
 0x15a   : > { %6603 = vmatmul.mubr.msk.bf16.gmra.mrb[28].mxu0 %vm328_vm0, %v8063_v42 }
 0x15b   : > { %6608 = vmatprep.mubr.msk.bf16.mxu0 %vm328_vm0, %v7760_v31  ;;  %v7217_v31 = vld [vmem:[%s9462_s3 + $0x18] sm:$0xff]  }
 0x162   : > { %6609 = vmatmul.mubr.msk.bf16.vlgmr.msra.gmra.mrb[0].mxu0 %vm328_vm0, %v7769_v16 }
 0x163   : > { %6641 = vmatpush3.bf16.msra.mxu0 %v7207_v7  ;;  %6612 = vmatprep.mubr.msk.bf16.mxu0 %vm328_vm0, %v7778_v37 }
 0x164   : > { %6674 = vmatprep.subr.bf16.mxu0 %v7208_v3 }
 0x16a   : > { %6613 = vmatmul.mubr.msk.bf16.gmra.mrb[4].mxu0 %vm328_vm0, %v7782_v32 }
 0x16b   : > { %6616 = vmatprep.mubr.msk.bf16.mxu0 %vm328_vm0, %v7796_v23 }
 0x172   : > { %6617 = vmatmul.mubr.msk.bf16.gmra.mrb[8].mxu0 %vm328_vm0, %v7803_v61 }
 0x173   : > { %6620 = vmatprep.mubr.msk.bf16.mxu0 %vm328_vm0, %v7810_v40 }
 0x17a   : > { %6621 = vmatmul.mubr.msk.bf16.gmra.mrb[12].mxu0 %vm328_vm0, %v7814_v12 }
 0x17b   : > { %6624 = vmatprep.mubr.msk.bf16.mxu0 %vm328_vm0, %v7822_v30 }
 0x182   : > { %6625 = vmatmul.mubr.msk.bf16.gmra.mrb[16].mxu0 %vm328_vm0, %v7843_v56 }
 0x183   : > { %6628 = vmatprep.mubr.msk.bf16.mxu0 %vm328_vm0, %v7850_v17 }
 0x18a   : > { %6629 = vmatmul.mubr.msk.bf16.gmra.mrb[20].mxu0 %vm328_vm0, %v7873_v34 }
 0x18b   : > { %6632 = vmatprep.mubr.msk.bf16.mxu0 %vm328_vm0, %v7880_v20 }
 0x192   : > { %6633 = vmatmul.mubr.msk.bf16.gmra.mrb[24].mxu0 %vm328_vm0, %v7899_v22 }
 0x193   : > { %6636 = vmatprep.mubr.msk.bf16.mxu0 %vm328_vm0, %v7904_v55 }
 0x19a   : > { %6637 = vmatmul.mubr.msk.bf16.gmra.mrb[28].mxu0 %vm328_vm0, %v8025_v36 }
 0x19b   : > { %6642 = vmatprep.mubr.msk.bf16.mxu0 %vm328_vm0, %v7285_v35  ;;  %v3189_v35 = vld [vmem:[#allocation3 + $0x28] sm:$0x1] }
 0x1a2   : > { %6643 = vmatmul.mubr.msk.bf16.vlgmr.msra.gmra.mrb[0].mxu0 %vm328_vm0, %v7286_v45  ;;  %v3245_v45 = vld [vmem:[#allocation3 + $0x148] sm:$0x80] }
 0x1a3   : > { %6675 = vmatpush3.bf16.msra.mxu0 %v7208_v3  ;;  %6646 = vmatprep.mubr.msk.bf16.mxu0 %vm328_vm0, %v7581_v62  ;;  %v3249_v3 = vsel %vm8240_vm14, 0, %v3248_v5 }
 0x1a4   : > { %6708 = vmatprep.subr.bf16.mxu0 %v7209_v47  ;;  %3250 = vst [vmem:[#allocation3 + $0x150] sm:$0x80] %v3249_v3 }
 0x1aa   : > { %6647 = vmatmul.mubr.msk.bf16.gmra.mrb[4].mxu0 %vm328_vm0, %v7585_v63  ;;  %v2292_v63 = vld [vmem:[#allocation2 + $0x88] sm:$0xff] }
 0x1ab   : > { %6650 = vmatprep.mubr.msk.bf16.mxu0 %vm328_vm0, %v7589_v2  ;;  %v451_v2 = vld [vmem:[#allocation2 + $0x1a8] sm:$0x80] }
 0x1ac   : > { %v452_v62 = vsel %vm7626_vm8, 0, %v451_v2  ;;  %v3246_v2 = vsel %vm8240_vm14, 0, %v3245_v45 }
 0x1ad   : > { %453 = vst [vmem:[#allocation2 + $0x1a8] sm:$0x80] %v452_v62  ;;  %3247 = vst [vmem:[#allocation3 + $0x148] sm:$0x80] %v3246_v2  ;;  %v3198_v62 = vld [vmem:[#allocation3 + $0x40] sm:$0x1] }
 0x1b2   : > { %6651 = vmatmul.mubr.msk.bf16.gmra.mrb[8].mxu0 %vm328_vm0, %v7598_v14  ;;  %v2543_v14 = vld [vmem:[#allocation2 + $0xa0] sm:$0xff] }
 0x1b3   : > { %6654 = vmatprep.mubr.msk.bf16.mxu0 %vm328_vm0, %v7665_v50  ;;  %v7210_v50 = vld [vmem:[%s9462_s3 + $0x40] sm:$0xff]  }
 0x1b4   : > { %6824 = vmatprep.subr.bf16.mxu1 %v7210_v50 }
 0x1b5   : > { %6832 = vmatpush3.bf16.msra.mxu1 %v7211_v38 }
 0x1ba   : > { %6655 = vmatmul.mubr.msk.bf16.gmra.mrb[12].mxu0 %vm328_vm0, %v7684_v49  ;;  %v7212_v49 = vld [vmem:[%s9462_s3 + $0x48] sm:$0xff]  }
 0x1bb   : > { %6658 = vmatprep.mubr.msk.bf16.mxu0 %vm328_vm0, %v7688_v11  ;;  %6825 = vmatprep.subr.bf16.mxu1 %v7212_v49  ;;  %v2544_v11 = vld [vmem:[#allocation2 + $0xa8] sm:$0xff] }
 0x1c2   : > { %6659 = vmatmul.mubr.msk.bf16.gmra.mrb[16].mxu0 %vm328_vm0, %v7703_v8  ;;  %v7213_v8 = vld [vmem:[%s9462_s3 + $0x8] sm:$0xff]  }
 0x1c3   : > { %6662 = vmatprep.mubr.msk.bf16.mxu0 %vm328_vm0, %v7707_v0  ;;  %v2545_v0 = vld [vmem:[#allocation2 + $0xb0] sm:$0xff]  ;;  %6833 = vmatpush3.bf16.msra.mxu1 %v7213_v8 }
 0x1ca   : > { %6663 = vmatmul.mubr.msk.bf16.gmra.mrb[20].mxu0 %vm328_vm0, %v7715_v44  ;;  %v7214_v44 = vld [vmem:[%s9462_s3 + $0x50] sm:$0xff]  }
 0x1cb   : > { %6666 = vmatprep.mubr.msk.bf16.mxu0 %vm328_vm0, %v7726_v1  ;;  %6826 = vmatprep.subr.bf16.mxu1 %v7214_v44  ;;  %v7215_v1 = vld [vmem:[%s9462_s3 + $0x10] sm:$0xff]  }
 0x1cc   : > { %6834 = vmatpush3.bf16.msra.mxu1 %v7215_v1 }
 0x1cd   : > { %6827 = vmatprep.subr.bf16.mxu1 %v7216_v25 }
 0x1d0   : > { %6835 = vmatpush3.bf16.msra.mxu1 %v7217_v31 }
 0x1d2   : > { %6667 = vmatmul.mubr.msk.bf16.gmra.mrb[24].mxu0 %vm328_vm0, %v7743_v19  ;;  %v2546_v19 = vld [vmem:[#allocation2 + $0xb8] sm:$0xff] }
 0x1d3   : > { %6670 = vmatprep.mubr.msk.bf16.mxu0 %vm328_vm0, %v7949_v57  ;;  %v3233_v57 = vld [vmem:[#allocation3 + $0x128] sm:$0x80] }
 0x1d4   : > { %v3234_v26 = vsel %vm8240_vm14, 0, %v3233_v57  ;;  %v3231_v57 = vsel %vm8240_vm14, 0, %v3230_v53 }
 0x1d5   : > { %3235 = vst [vmem:[#allocation3 + $0x128] sm:$0x80] %v3234_v26  ;;  %3232 = vst [vmem:[#allocation3 + $0x120] sm:$0x80] %v3231_v57 }
 0x1da   : > { %6671 = vmatmul.mubr.msk.bf16.gmra.mrb[28].mxu0 %vm328_vm0, %v2292_v63  ;;  %v3254_v63 = vld [vmem:[#allocation3 + $0x160] sm:$0x80] }
 0x1db   : > { %6676 = vmatprep.mubr.msk.bf16.mxu0 %vm328_vm0, %v2543_v14  ;;  %v3199_v14 = vsel %vm8221_vm12, 0, %v3198_v62 }
 0x1dc   : > { %3200 = vst [vmem:[#allocation3 + $0x40] sm:$0x1] %v3199_v14 }
 0x1e2   : > { %6677 = vmatmul.mubr.msk.bf16.vlgmr.msra.gmra.mrb[0].mxu0 %vm328_vm0, %v2544_v11  ;;  %v3251_v11 = vld [vmem:[#allocation3 + $0x158] sm:$0x80] }
 0x1e3   : > { %6709 = vmatpush3.bf16.msra.mxu0 %v7209_v47  ;;  %6680 = vmatprep.mubr.msk.bf16.mxu0 %vm328_vm0, %v2545_v0  ;;  %v3190_v47 = vsel %vm8221_vm12, 0, %v3189_v35  ;;  %v3204_v0 = vld [vmem:[#allocation3 + $0x50] sm:$0x1] }
 0x1e4   : > { %5947 = vmatprep.subr.bf16.mxu0 %v7210_v50  ;;  %3191 = vst [vmem:[#allocation3 + $0x28] sm:$0x1] %v3190_v47  ;;  %v3255_v50 = vsel %vm8240_vm14, 0, %v3254_v63 }
 0x1e5   : > { %3256 = vst [vmem:[#allocation3 + $0x160] sm:$0x80] %v3255_v50 }
 0x1ea   : > { %6681 = vmatmul.mubr.msk.bf16.gmra.mrb[4].mxu0 %vm328_vm0, %v2546_v19  ;;  %v3201_v19 = vld [vmem:[#allocation3 + $0x48] sm:$0x1] }
 0x1eb   : > { %6684 = vmatprep.mubr.msk.bf16.mxu0 %vm328_vm0, %v2547_v10  ;;  %v3257_v10 = vld [vmem:[#allocation3 + $0x168] sm:$0x80] }
 0x1f2   : > { %6685 = vmatmul.mubr.msk.bf16.gmra.mrb[8].mxu0 %vm328_vm0, %v2548_v51  ;;  %v3258_v51 = vsel %vm8240_vm14, 0, %v3257_v10 }
 0x1f3   : > { %6688 = vmatprep.mubr.msk.bf16.mxu0 %vm328_vm0, %v2549_v9  ;;  %3259 = vst [vmem:[#allocation3 + $0x168] sm:$0x80] %v3258_v51  ;;  %v3210_v9 = vld [vmem:[#allocation3 + $0x60] sm:$0x1] }
 0x1fa   : > { %6689 = vmatmul.mubr.msk.bf16.gmra.mrb[12].mxu0 %vm328_vm0, %v2550_v54  ;;  %v3266_v54 = vld [vmem:[#allocation3 + $0x180] sm:$0x80] }
 0x1fb   : > { %6692 = vmatprep.mubr.msk.bf16.mxu0 %vm328_vm0, %v2551_v46  ;;  %v3211_v46 = vsel %vm8221_vm12, 0, %v3210_v9 }
 0x1fc   : > { %3212 = vst [vmem:[#allocation3 + $0x60] sm:$0x1] %v3211_v46  ;;  %v3432_v46 = vld [vmem:[#allocation3 + $0x8] sm:$0xff] }
 0x202   : > { %6693 = vmatmul.mubr.msk.bf16.gmra.mrb[16].mxu0 %vm328_vm0, %v2552_v33  ;;  %v3267_v33 = vsel %vm8240_vm14, 0, %v3266_v54 }
 0x203   : > { %6696 = vmatprep.mubr.msk.bf16.mxu0 %vm328_vm0, %v2553_v6  ;;  %3268 = vst [vmem:[#allocation3 + $0x180] sm:$0x80] %v3267_v33  ;;  %v3207_v6 = vld [vmem:[#allocation3 + $0x58] sm:$0x1]  ;;  %v3530_v33 = vld [vmem:[#allocation3 + $0x128] sm:$0xff] }
 0x20a   : > { %6697 = vmatmul.mubr.msk.bf16.gmra.mrb[20].mxu0 %vm328_vm0, %v2554_v41  ;;  %v3263_v41 = vld [vmem:[#allocation3 + $0x178] sm:$0x80] }
 0x20b   : > { %6700 = vmatprep.mubr.msk.bf16.mxu0 %vm328_vm0, %v2555_v29  ;;  %v3208_v29 = vsel %vm8221_vm12, 0, %v3207_v6 }
 0x20c   : > { %3209 = vst [vmem:[#allocation3 + $0x58] sm:$0x1] %v3208_v29 }
 0x212   : > { %6701 = vmatmul.mubr.msk.bf16.gmra.mrb[24].mxu0 %vm328_vm0, %v2556_v28  ;;  %v3264_v28 = vsel %vm8240_vm14, 0, %v3263_v41 }
 0x213   : > { %6704 = vmatprep.mubr.msk.bf16.mxu0 %vm328_vm0, %v8063_v42  ;;  %v3193_v42 = vsel %vm8221_vm12, 0, %v3192_v59  ;;  %3265 = vst [vmem:[#allocation3 + $0x178] sm:$0x80] %v3264_v28 }
 0x214   : > { %3194 = vst [vmem:[#allocation3 + $0x30] sm:$0x1] %v3193_v42 }
 0x21a   : > { %6705 = vmatmul.mubr.msk.bf16.gmra.mrb[28].mxu0 %vm328_vm0, %v2558_v18  ;;  %v7226_v18 = vld [vmem:[%s9462_s3 + $0xc0] sm:$0xff]  }
 0x21b   : > { %6710 = vmatprep.mubr.msk.bf16.mxu0 %vm328_vm0, %v7769_v16  ;;  %v2824_v16 = vld [vmem:[#allocation2 + $0x1a8] sm:$0xff] }
 0x222   : > { %6711 = vmatmul.mubr.msk.bf16.vlgmr.msra.gmra.mrb[0].mxu0 %vm328_vm0, %v7778_v37  ;;  %v7287_v37 = vld [vmem:[#allocation3] sm:$0xff] }
 0x223   : > { %6714 = vmatprep.mubr.msk.bf16.mxu0 %vm328_vm0, %v7782_v32  ;;  %5948 = vmatpush3.bf16.msra.mxu0 %v7211_v38  ;;  %v7218_v32 = vld [vmem:[%s9462_s3 + $0x60] sm:$0xff]   ;;  %v3195_v38 = vld [vmem:[#allocation3 + $0x38] sm:$0x1] }
 0x224   : > { %5949 = vmatprep.subr.bf16.mxu0 %v7212_v49  ;;  %6828 = vmatprep.subr.bf16.mxu1 %v7218_v32  ;;  %v3196_v49 = vsel %vm8221_vm12, 0, %v3195_v38 }
 0x225   : > { %3197 = vst [vmem:[#allocation3 + $0x38] sm:$0x1] %v3196_v49 }
 0x227   : > { %5950 = vmatpush3.bf16.msra.mxu0 %v7213_v8  ;;  %v3252_v8 = vsel %vm8240_vm14, 0, %v3251_v11 }
 0x228   : > { %5951 = vmatprep.subr.bf16.mxu0 %v7214_v44  ;;  %3253 = vst [vmem:[#allocation3 + $0x158] sm:$0x80] %v3252_v8  ;;  %v3260_v44 = vld [vmem:[#allocation3 + $0x170] sm:$0x80] }
 0x22a   : > { %6715 = vmatmul.mubr.msk.bf16.gmra.mrb[4].mxu0 %vm328_vm0, %v7796_v23  ;;  %v7219_v23 = vld [vmem:[%s9462_s3 + $0x20] sm:$0xff]  }
 0x22b   : > { %6718 = vmatprep.mubr.msk.bf16.mxu0 %vm328_vm0, %v7803_v61  ;;  %5952 = vmatpush3.bf16.msra.mxu0 %v7215_v1  ;;  %v7220_v61 = vld [vmem:[%s9462_s3 + $0x68] sm:$0xff]   ;;  %v3205_v1 = vsel %vm8221_vm12, 0, %v3204_v0 }
 0x22c   : > { %5953 = vmatprep.subr.bf16.mxu0 %v7216_v25  ;;  %6836 = vmatpush3.bf16.msra.mxu1 %v7219_v23  ;;  %v3261_v25 = vsel %vm8240_vm14, 0, %v3260_v44  ;;  %3206 = vst [vmem:[#allocation3 + $0x50] sm:$0x1] %v3205_v1 }
 0x22d   : > { %6829 = vmatprep.subr.bf16.mxu1 %v7220_v61  ;;  %3262 = vst [vmem:[#allocation3 + $0x170] sm:$0x80] %v3261_v25 }
 0x22f   : > { %5954 = vmatpush3.bf16.msra.mxu0 %v7217_v31  ;;  %v3202_v31 = vsel %vm8221_vm12, 0, %v3201_v19  ;;  %v3533_v19 = vld [vmem:[#allocation3 + $0x130] sm:$0xff] }
 0x230   : > { %5955 = vmatprep.subr.bf16.mxu0 %v7218_v32  ;;  %3203 = vst [vmem:[#allocation3 + $0x48] sm:$0x1] %v3202_v31  ;;  %v3272_v32 = vld [vmem:[#allocation3 + $0x190] sm:$0x80] }
 0x232   : > { %6719 = vmatmul.mubr.msk.bf16.gmra.mrb[8].mxu0 %vm328_vm0, %v7810_v40  ;;  %v7221_v40 = vld [vmem:[%s9462_s3 + $0x28] sm:$0xff]  }
 0x233   : > { %6722 = vmatprep.mubr.msk.bf16.mxu0 %vm328_vm0, %v7814_v12  ;;  %5956 = vmatpush3.bf16.msra.mxu0 %v7219_v23  ;;  %v3213_v23 = vld [vmem:[#allocation3 + $0x68] sm:$0x1] }
 0x234   : > { %5957 = vmatprep.subr.bf16.mxu0 %v7220_v61  ;;  %6837 = vmatpush3.bf16.msra.mxu1 %v7221_v40  ;;  %v3273_v61 = vsel %vm8240_vm14, 0, %v3272_v32 }
 0x235   : > { %3274 = vst [vmem:[#allocation3 + $0x190] sm:$0x80] %v3273_v61 }
 0x237   : > { %5958 = vmatpush3.bf16.msra.mxu0 %v7221_v40  ;;  %v3214_v40 = vsel %vm8221_vm12, 0, %v3213_v23 }
 0x238   : > { %3215 = vst [vmem:[#allocation3 + $0x68] sm:$0x1] %v3214_v40 }
 0x23a   : > { %6723 = vmatmul.mubr.msk.bf16.gmra.mrb[12].mxu0 %vm328_vm0, %v7822_v30  ;;  %v7222_v30 = vld [vmem:[%s9462_s3 + $0x70] sm:$0xff]  }
 0x23b   : > { %6726 = vmatprep.mubr.msk.bf16.mxu0 %vm328_vm0, %v7843_v56  ;;  %v3174_v56 = vld [vmem:[#allocation3] sm:$0x1]  ;;  %5959 = vmatprep.subr.bf16.mxu0 %v7222_v30 }
 0x23c   : > { %6830 = vmatprep.subr.bf16.mxu1 %v7222_v30  ;;  %v3269_v30 = vld [vmem:[#allocation3 + $0x188] sm:$0x80] }
 0x242   : > { %6727 = vmatmul.mubr.msk.bf16.gmra.mrb[16].mxu0 %vm328_vm0, %v7850_v17  ;;  %v7223_v17 = vld [vmem:[%s9462_s3 + $0x30] sm:$0xff]  }
 0x243   : > { %6730 = vmatprep.mubr.msk.bf16.mxu0 %vm328_vm0, %v7873_v34  ;;  %v3175_v34 = vsel %vm8221_vm12, 0, %v3174_v56  ;;  %5960 = vmatpush3.bf16.msra.mxu0 %v7223_v17  ;;  %v3270_v56 = vsel %vm8240_vm14, 0, %v3269_v30 }
 0x244   : > { %3176 = vst [vmem:[#allocation3] sm:$0x1] %v3175_v34  ;;  %6838 = vmatpush3.bf16.msra.mxu1 %v7223_v17  ;;  %3271 = vst [vmem:[#allocation3 + $0x188] sm:$0x80] %v3270_v56  ;;  %v3222_v17 = vld [vmem:[#allocation3 + $0x80] sm:$0x1] }
 0x245   : > { %v3278_v34 = vld [vmem:[#allocation3 + $0x1a0] sm:$0x80] }
 0x24a   : > { %6731 = vmatmul.mubr.msk.bf16.gmra.mrb[20].mxu0 %vm328_vm0, %v7880_v20  ;;  %v7224_v20 = vld [vmem:[%s9462_s3 + $0x78] sm:$0xff]  }
 0x24b   : > { %6734 = vmatprep.mubr.msk.bf16.mxu0 %vm328_vm0, %v7899_v22  ;;  %v7225_v22 = vld [vmem:[%s9462_s3 + $0x38] sm:$0xff]   ;;  %5961 = vmatprep.subr.bf16.mxu0 %v7224_v20  ;;  %v3578_v48 = vld [vmem:[#allocation3] sm:$0xff] }
 0x24c   : > { %6831 = vmatprep.subr.bf16.mxu1 %v7224_v20  ;;  %5962 = vmatpush3.bf16.msra.mxu0 %v7225_v22  ;;  %v3223_v20 = vsel %vm8221_vm12, 0, %v3222_v17 }
 0x24d   : > { %6839 = vmatpush3.bf16.msra.mxu1 %v7225_v22  ;;  %v3279_v22 = vsel %vm8240_vm14, 0, %v3278_v34  ;;  %3224 = vst [vmem:[#allocation3 + $0x80] sm:$0x1] %v3223_v20 }
 0x24e   : > { %6059 = vmatprep.subr.bf16.mxu1 %v7226_v18  ;;  %3280 = vst [vmem:[#allocation3 + $0x1a0] sm:$0x80] %v3279_v22 }
 0x252   : > { %6735 = vmatmul.mubr.msk.bf16.gmra.mrb[24].mxu0 %vm328_vm0, %v7904_v55  ;;  %v3180_v55 = vld [vmem:[#allocation3 + $0x10] sm:$0x1] }
 0x253   : > { %6738 = vmatprep.mubr.msk.bf16.mxu0 %vm328_vm0, %v8025_v36  ;;  %v3181_v58 = vsel %vm8221_vm12, 0, %v3180_v55  ;;  %v3183_v36 = vld [vmem:[#allocation3 + $0x18] sm:$0x1] }
 0x254   : > { %3182 = vst [vmem:[#allocation3 + $0x10] sm:$0x1] %v3181_v58  ;;  %v3184_v7 = vsel %vm8221_vm12, 0, %v3183_v36  ;;  %v3219_v55 = vld [vmem:[#allocation3 + $0x78] sm:$0x1] }
 0x255   : > { %3185 = vst [vmem:[#allocation3 + $0x18] sm:$0x1] %v3184_v7  ;;  %v3220_v39 = vsel %vm8221_vm12, 0, %v3219_v55  ;;  %v3275_v58 = vld [vmem:[#allocation3 + $0x198] sm:$0x80] }
 0x256   : > { %3221 = vst [vmem:[#allocation3 + $0x78] sm:$0x1] %v3220_v39  ;;  %v3276_v4 = vsel %vm8240_vm14, 0, %v3275_v58 }
 0x257   : > { %3277 = vst [vmem:[#allocation3 + $0x198] sm:$0x80] %v3276_v4 }
 0x25a   : > { %6739 = vmatmul.mubr.msk.bf16.gmra.mrb[28].mxu0 %vm328_vm0, %v2824_v16  ;;  %v3216_v16 = vld [vmem:[#allocation3 + $0x70] sm:$0x1] }
 0x25b   : > { %4340 = vmatprep.mubr.bf16.mxu0 %v7287_v37  ;;  %v3217_v37 = vsel %vm8221_vm12, 0, %v3216_v16  ;;  %v3435_v1 = vld [vmem:[#allocation3 + $0x10] sm:$0xff] }
 0x25c   : > { %3218 = vst [vmem:[#allocation3 + $0x70] sm:$0x1] %v3217_v37 }
 0x262   : > { %4341 = vmatmul.mubr.bf16.vlgmr.msra.gmra.mrb[32].mxu0 %v3578_v48 }
 0x2f5   : > { %v6712_v26 = vpop.f32.mrb[0].mxu0 }
 0x2f6   : > { %v3083_v48 = vadd.f32 %v6712_v26, %v8316_v27  ;;  %v2915_v60 = vpop.f32.mrb[1].mxu0 }
 0x2f7   : > { %v3081_v13 = vadd.f32 %v8316_v27, %v2915_v60  ;;  %v6713_v15 = vpop.f32.mrb[2].mxu0  ;;  %v3441_v60 = vld [vmem:[#allocation3 + $0x20] sm:$0xff] }
 0x2f8   : > { %v3084_v24 = vadd.f32 %v6713_v15, %v8316_v27  ;;  %v2918_v36 = vpop.f32.mrb[3].mxu0  ;;  %v3115_v7 = vmax.f32 %v3083_v48, 0.0 }
 0x2f9   : > { %v3082_v21 = vadd.f32 %v8316_v27, %v2918_v36  ;;  %v3113_v59 = vmax.f32 %v3081_v13, 0.0  ;;  %v3539_v13 = vld [vmem:[#allocation3 + $0x140] sm:$0xff] }
 0x2fa   : > { %v3116_v43 = vmax.f32 %v3084_v24, 0.0 }
 0x2fb   : > { %v3114_v5 = vmax.f32 %v3082_v21, 0.0 }
 0x2fc   : > { %v3146_v42 = vpack.c.bf16 %v3116_v43, %v3115_v7  ;;  %v3438_v43 = vld [vmem:[#allocation3 + $0x18] sm:$0xff] }
 0x2fd   : > { %v3145_v3 = vpack.c.bf16 %v3114_v5, %v3113_v59  ;;  %v6716_v35 = vpop.f32.mrb[4].mxu0  ;;  %v3536_v59 = vld [vmem:[#allocation3 + $0x138] sm:$0xff] }
 0x2fe   : > { %3286 = vst [vmem:[#allocation3 + $0xa0] sm:$0xff] %v3146_v42  ;;  %v3309_v47 = vshrl.u32 %v3146_v42, 16  ;;  %v3312_v45 = vshll.u32 %v3146_v42, 16  ;;  %v3087_v2 = vadd.f32 %v6716_v35, %v8316_v27  ;;  %v2931_v62 = vpop.f32.mrb[5].mxu0 }
 0x2ff   : > { %3285 = vst [vmem:[#allocation3 + $0x98] sm:$0xff] %v3145_v3  ;;  %v3302_v63 = vshrl.u32 %v3145_v3, 16  ;;  %v3305_v14 = vshll.u32 %v3145_v3, 16  ;;  %v3085_v50 = vadd.f32 %v8316_v27, %v2931_v62  ;;  %v6717_v38 = vpop.f32.mrb[6].mxu0  ;;  %4348 = vmatprep.mubr.bf16.mxu0 %v3145_v3 }
 0x300   : > { %v3311_v49 = vrot.slane %v3309_v47, 7  ;;  %v3482_v8 = vrot.slane %v3312_v45, 1  ;;  %v3088_v0 = vadd.f32 %v6717_v38, %v8316_v27  ;;  %v2934_v44 = vpop.f32.mrb[7].mxu0  ;;  %v3119_v6 = vmax.f32 %v3087_v2, 0.0 }
 0x301   : > { %v3304_v31 = vrot.slane %v3302_v63, 7  ;;  %v3480_v10 = vrot.slane %v3305_v14, 1  ;;  %v3086_v51 = vadd.f32 %v8316_v27, %v2934_v44  ;;  %v3117_v18 = vmax.f32 %v3085_v50, 0.0 }
 0x302   : > { %v3314_v9 = vor.u32 %v3312_v45, %v3311_v49  ;;  %v3483_v54 = vor.u32 %v3482_v8, %v3309_v47  ;;  %v3120_v41 = vmax.f32 %v3088_v0, 0.0 }
 0x303   : > { %v3307_v29 = vor.u32 %v3305_v14, %v3304_v31  ;;  %v3481_v28 = vor.u32 %v3480_v10, %v3302_v63  ;;  %v3118_v16 = vmax.f32 %v3086_v51, 0.0 }
 0x304   : > { %v3436_v37 = vsel %vm8326_vm1, %v3314_v9, %v3435_v1  ;;  %v3534_v32 = vsel %vm8333_vm2, %v3483_v54, %v3533_v19  ;;  %v8342_v23 = vpack.c.bf16 %v3120_v41, %v3119_v6  ;;  %v3447_v6 = vld [vmem:[#allocation3 + $0x30] sm:$0xff] }
 0x305   : > { %3437 = vst [vmem:[#allocation3 + $0x10] sm:$0xff] %v3436_v37  ;;  %3535 = vst [vmem:[#allocation3 + $0x130] sm:$0xff] %v3534_v32  ;;  %v3433_v61 = vsel %vm8326_vm1, %v3307_v29, %v3432_v46  ;;  %v3531_v40 = vsel %vm8333_vm2, %v3481_v28, %v3530_v33  ;;  %v3147_v30 = vpack.c.bf16 %v3118_v16, %v3117_v18  ;;  %v6720_v56 = vpop.f32.mrb[8].mxu0  ;;  %v3545_v41 = vld [vmem:[#allocation3 + $0x150] sm:$0xff]  ;;  %v3444_v32 = vld [vmem:[#allocation3 + $0x28] sm:$0xff] }
 0x306   : > { %3434 = vst [vmem:[#allocation3 + $0x8] sm:$0xff] %v3433_v61  ;;  %3532 = vst [vmem:[#allocation3 + $0x128] sm:$0xff] %v3531_v40  ;;  %v3323_v17 = vshrl.u32 %v8342_v23, 16  ;;  %v3326_v34 = vshll.u32 %v8342_v23, 16  ;;  %v3091_v20 = vadd.f32 %v6720_v56, %v8316_v27  ;;  %v2947_v22 = vpop.f32.mrb[9].mxu0  ;;  %4349 = vmatmul.mubr.bf16.gmra.mrb[36].mxu0 %v3433_v61  ;;  %v3542_v61 = vld [vmem:[#allocation3 + $0x148] sm:$0xff] }
 0x307   : > { %3288 = vst [vmem:[#allocation3 + $0xb0] sm:$0xff] %v8342_v23  ;;  %3287 = vst [vmem:[#allocation3 + $0xa8] sm:$0xff] %v3147_v30  ;;  %v3316_v55 = vshrl.u32 %v3147_v30, 16  ;;  %v3319_v39 = vshll.u32 %v3147_v30, 16  ;;  %v3089_v58 = vadd.f32 %v8316_v27, %v2947_v22  ;;  %v6721_v4 = vpop.f32.mrb[10].mxu0  ;;  %4356 = vmatprep.mubr.bf16.mxu0 %v3146_v42  ;;  %v7227_v22 = vld [vmem:[%s9462_s3 + $0x80] sm:$0xff]  }
 0x308   : > { %v3325_v53 = vrot.slane %v3323_v17, 7  ;;  %v3486_v57 = vrot.slane %v3326_v34, 1  ;;  %v3092_v26 = vadd.f32 %v6721_v4, %v8316_v27  ;;  %v2950_v48 = vpop.f32.mrb[11].mxu0  ;;  %v3123_v5 = vmax.f32 %v3091_v20, 0.0  ;;  %v7228_v4 = vld [vmem:[%s9462_s3 + $0xc8] sm:$0xff]  }
 0x309   : > { %v3318_v15 = vrot.slane %v3316_v55, 7  ;;  %v3484_v24 = vrot.slane %v3319_v39, 1  ;;  %v3090_v36 = vadd.f32 %v8316_v27, %v2950_v48  ;;  %v3121_v42 = vmax.f32 %v3089_v58, 0.0 }
 0x30a   : > { %v3328_v21 = vor.u32 %v3326_v34, %v3325_v53  ;;  %v3487_v7 = vor.u32 %v3486_v57, %v3323_v17  ;;  %v3124_v3 = vmax.f32 %v3092_v26, 0.0 }
 0x30b   : > { %v3321_v35 = vor.u32 %v3319_v39, %v3318_v15  ;;  %v3485_v47 = vor.u32 %v3484_v24, %v3316_v55  ;;  %v3122_v45 = vmax.f32 %v3090_v36, 0.0 }
 0x30c   : > { %v8357_v2 = vsel %vm8326_vm1, %v3328_v21, %v3441_v60  ;;  %v3540_v62 = vsel %vm8333_vm2, %v3487_v7, %v3539_v13  ;;  %v8361_v63 = vpack.c.bf16 %v3124_v3, %v3123_v5 }
 0x30d   : > { %3443 = vst [vmem:[#allocation3 + $0x20] sm:$0xff] %v8357_v2  ;;  %3541 = vst [vmem:[#allocation3 + $0x140] sm:$0xff] %v3540_v62  ;;  %v8366_v14 = vsel %vm8326_vm1, %v3321_v35, %v3438_v43  ;;  %v8370_v50 = vsel %vm8333_vm2, %v3485_v47, %v3536_v59  ;;  %v3149_v38 = vpack.c.bf16 %v3122_v45, %v3121_v42  ;;  %v6724_v49 = vpop.f32.mrb[12].mxu0  ;;  %v7229_v59 = vld [vmem:[%s9462_s3 + $0x88] sm:$0xff]   ;;  %v7230_v42 = vld [vmem:[%s9462_s3 + $0xd0] sm:$0xff]  }
 0x30e   : > { %3440 = vst [vmem:[#allocation3 + $0x18] sm:$0xff] %v8366_v14  ;;  %3538 = vst [vmem:[#allocation3 + $0x138] sm:$0xff] %v8370_v50  ;;  %v3337_v8 = vshrl.u32 %v8361_v63, 16  ;;  %v3340_v0 = vshll.u32 %v8361_v63, 16  ;;  %v3095_v44 = vadd.f32 %v6724_v49, %v8316_v27  ;;  %v2963_v1 = vpop.f32.mrb[13].mxu0  ;;  %4357 = vmatmul.mubr.bf16.gmra.mrb[40].mxu0 %v3436_v37  ;;  %v3453_v45 = vld [vmem:[#allocation3 + $0x40] sm:$0xff] }
 0x30f   : > { %3290 = vst [vmem:[#allocation3 + $0xc0] sm:$0xff] %v8361_v63  ;;  %3289 = vst [vmem:[#allocation3 + $0xb8] sm:$0xff] %v3149_v38  ;;  %v3330_v19 = vshrl.u32 %v3149_v38, 16  ;;  %v3333_v31 = vshll.u32 %v3149_v38, 16  ;;  %v3093_v10 = vadd.f32 %v8316_v27, %v2963_v1  ;;  %v6725_v51 = vpop.f32.mrb[14].mxu0  ;;  %4364 = vmatprep.mubr.bf16.mxu0 %v3147_v30  ;;  %4380 = vmatprep.mubr.bf16.mxu1 %v3149_v38  ;;  %v3551_v62 = vld [vmem:[#allocation3 + $0x160] sm:$0xff] }
 0x310   : > { %v3339_v9 = vrot.slane %v3337_v8, 7  ;;  %v3490_v54 = vrot.slane %v3340_v0, 1  ;;  %v3096_v46 = vadd.f32 %v6725_v51, %v8316_v27  ;;  %v2966_v33 = vpop.f32.mrb[15].mxu0  ;;  %v3127_v40 = vmax.f32 %v3095_v44, 0.0  ;;  %v3450_v44 = vld [vmem:[#allocation3 + $0x38] sm:$0xff] }
 0x311   : > { %v3332_v29 = vrot.slane %v3330_v19, 7  ;;  %v3488_v28 = vrot.slane %v3333_v31, 1  ;;  %v3094_v18 = vadd.f32 %v8316_v27, %v2966_v33  ;;  %v3125_v34 = vmax.f32 %v3093_v10, 0.0  ;;  %v3548_v1 = vld [vmem:[#allocation3 + $0x158] sm:$0xff] }
 0x312   : > { %v3342_v16 = vor.u32 %v3340_v0, %v3339_v9  ;;  %v3491_v37 = vor.u32 %v3490_v54, %v3337_v8  ;;  %v3128_v56 = vmax.f32 %v3096_v46, 0.0  ;;  %v7231_v54 = vld [vmem:[%s9462_s3 + $0x90] sm:$0xff]  }
 0x313   : > { %v3335_v17 = vor.u32 %v3333_v31, %v3332_v29  ;;  %v3489_v30 = vor.u32 %v3488_v28, %v3330_v19  ;;  %v3126_v20 = vmax.f32 %v3094_v18, 0.0 }
 0x314   : > { %v8386_v55 = vsel %vm8326_vm1, %v3342_v16, %v3447_v6  ;;  %v8390_v39 = vsel %vm8333_vm2, %v3491_v37, %v3545_v41  ;;  %v8392_v58 = vpack.c.bf16 %v3128_v56, %v3127_v40  ;;  %v7232_v41 = vld [vmem:[%s9462_s3 + $0xd8] sm:$0xff]  }
 0x315   : > { %3449 = vst [vmem:[#allocation3 + $0x30] sm:$0xff] %v8386_v55  ;;  %3547 = vst [vmem:[#allocation3 + $0x150] sm:$0xff] %v8390_v39  ;;  %v8401_v53 = vsel %vm8326_vm1, %v3335_v17, %v3444_v32  ;;  %v8405_v57 = vsel %vm8333_vm2, %v3489_v30, %v3542_v61  ;;  %v8407_v26 = vpack.c.bf16 %v3126_v20, %v3125_v34  ;;  %v6728_v48 = vpop.f32.mrb[16].mxu0  ;;  %v7233_v20 = vld [vmem:[%s9462_s3 + $0x98] sm:$0xff]  }
 0x316   : > { %3446 = vst [vmem:[#allocation3 + $0x28] sm:$0xff] %v8401_v53  ;;  %3544 = vst [vmem:[#allocation3 + $0x148] sm:$0xff] %v8405_v57  ;;  %v3351_v60 = vshrl.u32 %v8392_v58, 16  ;;  %v3354_v13 = vshll.u32 %v8392_v58, 16  ;;  %v3099_v15 = vadd.f32 %v6728_v48, %v8316_v27  ;;  %v2979_v24 = vpop.f32.mrb[17].mxu0  ;;  %4365 = vmatmul.mubr.bf16.gmra.mrb[44].mxu0 %v8366_v14  ;;  %4381 = vmatmul.mubr.bf16.vlgmr.msra.gmra.mrb[0].mxu1 %v8401_v53 }
 0x317   : > { %3292 = vst [vmem:[#allocation3 + $0xd0] sm:$0xff] %v8392_v58  ;;  %3291 = vst [vmem:[#allocation3 + $0xc8] sm:$0xff] %v8407_v26  ;;  %v3344_v36 = vshrl.u32 %v8407_v26, 16  ;;  %v3347_v21 = vshll.u32 %v8407_v26, 16  ;;  %v3097_v7 = vadd.f32 %v8316_v27, %v2979_v24  ;;  %v6729_v43 = vpop.f32.mrb[18].mxu0  ;;  %6060 = vmatpush3.bf16.msra.mxu1 %v7227_v22  ;;  %4372 = vmatprep.mubr.bf16.mxu0 %v8342_v23 }
 0x318   : > { %v3353_v5 = vrot.slane %v3351_v60, 7  ;;  %v3494_v3 = vrot.slane %v3354_v13, 1  ;;  %v3100_v35 = vadd.f32 %v6729_v43, %v8316_v27  ;;  %v2982_v47 = vpop.f32.mrb[19].mxu0  ;;  %4388 = vmatprep.mubr.bf16.mxu1 %v8361_v63  ;;  %6061 = vmatprep.subr.bf16.mxu1 %v7228_v4  ;;  %v3131_v19 = vmax.f32 %v3099_v15, 0.0  ;;  %v3557_v15 = vld [vmem:[#allocation3 + $0x170] sm:$0xff]  ;;  %v3456_v43 = vld [vmem:[#allocation3 + $0x48] sm:$0xff] }
 0x319   : > { %v3346_v38 = vrot.slane %v3344_v36, 7  ;;  %v3492_v23 = vrot.slane %v3347_v21, 1  ;;  %v3098_v49 = vadd.f32 %v8316_v27, %v2982_v47  ;;  %v3129_v63 = vmax.f32 %v3097_v7, 0.0 }
 0x31a   : > { %v3356_v8 = vor.u32 %v3354_v13, %v3353_v5  ;;  %v3495_v0 = vor.u32 %v3494_v3, %v3351_v60  ;;  %v3132_v31 = vmax.f32 %v3100_v35, 0.0  ;;  %v7234_v60 = vld [vmem:[%s9462_s3 + $0xe0] sm:$0xff]  }
 0x31b   : > { %v3349_v10 = vor.u32 %v3347_v21, %v3346_v38  ;;  %v3493_v51 = vor.u32 %v3492_v23, %v3344_v36  ;;  %v3130_v9 = vmax.f32 %v3098_v49, 0.0  ;;  %6062 = vmatpush3.bf16.msra.mxu1 %v7229_v59  ;;  %v3459_v13 = vld [vmem:[#allocation3 + $0x50] sm:$0xff]  ;;  %v3554_v59 = vld [vmem:[#allocation3 + $0x168] sm:$0xff] }
 0x31c   : > { %v8436_v46 = vsel %vm8326_vm1, %v3356_v8, %v3453_v45  ;;  %v8440_v33 = vsel %vm8333_vm2, %v3495_v0, %v3551_v62  ;;  %v8442_v6 = vpack.c.bf16 %v3132_v31, %v3131_v19  ;;  %6063 = vmatprep.subr.bf16.mxu1 %v7230_v42  ;;  %v7235_v62 = vld [vmem:[%s9462_s3 + $0xa0] sm:$0xff]   ;;  %v7236_v8 = vld [vmem:[%s9462_s3 + $0xe8] sm:$0xff]  }
 0x31d   : > { %3455 = vst [vmem:[#allocation3 + $0x40] sm:$0xff] %v8436_v46  ;;  %3553 = vst [vmem:[#allocation3 + $0x160] sm:$0xff] %v8440_v33  ;;  %v8451_v29 = vsel %vm8326_vm1, %v3349_v10, %v3450_v44  ;;  %v8455_v28 = vsel %vm8333_vm2, %v3493_v51, %v3548_v1  ;;  %v8457_v18 = vpack.c.bf16 %v3130_v9, %v3129_v63  ;;  %v6732_v16 = vpop.f32.mrb[20].mxu0 }
 0x31e   : > { %3452 = vst [vmem:[#allocation3 + $0x38] sm:$0xff] %v8451_v29  ;;  %3550 = vst [vmem:[#allocation3 + $0x158] sm:$0xff] %v8455_v28  ;;  %v3365_v37 = vshrl.u32 %v8442_v6, 16  ;;  %v3368_v32 = vshll.u32 %v8442_v6, 16  ;;  %v3103_v61 = vadd.f32 %v6732_v16, %v8316_v27  ;;  %v2995_v40 = vpop.f32.mrb[21].mxu0  ;;  %4373 = vmatmul.mubr.bf16.gmra.mrb[48].mxu0 %v8357_v2  ;;  %4389 = vmatmul.mubr.bf16.gmra.mrb[4].mxu1 %v8386_v55 }
 0x31f   : > { %3294 = vst [vmem:[#allocation3 + $0xe0] sm:$0xff] %v8442_v6  ;;  %3293 = vst [vmem:[#allocation3 + $0xd8] sm:$0xff] %v8457_v18  ;;  %v3358_v56 = vshrl.u32 %v8457_v18, 16  ;;  %v3361_v17 = vshll.u32 %v8457_v18, 16  ;;  %v3101_v30 = vadd.f32 %v8316_v27, %v2995_v40  ;;  %v6733_v34 = vpop.f32.mrb[22].mxu0  ;;  %4396 = vmatprep.mubr.bf16.mxu1 %v8407_v26  ;;  %6064 = vmatpush3.bf16.msra.mxu1 %v7231_v54 }
 0x320   : > { %v3367_v22 = vrot.slane %v3365_v37, 7  ;;  %v3498_v2 = vrot.slane %v3368_v32, 1  ;;  %v3104_v4 = vadd.f32 %v6733_v34, %v8316_v27  ;;  %v2998_v48 = vpop.f32.mrb[23].mxu0  ;;  %6065 = vmatprep.subr.bf16.mxu1 %v7232_v41  ;;  %v3135_v5 = vmax.f32 %v3103_v61, 0.0  ;;  %v3563_v34 = vld [vmem:[#allocation3 + $0x180] sm:$0xff] }
 0x321   : > { %v3360_v24 = vrot.slane %v3358_v56, 7  ;;  %v3496_v36 = vrot.slane %v3361_v17, 1  ;;  %v3102_v26 = vadd.f32 %v8316_v27, %v2998_v48  ;;  %v3133_v42 = vmax.f32 %v3101_v30, 0.0  ;;  %v3465_v30 = vld [vmem:[#allocation3 + $0x60] sm:$0xff]  ;;  %v3462_v48 = vld [vmem:[#allocation3 + $0x58] sm:$0xff] }
 0x322   : > { %v3370_v21 = vor.u32 %v3368_v32, %v3367_v22  ;;  %v3499_v7 = vor.u32 %v3498_v2, %v3365_v37  ;;  %v3136_v3 = vmax.f32 %v3104_v4, 0.0  ;;  %v7237_v37 = vld [vmem:[%s9462_s3 + $0xa8] sm:$0xff]  }
 0x323   : > { %v3363_v35 = vor.u32 %v3361_v17, %v3360_v24  ;;  %v3497_v47 = vor.u32 %v3496_v36, %v3358_v56  ;;  %v3134_v45 = vmax.f32 %v3102_v26, 0.0  ;;  %6066 = vmatpush3.bf16.msra.mxu1 %v7233_v20  ;;  %v7238_v17 = vld [vmem:[%s9462_s3 + $0xf0] sm:$0xff]  }
 0x324   : > { %v8485_v38 = vsel %vm8326_vm1, %v3370_v21, %v3459_v13  ;;  %v8489_v23 = vsel %vm8333_vm2, %v3499_v7, %v3557_v15  ;;  %v8491_v49 = vpack.c.bf16 %v3136_v3, %v3135_v5  ;;  %6067 = vmatprep.subr.bf16.mxu1 %v7234_v60  ;;  %v3560_v60 = vld [vmem:[#allocation3 + $0x178] sm:$0xff]  ;;  %v7239_v7 = vld [vmem:[%s9462_s3 + $0xb0] sm:$0xff]   ;;  %v7240_v3 = vld [vmem:[%s9462_s3 + $0xf8] sm:$0xff]  }
 0x325   : > { %3461 = vst [vmem:[#allocation3 + $0x50] sm:$0xff] %v8485_v38  ;;  %3559 = vst [vmem:[#allocation3 + $0x170] sm:$0xff] %v8489_v23  ;;  %v8500_v0 = vsel %vm8326_vm1, %v3363_v35, %v3456_v43  ;;  %v8504_v44 = vsel %vm8333_vm2, %v3497_v47, %v3554_v59  ;;  %v8506_v1 = vpack.c.bf16 %v3134_v45, %v3133_v42  ;;  %v6736_v19 = vpop.f32.mrb[24].mxu0 }
 0x326   : > { %3458 = vst [vmem:[#allocation3 + $0x48] sm:$0xff] %v8500_v0  ;;  %3556 = vst [vmem:[#allocation3 + $0x168] sm:$0xff] %v8504_v44  ;;  %v3379_v31 = vshrl.u32 %v8491_v49, 16  ;;  %v3382_v10 = vshll.u32 %v8491_v49, 16  ;;  %v3107_v51 = vadd.f32 %v6736_v19, %v8316_v27  ;;  %v3011_v63 = vpop.f32.mrb[25].mxu0  ;;  %4397 = vmatmul.mubr.bf16.gmra.mrb[8].mxu1 %v8451_v29 }
 0x327   : > { %3296 = vst [vmem:[#allocation3 + $0xf0] sm:$0xff] %v8491_v49  ;;  %3295 = vst [vmem:[#allocation3 + $0xe8] sm:$0xff] %v8506_v1  ;;  %v3372_v9 = vshrl.u32 %v8506_v1, 16  ;;  %v3375_v54 = vshll.u32 %v8506_v1, 16  ;;  %v3105_v41 = vadd.f32 %v8316_v27, %v3011_v63  ;;  %v6737_v16 = vpop.f32.mrb[26].mxu0  ;;  %4404 = vmatprep.mubr.bf16.mxu1 %v8392_v58  ;;  %6068 = vmatpush3.bf16.msra.mxu1 %v7235_v62 }
 0x328   : > { %v3381_v32 = vrot.slane %v3379_v31, 7  ;;  %v3502_v61 = vrot.slane %v3382_v10, 1  ;;  %v3108_v40 = vadd.f32 %v6737_v16, %v8316_v27  ;;  %v3014_v56 = vpop.f32.mrb[27].mxu0  ;;  %6069 = vmatprep.subr.bf16.mxu1 %v7236_v8  ;;  %v3139_v13 = vmax.f32 %v3107_v51, 0.0 }
 0x329   : > { %v3374_v20 = vrot.slane %v3372_v9, 7  ;;  %v3500_v22 = vrot.slane %v3375_v54, 1  ;;  %v3106_v58 = vadd.f32 %v8316_v27, %v3014_v56  ;;  %v3137_v26 = vmax.f32 %v3105_v41, 0.0  ;;  %v3569_v56 = vld [vmem:[#allocation3 + $0x190] sm:$0xff] }
 0x32a   : > { %v3384_v2 = vor.u32 %v3382_v10, %v3381_v32  ;;  %v3503_v4 = vor.u32 %v3502_v61, %v3379_v31  ;;  %v3140_v15 = vmax.f32 %v3108_v40, 0.0  ;;  %v7242_v61 = vld [vmem:[%s9462_s3 + $0x140] sm:$0xff]  }
 0x32b   : > { %v3377_v24 = vor.u32 %v3375_v54, %v3374_v20  ;;  %v3501_v36 = vor.u32 %v3500_v22, %v3372_v9  ;;  %v3138_v21 = vmax.f32 %v3106_v58, 0.0  ;;  %6070 = vmatpush3.bf16.msra.mxu1 %v7237_v37  ;;  %v7241_v54 = vld [vmem:[%s9462_s3 + $0xb8] sm:$0xff]   ;;  %v3471_v40 = vld [vmem:[#allocation3 + $0x70] sm:$0xff] }
 0x32c   : > { %v8533_v43 = vsel %vm8326_vm1, %v3384_v2, %v3465_v30  ;;  %v8537_v59 = vsel %vm8333_vm2, %v3503_v4, %v3563_v34  ;;  %v8539_v5 = vpack.c.bf16 %v3140_v15, %v3139_v13  ;;  %6071 = vmatprep.subr.bf16.mxu1 %v7238_v17  ;;  %v3468_v22 = vld [vmem:[#allocation3 + $0x68] sm:$0xff] }
 0x32d   : > { %3467 = vst [vmem:[#allocation3 + $0x60] sm:$0xff] %v8533_v43  ;;  %3565 = vst [vmem:[#allocation3 + $0x180] sm:$0xff] %v8537_v59  ;;  %v8548_v35 = vsel %vm8326_vm1, %v3377_v24, %v3462_v48  ;;  %v8552_v47 = vsel %vm8333_vm2, %v3501_v36, %v3560_v60  ;;  %v8554_v42 = vpack.c.bf16 %v3138_v21, %v3137_v26  ;;  %v6740_v45 = vpop.f32.mrb[28].mxu0  ;;  %v3566_v58 = vld [vmem:[#allocation3 + $0x188] sm:$0xff] }
 0x32e   : > { %3464 = vst [vmem:[#allocation3 + $0x58] sm:$0xff] %v8548_v35  ;;  %3562 = vst [vmem:[#allocation3 + $0x178] sm:$0xff] %v8552_v47  ;;  %v3393_v62 = vshrl.u32 %v8539_v5, 16  ;;  %v3396_v8 = vshll.u32 %v8539_v5, 16  ;;  %v3111_v19 = vadd.f32 %v6740_v45, %v8316_v27  ;;  %v3027_v31 = vpop.f32.mrb[29].mxu0  ;;  %4405 = vmatmul.mubr.bf16.gmra.mrb[12].mxu1 %v8436_v46 }
 0x32f   : > { %3298 = vst [vmem:[#allocation3 + $0x100] sm:$0xff] %v8539_v5  ;;  %3297 = vst [vmem:[#allocation3 + $0xf8] sm:$0xff] %v8554_v42  ;;  %v3386_v10 = vshrl.u32 %v8554_v42, 16  ;;  %v3389_v51 = vshll.u32 %v8554_v42, 16  ;;  %v3109_v63 = vadd.f32 %v8316_v27, %v3027_v31  ;;  %v6741_v9 = vpop.f32.mrb[30].mxu0  ;;  %4412 = vmatprep.mubr.bf16.mxu1 %v8457_v18  ;;  %6072 = vmatpush3.bf16.msra.mxu1 %v7239_v7 }
 0x330   : > { %v3395_v41 = vrot.slane %v3393_v62, 7  ;;  %v3506_v16 = vrot.slane %v3396_v8, 1  ;;  %v3112_v37 = vadd.f32 %v6741_v9, %v8316_v27  ;;  %v3030_v32 = vpop.f32.mrb[31].mxu0  ;;  %6073 = vmatprep.subr.bf16.mxu1 %v7240_v3  ;;  %v3143_v2 = vmax.f32 %v3111_v19, 0.0 }
 0x331   : > { %v3388_v17 = vrot.slane %v3386_v10, 7  ;;  %v3504_v30 = vrot.slane %v3389_v51, 1  ;;  %v3110_v18 = vadd.f32 %v8316_v27, %v3030_v32  ;;  %v3141_v13 = vmax.f32 %v3109_v63, 0.0 }
 0x332   : > { %v3398_v34 = vor.u32 %v3396_v8, %v3395_v41  ;;  %v3507_v20 = vor.u32 %v3506_v16, %v3393_v62  ;;  %v3144_v4 = vmax.f32 %v3112_v37, 0.0  ;;  %v3474_v16 = vld [vmem:[#allocation3 + $0x78] sm:$0xff] }
 0x333   : > { %v3391_v48 = vor.u32 %v3389_v51, %v3388_v17  ;;  %v3505_v60 = vor.u32 %v3504_v30, %v3386_v10  ;;  %v3142_v15 = vmax.f32 %v3110_v18, 0.0  ;;  %6074 = vmatpush3.bf16.msra.mxu1 %v7241_v54  ;;  %v3477_v10 = vld [vmem:[#allocation3 + $0x80] sm:$0xff]  ;;  %v3572_v37 = vld [vmem:[#allocation3 + $0x198] sm:$0xff] }
 0x334   : > { %v8578_v24 = vsel %vm8326_vm1, %v3398_v34, %v3471_v40  ;;  %v8582_v36 = vsel %vm8333_vm2, %v3507_v20, %v3569_v56  ;;  %v3160_v27 = vpack.c.bf16 %v3144_v4, %v3143_v2  ;;  %6171 = vmatprep.subr.bf16.mxu1 %v7242_v61  ;;  %v3575_v51 = vld [vmem:[#allocation3 + $0x1a0] sm:$0xff] }
 0x335   : > { %3473 = vst [vmem:[#allocation3 + $0x70] sm:$0xff] %v8578_v24  ;;  %3571 = vst [vmem:[#allocation3 + $0x190] sm:$0xff] %v8582_v36  ;;  %v8588_v26 = vsel %vm8326_vm1, %v3391_v48, %v3468_v22  ;;  %v8592_v21 = vsel %vm8333_vm2, %v3505_v60, %v3566_v58  ;;  %v8594_v7 = vpack.c.bf16 %v3142_v15, %v3141_v13  ;;  %v5963_v11 = vpop.f32.mrb[32].mxu0  ;;  %v8641_v22 = vld [vmem:[#allocation3 + $0x10] sm:$0xff]  ;;  %v7245_v58 = vld [vmem:[%s9462_s3 + $0x108] sm:$0xff]  }
 0x336   : > { %3470 = vst [vmem:[#allocation3 + $0x68] sm:$0xff] %v8588_v26  ;;  %3568 = vst [vmem:[#allocation3 + $0x188] sm:$0xff] %v8592_v21  ;;  %v3407_v3 = vshrl.u32 %v3160_v27, 16  ;;  %v3410_v45 = vshll.u32 %v3160_v27, 16  ;;  %4413 = vmatmul.mubr.bf16.gmra.mrb[16].mxu1 %v8500_v0  ;;  %v5964_v25 = vpop.f32.mrb[33].mxu0  ;;  %v7246_v2 = vld [vmem:[%s9462_s3 + $0x150] sm:$0xff]  }
 0x337   : > { %3300 = vst [vmem:[#allocation3 + $0x110] sm:$0xff] %v3160_v27  ;;  %3299 = vst [vmem:[#allocation3 + $0x108] sm:$0xff] %v8594_v7  ;;  %v3400_v62 = vshrl.u32 %v8594_v7, 16  ;;  %v3403_v8 = vshll.u32 %v8594_v7, 16  ;;  %4420 = vmatprep.mubr.bf16.mxu1 %v8442_v6  ;;  %v8626_v30 = vadd.f32 %v5964_v25, %v5963_v11  ;;  %v5966_v18 = vpop.f32.mrb[34].mxu0  ;;  %v7247_v4 = vld [vmem:[%s9462_s3 + $0x110] sm:$0xff]  }
 0x338   : > { %v3409_v19 = vrot.slane %v3407_v3, 7  ;;  %v3510_v31 = vrot.slane %v3410_v45, 1  ;;  %v5967_v34 = vpop.f32.mrb[35].mxu0  ;;  %v7248_v48 = vld [vmem:[%s9462_s3 + $0x158] sm:$0xff]   ;;  %v7250_v15 = vld [vmem:[%s9462_s3 + $0x160] sm:$0xff]  }
 0x339   : > { %v3402_v63 = vrot.slane %v3400_v62, 7  ;;  %v3508_v9 = vrot.slane %v3403_v8, 1  ;;  %v8630_v20 = vadd.f32 %v5967_v34, %v5966_v18  ;;  %v8656_v60 = vld [vmem:[#allocation3 + $0x128] sm:$0xff]  ;;  %v7251_v27 = vld [vmem:[%s9462_s3 + $0x120] sm:$0xff]  }
 0x33a   : > { %v3412_v54 = vor.u32 %v3410_v45, %v3409_v19  ;;  %v3511_v41 = vor.u32 %v3510_v31, %v3407_v3  ;;  %v7249_v13 = vld [vmem:[%s9462_s3 + $0x118] sm:$0xff]   ;;  %v8672_v3 = vld [vmem:[#allocation3 + $0x130] sm:$0xff]  ;;  %v8675_v45 = vld [vmem:[#allocation3 + $0x20] sm:$0xff] }
 0x33b   : > { %v3405_v32 = vor.u32 %v3403_v8, %v3402_v63  ;;  %v3509_v61 = vor.u32 %v3508_v9, %v3400_v62  ;;  %v7253_v62 = vld [vmem:[%s9462_s3 + $0x128] sm:$0xff]   ;;  %v7254_v8 = vld [vmem:[%s9462_s3 + $0x170] sm:$0xff]   ;;  %v7256_v31 = vld [vmem:[%s9462_s3 + $0x178] sm:$0xff]  }
 0x33c   : > { %v8605_v40 = vsel %vm8326_vm1, %v3412_v54, %v3477_v10  ;;  %v3576_v56 = vsel %vm8333_vm2, %v3511_v41, %v3575_v51  ;;  %v7255_v19 = vld [vmem:[%s9462_s3 + $0x130] sm:$0xff]   ;;  %v7257_v10 = vld [vmem:[%s9462_s3 + $0x138] sm:$0xff]   ;;  %v7258_v51 = vld [vmem:[%s9462_s3 + $0x1c0] sm:$0xff]  }
 0x33d   : > { %3479 = vst [vmem:[#allocation3 + $0x80] sm:$0xff] %v8605_v40  ;;  %3577 = vst [vmem:[#allocation3 + $0x1a0] sm:$0xff] %v3576_v56  ;;  %v8612_v6 = vsel %vm8326_vm1, %v3405_v32, %v3474_v16  ;;  %v8616_v17 = vsel %vm8333_vm2, %v3509_v61, %v3572_v37  ;;  %v8698_v63 = vld [vmem:[#allocation3 + $0x140] sm:$0xff]  ;;  %v7259_v9 = vld [vmem:[%s9462_s3 + $0x180] sm:$0xff]  }
 0x33e   : > { %3476 = vst [vmem:[#allocation3 + $0x78] sm:$0xff] %v8612_v6  ;;  %3574 = vst [vmem:[#allocation3 + $0x198] sm:$0xff] %v8616_v17  ;;  %4421 = vmatmul.mubr.bf16.gmra.mrb[20].mxu1 %v8485_v38  ;;  %v7260_v16 = vld [vmem:[%s9462_s3 + $0x1c8] sm:$0xff]   ;;  %v7262_v56 = vld [vmem:[%s9462_s3 + $0x1d0] sm:$0xff]  }
 0x33f   : > { %4428 = vmatprep.mubr.bf16.mxu1 %v8506_v1  ;;  %v3610_v1 = vld [vmem:[#allocation3 + $0x120] sm:$0xff]  ;;  %v3642_v61 = vld [vmem:[#allocation3 + $0x98] sm:$0xff] }
 0x346   : > { %4429 = vmatmul.mubr.bf16.gmra.mrb[24].mxu1 %v8548_v35 }
 0x347   : > { %4436 = vmatprep.mubr.bf16.mxu1 %v8491_v49  ;;  %v3626_v49 = vld [vmem:[#allocation3 + $0x8] sm:$0xff] }
 0x34e   : > { %4437 = vmatmul.mubr.bf16.gmra.mrb[28].mxu1 %v8533_v43 }
 0x34f   : > { %4444 = vmatprep.mubr.bf16.mxu1 %v8554_v42  ;;  %v7243_v42 = vld [vmem:[%s9462_s3 + $0x100] sm:$0xff]  }
 0x356   : > { %4445 = vmatmul.mubr.bf16.gmra.mrb[32].mxu1 %v8588_v26 }
 0x357   : > { %4452 = vmatprep.mubr.bf16.mxu1 %v8539_v5  ;;  %v7244_v5 = vld [vmem:[%s9462_s3 + $0x148] sm:$0xff]  }
 0x35e   : > { %4453 = vmatmul.mubr.bf16.gmra.mrb[36].mxu1 %v8578_v24 }
 0x35f   : > { %4460 = vmatprep.mubr.bf16.mxu1 %v8594_v7 }
 0x366   : > { %4461 = vmatmul.mubr.bf16.gmra.mrb[40].mxu1 %v8612_v6 }
 0x367   : > { %4501 = vmatprep.mubr.bf16.mxu1 %v3626_v49 }
 0x36e   : > { %4502 = vmatmul.mubr.bf16.vlgmr.msra.gmra.mrb[44].mxu1 %v3610_v1 }
 0x36f   : > { %6172 = vmatpush3.bf16.msra.mxu1 %v7243_v42  ;;  %4509 = vmatprep.mubr.bf16.mxu1 %v8641_v22 }
 0x370   : > { %6173 = vmatprep.subr.bf16.mxu1 %v7244_v5  ;;  %v7263_v5 = vld [vmem:[%s9462_s3 + $0x190] sm:$0xff]  }
 0x373   : > { %6174 = vmatpush3.bf16.msra.mxu1 %v7245_v58 }
 0x374   : > { %6175 = vmatprep.subr.bf16.mxu1 %v7246_v2 }
 0x376   : > { %4510 = vmatmul.mubr.bf16.gmra.mrb[48].mxu1 %v8656_v60 }
 0x377   : > { %4517 = vmatprep.mubr.bf16.mxu1 %v8366_v14  ;;  %6176 = vmatpush3.bf16.msra.mxu1 %v7247_v4  ;;  %v7252_v14 = vld [vmem:[%s9462_s3 + $0x168] sm:$0xff]   ;;  %v7264_v4 = vld [vmem:[%s9462_s3 + $0x1d8] sm:$0xff]  }
 0x378   : > { %6177 = vmatprep.subr.bf16.mxu1 %v7248_v48 }
 0x37b   : > { %6178 = vmatpush3.bf16.msra.mxu1 %v7249_v13  ;;  %v8767_v13 = vld [vmem:[#allocation3 + $0xa0] sm:$0xff] }
 0x37c   : > { %6179 = vmatprep.subr.bf16.mxu1 %v7250_v15  ;;  %v8770_v15 = vld [vmem:[#allocation3 + $0x138] sm:$0xff] }
 0x37d   : > { %9525 = vst [vmem:[#allocation4_spill] sm:$0xff] %v8770_v15 }
 0x37e   : > { %4518 = vmatmul.mubr.bf16.gmra.mrb[52].mxu1 %v8672_v3 }
 0x37f   : > { %4525 = vmatprep.mubr.bf16.mxu1 %v8675_v45  ;;  %6180 = vmatpush3.bf16.msra.mxu1 %v7251_v27  ;;  %v7265_v27 = vld [vmem:[%s9462_s3 + $0x198] sm:$0xff]  }
 0x380   : > { %6181 = vmatprep.subr.bf16.mxu1 %v7252_v14  ;;  %v7266_v14 = vld [vmem:[%s9462_s3 + $0x1e0] sm:$0xff]  }
 0x383   : > { %6182 = vmatpush3.bf16.msra.mxu1 %v7253_v62 }
 0x384   : > { %6183 = vmatprep.subr.bf16.mxu1 %v7254_v8 }
 0x386   : > { %4526 = vmatmul.mubr.bf16.gmra.mrb[56].mxu1 %v8370_v50 }
 0x387   : > { %4533 = vmatprep.mubr.bf16.mxu1 %v8401_v53  ;;  %6184 = vmatpush3.bf16.msra.mxu1 %v7255_v19 }
 0x388   : > { %6185 = vmatprep.subr.bf16.mxu1 %v7256_v31  ;;  %v7267_v31 = vld [vmem:[%s9462_s3 + $0x1a0] sm:$0xff]  }
 0x38b   : > { %6186 = vmatpush3.bf16.msra.mxu1 %v7257_v10 }
 0x38c   : > { %6283 = vmatprep.subr.bf16.mxu1 %v7258_v51  ;;  %v7268_v51 = vld [vmem:[%s9462_s3 + $0x1e8] sm:$0xff]  }
 0x38e   : > { %4534 = vmatmul.mubr.bf16.gmra.mrb[60].mxu1 %v8698_v63 }
 0x38f   : > { %4541 = vmatprep.mubr.bf16.mxu1 %v8386_v55 }
 0x396   : > { %4542 = vmatmul.mubr.bf16.gmra.mrb[64].mxu1 %v8405_v57 }
 0x397   : > { %4549 = vmatprep.mubr.bf16.mxu1 %v8451_v29 }
 0x39e   : > { %4550 = vmatmul.mubr.bf16.gmra.mrb[68].mxu1 %v8390_v39 }
 0x39f   : > { %4557 = vmatprep.mubr.bf16.mxu1 %v8436_v46 }
 0x3a6   : > { %4558 = vmatmul.mubr.bf16.gmra.mrb[72].mxu1 %v8455_v28 }
 0x3a7   : > { %4565 = vmatprep.mubr.bf16.mxu1 %v8500_v0 }
 0x3ae   : > { %4566 = vmatmul.mubr.bf16.gmra.mrb[76].mxu1 %v8440_v33 }
 0x3af   : > { %4573 = vmatprep.mubr.bf16.mxu1 %v8485_v38 }
 0x3b6   : > { %4574 = vmatmul.mubr.bf16.gmra.mrb[80].mxu1 %v8504_v44 }
 0x3b7   : > { %4581 = vmatprep.mubr.bf16.mxu1 %v8548_v35 }
 0x3be   : > { %4582 = vmatmul.mubr.bf16.gmra.mrb[84].mxu1 %v8489_v23 }
 0x3bf   : > { %4589 = vmatprep.mubr.bf16.mxu1 %v8533_v43 }
 0x3c6   : > { %4590 = vmatmul.mubr.bf16.gmra.mrb[88].mxu1 %v8552_v47 }
 0x3c7   : > { %4597 = vmatprep.mubr.bf16.mxu1 %v8588_v26 }
 0x3ce   : > { %4598 = vmatmul.mubr.bf16.gmra.mrb[92].mxu1 %v8537_v59 }
 0x3cf   : > { %4605 = vmatprep.mubr.bf16.mxu1 %v8578_v24 }
 0x3d6   : > { %4606 = vmatmul.mubr.bf16.gmra.mrb[96].mxu1 %v8592_v21 }
 0x3d7   : > { %4613 = vmatprep.mubr.bf16.mxu1 %v8612_v6 }
 0x3d9   : > { %v5969_v50 = vpop.f32.mrb[36].mxu0 }
 0x3da   : > { %v5970_v55 = vpop.f32.mrb[37].mxu0 }
 0x3db   : > { %v8720_v39 = vadd.f32 %v5970_v55, %v5969_v50  ;;  %v5972_v53 = vpop.f32.mrb[38].mxu0  ;;  %v8789_v55 = vld [vmem:[#allocation3 + $0xa8] sm:$0xff] }
 0x3dc   : > { %v5973_v57 = vpop.f32.mrb[39].mxu0 }
 0x3dd   : > { %v8722_v46 = vadd.f32 %v5973_v57, %v5972_v53  ;;  %v7269_v53 = vld [vmem:[%s9462_s3 + $0x1a8] sm:$0xff]   ;;  %v7270_v57 = vld [vmem:[%s9462_s3 + $0x1f0] sm:$0xff]  }
 0x3de   : > { %4614 = vmatmul.mubr.bf16.gmra.mrb[100].mxu1 %v8582_v36 }
 0x3df   : > { %4621 = vmatprep.mubr.bf16.mxu1 %v8605_v40  ;;  %v7261_v40 = vld [vmem:[%s9462_s3 + $0x188] sm:$0xff]  }
 0x3e1   : > { %v5975_v33 = vpop.f32.mrb[40].mxu0 }
 0x3e2   : > { %v5976_v29 = vpop.f32.mrb[41].mxu0 }
 0x3e3   : > { %v8726_v28 = vadd.f32 %v5976_v29, %v5975_v33  ;;  %v5978_v38 = vpop.f32.mrb[42].mxu0 }
 0x3e4   : > { %v5979_v23 = vpop.f32.mrb[43].mxu0 }
 0x3e5   : > { %v8728_v0 = vadd.f32 %v5979_v23, %v5978_v38 }
 0x3e6   : > { %4622 = vmatmul.mubr.bf16.gmra.mrb[104].mxu1 %v8616_v17 }
 0x3e7   : > { %4662 = vmatprep.mubr.bf16.mxu1 %v8656_v60 }
 0x3e9   : > { %v5981_v44 = vpop.f32.mrb[44].mxu0  ;;  %v5993_v43 = vpop.f32.mrb[0].mxu1 }
 0x3ea   : > { %v5982_v59 = vpop.f32.mrb[45].mxu0  ;;  %v5994_v35 = vpop.f32.mrb[1].mxu1 }
 0x3eb   : > { %v8732_v47 = vadd.f32 %v5982_v59, %v5981_v44  ;;  %v8734_v24 = vadd.f32 %v5994_v35, %v5993_v43  ;;  %v5984_v36 = vpop.f32.mrb[46].mxu0  ;;  %v5996_v26 = vpop.f32.mrb[2].mxu1  ;;  %v7272_v43 = vld [vmem:[%s9462_s3 + $0x1f8] sm:$0xff]   ;;  %v8809_v35 = vld [vmem:[#allocation3 + $0xb0] sm:$0xff] }
 0x3ec   : > { %v5985_v54 = vpop.f32.mrb[47].mxu0  ;;  %v5997_v41 = vpop.f32.mrb[3].mxu1 }
 0x3ed   : > { %v8742_v37 = vadd.f32 %v5985_v54, %v5984_v36  ;;  %v8744_v32 = vadd.f32 %v5997_v41, %v5996_v26  ;;  %v8812_v36 = vld [vmem:[#allocation3 + $0x148] sm:$0xff] }
 0x3ee   : > { %4663 = vmatmul.mubr.bf16.vlgmr.msra.gmra.mrb[108].mxu1 %v3642_v61  ;;  %9526 = vst [vmem:[#allocation5_spill] sm:$0xff] %v8812_v36  ;;  %v7273_v26 = vld [vmem:[%s9462_s3 + $0x1b8] sm:$0xff]  }
 0x3ef   : > { %6284 = vmatpush3.bf16.msra.mxu1 %v7259_v9  ;;  %4670 = vmatprep.mubr.bf16.mxu1 %v8672_v3  ;;  %v8821_v9 = vld [vmem:[%s9462_s3 + $0x200] sm:$0xff]  }
 0x3f0   : > { %6285 = vmatprep.subr.bf16.mxu1 %v7260_v16 }
 0x3f1   : > { %v5987_v6 = vpop.f32.mrb[48].mxu0  ;;  %v5999_v11 = vpop.f32.mrb[4].mxu1 }
 0x3f2   : > { %v5988_v25 = vpop.f32.mrb[49].mxu0  ;;  %v6000_v18 = vpop.f32.mrb[5].mxu1 }
 0x3f3   : > { %v8753_v34 = vadd.f32 %v5988_v25, %v5987_v6  ;;  %v8755_v49 = vadd.f32 %v6000_v18, %v5999_v11  ;;  %v5990_v1 = vpop.f32.mrb[50].mxu0  ;;  %v6002_v42 = vpop.f32.mrb[6].mxu1  ;;  %6286 = vmatpush3.bf16.msra.mxu1 %v7261_v40  ;;  %v8828_v6 = vld [vmem:[#allocation3 + $0xb8] sm:$0xff]  ;;  %v8831_v11 = vld [vmem:[#allocation3 + $0x150] sm:$0xff] }
 0x3f4   : > { %v5991_v58 = vpop.f32.mrb[51].mxu0  ;;  %v6003_v2 = vpop.f32.mrb[7].mxu1  ;;  %6287 = vmatprep.subr.bf16.mxu1 %v7262_v56  ;;  %9527 = vst [vmem:[#allocation6_spill] sm:$0xff] %v8831_v11 }
 0x3f5   : > { %v8763_v48 = vadd.f32 %v5991_v58, %v5990_v1  ;;  %v8765_v60 = vadd.f32 %v6003_v2, %v6002_v42  ;;  %v8838_v2 = vld [vmem:[#allocation3 + $0xc0] sm:$0xff] }
 0x3f6   : > { %4671 = vmatmul.mubr.bf16.gmra.mrb[112].mxu1 %v8767_v13 }
 0x3f7   : > { %4678 = vmatprep.mubr.bf16.mxu1 %v8770_v15  ;;  %6288 = vmatpush3.bf16.msra.mxu1 %v7263_v5 }
 0x3f8   : > { %6289 = vmatprep.subr.bf16.mxu1 %v7264_v4  ;;  %v8841_v4 = vld [vmem:[#allocation3 + $0x158] sm:$0xff] }
 0x3f9   : > { %v6005_v3 = vpop.f32.mrb[8].mxu1  ;;  %9528 = vst [vmem:[#allocation7_spill] sm:$0xff] %v8841_v4 }
 0x3fa   : > { %v6006_v62 = vpop.f32.mrb[9].mxu1 }
 0x3fb   : > { %v8779_v8 = vadd.f32 %v6006_v62, %v6005_v3  ;;  %v6008_v19 = vpop.f32.mrb[10].mxu1  ;;  %6290 = vmatpush3.bf16.msra.mxu1 %v7265_v27 }
 0x3fc   : > { %v6009_v10 = vpop.f32.mrb[11].mxu1  ;;  %6291 = vmatprep.subr.bf16.mxu1 %v7266_v14 }
 0x3fd   : > { %v8787_v50 = vadd.f32 %v6009_v10, %v6008_v19  ;;  %v8848_v10 = vld [vmem:[#allocation3 + $0xc8] sm:$0xff] }
 0x3fe   : > { %4679 = vmatmul.mubr.bf16.gmra.mrb[116].mxu1 %v8789_v55 }
 0x3ff   : > { %4686 = vmatprep.mubr.bf16.mxu1 %v8698_v63  ;;  %6292 = vmatpush3.bf16.msra.mxu1 %v7267_v31  ;;  %v7271_v63 = vld [vmem:[%s9462_s3 + $0x1b0] sm:$0xff]  }
 0x400   : > { %6293 = vmatprep.subr.bf16.mxu1 %v7268_v51  ;;  %v8851_v51 = vld [vmem:[#allocation3 + $0x160] sm:$0xff] }
 0x401   : > { %v6011_v33 = vpop.f32.mrb[12].mxu1  ;;  %9529 = vst [vmem:[#allocation8_spill] sm:$0xff] %v8851_v51 }
 0x402   : > { %v6012_v29 = vpop.f32.mrb[13].mxu1 }
 0x403   : > { %v8799_v38 = vadd.f32 %v6012_v29, %v6011_v33  ;;  %v6014_v23 = vpop.f32.mrb[14].mxu1  ;;  %6294 = vmatpush3.bf16.msra.mxu1 %v7269_v53 }
 0x404   : > { %v6015_v44 = vpop.f32.mrb[15].mxu1  ;;  %6295 = vmatprep.subr.bf16.mxu1 %v7270_v57 }
 0x405   : > { %v8807_v59 = vadd.f32 %v6015_v44, %v6014_v23  ;;  %v8858_v44 = vld [vmem:[#allocation3 + $0xd0] sm:$0xff] }
 0x406   : > { %4687 = vmatmul.mubr.bf16.gmra.mrb[120].mxu1 %v8809_v35 }
 0x407   : > { %4694 = vmatprep.mubr.bf16.mxu1 %v8812_v36  ;;  %6296 = vmatpush3.bf16.msra.mxu1 %v7271_v63 }
 0x408   : > { %6297 = vmatprep.subr.bf16.mxu1 %v7272_v43  ;;  %v8861_v43 = vld [vmem:[#allocation3 + $0x168] sm:$0xff] }
 0x409   : > { %v6017_v54 = vpop.f32.mrb[16].mxu1  ;;  %9530 = vst [vmem:[#allocation9_spill] sm:$0xff] %v8861_v43 }
 0x40a   : > { %v6018_v41 = vpop.f32.mrb[17].mxu1 }
 0x40b   : > { %v8823_v16 = vadd.f32 %v6018_v41, %v6017_v54  ;;  %v6020_v61 = vpop.f32.mrb[18].mxu1  ;;  %6298 = vmatpush3.bf16.msra.mxu1 %v7273_v26 }
 0x40c   : > { %v6021_v40 = vpop.f32.mrb[19].mxu1  ;;  %6742 = vmatprep.subr.bf16.mxu1 %v8821_v9 }
 0x40d   : > { %v8826_v56 = vadd.f32 %v6021_v40, %v6020_v61 }
 0x40e   : > { %4695 = vmatmul.mubr.bf16.gmra.mrb[124].mxu1 %v8828_v6 }
 0x40f   : > { %4702 = vmatprep.mubr.bf16.mxu1 %v8831_v11 }
 0x411   : > { %v6023_v25 = vpop.f32.mrb[20].mxu1 }
 0x412   : > { %v6024_v18 = vpop.f32.mrb[21].mxu1 }
 0x413   : > { %v8834_v1 = vadd.f32 %v6024_v18, %v6023_v25  ;;  %v6026_v42 = vpop.f32.mrb[22].mxu1  ;;  %v8868_v18 = vld [vmem:[#allocation3 + $0xd8] sm:$0xff] }
 0x414   : > { %v6027_v5 = vpop.f32.mrb[23].mxu1 }
 0x415   : > { %v8836_v58 = vadd.f32 %v6027_v5, %v6026_v42  ;;  %v8871_v42 = vld [vmem:[#allocation3 + $0x170] sm:$0xff] }
 0x416   : > { %4703 = vmatmul.mubr.bf16.gmra.mrb[128].mxu1 %v8838_v2  ;;  %9531 = vst [vmem:[#allocation10_spill] sm:$0xff] %v8871_v42 }
 0x417   : > { %4710 = vmatprep.mubr.bf16.mxu1 %v8841_v4 }
 0x419   : > { %v6029_v27 = vpop.f32.mrb[24].mxu1 }
 0x41a   : > { %v6030_v14 = vpop.f32.mrb[25].mxu1 }
 0x41b   : > { %v8844_v3 = vadd.f32 %v6030_v14, %v6029_v27  ;;  %v6032_v62 = vpop.f32.mrb[26].mxu1 }
 0x41c   : > { %v6033_v19 = vpop.f32.mrb[27].mxu1 }
 0x41d   : > { %v8846_v31 = vadd.f32 %v6033_v19, %v6032_v62 }
 0x41e   : > { %4711 = vmatmul.mubr.bf16.gmra.mrb[132].mxu1 %v8848_v10 }
 0x41f   : > { %4718 = vmatprep.mubr.bf16.mxu1 %v8851_v51 }
 0x421   : > { %v6035_v53 = vpop.f32.mrb[28].mxu1 }
 0x422   : > { %v6036_v57 = vpop.f32.mrb[29].mxu1 }
 0x423   : > { %v8854_v33 = vadd.f32 %v6036_v57, %v6035_v53  ;;  %v6038_v29 = vpop.f32.mrb[30].mxu1  ;;  %v8878_v57 = vld [vmem:[#allocation3 + $0xe0] sm:$0xff] }
 0x424   : > { %v6039_v23 = vpop.f32.mrb[31].mxu1 }
 0x425   : > { %v8856_v63 = vadd.f32 %v6039_v23, %v6038_v29  ;;  %v8881_v29 = vld [vmem:[#allocation3 + $0x178] sm:$0xff] }
 0x426   : > { %4719 = vmatmul.mubr.bf16.gmra.mrb[136].mxu1 %v8858_v44  ;;  %9532 = vst [vmem:[#allocation11_spill] sm:$0xff] %v8881_v29 }
 0x427   : > { %4726 = vmatprep.mubr.bf16.mxu1 %v8861_v43 }
 0x429   : > { %v6041_v26 = vpop.f32.mrb[32].mxu1 }
 0x42a   : > { %v6042_v54 = vpop.f32.mrb[33].mxu1 }
 0x42b   : > { %v8864_v41 = vadd.f32 %v6042_v54, %v6041_v26  ;;  %v6044_v61 = vpop.f32.mrb[34].mxu1 }
 0x42c   : > { %v6045_v40 = vpop.f32.mrb[35].mxu1 }
 0x42d   : > { %v8866_v25 = vadd.f32 %v6045_v40, %v6044_v61 }
 0x42e   : > { %4727 = vmatmul.mubr.bf16.gmra.mrb[140].mxu1 %v8868_v18 }
 0x42f   : > { %4734 = vmatprep.mubr.bf16.mxu1 %v8871_v42 }
 0x431   : > { %v6047_v5 = vpop.f32.mrb[36].mxu1 }
 0x432   : > { %v6048_v27 = vpop.f32.mrb[37].mxu1 }
 0x433   : > { %v8874_v14 = vadd.f32 %v6048_v27, %v6047_v5  ;;  %v6050_v62 = vpop.f32.mrb[38].mxu1  ;;  %v8888_v27 = vld [vmem:[#allocation3 + $0xe8] sm:$0xff] }
 0x434   : > { %v6051_v19 = vpop.f32.mrb[39].mxu1 }
 0x435   : > { %v8876_v53 = vadd.f32 %v6051_v19, %v6050_v62  ;;  %v8891_v62 = vld [vmem:[#allocation3 + $0x180] sm:$0xff]  ;;  %v8897_v19 = vld [vmem:[%s9463_s4] ss:$0 sm:$0xff] }
 0x436   : > { %4735 = vmatmul.mubr.bf16.gmra.mrb[144].mxu1 %v8878_v57  ;;  %9533 = vst [vmem:[#allocation12_spill] sm:$0xff] %v8891_v62  ;;  %v4351_v15 = vadd.f32 %v8720_v39, %v8897_v19 }
 0x437   : > { %4742 = vmatprep.mubr.bf16.mxu1 %v8881_v29 }
 0x439   : > { %v6053_v23 = vpop.f32.mrb[40].mxu1 }
 0x43a   : > { %v6054_v26 = vpop.f32.mrb[41].mxu1 }
 0x43b   : > { %v8884_v54 = vadd.f32 %v6054_v26, %v6053_v23  ;;  %v6056_v61 = vpop.f32.mrb[42].mxu1  ;;  %v4343_v23 = vadd.f32 %v8626_v30, %v8897_v19 }
 0x43c   : > { %v6057_v40 = vpop.f32.mrb[43].mxu1 }
 0x43d   : > { %v8886_v5 = vadd.f32 %v6057_v40, %v6056_v61  ;;  %v4346_v61 = vadd.f32 %v8630_v20, %v8897_v19 }
 0x43e   : > { %4743 = vmatmul.mubr.bf16.gmra.mrb[148].mxu1 %v8888_v27 }
 0x43f   : > { %4750 = vmatprep.mubr.bf16.mxu1 %v8891_v62  ;;  %v8905_v62 = vld [vmem:[#allocation3 + $0xf0] sm:$0xff] }
 0x441   : > { %v6075_v26 = vpop.f32.mrb[44].mxu1 }
 0x442   : > { %v6076_v29 = vpop.f32.mrb[45].mxu1 }
 0x443   : > { %v6077_v40 = vadd.f32 %v6076_v29, %v6075_v26  ;;  %v6078_v42 = vpop.f32.mrb[46].mxu1 }
 0x444   : > { %v6079_v43 = vpop.f32.mrb[47].mxu1 }
 0x445   : > { %v8903_v51 = vadd.f32 %v6077_v40, %v4343_v23  ;;  %v6080_v4 = vadd.f32 %v6079_v43, %v6078_v42  ;;  %v4354_v23 = vadd.f32 %v8722_v46, %v8897_v19  ;;  %v8917_v40 = vld [vmem:[#allocation3 + $0xf8] sm:$0xff] }
 0x446   : > { %4751 = vmatmul.mubr.bf16.gmra.mrb[152].mxu1 %v8905_v62 }
 0x447   : > { %v8908_v11 = vadd.f32 %v6080_v4, %v4346_v61  ;;  %4758 = vmatprep.mubr.bf16.mxu1 %v8592_v21  ;;  %v8920_v4 = vld [vmem:[#allocation3 + $0x190] sm:$0xff]  ;;  %v4359_v61 = vadd.f32 %v8726_v28, %v8897_v19  ;;  %v4367_v28 = vadd.f32 %v8732_v47, %v8897_v19 }
 0x448   : > { %9535 = vst [vmem:[#allocation14_spill] sm:$0xff] %v8920_v4 }
 0x449   : > { %v6081_v30 = vpop.f32.mrb[48].mxu1 }
 0x44a   : > { %v6082_v36 = vpop.f32.mrb[49].mxu1 }
 0x44b   : > { %v6083_v20 = vadd.f32 %v6082_v36, %v6081_v30  ;;  %v6084_v29 = vpop.f32.mrb[50].mxu1 }
 0x44c   : > { %v6085_v26 = vpop.f32.mrb[51].mxu1 }
 0x44d   : > { %v8915_v43 = vadd.f32 %v6083_v20, %v4351_v15  ;;  %v6086_v42 = vadd.f32 %v6085_v26, %v6084_v29  ;;  %v4362_v20 = vadd.f32 %v8728_v0, %v8897_v19  ;;  %v4370_v0 = vadd.f32 %v8742_v37, %v8897_v19 }
 0x44e   : > { %4759 = vmatmul.mubr.bf16.gmra.mrb[156].mxu1 %v8917_v40  ;;  %v4375_v37 = vadd.f32 %v8753_v34, %v8897_v19  ;;  %v4383_v34 = vadd.f32 %v8734_v24, %v8897_v19  ;;  %v7276_v24 = vld [vmem:[%s9462_s3 + $0x210] sm:$0xff]  }
 0x44f   : > { %9534 = vst [vmem:[#allocation13_spill] sm:$0xff] %v8915_v43  ;;  %v8922_v21 = vadd.f32 %v6086_v42, %v4354_v23  ;;  %4766 = vmatprep.mubr.bf16.mxu1 %v8920_v4  ;;  %v8931_v43 = vld [vmem:[#allocation3 + $0x100] sm:$0xff] }
 0x451   : > { %9536 = vst [vmem:[#allocation15_spill] sm:$0xff] %v8922_v21  ;;  %v6087_v39 = vpop.f32.mrb[52].mxu1 }
 0x452   : > { %v6088_v36 = vpop.f32.mrb[53].mxu1 }
 0x453   : > { %v6089_v30 = vadd.f32 %v6088_v36, %v6087_v39  ;;  %v6090_v46 = vpop.f32.mrb[54].mxu1 }
 0x454   : > { %v6091_v15 = vpop.f32.mrb[55].mxu1 }
 0x455   : > { %v8929_v29 = vadd.f32 %v6089_v30, %v4359_v61  ;;  %v6092_v26 = vadd.f32 %v6091_v15, %v6090_v46  ;;  %v3225_v46 = vld [vmem:[#allocation3 + $0x88] sm:$0x1]  ;;  %v8944_v15 = vld [vmem:[#allocation3 + $0x1a0] sm:$0xff] }
 0x456   : > { %4767 = vmatmul.mubr.bf16.gmra.mrb[160].mxu1 %v8931_v43 }
 0x457   : > { %v8934_v23 = vadd.f32 %v6092_v26, %v4362_v20  ;;  %4774 = vmatprep.mubr.bf16.mxu1 %v8616_v17  ;;  %v3226_v17 = vsel %vm8221_vm12, 0, %v3225_v46 }
 0x458   : > { %3227 = vst [vmem:[#allocation3 + $0x88] sm:$0x1] %v3226_v17 }
 0x459   : > { %v6093_v42 = vpop.f32.mrb[56].mxu1 }
 0x45a   : > { %v6094_v4 = vpop.f32.mrb[57].mxu1 }
 0x45b   : > { %v6095_v39 = vadd.f32 %v6094_v4, %v6093_v42  ;;  %v6096_v36 = vpop.f32.mrb[58].mxu1 }
 0x45c   : > { %v6097_v21 = vpop.f32.mrb[59].mxu1 }
 0x45d   : > { %v8941_v61 = vadd.f32 %v6095_v39, %v4367_v28  ;;  %v6098_v30 = vadd.f32 %v6097_v21, %v6096_v36  ;;  %v8957_v39 = vld [vmem:[#allocation3 + $0x110] sm:$0xff] }
 0x45e   : > { %4775 = vmatmul.mubr.bf16.gmra.mrb[164].mxu1 %v8594_v7  ;;  %v4378_v7 = vadd.f32 %v8763_v48, %v8897_v19  ;;  %v7275_v48 = vld [vmem:[%s9462_s3 + $0x208] sm:$0xff]  }
 0x45f   : > { %v8948_v20 = vadd.f32 %v6098_v30, %v4370_v0  ;;  %4782 = vmatprep.mubr.bf16.mxu1 %v8944_v15 }
 0x461   : > { %v6099_v47 = vpop.f32.mrb[60].mxu1 }
 0x462   : > { %v6100_v4 = vpop.f32.mrb[61].mxu1 }
 0x463   : > { %v6101_v26 = vadd.f32 %v6100_v4, %v6099_v47  ;;  %v6102_v21 = vpop.f32.mrb[62].mxu1 }
 0x464   : > { %v6103_v42 = vpop.f32.mrb[63].mxu1 }
 0x465   : > { %v8955_v28 = vadd.f32 %v6101_v26, %v4375_v37  ;;  %v6104_v12 = vadd.f32 %v6103_v42, %v6102_v21  ;;  %v4386_v37 = vadd.f32 %v8744_v32, %v8897_v19 }
 0x466   : > { %4783 = vmatmul.mubr.bf16.gmra.mrb[168].mxu1 %v8957_v39 }
 0x467   : > { %v8960_v36 = vadd.f32 %v6104_v12, %v4378_v7  ;;  %4823 = vmatprep.mubr.bf16.mxu1 %v8767_v13  ;;  %v4391_v7 = vadd.f32 %v8755_v49, %v8897_v19  ;;  %v7278_v49 = vld [vmem:[%s9462_s3 + $0x220] sm:$0xff]  }
 0x469   : > { %v6105_v0 = vpop.f32.mrb[64].mxu1 }
 0x46a   : > { %v6106_v30 = vpop.f32.mrb[65].mxu1 }
 0x46b   : > { %v6107_v46 = vadd.f32 %v6106_v30, %v6105_v0  ;;  %v6108_v17 = vpop.f32.mrb[66].mxu1  ;;  %v4394_v0 = vadd.f32 %v8765_v60, %v8897_v19 }
 0x46c   : > { %v6109_v47 = vpop.f32.mrb[67].mxu1 }
 0x46d   : > { %v8968_v4 = vadd.f32 %v6107_v46, %v4383_v34  ;;  %v6110_v26 = vadd.f32 %v6109_v47, %v6108_v17  ;;  %v3676_v34 = vld [vmem:[#allocation3 + $0x18] sm:$0xff] }
 0x46e   : > { %4824 = vmatmul.mubr.bf16.vlgmr.msra.gmra.mrb[172].mxu1 %v8641_v22 }
 0x46f   : > { %v8973_v13 = vadd.f32 %v6110_v26, %v4386_v37  ;;  %6743 = vmatpush3.bf16.msra.mxu1 %v8821_v9  ;;  %4831 = vmatprep.mubr.bf16.mxu1 %v8789_v55  ;;  %v7277_v9 = vld [vmem:[%s9462_s3 + $0x218] sm:$0xff]  }
 0x470   : > { %6744 = vmatprep.subr.bf16.mxu1 %v7275_v48 }
 0x471   : > { %v6111_v21 = vpop.f32.mrb[68].mxu1 }
 0x472   : > { %v6112_v42 = vpop.f32.mrb[69].mxu1 }
 0x473   : > { %v6113_v32 = vadd.f32 %v6112_v42, %v6111_v21  ;;  %v6114_v12 = vpop.f32.mrb[70].mxu1  ;;  %6745 = vmatpush3.bf16.msra.mxu1 %v7275_v48  ;;  %v4399_v48 = vadd.f32 %v8779_v8, %v8897_v19  ;;  %v4402_v21 = vadd.f32 %v8787_v50, %v8897_v19  ;;  %v7280_v8 = vld [vmem:[%s9462_s3 + $0x230] sm:$0xff]  }
 0x474   : > { %v6115_v22 = vpop.f32.mrb[71].mxu1  ;;  %6746 = vmatprep.subr.bf16.mxu1 %v7276_v24 }
 0x475   : > { %v8985_v55 = vadd.f32 %v6113_v32, %v4391_v7  ;;  %v6116_v30 = vadd.f32 %v6115_v22, %v6114_v12  ;;  %v4407_v22 = vadd.f32 %v8799_v38, %v8897_v19  ;;  %v9026_v38 = vld [vmem:[%s9464_s5] sm:$0xff]  }
 0x476   : > { %4832 = vmatmul.mubr.bf16.gmra.mrb[176].mxu1 %v3676_v34 }
 0x477   : > { %v8989_v46 = vadd.f32 %v6116_v30, %v4394_v0  ;;  %4839 = vmatprep.mubr.bf16.mxu1 %v8809_v35  ;;  %6747 = vmatpush3.bf16.msra.mxu1 %v7276_v24  ;;  %v7279_v35 = vld [vmem:[%s9462_s3 + $0x228] sm:$0xff]  }
 0x478   : > { %6748 = vmatprep.subr.bf16.mxu1 %v7277_v9 }
 0x479   : > { %v6117_v17 = vpop.f32.mrb[72].mxu1 }
 0x47a   : > { %v6118_v47 = vpop.f32.mrb[73].mxu1 }
 0x47b   : > { %v6119_v37 = vadd.f32 %v6118_v47, %v6117_v17  ;;  %v6120_v60 = vpop.f32.mrb[74].mxu1  ;;  %6749 = vmatpush3.bf16.msra.mxu1 %v7277_v9 }
 0x47c   : > { %v6121_v26 = vpop.f32.mrb[75].mxu1  ;;  %6750 = vmatprep.subr.bf16.mxu1 %v7278_v49 }
 0x47d   : > { %v9000_v24 = vadd.f32 %v6119_v37, %v4399_v48  ;;  %v6122_v42 = vadd.f32 %v6121_v26, %v6120_v60 }
 0x47e   : > { %4840 = vmatmul.mubr.bf16.gmra.mrb[180].mxu1 %v8675_v45  ;;  %v7281_v45 = vld [vmem:[%s9462_s3 + $0x238] sm:$0xff]  }
 0x47f   : > { %v9005_v7 = vadd.f32 %v6122_v42, %v4402_v21  ;;  %4847 = vmatprep.mubr.bf16.mxu1 %v8828_v6  ;;  %6751 = vmatpush3.bf16.msra.mxu1 %v7278_v49  ;;  %v4410_v6 = vadd.f32 %v8807_v59, %v8897_v19  ;;  %v3678_v49 = vld [vmem:[#allocation3 + $0x28] sm:$0xff]  ;;  %v4415_v59 = vadd.f32 %v8823_v16, %v8897_v19  ;;  %v3679_v42 = vld [vmem:[#allocation3 + $0x30] sm:$0xff] }
 0x480   : > { %6752 = vmatprep.subr.bf16.mxu1 %v7279_v35 }
 0x481   : > { %v6123_v32 = vpop.f32.mrb[76].mxu1 }
 0x482   : > { %v6124_v12 = vpop.f32.mrb[77].mxu1 }
 0x483   : > { %v6125_v9 = vadd.f32 %v6124_v12, %v6123_v32  ;;  %v6126_v50 = vpop.f32.mrb[78].mxu1  ;;  %6753 = vmatpush3.bf16.msra.mxu1 %v7279_v35  ;;  %v4423_v12 = vadd.f32 %v8834_v1, %v8897_v19  ;;  %v4431_v1 = vadd.f32 %v8844_v3, %v8897_v19 }
 0x484   : > { %v6127_v0 = vpop.f32.mrb[79].mxu1  ;;  %6754 = vmatprep.subr.bf16.mxu1 %v7280_v8 }
 0x485   : > { %v9018_v30 = vadd.f32 %v6125_v9, %v4407_v22  ;;  %v6128_v34 = vadd.f32 %v6127_v0, %v6126_v50 }
 0x486   : > { %4848 = vmatmul.mubr.bf16.gmra.mrb[184].mxu1 %v3678_v49 }
 0x487   : > { %v9020_v17 = vadd.f32 %v6128_v34, %v4410_v6  ;;  %4855 = vmatprep.mubr.bf16.mxu1 %v8838_v2  ;;  %6755 = vmatpush3.bf16.msra.mxu1 %v7280_v8  ;;  %v4418_v2 = vadd.f32 %v8826_v56, %v8897_v19  ;;  %v4426_v56 = vadd.f32 %v8836_v58, %v8897_v19  ;;  %v3680_v6 = vld [vmem:[#allocation3 + $0x38] sm:$0xff] }
 0x488   : > { %6756 = vmatprep.subr.bf16.mxu1 %v7281_v45  ;;  %v4434_v58 = vadd.f32 %v8846_v31, %v8897_v19 }
 0x489   : > { %v6129_v47 = vpop.f32.mrb[80].mxu1 }
 0x48a   : > { %v6130_v48 = vpop.f32.mrb[81].mxu1 }
 0x48b   : > { %v6131_v37 = vadd.f32 %v6130_v48, %v6129_v47  ;;  %v6132_v60 = vpop.f32.mrb[82].mxu1  ;;  %6757 = vmatpush3.bf16.msra.mxu1 %v7281_v45 }
 0x48c   : > { %v6133_v26 = vpop.f32.mrb[83].mxu1  ;;  %6790 = vmatprep.subr.bf16.mxu1 %v9026_v38 }
 0x48d   : > { %v9033_v35 = vadd.f32 %v6131_v37, %v4415_v59  ;;  %v6134_v21 = vadd.f32 %v6133_v26, %v6132_v60  ;;  %v3681_v26 = vld [vmem:[#allocation3 + $0x40] sm:$0xff] }
 0x48e   : > { %4856 = vmatmul.mubr.bf16.gmra.mrb[188].mxu1 %v3679_v42 }
 0x48f   : > { %v9035_v8 = vadd.f32 %v6134_v21, %v4418_v2  ;;  %4863 = vmatprep.mubr.bf16.mxu1 %v8848_v10  ;;  %v3281_v2 = vld [vmem:[#allocation3 + $0x1a8] sm:$0x80] }
 0x491   : > { %v6135_v32 = vpop.f32.mrb[84].mxu1 }
 0x492   : > { %v6136_v16 = vpop.f32.mrb[85].mxu1 }
 0x493   : > { %v6137_v22 = vadd.f32 %v6136_v16, %v6135_v32  ;;  %v6138_v9 = vpop.f32.mrb[86].mxu1  ;;  %v4439_v32 = vadd.f32 %v8854_v33, %v8897_v19  ;;  %v4447_v33 = vadd.f32 %v8864_v41, %v8897_v19  ;;  %v4455_v41 = vadd.f32 %v8874_v14, %v8897_v19 }
 0x494   : > { %v6139_v50 = vpop.f32.mrb[87].mxu1  ;;  %v4463_v14 = vadd.f32 %v8884_v54, %v8897_v19 }
 0x495   : > { %v9042_v0 = vadd.f32 %v6137_v22, %v4423_v12  ;;  %v6140_v45 = vadd.f32 %v6139_v50, %v6138_v9  ;;  %v4442_v22 = vadd.f32 %v8856_v63, %v8897_v19  ;;  %v3682_v50 = vld [vmem:[#allocation3 + $0x48] sm:$0xff]  ;;  %v4450_v63 = vadd.f32 %v8866_v25, %v8897_v19 }
 0x496   : > { %4864 = vmatmul.mubr.bf16.gmra.mrb[192].mxu1 %v3680_v6  ;;  %v4458_v25 = vadd.f32 %v8876_v53, %v8897_v19  ;;  %v4466_v53 = vadd.f32 %v8886_v5, %v8897_v19 }
 0x497   : > { %v9044_v34 = vadd.f32 %v6140_v45, %v4426_v56  ;;  %4871 = vmatprep.mubr.bf16.mxu1 %v8858_v44  ;;  %v3282_v44 = vsel %vm8240_vm14, 0, %v3281_v2 }
 0x498   : > { %3283 = vst [vmem:[#allocation3 + $0x1a8] sm:$0x80] %v3282_v44 }
 0x499   : > { %v6141_v10 = vpop.f32.mrb[88].mxu1 }
 0x49a   : > { %v6142_v49 = vpop.f32.mrb[89].mxu1 }
 0x49b   : > { %v6143_v47 = vadd.f32 %v6142_v49, %v6141_v10  ;;  %v6144_v48 = vpop.f32.mrb[90].mxu1 }
 0x49c   : > { %v6145_v59 = vpop.f32.mrb[91].mxu1 }
 0x49d   : > { %v9051_v37 = vadd.f32 %v6143_v47, %v4431_v1  ;;  %v6146_v60 = vadd.f32 %v6145_v59, %v6144_v48  ;;  %v3683_v48 = vld [vmem:[#allocation3 + $0x50] sm:$0xff] }
 0x49e   : > { %4872 = vmatmul.mubr.bf16.gmra.mrb[196].mxu1 %v3681_v26 }
 0x49f   : > { %v9055_v21 = vadd.f32 %v6146_v60, %v4434_v58  ;;  %4879 = vmatprep.mubr.bf16.mxu1 %v8868_v18 }
 0x4a1   : > { %v6147_v3 = vpop.f32.mrb[92].mxu1 }
 0x4a2   : > { %v6148_v42 = vpop.f32.mrb[93].mxu1 }
 0x4a3   : > { %v6149_v31 = vadd.f32 %v6148_v42, %v6147_v3  ;;  %v6150_v16 = vpop.f32.mrb[94].mxu1  ;;  %v3684_v42 = vld [vmem:[#allocation3 + $0x58] sm:$0xff] }
 0x4a4   : > { %v6151_v12 = vpop.f32.mrb[95].mxu1 }
 0x4a5   : > { %v9062_v9 = vadd.f32 %v6149_v31, %v4439_v32  ;;  %v6152_v52 = vadd.f32 %v6151_v12, %v6150_v16 }
 0x4a6   : > { %4880 = vmatmul.mubr.bf16.gmra.mrb[200].mxu1 %v3682_v50 }
 0x4a7   : > { %v9064_v56 = vadd.f32 %v6152_v52, %v4442_v22  ;;  %4887 = vmatprep.mubr.bf16.mxu1 %v8878_v57 }
 0x4a9   : > { %v6153_v18 = vpop.f32.mrb[96].mxu1 }
 0x4aa   : > { %v6154_v45 = vpop.f32.mrb[97].mxu1 }
 0x4ab   : > { %v6155_v6 = vadd.f32 %v6154_v45, %v6153_v18  ;;  %v6156_v10 = vpop.f32.mrb[98].mxu1  ;;  %v3685_v18 = vld [vmem:[#allocation3 + $0x60] sm:$0xff] }
 0x4ac   : > { %v6157_v49 = vpop.f32.mrb[99].mxu1 }
 0x4ad   : > { %v9071_v1 = vadd.f32 %v6155_v6, %v4447_v33  ;;  %v6158_v47 = vadd.f32 %v6157_v49, %v6156_v10 }
 0x4ae   : > { %4888 = vmatmul.mubr.bf16.gmra.mrb[204].mxu1 %v3683_v48 }
 0x4af   : > { %v9073_v59 = vadd.f32 %v6158_v47, %v4450_v63  ;;  %4895 = vmatprep.mubr.bf16.mxu1 %v8888_v27  ;;  %v3686_v47 = vld [vmem:[#allocation3 + $0x68] sm:$0xff] }
 0x4b1   : > { %v6159_v57 = vpop.f32.mrb[100].mxu1 }
 0x4b2   : > { %v6160_v58 = vpop.f32.mrb[101].mxu1 }
 0x4b3   : > { %v6161_v60 = vadd.f32 %v6160_v58, %v6159_v57  ;;  %v6162_v26 = vpop.f32.mrb[102].mxu1 }
 0x4b4   : > { %v6163_v2 = vpop.f32.mrb[103].mxu1 }
 0x4b5   : > { %v9080_v44 = vadd.f32 %v6161_v60, %v4455_v41  ;;  %v6164_v3 = vadd.f32 %v6163_v2, %v6162_v26  ;;  %v9537_v41 = vld [vmem:[#allocation13_spill] sm:$0xff]  ;;  %v3687_v2 = vld [vmem:[#allocation3 + $0x70] sm:$0xff] }
 0x4b6   : > { %4896 = vmatmul.mubr.bf16.gmra.mrb[208].mxu1 %v3684_v42 }
 0x4b7   : > { %v9082_v32 = vadd.f32 %v6164_v3, %v4458_v25  ;;  %4903 = vmatprep.mubr.bf16.mxu1 %v8905_v62  ;;  %v9538_v25 = vld [vmem:[#allocation15_spill] sm:$0xff] }
 0x4b9   : > { %v6165_v27 = vpop.f32.mrb[104].mxu1 }
 0x4ba   : > { %v6166_v31 = vpop.f32.mrb[105].mxu1 }
 0x4bb   : > { %v6167_v16 = vadd.f32 %v6166_v31, %v6165_v27  ;;  %v6168_v12 = vpop.f32.mrb[106].mxu1 }
 0x4bc   : > { %v6169_v22 = vpop.f32.mrb[107].mxu1 }
 0x4bd   : > { %v9089_v52 = vadd.f32 %v6167_v16, %v4463_v14  ;;  %v6170_v50 = vadd.f32 %v6169_v22, %v6168_v12  ;;  %v3688_v12 = vld [vmem:[#allocation3 + $0x78] sm:$0xff] }
 0x4be   : > { %4904 = vmatmul.mubr.bf16.gmra.mrb[212].mxu1 %v3685_v18 }
 0x4bf   : > { %v9091_v45 = vadd.f32 %v6170_v50, %v4466_v53  ;;  %4911 = vmatprep.mubr.bf16.mxu1 %v8917_v40 }
 0x4c1   : > { %v6187_v62 = vpop.f32.mrb[108].mxu1 }
 0x4c2   : > { %v6188_v33 = vpop.f32.mrb[109].mxu1 }
 0x4c3   : > { %v6189_v6 = vadd.f32 %v6188_v33, %v6187_v62  ;;  %v6190_v10 = vpop.f32.mrb[110].mxu1 }
 0x4c4   : > { %v6191_v54 = vpop.f32.mrb[111].mxu1 }
 0x4c5   : > { %v9095_v49 = vadd.f32 %v6189_v6, %v8903_v51  ;;  %v6192_v63 = vadd.f32 %v6191_v54, %v6190_v10  ;;  %v3705_v51 = vld [vmem:[#allocation3 + $0x108] sm:$0xff]  ;;  %v3689_v54 = vld [vmem:[#allocation3 + $0x80] sm:$0xff] }
 0x4c6   : > { %4912 = vmatmul.mubr.bf16.gmra.mrb[216].mxu1 %v3686_v47 }
 0x4c7   : > { %v9098_v5 = vadd.f32 %v6192_v63, %v8908_v11  ;;  %4919 = vmatprep.mubr.bf16.mxu1 %v8931_v43  ;;  %v7288_v63 = vld [vmem:[#allocation3 + $0x90] sm:$0xff] }
 0x4c9   : > { %v6193_v19 = vpop.f32.mrb[112].mxu1 }
 0x4ca   : > { %v6194_v48 = vpop.f32.mrb[113].mxu1 }
 0x4cb   : > { %v6195_v57 = vadd.f32 %v6194_v48, %v6193_v19  ;;  %v6196_v40 = vpop.f32.mrb[114].mxu1  ;;  %v3690_v48 = vld [vmem:[#allocation3 + $0x88] sm:$0xff] }
 0x4cc   : > { %v6197_v58 = vpop.f32.mrb[115].mxu1 }
 0x4cd   : > { %v9102_v60 = vadd.f32 %v6195_v57, %v9537_v41  ;;  %v6198_v26 = vadd.f32 %v6197_v58, %v6196_v40 }
 0x4ce   : > { %4920 = vmatmul.mubr.bf16.gmra.mrb[220].mxu1 %v3687_v2 }
 0x4cf   : > { %v9105_v3 = vadd.f32 %v6198_v26, %v9538_v25  ;;  %4927 = vmatprep.mubr.bf16.mxu1 %v3705_v51 }
 0x4d1   : > { %v6199_v11 = vpop.f32.mrb[116].mxu1 }
 0x4d2   : > { %v6200_v42 = vpop.f32.mrb[117].mxu1 }
 0x4d3   : > { %v6201_v27 = vadd.f32 %v6200_v42, %v6199_v11  ;;  %v6202_v43 = vpop.f32.mrb[118].mxu1 }
 0x4d4   : > { %v6203_v31 = vpop.f32.mrb[119].mxu1 }
 0x4d5   : > { %v9108_v14 = vadd.f32 %v6201_v27, %v8929_v29  ;;  %v6204_v16 = vadd.f32 %v6203_v31, %v6202_v43  ;;  %v9539_v27 = vld [vmem:[#allocation4_spill] sm:$0xff] }
 0x4d6   : > { %4928 = vmatmul.mubr.bf16.gmra.mrb[224].mxu1 %v3688_v12 }
 0x4d7   : > { %v9111_v22 = vadd.f32 %v6204_v16, %v8934_v23  ;;  %4935 = vmatprep.mubr.bf16.mxu1 %v8957_v39 }
 0x4d9   : > { %v6205_v53 = vpop.f32.mrb[120].mxu1 }
 0x4da   : > { %v6206_v50 = vpop.f32.mrb[121].mxu1 }
 0x4db   : > { %v6207_v18 = vadd.f32 %v6206_v50, %v6205_v53  ;;  %v6208_v62 = vpop.f32.mrb[122].mxu1 }
 0x4dc   : > { %v6209_v33 = vpop.f32.mrb[123].mxu1 }
 0x4dd   : > { %v9115_v6 = vadd.f32 %v6207_v18, %v8941_v61  ;;  %v6210_v10 = vadd.f32 %v6209_v33, %v6208_v62  ;;  %v3709_v61 = vld [vmem:[#allocation3 + $0x130] sm:$0xff]  ;;  %v9540_v18 = vld [vmem:[#allocation5_spill] sm:$0xff]  ;;  %v9541_v33 = vld [vmem:[#allocation6_spill] sm:$0xff] }
 0x4de   : > { %4936 = vmatmul.mubr.bf16.gmra.mrb[228].mxu1 %v3689_v54 }
 0x4df   : > { %v9118_v29 = vadd.f32 %v6210_v10, %v8948_v20  ;;  %4943 = vmatprep.mubr.bf16.mxu1 %v7288_v63 }
 0x4e1   : > { %v6211_v23 = vpop.f32.mrb[124].mxu1 }
 0x4e2   : > { %v6212_v47 = vpop.f32.mrb[125].mxu1 }
 0x4e3   : > { %v6213_v19 = vadd.f32 %v6212_v47, %v6211_v23  ;;  %v6214_v39 = vpop.f32.mrb[126].mxu1 }
 0x4e4   : > { %v6215_v57 = vpop.f32.mrb[127].mxu1 }
 0x4e5   : > { %v9121_v40 = vadd.f32 %v6213_v19, %v8955_v28  ;;  %v6216_v58 = vadd.f32 %v6215_v57, %v6214_v39  ;;  %v3711_v28 = vld [vmem:[#allocation3 + $0x140] sm:$0xff]  ;;  %v9542_v19 = vld [vmem:[#allocation7_spill] sm:$0xff]  ;;  %v9543_v39 = vld [vmem:[#allocation8_spill] sm:$0xff] }
 0x4e6   : > { %4944 = vmatmul.mubr.bf16.gmra.mrb[232].mxu1 %v3690_v48 }
 0x4e7   : > { %v9124_v41 = vadd.f32 %v6216_v58, %v8960_v36  ;;  %6758 = vmatprep.mubr.bf16.mxu1 %v3709_v61 }
 0x4e9   : > { %v6217_v20 = vpop.f32.mrb[128].mxu1 }
 0x4ea   : > { %v6218_v26 = vpop.f32.mrb[129].mxu1 }
 0x4eb   : > { %v6219_v2 = vadd.f32 %v6218_v26, %v6217_v20  ;;  %v6220_v51 = vpop.f32.mrb[130].mxu1 }
 0x4ec   : > { %v6221_v25 = vpop.f32.mrb[131].mxu1 }
 0x4ed   : > { %v9127_v11 = vadd.f32 %v6219_v2, %v8968_v4  ;;  %v6222_v42 = vadd.f32 %v6221_v25, %v6220_v51  ;;  %v9544_v2 = vld [vmem:[#allocation9_spill] sm:$0xff]  ;;  %v9545_v51 = vld [vmem:[#allocation10_spill] sm:$0xff] }
 0x4ee   : > { %6759 = vmatmul.mubr.bf16.vlgmr.msra.gmra.mrb[236].mxu1 %v9539_v27 }
 0x4ef   : > { %v9131_v43 = vadd.f32 %v6222_v42, %v8973_v13  ;;  %6791 = vmatpush3.bf16.msra.mxu1 %v9026_v38  ;;  %6762 = vmatprep.mubr.bf16.mxu1 %v3711_v28 }
 0x4f1   : > { %v6223_v36 = vpop.f32.mrb[132].mxu1 }
 0x4f2   : > { %v6224_v31 = vpop.f32.mrb[133].mxu1 }
 0x4f3   : > { %v6225_v16 = vadd.f32 %v6224_v31, %v6223_v36  ;;  %v6226_v12 = vpop.f32.mrb[134].mxu1 }
 0x4f4   : > { %v6227_v53 = vpop.f32.mrb[135].mxu1 }
 0x4f5   : > { %v9135_v50 = vadd.f32 %v6225_v16, %v8985_v55  ;;  %v6228_v4 = vadd.f32 %v6227_v53, %v6226_v12  ;;  %v9546_v16 = vld [vmem:[#allocation11_spill] sm:$0xff]  ;;  %v9547_v12 = vld [vmem:[#allocation12_spill] sm:$0xff] }
 0x4f6   : > { %6763 = vmatmul.mubr.bf16.gmra.mrb[240].mxu1 %v9540_v18 }
 0x4f7   : > { %v9139_v62 = vadd.f32 %v6228_v4, %v8989_v46  ;;  %6766 = vmatprep.mubr.bf16.mxu1 %v9541_v33 }
 0x4f9   : > { %v6229_v13 = vpop.f32.mrb[136].mxu1 }
 0x4fa   : > { %v6230_v10 = vpop.f32.mrb[137].mxu1 }
 0x4fb   : > { %v6231_v38 = vadd.f32 %v6230_v10, %v6229_v13  ;;  %v6232_v54 = vpop.f32.mrb[138].mxu1 }
 0x4fc   : > { %v6233_v63 = vpop.f32.mrb[139].mxu1 }
 0x4fd   : > { %v9143_v23 = vadd.f32 %v6231_v38, %v9000_v24  ;;  %v6234_v47 = vadd.f32 %v6233_v63, %v6232_v54 }
 0x4fe   : > { %6767 = vmatmul.mubr.bf16.gmra.mrb[244].mxu1 %v9542_v19 }
 0x4ff   : > { %v9147_v55 = vadd.f32 %v6234_v47, %v9005_v7  ;;  %6770 = vmatprep.mubr.bf16.mxu1 %v9543_v39 }
 0x501   : > { %v6235_v46 = vpop.f32.mrb[140].mxu1 }
 0x502   : > { %v6236_v48 = vpop.f32.mrb[141].mxu1 }
 0x503   : > { %v6237_v57 = vadd.f32 %v6236_v48, %v6235_v46  ;;  %v6238_v58 = vpop.f32.mrb[142].mxu1  ;;  %v3722_v48 = vld [vmem:[#allocation3 + $0x198] sm:$0xff] }
 0x504   : > { %v6239_v61 = vpop.f32.mrb[143].mxu1 }
 0x505   : > { %v9151_v20 = vadd.f32 %v6237_v57, %v9018_v30  ;;  %v6240_v26 = vadd.f32 %v6239_v61, %v6238_v58  ;;  %v5114_v58 = vld [vmem:[%s7382_s10 + $0x8] sm:$0xff] }
 0x506   : > { %6771 = vmatmul.mubr.bf16.gmra.mrb[248].mxu1 %v9544_v2 }
 0x507   : > { %v9155_v24 = vadd.f32 %v6240_v26, %v9020_v17  ;;  %6774 = vmatprep.mubr.bf16.mxu1 %v9545_v51 }
 0x509   : > { %v6241_v7 = vpop.f32.mrb[144].mxu1 }
 0x50a   : > { %v6242_v25 = vpop.f32.mrb[145].mxu1 }
 0x50b   : > { %v6243_v42 = vadd.f32 %v6242_v25, %v6241_v7  ;;  %v6244_v27 = vpop.f32.mrb[146].mxu1 }
 0x50c   : > { %v6245_v28 = vpop.f32.mrb[147].mxu1 }
 0x50d   : > { %v9159_v36 = vadd.f32 %v6243_v42, %v9033_v35  ;;  %v6246_v31 = vadd.f32 %v6245_v28, %v6244_v27  ;;  %v3720_v35 = vld [vmem:[#allocation3 + $0x188] sm:$0xff] }
 0x50e   : > { %6775 = vmatmul.mubr.bf16.gmra.mrb[252].mxu1 %v9546_v16  ;;  %v5116_v28 = vld [vmem:[%s7382_s10 + $0x18] sm:$0xff]  ;;  %v5118_v16 = vld [vmem:[%s7382_s10 + $0x28] sm:$0xff] }
 0x50f   : > { %v9163_v30 = vadd.f32 %v6246_v31, %v9035_v8  ;;  %6778 = vmatprep.mubr.bf16.mxu1 %v9547_v12  ;;  %v9548_v8 = vld [vmem:[#allocation14_spill] sm:$0xff]  ;;  %v5117_v31 = vld [vmem:[%s7382_s10 + $0x20] sm:$0xff] }
 0x511   : > { %v6247_v17 = vpop.f32.mrb[148].mxu1 }
 0x512   : > { %v6248_v53 = vpop.f32.mrb[149].mxu1 }
 0x513   : > { %v6249_v4 = vadd.f32 %v6248_v53, %v6247_v17  ;;  %v6250_v18 = vpop.f32.mrb[150].mxu1 }
 0x514   : > { %v6251_v33 = vpop.f32.mrb[151].mxu1 }
 0x515   : > { %v9167_v13 = vadd.f32 %v6249_v4, %v9042_v0  ;;  %v6252_v10 = vadd.f32 %v6251_v33, %v6250_v18  ;;  %v5147_v18 = vpack.c.bf16 %v5118_v16, %v5117_v31 }
 0x516   : > { %6779 = vmatmul.mubr.bf16.gmra.mrb[0].mxu1 %v3720_v35 }
 0x517   : > { %v9170_v38 = vadd.f32 %v6252_v10, %v9044_v34  ;;  %6782 = vmatprep.mubr.bf16.mxu1 %v9548_v8  ;;  %v5113_v34 = vld [vmem:[%s7382_s10] sm:$0xff]  ;;  %v5119_v8 = vld [vmem:[%s7382_s10 + $0x30] sm:$0xff] }
 0x518   : > { %v5145_v7 = vpack.c.bf16 %v5114_v58, %v5113_v34 }
 0x519   : > { %v6253_v54 = vpop.f32.mrb[152].mxu1 }
 0x51a   : > { %v6254_v63 = vpop.f32.mrb[153].mxu1 }
 0x51b   : > { %v6255_v47 = vadd.f32 %v6254_v63, %v6253_v54  ;;  %v6256_v19 = vpop.f32.mrb[154].mxu1  ;;  %v5120_v54 = vld [vmem:[%s7382_s10 + $0x38] sm:$0xff]  ;;  %v5121_v63 = vld [vmem:[%s7382_s10 + $0x40] sm:$0xff] }
 0x51c   : > { %v6257_v39 = vpop.f32.mrb[155].mxu1 }
 0x51d   : > { %v9174_v46 = vadd.f32 %v6255_v47, %v9051_v37  ;;  %v6258_v0 = vadd.f32 %v6257_v39, %v6256_v19  ;;  %v3724_v37 = vld [vmem:[#allocation3 + $0x1a8] sm:$0xff]  ;;  %v5122_v47 = vld [vmem:[%s7382_s10 + $0x48] sm:$0xff] }
 0x51e   : > { %6783 = vmatmul.mubr.bf16.gmra.mrb[4].mxu1 %v3722_v48  ;;  %v5149_v34 = vpack.c.bf16 %v5122_v47, %v5121_v63 }
 0x51f   : > { %v9177_v57 = vadd.f32 %v6258_v0, %v9055_v21  ;;  %6786 = vmatprep.mubr.bf16.mxu1 %v8944_v15  ;;  %v5115_v15 = vld [vmem:[%s7382_s10 + $0x10] sm:$0xff] }
 0x520   : > { %v5146_v53 = vpack.c.bf16 %v5116_v28, %v5115_v15 }
 0x521   : > { %v6259_v61 = vpop.f32.mrb[156].mxu1 }
 0x522   : > { %v6260_v26 = vpop.f32.mrb[157].mxu1 }
 0x523   : > { %v6261_v2 = vadd.f32 %v6260_v26, %v6259_v61  ;;  %v6262_v51 = vpop.f32.mrb[158].mxu1 }
 0x524   : > { %v6263_v25 = vpop.f32.mrb[159].mxu1 }
 0x525   : > { %v9183_v42 = vadd.f32 %v6261_v2, %v9062_v9  ;;  %v6264_v21 = vadd.f32 %v6263_v25, %v6262_v51  ;;  %v5123_v2 = vld [vmem:[%s7382_s10 + $0x50] sm:$0xff]  ;;  %v5124_v51 = vld [vmem:[%s7382_s10 + $0x58] sm:$0xff] }
 0x526   : > { %6787 = vmatmul.mubr.bf16.gmra.mrb[8].mxu1 %v3724_v37  ;;  %v5125_v37 = vld [vmem:[%s7382_s10 + $0x60] sm:$0xff] }
 0x527   : > { %v9186_v27 = vadd.f32 %v6264_v21, %v9064_v56  ;;  %6792 = vmatprep.mubr.msk.bf16.mxu1 %vm328_vm0, %v5145_v7  ;;  %v5126_v7 = vld [vmem:[%s7382_s10 + $0x68] sm:$0xff] }
 0x528   : > { %v5151_v31 = vpack.c.bf16 %v5126_v7, %v5125_v37 }
 0x529   : > { %v6265_v12 = vpop.f32.mrb[160].mxu1 }
 0x52a   : > { %v6266_v17 = vpop.f32.mrb[161].mxu1 }
 0x52b   : > { %v6267_v9 = vadd.f32 %v6266_v17, %v6265_v12  ;;  %v6268_v4 = vpop.f32.mrb[162].mxu1 }
 0x52c   : > { %v6269_v33 = vpop.f32.mrb[163].mxu1 }
 0x52d   : > { %v9194_v56 = vadd.f32 %v6267_v9, %v9071_v1  ;;  %v6270_v10 = vadd.f32 %v6269_v33, %v6268_v4  ;;  %v5148_v1 = vpack.c.bf16 %v5120_v54, %v5119_v8  ;;  %v5128_v9 = vld [vmem:[%s7382_s10 + $0x78] sm:$0xff]  ;;  %v5129_v4 = vld [vmem:[%s7382_s10 + $0x80] sm:$0xff] }
 0x52e   : > { %6793 = vmatmul.mubr.msk.bf16.vlgmr.msra.gmra.mrb[236].mxu1 %vm328_vm0, %v5146_v53  ;;  %v5127_v53 = vld [vmem:[%s7382_s10 + $0x70] sm:$0xff] }
 0x52f   : > { %v9198_v35 = vadd.f32 %v6270_v10, %v9073_v59  ;;  %6796 = vmatprep.mubr.msk.bf16.mxu1 %vm328_vm0, %v5147_v18  ;;  %v5130_v18 = vld [vmem:[%s7382_s10 + $0x88] sm:$0xff] }
 0x530   : > { %v5153_v63 = vpack.c.bf16 %v5130_v18, %v5129_v4 }
 0x531   : > { %v6271_v19 = vpop.f32.mrb[164].mxu1 }
 0x532   : > { %v6272_v39 = vpop.f32.mrb[165].mxu1 }
 0x533   : > { %v6273_v0 = vadd.f32 %v6272_v39, %v6271_v19  ;;  %v6274_v48 = vpop.f32.mrb[166].mxu1 }
 0x534   : > { %v6275_v58 = vpop.f32.mrb[167].mxu1 }
 0x535   : > { %v9206_v59 = vadd.f32 %v6273_v0, %v9080_v44  ;;  %v6276_v61 = vadd.f32 %v6275_v58, %v6274_v48  ;;  %v5150_v44 = vpack.c.bf16 %v5124_v51, %v5123_v2  ;;  %v5132_v0 = vld [vmem:[%s7382_s10 + $0x98] sm:$0xff]  ;;  %v5133_v48 = vld [vmem:[%s7382_s10 + $0xa0] sm:$0xff] }
 0x536   : > { %6797 = vmatmul.mubr.msk.bf16.gmra.mrb[240].mxu1 %vm328_vm0, %v5148_v1  ;;  %v5131_v1 = vld [vmem:[%s7382_s10 + $0x90] sm:$0xff] }
 0x537   : > { %v9210_v26 = vadd.f32 %v6276_v61, %v9082_v32  ;;  %6800 = vmatprep.mubr.msk.bf16.mxu1 %vm328_vm0, %v5149_v34  ;;  %v5134_v34 = vld [vmem:[%s7382_s10 + $0xa8] sm:$0xff]  ;;  %v5154_v2 = vpack.c.bf16 %v5132_v0, %v5131_v1 }
 0x538   : > { %v5155_v37 = vpack.c.bf16 %v5134_v34, %v5133_v48 }
 0x539   : > { %v6277_v25 = vpop.f32.mrb[168].mxu1 }
 0x53a   : > { %v6278_v21 = vpop.f32.mrb[169].mxu1 }
 0x53b   : > { %v6279_v15 = vadd.f32 %v6278_v21, %v6277_v25  ;;  %v6280_v28 = vpop.f32.mrb[170].mxu1 }
 0x53c   : > { %v6281_v16 = vpop.f32.mrb[171].mxu1 }
 0x53d   : > { %v9218_v32 = vadd.f32 %v6279_v15, %v9089_v52  ;;  %v6282_v12 = vadd.f32 %v6281_v16, %v6280_v28  ;;  %v5152_v52 = vpack.c.bf16 %v5128_v9, %v5127_v53  ;;  %v5136_v15 = vld [vmem:[%s7382_s10 + $0xb8] sm:$0xff]  ;;  %v5137_v28 = vld [vmem:[%s7382_s10 + $0xc0] sm:$0xff] }
 0x53e   : > { %6801 = vmatmul.mubr.msk.bf16.gmra.mrb[244].mxu1 %vm328_vm0, %v5150_v44  ;;  %v5135_v44 = vld [vmem:[%s7382_s10 + $0xb0] sm:$0xff] }
 0x53f   : > { %v9222_v17 = vadd.f32 %v6282_v12, %v9091_v45  ;;  %6804 = vmatprep.mubr.msk.bf16.mxu1 %vm328_vm0, %v5151_v31  ;;  %v5138_v31 = vld [vmem:[%s7382_s10 + $0xc8] sm:$0xff]  ;;  %v5156_v53 = vpack.c.bf16 %v5136_v15, %v5135_v44 }
 0x540   : > { %v5157_v4 = vpack.c.bf16 %v5138_v31, %v5137_v28 }
 0x541   : > { %v6299_v33 = vpop.f32.mrb[172].mxu1 }
 0x542   : > { %v6300_v10 = vpop.f32.mrb[173].mxu1 }
 0x543   : > { %v6301_v8 = vadd.f32 %v6300_v10, %v6299_v33  ;;  %v6302_v54 = vpop.f32.mrb[174].mxu1 }
 0x544   : > { %v6303_v47 = vpop.f32.mrb[175].mxu1 }
 0x545   : > { %v6304_v19 = vadd.f32 %v6303_v47, %v6302_v54  ;;  %v9230_v45 = vadd.f32 %v6301_v8, %v9095_v49  ;;  %v5140_v8 = vld [vmem:[%s7382_s10 + $0xd8] sm:$0xff]  ;;  %v5141_v54 = vld [vmem:[%s7382_s10 + $0xe0] sm:$0xff] }
 0x546   : > { %6805 = vmatmul.mubr.msk.bf16.gmra.mrb[248].mxu1 %vm328_vm0, %v5152_v52  ;;  %v5139_v52 = vld [vmem:[%s7382_s10 + $0xd0] sm:$0xff] }
 0x547   : > { %v9234_v39 = vadd.f32 %v6304_v19, %v9098_v5  ;;  %6808 = vmatprep.mubr.msk.bf16.mxu1 %vm328_vm0, %v5153_v63  ;;  %v5142_v63 = vld [vmem:[%s7382_s10 + $0xe8] sm:$0xff]  ;;  %v5158_v1 = vpack.c.bf16 %v5140_v8, %v5139_v52 }
 0x548   : > { %v5159_v48 = vpack.c.bf16 %v5142_v63, %v5141_v54 }
 0x549   : > { %v6305_v58 = vpop.f32.mrb[176].mxu1 }
 0x54a   : > { %v6306_v61 = vpop.f32.mrb[177].mxu1 }
 0x54b   : > { %v6307_v49 = vadd.f32 %v6306_v61, %v6305_v58  ;;  %v6308_v51 = vpop.f32.mrb[178].mxu1 }
 0x54c   : > { %v6309_v7 = vpop.f32.mrb[179].mxu1 }
 0x54d   : > { %v6310_v25 = vadd.f32 %v6309_v7, %v6308_v51  ;;  %v9242_v5 = vadd.f32 %v6307_v49, %v9102_v60  ;;  %v5144_v49 = vld [vmem:[%s7382_s10 + $0xf8] sm:$0xff] }
 0x54e   : > { %6809 = vmatmul.mubr.msk.bf16.gmra.mrb[252].mxu1 %vm328_vm0, %v5154_v2  ;;  %v5143_v2 = vld [vmem:[%s7382_s10 + $0xf0] sm:$0xff] }
 0x54f   : > { %v9246_v21 = vadd.f32 %v6310_v25, %v9105_v3  ;;  %6812 = vmatprep.mubr.msk.bf16.mxu1 %vm328_vm0, %v5155_v37  ;;  %v5160_v7 = vpack.c.bf16 %v5144_v49, %v5143_v2 }
 0x551   : > { %v6311_v16 = vpop.f32.mrb[180].mxu1 }
 0x552   : > { %v6312_v12 = vpop.f32.mrb[181].mxu1 }
 0x553   : > { %v6313_v60 = vadd.f32 %v6312_v12, %v6311_v16  ;;  %v6314_v9 = vpop.f32.mrb[182].mxu1 }
 0x554   : > { %v6315_v18 = vpop.f32.mrb[183].mxu1 }
 0x555   : > { %v9254_v3 = vadd.f32 %v6313_v60, %v9108_v14  ;;  %v6316_v33 = vadd.f32 %v6315_v18, %v6314_v9 }
 0x556   : > { %6813 = vmatmul.mubr.msk.bf16.gmra.mrb[0].mxu1 %vm328_vm0, %v5156_v53 }
 0x557   : > { %v9258_v10 = vadd.f32 %v6316_v33, %v9111_v22  ;;  %6816 = vmatprep.mubr.msk.bf16.mxu1 %vm328_vm0, %v5157_v4 }
 0x559   : > { %v6317_v47 = vpop.f32.mrb[184].mxu1 }
 0x55a   : > { %v6318_v19 = vpop.f32.mrb[185].mxu1 }
 0x55b   : > { %v6319_v0 = vadd.f32 %v6318_v19, %v6317_v47  ;;  %v6320_v14 = vpop.f32.mrb[186].mxu1 }
 0x55c   : > { %v6321_v34 = vpop.f32.mrb[187].mxu1 }
 0x55d   : > { %v9266_v58 = vadd.f32 %v6319_v0, %v9115_v6  ;;  %v6322_v22 = vadd.f32 %v6321_v34, %v6320_v14 }
 0x55e   : > { %6817 = vmatmul.mubr.msk.bf16.gmra.mrb[4].mxu1 %vm328_vm0, %v5158_v1 }
 0x55f   : > { %v9270_v61 = vadd.f32 %v6322_v22, %v9118_v29  ;;  %6820 = vmatprep.mubr.msk.bf16.mxu1 %vm328_vm0, %v5159_v48 }
 0x561   : > { %v6323_v51 = vpop.f32.mrb[188].mxu1 }
 0x562   : > { %v6324_v37 = vpop.f32.mrb[189].mxu1 }
 0x563   : > { %v6325_v25 = vadd.f32 %v6324_v37, %v6323_v51  ;;  %v6326_v44 = vpop.f32.mrb[190].mxu1 }
 0x564   : > { %v6327_v15 = vpop.f32.mrb[191].mxu1 }
 0x565   : > { %v9276_v28 = vadd.f32 %v6325_v25, %v9121_v40  ;;  %v6328_v6 = vadd.f32 %v6327_v15, %v6326_v44 }
 0x566   : > { %6821 = vmatmul.mubr.msk.bf16.gmra.mrb[8].mxu1 %vm328_vm0, %v5160_v7 }
 0x567   : > { %v9280_v31 = vadd.f32 %v6328_v6, %v9124_v41 }
 0x569   : > { %v6329_v29 = vpop.f32.mrb[192].mxu1 }
 0x56a   : > { %v6330_v16 = vpop.f32.mrb[193].mxu1 }
 0x56b   : > { %v6331_v12 = vadd.f32 %v6330_v16, %v6329_v29  ;;  %v6332_v53 = vpop.f32.mrb[194].mxu1 }
 0x56c   : > { %v6333_v60 = vpop.f32.mrb[195].mxu1 }
 0x56d   : > { %v9283_v9 = vadd.f32 %v6331_v12, %v9127_v11  ;;  %v6334_v4 = vadd.f32 %v6333_v60, %v6332_v53 }
 0x56f   : > { %v9286_v18 = vadd.f32 %v6334_v4, %v9131_v43 }
 0x571   : > { %v6335_v40 = vpop.f32.mrb[196].mxu1 }
 0x572   : > { %v6336_v33 = vpop.f32.mrb[197].mxu1 }
 0x573   : > { %v6337_v52 = vadd.f32 %v6336_v33, %v6335_v40  ;;  %v6338_v8 = vpop.f32.mrb[198].mxu1 }
 0x574   : > { %v6339_v54 = vpop.f32.mrb[199].mxu1 }
 0x575   : > { %v9289_v41 = vadd.f32 %v6337_v52, %v9135_v50  ;;  %v6340_v63 = vadd.f32 %v6339_v54, %v6338_v8 }
 0x577   : > { %v9292_v47 = vadd.f32 %v6340_v63, %v9139_v62 }
 0x579   : > { %v6341_v19 = vpop.f32.mrb[200].mxu1 }
 0x57a   : > { %v6342_v1 = vpop.f32.mrb[201].mxu1 }
 0x57b   : > { %v6343_v11 = vadd.f32 %v6342_v1, %v6341_v19  ;;  %v6344_v0 = vpop.f32.mrb[202].mxu1 }
 0x57c   : > { %v6345_v14 = vpop.f32.mrb[203].mxu1 }
 0x57d   : > { %v9295_v43 = vadd.f32 %v6343_v11, %v9143_v23  ;;  %v6346_v48 = vadd.f32 %v6345_v14, %v6344_v0 }
 0x57f   : > { %v9298_v34 = vadd.f32 %v6346_v48, %v9147_v55 }
 0x581   : > { %v6347_v22 = vpop.f32.mrb[204].mxu1 }
 0x582   : > { %v6348_v2 = vpop.f32.mrb[205].mxu1 }
 0x583   : > { %v6349_v50 = vadd.f32 %v6348_v2, %v6347_v22  ;;  %v6350_v49 = vpop.f32.mrb[206].mxu1 }
 0x584   : > { %v6351_v51 = vpop.f32.mrb[207].mxu1 }
 0x585   : > { %v9301_v62 = vadd.f32 %v6349_v50, %v9151_v20  ;;  %v6352_v37 = vadd.f32 %v6351_v51, %v6350_v49 }
 0x587   : > { %v9304_v7 = vadd.f32 %v6352_v37, %v9155_v24 }
 0x589   : > { %v6353_v25 = vpop.f32.mrb[208].mxu1 }
 0x58a   : > { %v6354_v44 = vpop.f32.mrb[209].mxu1 }
 0x58b   : > { %v6355_v23 = vadd.f32 %v6354_v44, %v6353_v25  ;;  %v6356_v15 = vpop.f32.mrb[210].mxu1 }
 0x58c   : > { %v6357_v6 = vpop.f32.mrb[211].mxu1 }
 0x58d   : > { %v9307_v55 = vadd.f32 %v6355_v23, %v9159_v36  ;;  %v6358_v29 = vadd.f32 %v6357_v6, %v6356_v15 }
 0x58f   : > { %v9310_v16 = vadd.f32 %v6358_v29, %v9163_v30 }
 0x591   : > { %v6359_v12 = vpop.f32.mrb[212].mxu1 }
 0x592   : > { %v6360_v53 = vpop.f32.mrb[213].mxu1 }
 0x593   : > { %v6361_v20 = vadd.f32 %v6360_v53, %v6359_v12  ;;  %v6362_v60 = vpop.f32.mrb[214].mxu1 }
 0x594   : > { %v6363_v4 = vpop.f32.mrb[215].mxu1 }
 0x595   : > { %v9313_v24 = vadd.f32 %v6361_v20, %v9167_v13  ;;  %v6364_v40 = vadd.f32 %v6363_v4, %v6362_v60 }
 0x597   : > { %v9316_v33 = vadd.f32 %v6364_v40, %v9170_v38 }
 0x599   : > { %v6365_v52 = vpop.f32.mrb[216].mxu1 }
 0x59a   : > { %v6366_v8 = vpop.f32.mrb[217].mxu1 }
 0x59b   : > { %v6367_v36 = vadd.f32 %v6366_v8, %v6365_v52  ;;  %v6368_v54 = vpop.f32.mrb[218].mxu1 }
 0x59c   : > { %v6369_v63 = vpop.f32.mrb[219].mxu1 }
 0x59d   : > { %v9319_v30 = vadd.f32 %v6367_v36, %v9174_v46  ;;  %v6370_v19 = vadd.f32 %v6369_v63, %v6368_v54 }
 0x59f   : > { %v9322_v1 = vadd.f32 %v6370_v19, %v9177_v57 }
 0x5a1   : > { %v6371_v11 = vpop.f32.mrb[220].mxu1 }
 0x5a2   : > { %v6372_v0 = vpop.f32.mrb[221].mxu1 }
 0x5a3   : > { %v6373_v13 = vadd.f32 %v6372_v0, %v6371_v11  ;;  %v6374_v14 = vpop.f32.mrb[222].mxu1 }
 0x5a4   : > { %v6375_v48 = vpop.f32.mrb[223].mxu1 }
 0x5a5   : > { %v9325_v38 = vadd.f32 %v6373_v13, %v9183_v42  ;;  %v6376_v22 = vadd.f32 %v6375_v48, %v6374_v14 }
 0x5a7   : > { %v9328_v2 = vadd.f32 %v6376_v22, %v9186_v27 }
 0x5a9   : > { %v6377_v50 = vpop.f32.mrb[224].mxu1 }
 0x5aa   : > { %v6378_v49 = vpop.f32.mrb[225].mxu1 }
 0x5ab   : > { %v6379_v46 = vadd.f32 %v6378_v49, %v6377_v50  ;;  %v6380_v51 = vpop.f32.mrb[226].mxu1 }
 0x5ac   : > { %v6381_v37 = vpop.f32.mrb[227].mxu1 }
 0x5ad   : > { %v9331_v57 = vadd.f32 %v6379_v46, %v9194_v56  ;;  %v6382_v25 = vadd.f32 %v6381_v37, %v6380_v51 }
 0x5af   : > { %v9334_v44 = vadd.f32 %v6382_v25, %v9198_v35 }
 0x5b1   : > { %v6383_v23 = vpop.f32.mrb[228].mxu1 }
 0x5b2   : > { %v6384_v15 = vpop.f32.mrb[229].mxu1 }
 0x5b3   : > { %v6385_v42 = vadd.f32 %v6384_v15, %v6383_v23  ;;  %v6386_v6 = vpop.f32.mrb[230].mxu1 }
 0x5b4   : > { %v6387_v29 = vpop.f32.mrb[231].mxu1 }
 0x5b5   : > { %v9337_v27 = vadd.f32 %v6385_v42, %v9206_v59  ;;  %v6388_v12 = vadd.f32 %v6387_v29, %v6386_v6  ;;  %v9351_v59 = vld [vmem:[%s9465_s6] ss:$0 sm:$0xff] }
 0x5b6   : > { %v6844_v63 = vadd.f32 %v9351_v59, %v9246_v21  ;;  %v6846_v11 = vadd.f32 %v9351_v59, %v9234_v39  ;;  %v6848_v22 = vadd.f32 %v9351_v59, %v9266_v58  ;;  %v6850_v49 = vadd.f32 %v9351_v59, %v9254_v3 }
 0x5b7   : > { %v9340_v53 = vadd.f32 %v6388_v12, %v9210_v26  ;;  %v6852_v37 = vadd.f32 %v9351_v59, %v9270_v61  ;;  %v6854_v58 = vadd.f32 %v9351_v59, %v9258_v10  ;;  %v6858_v10 = vadd.f32 %v9351_v59, %v9276_v28 }
 0x5b9   : > { %v6389_v20 = vpop.f32.mrb[232].mxu1 }
 0x5ba   : > { %v6390_v60 = vpop.f32.mrb[233].mxu1 }
 0x5bb   : > { %v6391_v56 = vadd.f32 %v6390_v60, %v6389_v20  ;;  %v6392_v4 = vpop.f32.mrb[234].mxu1  ;;  %v6856_v60 = vadd.f32 %v9351_v59, %v9283_v9 }
 0x5bc   : > { %v6393_v40 = vpop.f32.mrb[235].mxu1 }
 0x5bd   : > { %v9343_v35 = vadd.f32 %v6391_v56, %v9218_v32  ;;  %v6394_v52 = vadd.f32 %v6393_v40, %v6392_v4  ;;  %v6860_v40 = vadd.f32 %v9351_v59, %v9286_v18 }
 0x5bf   : > { %v9346_v8 = vadd.f32 %v6394_v52, %v9222_v17 }
 0x601   : > { %v6794_v26 = vpop.f32.mrb[236].mxu1 }
 0x602   : > { %v6840_v36 = vadd.f32 %v6794_v26, %v9242_v5  ;;  %v5258_v54 = vpop.f32.mrb[237].mxu1 }
 0x603   : > { %v6842_v19 = vadd.f32 %v5258_v54, %v9230_v45  ;;  %v6795_v32 = vpop.f32.mrb[238].mxu1 }
 0x604   : > { %v6841_v17 = vadd.f32 %v6840_v36, %v9351_v59  ;;  %v6845_v0 = vadd.f32 %v6844_v63, %v6795_v32  ;;  %v5261_v13 = vpop.f32.mrb[239].mxu1  ;;  %v6862_v36 = vadd.f32 %v9351_v59, %v9280_v31  ;;  %v6866_v31 = vadd.f32 %v9351_v59, %v9289_v41 }
 0x605   : > { %v6843_v45 = vadd.f32 %v6842_v19, %v9351_v59  ;;  %v6847_v5 = vadd.f32 %v6846_v11, %v5261_v13 }
 0x606   : > { %v5419_v21 = vmax.f32 %v6841_v17, 0.0  ;;  %v5420_v14 = vmax.f32 %v6845_v0, 0.0  ;;  %v6864_v17 = vadd.f32 %v9351_v59, %v9295_v43 }
 0x607   : > { %v5417_v39 = vmax.f32 %v6843_v45, 0.0  ;;  %v5418_v48 = vmax.f32 %v6847_v5, 0.0  ;;  %v6868_v45 = vadd.f32 %v9351_v59, %v9298_v34 }
 0x608   : > { %5451 = vst [vmem:[%s9365_s28 + $0x10] sm:$0xff] %v5419_v21  ;;  %5452 = vst [vmem:[%s9365_s28 + $0x18] sm:$0xff] %v5420_v14  ;;  %v6870_v14 = vadd.f32 %v9351_v59, %v9292_v47  ;;  %v6874_v47 = vadd.f32 %v9351_v59, %v9301_v62 }
 0x609   : > { %5449 = vst [vmem:[%s9365_s28] sm:$0xff] %v5417_v39  ;;  %5450 = vst [vmem:[%s9365_s28 + $0x8] sm:$0xff] %v5418_v48  ;;  %v6798_v50 = vpop.f32.mrb[240].mxu1 }
 0x60a   : > { %v6849_v46 = vadd.f32 %v6848_v22, %v6798_v50  ;;  %v5274_v51 = vpop.f32.mrb[241].mxu1 }
 0x60b   : > { %v6851_v25 = vadd.f32 %v6850_v49, %v5274_v51  ;;  %v6799_v23 = vpop.f32.mrb[242].mxu1 }
 0x60c   : > { %v5423_v15 = vmax.f32 %v6849_v46, 0.0  ;;  %v6853_v42 = vadd.f32 %v6852_v37, %v6799_v23  ;;  %v5277_v6 = vpop.f32.mrb[243].mxu1  ;;  %v6872_v46 = vadd.f32 %v9351_v59, %v9307_v55 }
 0x60d   : > { %v5421_v29 = vmax.f32 %v6851_v25, 0.0  ;;  %v6855_v12 = vadd.f32 %v6854_v58, %v5277_v6  ;;  %v6876_v25 = vadd.f32 %v9351_v59, %v9310_v16 }
 0x60e   : > { %5455 = vst [vmem:[%s9365_s28 + $0x30] sm:$0xff] %v5423_v15  ;;  %v5424_v20 = vmax.f32 %v6853_v42, 0.0  ;;  %v6878_v15 = vadd.f32 %v9351_v59, %v9304_v7  ;;  %v6882_v7 = vadd.f32 %v9351_v59, %v9313_v24 }
 0x60f   : > { %5453 = vst [vmem:[%s9365_s28 + $0x20] sm:$0xff] %v5421_v29  ;;  %v5422_v3 = vmax.f32 %v6855_v12, 0.0 }
 0x610   : > { %5456 = vst [vmem:[%s9365_s28 + $0x38] sm:$0xff] %v5424_v20 }
 0x611   : > { %5454 = vst [vmem:[%s9365_s28 + $0x28] sm:$0xff] %v5422_v3  ;;  %v6802_v61 = vpop.f32.mrb[244].mxu1  ;;  %v6880_v3 = vadd.f32 %v9351_v59, %v9319_v30 }
 0x612   : > { %v6857_v56 = vadd.f32 %v6856_v60, %v6802_v61  ;;  %v5290_v4 = vpop.f32.mrb[245].mxu1 }
 0x613   : > { %v6859_v52 = vadd.f32 %v6858_v10, %v5290_v4  ;;  %v6803_v26 = vpop.f32.mrb[246].mxu1  ;;  %v6884_v10 = vadd.f32 %v9351_v59, %v9322_v1 }
 0x614   : > { %v5427_v54 = vmax.f32 %v6857_v56, 0.0  ;;  %v6861_v9 = vadd.f32 %v6860_v40, %v6803_v26  ;;  %v5293_v63 = vpop.f32.mrb[247].mxu1  ;;  %v6886_v40 = vadd.f32 %v9351_v59, %v9316_v33  ;;  %v6890_v33 = vadd.f32 %v9351_v59, %v9325_v38 }
 0x615   : > { %v5425_v19 = vmax.f32 %v6859_v52, 0.0  ;;  %v6863_v32 = vadd.f32 %v6862_v36, %v5293_v63  ;;  %v6888_v63 = vadd.f32 %v9351_v59, %v9331_v57 }
 0x616   : > { %5459 = vst [vmem:[%s9365_s28 + $0x50] sm:$0xff] %v5427_v54  ;;  %v5428_v11 = vmax.f32 %v6861_v9, 0.0 }
 0x617   : > { %5457 = vst [vmem:[%s9365_s28 + $0x40] sm:$0xff] %v5425_v19  ;;  %v5426_v28 = vmax.f32 %v6863_v32, 0.0 }
 0x618   : > { %5460 = vst [vmem:[%s9365_s28 + $0x58] sm:$0xff] %v5428_v11  ;;  %v6892_v11 = vadd.f32 %v9351_v59, %v9334_v44 }
 0x619   : > { %5458 = vst [vmem:[%s9365_s28 + $0x48] sm:$0xff] %v5426_v28  ;;  %v6806_v18 = vpop.f32.mrb[248].mxu1 }
 0x61a   : > { %v6865_v0 = vadd.f32 %v6864_v17, %v6806_v18  ;;  %v5306_v13 = vpop.f32.mrb[249].mxu1  ;;  %v6894_v18 = vadd.f32 %v9351_v59, %v9328_v2  ;;  %v6898_v2 = vadd.f32 %v9351_v59, %v9337_v27 }
 0x61b   : > { %v6867_v5 = vadd.f32 %v6866_v31, %v5306_v13  ;;  %v6807_v21 = vpop.f32.mrb[250].mxu1 }
 0x61c   : > { %v5431_v39 = vmax.f32 %v6865_v0, 0.0  ;;  %v6869_v43 = vadd.f32 %v6868_v45, %v6807_v21  ;;  %v5309_v48 = vpop.f32.mrb[251].mxu1  ;;  %v6896_v21 = vadd.f32 %v9351_v59, %v9343_v35 }
 0x61d   : > { %v5429_v22 = vmax.f32 %v6867_v5, 0.0  ;;  %v6871_v50 = vadd.f32 %v6870_v14, %v5309_v48 }
 0x61e   : > { %5463 = vst [vmem:[%s9365_s28 + $0x70] sm:$0xff] %v5431_v39  ;;  %v5432_v49 = vmax.f32 %v6869_v43, 0.0  ;;  %v6900_v43 = vadd.f32 %v9351_v59, %v9346_v8 }
 0x61f   : > { %5461 = vst [vmem:[%s9365_s28 + $0x60] sm:$0xff] %v5429_v22  ;;  %v5430_v41 = vmax.f32 %v6871_v50, 0.0  ;;  %v6902_v50 = vadd.f32 %v9351_v59, %v9340_v53 }
 0x620   : > { %5464 = vst [vmem:[%s9365_s28 + $0x78] sm:$0xff] %v5432_v49 }
 0x621   : > { %5462 = vst [vmem:[%s9365_s28 + $0x68] sm:$0xff] %v5430_v41  ;;  %v6810_v34 = vpop.f32.mrb[252].mxu1 }
 0x622   : > { %v6873_v51 = vadd.f32 %v6872_v46, %v6810_v34  ;;  %v5322_v37 = vpop.f32.mrb[253].mxu1 }
 0x623   : > { %v6875_v23 = vadd.f32 %v6874_v47, %v5322_v37  ;;  %v6811_v58 = vpop.f32.mrb[254].mxu1 }
 0x624   : > { %v5435_v42 = vmax.f32 %v6873_v51, 0.0  ;;  %v6877_v55 = vadd.f32 %v6876_v25, %v6811_v58  ;;  %v5325_v6 = vpop.f32.mrb[255].mxu1 }
 0x625   : > { %v5433_v29 = vmax.f32 %v6875_v23, 0.0  ;;  %v6879_v12 = vadd.f32 %v6878_v15, %v5325_v6 }
 0x626   : > { %5467 = vst [vmem:[%s9365_s28 + $0x90] sm:$0xff] %v5435_v42  ;;  %v5436_v20 = vmax.f32 %v6877_v55, 0.0 }
 0x627   : > { %5465 = vst [vmem:[%s9365_s28 + $0x80] sm:$0xff] %v5433_v29  ;;  %v5434_v62 = vmax.f32 %v6879_v12, 0.0 }
 0x628   : > { %5468 = vst [vmem:[%s9365_s28 + $0x98] sm:$0xff] %v5436_v20 }
 0x629   : > { %5466 = vst [vmem:[%s9365_s28 + $0x88] sm:$0xff] %v5434_v62  ;;  %v6814_v16 = vpop.f32.mrb[0].mxu1 }
 0x62a   : > { %v6881_v60 = vadd.f32 %v6880_v3, %v6814_v16  ;;  %v5338_v61 = vpop.f32.mrb[1].mxu1 }
 0x62b   : > { %v6883_v56 = vadd.f32 %v6882_v7, %v5338_v61  ;;  %v6815_v4 = vpop.f32.mrb[2].mxu1 }
 0x62c   : > { %v5439_v52 = vmax.f32 %v6881_v60, 0.0  ;;  %v6885_v30 = vadd.f32 %v6884_v10, %v6815_v4  ;;  %v5341_v26 = vpop.f32.mrb[3].mxu1 }
 0x62d   : > { %v5437_v36 = vmax.f32 %v6883_v56, 0.0  ;;  %v6887_v54 = vadd.f32 %v6886_v40, %v5341_v26 }
 0x62e   : > { %5471 = vst [vmem:[%s9365_s28 + $0xb0] sm:$0xff] %v5439_v52  ;;  %v5440_v9 = vmax.f32 %v6885_v30, 0.0 }
 0x62f   : > { %5469 = vst [vmem:[%s9365_s28 + $0xa0] sm:$0xff] %v5437_v36  ;;  %v5438_v24 = vmax.f32 %v6887_v54, 0.0 }
 0x630   : > { %5472 = vst [vmem:[%s9365_s28 + $0xb8] sm:$0xff] %v5440_v9 }
 0x631   : > { %5470 = vst [vmem:[%s9365_s28 + $0xa8] sm:$0xff] %v5438_v24  ;;  %v6818_v1 = vpop.f32.mrb[4].mxu1 }
 0x632   : > { %v6889_v19 = vadd.f32 %v6888_v63, %v6818_v1  ;;  %v5354_v32 = vpop.f32.mrb[5].mxu1 }
 0x633   : > { %v6891_v28 = vadd.f32 %v6890_v33, %v5354_v32  ;;  %v6819_v17 = vpop.f32.mrb[6].mxu1 }
 0x634   : > { %v5443_v31 = vmax.f32 %v6889_v19, 0.0  ;;  %v6893_v57 = vadd.f32 %v6892_v11, %v6819_v17  ;;  %v5357_v0 = vpop.f32.mrb[7].mxu1 }
 0x635   : > { %v5441_v13 = vmax.f32 %v6891_v28, 0.0  ;;  %v6895_v45 = vadd.f32 %v6894_v18, %v5357_v0 }
 0x636   : > { %5475 = vst [vmem:[%s9365_s28 + $0xd0] sm:$0xff] %v5443_v31  ;;  %v5444_v5 = vmax.f32 %v6893_v57, 0.0 }
 0x637   : > { %5473 = vst [vmem:[%s9365_s28 + $0xc0] sm:$0xff] %v5441_v13  ;;  %v5442_v38 = vmax.f32 %v6895_v45, 0.0 }
 0x638   : > { %5476 = vst [vmem:[%s9365_s28 + $0xd8] sm:$0xff] %v5444_v5 }
 0x639   : > { %5474 = vst [vmem:[%s9365_s28 + $0xc8] sm:$0xff] %v5442_v38  ;;  %v6822_v44 = vpop.f32.mrb[8].mxu1 }
 0x63a   : > { %v6897_v14 = vadd.f32 %v6896_v21, %v6822_v44  ;;  %v5370_v39 = vpop.f32.mrb[9].mxu1 }
 0x63b   : > { %v6899_v48 = vadd.f32 %v6898_v2, %v5370_v39  ;;  %v6823_v22 = vpop.f32.mrb[10].mxu1 }
 0x63c   : > { %v5447_v49 = vmax.f32 %v6897_v14, 0.0  ;;  %v6901_v35 = vadd.f32 %v6900_v43, %v6823_v22  ;;  %v5373_v41 = vpop.f32.mrb[11].mxu1 }
 0x63d   : > { %v5445_v46 = vmax.f32 %v6899_v48, 0.0  ;;  %v6903_v34 = vadd.f32 %v6902_v50, %v5373_v41 }
 0x63e   : > { %5479 = vst [vmem:[%s9365_s28 + $0xf0] sm:$0xff] %v5447_v49  ;;  %v5448_v47 = vmax.f32 %v6901_v35, 0.0 }
 0x63f   : > { %5477 = vst [vmem:[%s9365_s28 + $0xe0] sm:$0xff] %v5445_v46  ;;  %v5446_v27 = vmax.f32 %v6903_v34, 0.0 }
 0x640   : > { %5480 = vst [vmem:[%s9365_s28 + $0xf8] sm:$0xff] %v5448_v47 }
 0x641   : > { %5478 = vst [vmem:[%s9365_s28 + $0xe8] sm:$0xff] %v5446_v27 }
 0x642 PF: > { %s17_s24 = sadd.s32 1, %s7295_s24  }
 0x643   : > { %p14_p4 = scmp.ge.s32.totalorder %s17_s24, 4  }
 0x645   :  { %16 = sbr.rel (!%p14_p4) target bundleno = 1 (0x1), region = 100 }

</bundles_post_ra>
